<compile_context>
chip_gen: v6e
topology: v6e:2x2x1
jax: 0.10.0
libtpu: 0.0.40
codegen_flags: <defaults>
</compile_context>

<pallas_src>
import functools

import jax
import jax.numpy as jnp
from jax import lax
from jax.experimental import pallas as pl
from jax.experimental.pallas import tpu as pltpu


# ----------------------------------------------------------------------------
# Kernel 1: fused 1x1 conv (channels-first matmul) + bias + global max pool,
#           tiled over (batch, spatial).
# ----------------------------------------------------------------------------
def _conv1x1_maxpool_kernel(x_ref, w_ref, b_ref, feat_ref, pool_ref, max_sc,
                            *, hw_total, t_hw):
    # x_ref:    (Cin, T_HW)   spatial tile of one batch element, channels-first
    # w_ref:    (Cout, Cin)   conv weight (PyTorch (Cout, Cin, 1, 1) squeezed)
    # b_ref:    (Cout, 1)
    # feat_ref: (Cout, T_HW)  conv output tile (pre-pool), NCHW-compatible
    # pool_ref: (Cout, 1)     global max over all spatial positions (written last)
    # max_sc:   (Cout, 1) f32 running-max scratch, persists across hw steps
    hw = pl.program_id(1)

    @pl.when(hw == 0)
    def _():
        max_sc[...] = jnp.full(max_sc.shape, -jnp.inf, dtype=max_sc.dtype)

    # (Cout, Cin) @ (Cin, T_HW) -> (Cout, T_HW); HW on the lane axis.
    y = jnp.dot(w_ref[...], x_ref[...],
                preferred_element_type=jnp.float32) + b_ref[...]
    # Lane-dense, unmasked store straight from the matmul result (no temp copy).
    feat_ref[...] = y

    # Running max over the spatial (lane) axis.  Mask padded lanes of a partial
    # last tile to -inf so they cannot corrupt the max (static no-op when the
    # tile size divides HW).
    if hw_total % t_hw != 0:
        col = lax.broadcasted_iota(jnp.int32, y.shape, 1) + hw * t_hw
        y = jnp.where(col < hw_total, y, -jnp.inf)
    max_sc[...] = jnp.maximum(max_sc[...], jnp.max(y, axis=1, keepdims=True))

    @pl.when(hw == pl.num_programs(1) - 1)
    def _():
        pool_ref[...] = max_sc[...]


def conv1x1_and_global_maxpool(x_cf, w, b, *, max_t_hw=512):
    """x_cf: (B, Cin, HW) channels-first.  Returns ((B, Cout, HW), (B, Cout, 1))."""
    B, Cin, HW = x_cf.shape
    Cout = w.shape[0]
    # Tile the spatial axis; <=512 keeps feature buffers ~2 MiB (double-buffered)
    # so the kernel fits v7x's smaller VMEM while staying >85% of HBM roofline.
    T_HW = min(max_t_hw, HW)
    n_hw = pl.cdiv(HW, T_HW)

    kernel = functools.partial(_conv1x1_maxpool_kernel,
                               hw_total=HW, t_hw=T_HW)
    feat, pooled = pl.pallas_call(
        kernel,
        out_shape=(jax.ShapeDtypeStruct((B, Cout, HW), jnp.float32),
                   jax.ShapeDtypeStruct((B, Cout, 1), jnp.float32)),
        grid=(B, n_hw),
        in_specs=[
            pl.BlockSpec((None, Cin, T_HW), lambda bi, hwi: (bi, 0, hwi)),
            pl.BlockSpec((Cout, Cin), lambda bi, hwi: (0, 0)),
            pl.BlockSpec((Cout, 1), lambda bi, hwi: (0, 0)),
        ],
        out_specs=(
            pl.BlockSpec((None, Cout, T_HW), lambda bi, hwi: (bi, 0, hwi)),
            pl.BlockSpec((None, Cout, 1), lambda bi, hwi: (bi, 0, 0)),
        ),
        scratch_shapes=[pltpu.VMEM((Cout, 1), jnp.float32)],
        compiler_params=pltpu.CompilerParams(
            dimension_semantics=("parallel", "arbitrary")),
    )(x_cf, w, b)
    return feat, pooled


# ----------------------------------------------------------------------------
# Kernel 2: fused 3-layer MLP head (Linear+ReLU, Linear+ReLU, Linear).
# Output is lane-padded to a multiple of 128 by the wrapper (NC=10 -> 128).
# ----------------------------------------------------------------------------
def _mlp_kernel(x_ref, w1_ref, b1_ref, w2_ref, b2_ref, w3_ref, b3_ref,
                out_ref):
    h = jnp.dot(x_ref[...], w1_ref[...],
                preferred_element_type=jnp.float32) + b1_ref[...]
    h = jnp.maximum(h, 0.0)
    h = jnp.dot(h, w2_ref[...],
                preferred_element_type=jnp.float32) + b2_ref[...]
    h = jnp.maximum(h, 0.0)
    out_ref[...] = jnp.dot(h, w3_ref[...],
                           preferred_element_type=jnp.float32) + b3_ref[...]


def mlp_head(x, w1, b1, w2, b2, w3, b3):
    B, D0 = x.shape
    D1 = w1.shape[1]
    D2 = w2.shape[1]
    NC = w3.shape[1]
    # Pad logits width to a lane-dense multiple of 128 (unmasked stores),
    # slice back afterwards.
    NCP = max(128, ((NC + 127) // 128) * 128)
    if NCP != NC:
        w3p = jnp.pad(w3, ((0, 0), (0, NCP - NC)))
        b3p = jnp.pad(b3, ((0, 0), (0, NCP - NC)))
    else:
        w3p, b3p = w3, b3

    logits_p = pl.pallas_call(
        _mlp_kernel,
        out_shape=jax.ShapeDtypeStruct((B, NCP), jnp.float32),
        grid=(1,),
        in_specs=[
            pl.BlockSpec((B, D0), lambda i: (0, 0)),
            pl.BlockSpec((D0, D1), lambda i: (0, 0)),
            pl.BlockSpec((1, D1), lambda i: (0, 0)),
            pl.BlockSpec((D1, D2), lambda i: (0, 0)),
            pl.BlockSpec((1, D2), lambda i: (0, 0)),
            pl.BlockSpec((D2, NCP), lambda i: (0, 0)),
            pl.BlockSpec((1, NCP), lambda i: (0, 0)),
        ],
        out_specs=pl.BlockSpec((B, NCP), lambda i: (0, 0)),
    )(x, w1, b1, w2, b2, w3p, b3p)
    return logits_p[:, :NC]


# ----------------------------------------------------------------------------
# Parameter init (deterministic, PyTorch-default-style uniform bounds)
# ----------------------------------------------------------------------------
def init_params(key, prev_channels, n_classes):
    def _uniform(k, shape, fan_in):
        bound = 1.0 / jnp.sqrt(jnp.float32(fan_in))
        return jax.random.uniform(k, shape, jnp.float32, -bound, bound)

    ks = jax.random.split(key, 8)
    return dict(
        # conv weight stored as (Cout, Cin) (PyTorch (512, Cin, 1, 1) squeezed)
        conv_w=_uniform(ks[0], (512, prev_channels), prev_channels),
        conv_b=_uniform(ks[1], (512, 1), prev_channels),
        # linear weights stored as (in, out) (PyTorch (out, in) transposed)
        w1=_uniform(ks[2], (512, 1024), 512),
        b1=_uniform(ks[3], (1, 1024), 512),
        w2=_uniform(ks[4], (1024, 1024), 1024),
        b2=_uniform(ks[5], (1, 1024), 1024),
        w3=_uniform(ks[6], (1024, n_classes), 1024),
        b3=_uniform(ks[7], (1, n_classes), 1024),
    )


# ----------------------------------------------------------------------------
# Full Classifier forward (NCHW in, (logits, feature-NCHW) out)
# ----------------------------------------------------------------------------
@jax.jit
def classifier_forward(x_nchw, params):
    B, Cin, H, W = x_nchw.shape
    HW = H * W
    # NCHW -> (B, Cin, HW): pure reshape, no transpose, no extra HBM traffic.
    x_cf = x_nchw.reshape(B, Cin, HW)
    feat_cf, pooled = conv1x1_and_global_maxpool(
        x_cf, params["conv_w"], params["conv_b"])
    feature = feat_cf.reshape(B, 512, H, W)      # free reshape (NCHW layout)
    pooled2d = pooled.reshape(B, 512)
    logits = mlp_head(pooled2d, params["w1"], params["b1"],
                      params["w2"], params["b2"],
                      params["w3"], params["b3"])
    return logits, feature


# ----------------------------------------------------------------------------
# Pure-JAX reference for a sanity check
# ----------------------------------------------------------------------------
def classifier_reference(x_nchw, params):
    B, Cin, H, W = x_nchw.shape
    x_cf = x_nchw.reshape(B, Cin, H * W)
    y = jnp.einsum("oc,bcs->bos", params["conv_w"], x_cf) \
        + params["conv_b"][None]                               # (B, 512, HW)
    feature = y.reshape(B, 512, H, W)
    pooled = jnp.max(y, axis=2)                                # (B, 512)
    h = jnp.maximum(pooled @ params["w1"] + params["b1"], 0.0)
    h = jnp.maximum(h @ params["w2"] + params["b2"], 0.0)
    logits = h @ params["w3"] + params["b3"]
    return logits, feature


if __name__ == "__main__":
    B, prev_channels, H, W = 2, 4, 16, 16
    n_classes = 10

    key = jax.random.PRNGKey(0)
    k_x, k_p = jax.random.split(key)
    x = jax.random.normal(k_x, (B, prev_channels, H, W), jnp.float32)
    params = init_params(k_p, prev_channels, n_classes)

    logits, feature = classifier_forward(x, params)
    logits = jax.block_until_ready(logits)
    feature = jax.block_until_ready(feature)

    assert logits.shape == (B, n_classes)
    assert feature.shape == (B, 512, H, W)

    ref_logits, ref_feature = classifier_reference(x, params)
    assert jnp.allclose(logits, ref_logits, atol=1e-4, rtol=1e-4)
    assert jnp.allclose(feature, ref_feature, atol=1e-4, rtol=1e-4)

    print("KERNEL_OK")
</pallas_src>

<mosaic_0001>
module attributes {stable_mosaic.version = 11 : i64} {
  func.func @_conv1x1_maxpool_kernel(%arg0: i32, %arg1: i32, %arg2: memref<1x4x256xf32, #tpu.memory_space<vmem>>, %arg3: memref<512x4xf32, #tpu.memory_space<vmem>>, %arg4: memref<512x1xf32, #tpu.memory_space<vmem>>, %arg5: memref<1x512x256xf32, #tpu.memory_space<vmem>>, %arg6: memref<1x512x1xf32, #tpu.memory_space<vmem>>, %arg7: memref<512x1xf32, #tpu.memory_space<vmem>>) attributes {dimension_semantics = [#tpu.dimension_semantics<parallel>, #tpu.dimension_semantics<arbitrary>], iteration_bounds = array<i64: 2, 1>, scalar_prefetch = 0 : i64, scratch_operands = 1 : i64, tpu.core_type = #tpu.core_type<tc>, window_params = [{transform_indices = @transform_0, window_bounds = array<i64: 1, 4, 256>}, {pipeline_mode = #tpu.pipeline_mode<synchronous>, transform_indices = @transform_1, window_bounds = array<i64: 512, 4>}, {pipeline_mode = #tpu.pipeline_mode<synchronous>, transform_indices = @transform_2, window_bounds = array<i64: 512, 1>}, {transform_indices = @transform_3, window_bounds = array<i64: 1, 512, 256>}, {transform_indices = @transform_4, window_bounds = array<i64: 1, 512, 1>}]} {
    %c0_i32 = arith.constant 0 : i32
    %0 = arith.cmpi eq, %arg1, %c0_i32 : i32
    %1 = arith.extui %0 : i1 to i32
    %c0_i32_0 = arith.constant 0 : i32
    %2 = arith.cmpi ne, %1, %c0_i32_0 : i32
    scf.if %2 {
      %cst_17 = arith.constant 0xFF800000 : f32
      %21 = vector.broadcast %cst_17 : f32 to vector<512x1xf32>
      %c0_18 = arith.constant 0 : index
      %c0_19 = arith.constant 0 : index
      %22 = vector.load %arg7[%c0_18, %c0_19] : memref<512x1xf32, #tpu.memory_space<vmem>>, vector<512x1xf32>
      tpu.vector_store %arg7[%c0_18, %c0_19], %21 {strides = array<i32>} : memref<512x1xf32, #tpu.memory_space<vmem>>, vector<512x1xf32>,
    } else {
    }
    %c0 = arith.constant 0 : index
    %c0_1 = arith.constant 0 : index
    %3 = vector.load %arg3[%c0, %c0_1] : memref<512x4xf32, #tpu.memory_space<vmem>>, vector<512x4xf32>
    %c0_2 = arith.constant 0 : index
    %c0_3 = arith.constant 0 : index
    %c0_4 = arith.constant 0 : index
    %4 = vector.load %arg2[%c0_2, %c0_3, %c0_4] : memref<1x4x256xf32, #tpu.memory_space<vmem>>, vector<1x4x256xf32>
    %5 = vector.shape_cast %4 : vector<1x4x256xf32> to vector<4x256xf32>
    %cst = arith.constant dense<0.000000e+00> : vector<512x256xf32>
    %6 = tpu.matmul %3, %5, %cst {dimension_numbers = #tpu.dot_dimension_numbers<[1], [0], [0], [1], [0, 0, 1, 1], [], []>} : vector<512x4xf32>, vector<4x256xf32>, vector<512x256xf32> -> vector<512x256xf32>
    %c0_5 = arith.constant 0 : index
    %c0_6 = arith.constant 0 : index
    %7 = vector.load %arg4[%c0_5, %c0_6] : memref<512x1xf32, #tpu.memory_space<vmem>>, vector<512x1xf32>
    %8 = vector.broadcast %7 : vector<512x1xf32> to vector<512x256xf32>
    %9 = arith.addf %6, %8 : vector<512x256xf32>
    %c0_7 = arith.constant 0 : index
    %c0_8 = arith.constant 0 : index
    %c0_9 = arith.constant 0 : index
    %10 = vector.load %arg5[%c0_7, %c0_8, %c0_9] : memref<1x512x256xf32, #tpu.memory_space<vmem>>, vector<1x512x256xf32>
    %11 = vector.shape_cast %10 : vector<1x512x256xf32> to vector<512x256xf32>
    %12 = vector.shape_cast %9 : vector<512x256xf32> to vector<1x512x256xf32>
    tpu.vector_store %arg5[%c0_7, %c0_8, %c0_9], %12 {strides = array<i32>} : memref<1x512x256xf32, #tpu.memory_space<vmem>>, vector<1x512x256xf32>,
    %c0_10 = arith.constant 0 : index
    %c0_11 = arith.constant 0 : index
    %13 = vector.load %arg7[%c0_10, %c0_11] : memref<512x1xf32, #tpu.memory_space<vmem>>, vector<512x1xf32>
    %cst_12 = arith.constant dense<0xFF800000> : vector<512xf32>
    %14 = vector.multi_reduction <maximumf>, %9, %cst_12 [1] : vector<512x256xf32> to vector<512xf32>
    %15 = vector.shape_cast %14 : vector<512xf32> to vector<512x1xf32>
    %16 = arith.maximumf %13, %15 : vector<512x1xf32>
    %c0_13 = arith.constant 0 : index
    %c0_14 = arith.constant 0 : index
    %17 = vector.load %arg7[%c0_13, %c0_14] : memref<512x1xf32, #tpu.memory_space<vmem>>, vector<512x1xf32>
    tpu.vector_store %arg7[%c0_13, %c0_14], %16 {strides = array<i32>} : memref<512x1xf32, #tpu.memory_space<vmem>>, vector<512x1xf32>,
    %c0_i32_15 = arith.constant 0 : i32
    %18 = arith.cmpi eq, %arg1, %c0_i32_15 : i32
    %19 = arith.extui %18 : i1 to i32
    %c0_i32_16 = arith.constant 0 : i32
    %20 = arith.cmpi ne, %19, %c0_i32_16 : i32
    scf.if %20 {
      %c0_17 = arith.constant 0 : index
      %c0_18 = arith.constant 0 : index
      %21 = vector.load %arg7[%c0_17, %c0_18] : memref<512x1xf32, #tpu.memory_space<vmem>>, vector<512x1xf32>
      %c0_19 = arith.constant 0 : index
      %c0_20 = arith.constant 0 : index
      %c0_21 = arith.constant 0 : index
      %22 = vector.load %arg6[%c0_19, %c0_20, %c0_21] : memref<1x512x1xf32, #tpu.memory_space<vmem>>, vector<1x512x1xf32>
      %23 = vector.shape_cast %22 : vector<1x512x1xf32> to vector<512x1xf32>
      %24 = vector.shape_cast %21 : vector<512x1xf32> to vector<1x512x1xf32>
      tpu.vector_store %arg6[%c0_19, %c0_20, %c0_21], %24 {strides = array<i32>} : memref<1x512x1xf32, #tpu.memory_space<vmem>>, vector<1x512x1xf32>,
    } else {
    }
    return
  }
  func.func @transform_0(%arg0: i32, %arg1: i32) -> (i32, i32, i32) {
    %c0_i32 = arith.constant 0 : i32
    %c0_i32_0 = arith.constant 0 : i32
    return %arg0, %c0_i32, %arg1 : i32, i32, i32
  }
  func.func @transform_1(%arg0: i32, %arg1: i32) -> (i32, i32) {
    %c0_i32 = arith.constant 0 : i32
    %c0_i32_0 = arith.constant 0 : i32
    %c0_i32_1 = arith.constant 0 : i32
    return %c0_i32, %c0_i32_0 : i32, i32
  }
  func.func @transform_2(%arg0: i32, %arg1: i32) -> (i32, i32) {
    %c0_i32 = arith.constant 0 : i32
    %c0_i32_0 = arith.constant 0 : i32
    %c0_i32_1 = arith.constant 0 : i32
    return %c0_i32, %c0_i32_0 : i32, i32
  }
  func.func @transform_3(%arg0: i32, %arg1: i32) -> (i32, i32, i32) {
    %c0_i32 = arith.constant 0 : i32
    %c0_i32_0 = arith.constant 0 : i32
    return %arg0, %c0_i32, %arg1 : i32, i32, i32
  }
  func.func @transform_4(%arg0: i32, %arg1: i32) -> (i32, i32, i32) {
    %c0_i32 = arith.constant 0 : i32
    %c0_i32_0 = arith.constant 0 : i32
    %c0_i32_1 = arith.constant 0 : i32
    return %arg0, %c0_i32, %c0_i32_0 : i32, i32, i32
  }
}

module attributes {stable_mosaic.version = 11 : i64} {
  func.func @_mlp_kernel(%arg0: i32, %arg1: memref<2x512xf32, #tpu.memory_space<vmem>>, %arg2: memref<512x1024xf32, #tpu.memory_space<vmem>>, %arg3: memref<1x1024xf32, #tpu.memory_space<vmem>>, %arg4: memref<1024x1024xf32, #tpu.memory_space<vmem>>, %arg5: memref<1x1024xf32, #tpu.memory_space<vmem>>, %arg6: memref<1024x128xf32, #tpu.memory_space<vmem>>, %arg7: memref<1x128xf32, #tpu.memory_space<vmem>>, %arg8: memref<2x128xf32, #tpu.memory_space<vmem>>) attributes {dimension_semantics = [#tpu.dimension_semantics<arbitrary>], iteration_bounds = array<i64: 1>, scalar_prefetch = 0 : i64, scratch_operands = 0 : i64, tpu.core_type = #tpu.core_type<tc>, window_params = [{pipeline_mode = #tpu.pipeline_mode<synchronous>, transform_indices = @transform_0, window_bounds = array<i64: 2, 512>}, {pipeline_mode = #tpu.pipeline_mode<synchronous>, transform_indices = @transform_1, window_bounds = array<i64: 512, 1024>}, {pipeline_mode = #tpu.pipeline_mode<synchronous>, transform_indices = @transform_2, window_bounds = array<i64: 1, 1024>}, {pipeline_mode = #tpu.pipeline_mode<synchronous>, transform_indices = @transform_3, window_bounds = array<i64: 1024, 1024>}, {pipeline_mode = #tpu.pipeline_mode<synchronous>, transform_indices = @transform_4, window_bounds = array<i64: 1, 1024>}, {pipeline_mode = #tpu.pipeline_mode<synchronous>, transform_indices = @transform_5, window_bounds = array<i64: 1024, 128>}, {pipeline_mode = #tpu.pipeline_mode<synchronous>, transform_indices = @transform_6, window_bounds = array<i64: 1, 128>}, {pipeline_mode = #tpu.pipeline_mode<synchronous>, transform_indices = @transform_7, window_bounds = array<i64: 2, 128>}]} {
    %c0 = arith.constant 0 : index
    %c0_0 = arith.constant 0 : index
    %0 = vector.load %arg1[%c0, %c0_0] : memref<2x512xf32, #tpu.memory_space<vmem>>, vector<2x512xf32>
    %c0_1 = arith.constant 0 : index
    %c0_2 = arith.constant 0 : index
    %1 = vector.load %arg2[%c0_1, %c0_2] : memref<512x1024xf32, #tpu.memory_space<vmem>>, vector<512x1024xf32>
    %cst = arith.constant dense<0.000000e+00> : vector<2x1024xf32>
    %2 = tpu.matmul %0, %1, %cst {dimension_numbers = #tpu.dot_dimension_numbers<[1], [0], [0], [1], [0, 0, 1, 1], [], []>} : vector<2x512xf32>, vector<512x1024xf32>, vector<2x1024xf32> -> vector<2x1024xf32>
    %c0_3 = arith.constant 0 : index
    %c0_4 = arith.constant 0 : index
    %3 = vector.load %arg3[%c0_3, %c0_4] : memref<1x1024xf32, #tpu.memory_space<vmem>>, vector<1x1024xf32>
    %4 = vector.broadcast %3 : vector<1x1024xf32> to vector<2x1024xf32>
    %5 = arith.addf %2, %4 : vector<2x1024xf32>
    %cst_5 = arith.constant 0.000000e+00 : f32
    %6 = vector.broadcast %cst_5 : f32 to vector<2x1024xf32>
    %7 = arith.maximumf %5, %6 : vector<2x1024xf32>
    %c0_6 = arith.constant 0 : index
    %c0_7 = arith.constant 0 : index
    %8 = vector.load %arg4[%c0_6, %c0_7] : memref<1024x1024xf32, #tpu.memory_space<vmem>>, vector<1024x1024xf32>
    %cst_8 = arith.constant dense<0.000000e+00> : vector<2x1024xf32>
    %9 = tpu.matmul %7, %8, %cst_8 {dimension_numbers = #tpu.dot_dimension_numbers<[1], [0], [0], [1], [0, 0, 1, 1], [], []>} : vector<2x1024xf32>, vector<1024x1024xf32>, vector<2x1024xf32> -> vector<2x1024xf32>
    %c0_9 = arith.constant 0 : index
    %c0_10 = arith.constant 0 : index
    %10 = vector.load %arg5[%c0_9, %c0_10] : memref<1x1024xf32, #tpu.memory_space<vmem>>, vector<1x1024xf32>
    %11 = vector.broadcast %10 : vector<1x1024xf32> to vector<2x1024xf32>
    %12 = arith.addf %9, %11 : vector<2x1024xf32>
    %cst_11 = arith.constant 0.000000e+00 : f32
    %13 = vector.broadcast %cst_11 : f32 to vector<2x1024xf32>
    %14 = arith.maximumf %12, %13 : vector<2x1024xf32>
    %c0_12 = arith.constant 0 : index
    %c0_13 = arith.constant 0 : index
    %15 = vector.load %arg6[%c0_12, %c0_13] : memref<1024x128xf32, #tpu.memory_space<vmem>>, vector<1024x128xf32>
    %cst_14 = arith.constant dense<0.000000e+00> : vector<2x128xf32>
    %16 = tpu.matmul %14, %15, %cst_14 {dimension_numbers = #tpu.dot_dimension_numbers<[1], [0], [0], [1], [0, 0, 1, 1], [], []>} : vector<2x1024xf32>, vector<1024x128xf32>, vector<2x128xf32> -> vector<2x128xf32>
    %c0_15 = arith.constant 0 : index
    %c0_16 = arith.constant 0 : index
    %17 = vector.load %arg7[%c0_15, %c0_16] : memref<1x128xf32, #tpu.memory_space<vmem>>, vector<1x128xf32>
    %18 = vector.broadcast %17 : vector<1x128xf32> to vector<2x128xf32>
    %19 = arith.addf %16, %18 : vector<2x128xf32>
    %c0_17 = arith.constant 0 : index
    %c0_18 = arith.constant 0 : index
    %20 = vector.load %arg8[%c0_17, %c0_18] : memref<2x128xf32, #tpu.memory_space<vmem>>, vector<2x128xf32>
    tpu.vector_store %arg8[%c0_17, %c0_18], %19 {strides = array<i32>} : memref<2x128xf32, #tpu.memory_space<vmem>>, vector<2x128xf32>,
    return
  }
  func.func @transform_0(%arg0: i32) -> (i32, i32) {
    %c0_i32 = arith.constant 0 : i32
    %c0_i32_0 = arith.constant 0 : i32
    %c0_i32_1 = arith.constant 0 : i32
    return %c0_i32, %c0_i32_0 : i32, i32
  }
  func.func @transform_1(%arg0: i32) -> (i32, i32) {
    %c0_i32 = arith.constant 0 : i32
    %c0_i32_0 = arith.constant 0 : i32
    %c0_i32_1 = arith.constant 0 : i32
    return %c0_i32, %c0_i32_0 : i32, i32
  }
  func.func @transform_2(%arg0: i32) -> (i32, i32) {
    %c0_i32 = arith.constant 0 : i32
    %c0_i32_0 = arith.constant 0 : i32
    %c0_i32_1 = arith.constant 0 : i32
    return %c0_i32, %c0_i32_0 : i32, i32
  }
  func.func @transform_3(%arg0: i32) -> (i32, i32) {
    %c0_i32 = arith.constant 0 : i32
    %c0_i32_0 = arith.constant 0 : i32
    %c0_i32_1 = arith.constant 0 : i32
    return %c0_i32, %c0_i32_0 : i32, i32
  }
  func.func @transform_4(%arg0: i32) -> (i32, i32) {
    %c0_i32 = arith.constant 0 : i32
    %c0_i32_0 = arith.constant 0 : i32
    %c0_i32_1 = arith.constant 0 : i32
    return %c0_i32, %c0_i32_0 : i32, i32
  }
  func.func @transform_5(%arg0: i32) -> (i32, i32) {
    %c0_i32 = arith.constant 0 : i32
    %c0_i32_0 = arith.constant 0 : i32
    %c0_i32_1 = arith.constant 0 : i32
    return %c0_i32, %c0_i32_0 : i32, i32
  }
  func.func @transform_6(%arg0: i32) -> (i32, i32) {
    %c0_i32 = arith.constant 0 : i32
    %c0_i32_0 = arith.constant 0 : i32
    %c0_i32_1 = arith.constant 0 : i32
    return %c0_i32, %c0_i32_0 : i32, i32
  }
  func.func @transform_7(%arg0: i32) -> (i32, i32) {
    %c0_i32 = arith.constant 0 : i32
    %c0_i32_0 = arith.constant 0 : i32
    %c0_i32_1 = arith.constant 0 : i32
    return %c0_i32, %c0_i32_0 : i32, i32
  }
}

</mosaic_0001>

<bundles_post_ra>
// kernel: classifier_forward.2
= control target key start
LH: loop header
LB: loop body
LE: loop exit
PB: predicated region body
PF: predicated region fallthrough
CT: control target
= control target key end

     0   :  { %s2347_s15 = smov 0   ;;  %s2349_s16 = smov 0   ;;  %s3506_s0 = inlined_call_operand.vmem [shape: f32[2,4,256], index: 0, kind: input, shape index: {}]   ;;  %s3507_s1 = inlined_call_operand.vmem [shape: f32[512,4], index: 1, kind: input, shape index: {}]   ;;  %s3508_s2 = inlined_call_operand.vmem [shape: f32[512,1], index: 2, kind: input, shape index: {}]   ;;  %s3509_s3 = inlined_call_operand.vmem [shape: f32[2,512,256], index: 3, kind: output, shape index: {0}]   ;;  %s3510_s4 = inlined_call_operand.vmem [shape: f32[2,512,1], index: 4, kind: output, shape index: {1}]  }
   0x1   :  { %s2351_s17 = smov 0  }
   0x2 LB: > { %s27_s18 = sadd.s32 1, %s2313_s16  ;;  %p2185_p0 = scmp.ge.s32.totalorder %s2317_s17, 1  ;;  %s2317_s17 = sphi %s2351_s17, %s15_s17   ;;  %s2313_s16 = sphi %s2349_s16, %s3512_s16   ;;  %s2309_s15 = sphi %s2347_s15, %s3511_s15  }
   0x3   : > { %p29_p1 = scmp.ge.s32.totalorder %s27_s18, 2  ;;  %p186_p2 = scmp.lt.s32.totalorder %s2317_s17, 3 }
   0x5   : > { %s3514_s18 = smov (%p29_p1, %s27_s18), 0  ;;  %p187_p3 = pnand %p2185_p0, %p186_p2 }
   0x6   : > { %p226_p4 = scmp.lt.s32.totalorder (!%p187_p3), %s2309_s15, 1 }
   0x7   : > { %190 = sbr.rel (%p187_p3) target bundleno = 498 (0x1f2), region = 32 }
   0xc   : > { %v386_v0 = vld [vmem:[%s3508_s2 + $0x10] sm:$0xff]  ;;  %v384_v1 = vld [vmem:[%s3508_s2] sm:$0xff]  ;;  %v2319_v2 = vmov 0   ;;  %s3516_s15 = smov (!%p226_p4, %s2309_s15), 1  ;;  %v387_v3 = vld [vmem:[%s3508_s2 + $0x18] sm:$0xff]  ;;  %v2320_v5 = vmov 0.0  }
   0xd   : > { %2293 = vset.pattern.permute.xlu1 %v2319_v2  ;;  %2292 = vset.pattern.permute.xlu0 %v2319_v2  ;;  %v385_v4 = vld [vmem:[%s3508_s2 + $0x8] sm:$0xff]  ;;  %s2260_s27 = sshll.u32 %s3516_s15, 3  ;;  %vm963_vm0 = vcmask 1043456   ;;  %v388_v9 = vld [vmem:[%s3508_s2 + $0x20] sm:$0xff]  ;;  %vm770_vm1 = vcmask 31744   ;;  %v391_v12 = vld [vmem:[%s3508_s2 + $0x38] sm:$0xff] }
   0xe   : > { %460 = vperm.xlu1 %2293, %v386_v0   ;;  %450 = vperm.xlu0 %2292, %v384_v1   ;;  %s233_s30 = scalar_lea.vmem %s3506_s0, %s2260_s27  ;;  %v389_v8 = vld [vmem:[%s3508_s2 + $0x28] sm:$0xff]  ;;  %v319_v10 = vld [vmem:[%s3507_s1] sm:$0xff]  ;;  %v390_v13 = vld [vmem:[%s3508_s2 + $0x30] sm:$0xff]  ;;  %s2261_s11 = sshll.u32 %s3516_s15, 10  ;;  %vm254_vm2 = vcmask 7168  }
   0xf   : > { %1032 = vmatprep.mubr.f32.mxu0 %v2320_v5  ;;  %1224 = vmatprep.mubr.f32.mxu1 %v2320_v5  ;;  %v383_v6 = vld [vmem:[%s233_s30] sm:$0xff]  ;;  %v320_v14 = vld [vmem:[%s3507_s1 + $0x8] sm:$0xff]  ;;  %v321_v18 = vld [vmem:[%s3507_s1 + $0x10] sm:$0xff]  ;;  %s2951_s14 = scalar_lea.vmem %s3509_s3, %s2261_s11  ;;  %s2262_s19 = sshll.u32 %s3516_s15, 9 }
  0x10   : > { %v769_v7 = vcombine.high %v383_v6, %v383_v6  ;;  %v351_v11 = vld [vmem:[%s3507_s1 + $0x100] sm:$0xff]  ;;  %v352_v15 = vld [vmem:[%s3507_s1 + $0x108] sm:$0xff]  ;;  %v353_v19 = vld [vmem:[%s3507_s1 + $0x110] sm:$0xff]  ;;  %s3307_s22 = scalar_lea.vmem %s3510_s4, %s2262_s19 }
  0x11   : > { %v393_v16 = vld [vmem:[%s3508_s2 + $0x48] sm:$0xff]  ;;  %v392_v17 = vld [vmem:[%s3508_s2 + $0x40] sm:$0xff]  ;;  %v395_v20 = vld [vmem:[%s3508_s2 + $0x58] sm:$0xff] }
  0x12   : > { %465 = vperm.xlu1 %2293, %v387_v3   ;;  %455 = vperm.xlu0 %2292, %v385_v4   ;;  %v394_v21 = vld [vmem:[%s3508_s2 + $0x50] sm:$0xff]  ;;  %v322_v22 = vld [vmem:[%s3507_s1 + $0x18] sm:$0xff]  ;;  %v397_v24 = vld [vmem:[%s3508_s2 + $0x68] sm:$0xff] }
  0x13   : > { %2192 = vmatprep.subr.msk.mxu0 %vm963_vm0, %v769_v7  ;;  %2263 = vmatprep.subr.msk.mxu1 %vm963_vm0, %v769_v7  ;;  %v354_v23 = vld [vmem:[%s3507_s1 + $0x118] sm:$0xff]  ;;  %v396_v25 = vld [vmem:[%s3508_s2 + $0x60] sm:$0xff]  ;;  %v398_v29 = vld [vmem:[%s3508_s2 + $0x70] sm:$0xff] }
  0x14   : > { %2193 = vmatpush1.msk.msra.mxu0 %vm963_vm0, %v383_v6  ;;  %2264 = vmatpush1.msk.msra.mxu1 %vm963_vm0, %v383_v6  ;;  %v323_v26 = vld [vmem:[%s3507_s1 + $0x20] sm:$0xff]  ;;  %v399_v28 = vld [vmem:[%s3508_s2 + $0x78] sm:$0xff]  ;;  %v324_v30 = vld [vmem:[%s3507_s1 + $0x28] sm:$0xff] }
  0x15   : > { %2194 = vmatmul.mubr.msk.f32.vlgmr.msra.gmra.mxu0 %vm770_vm1, %v319_v10  ;;  %2226 = vmatmul.mubr.msk.f32.vlgmr.msra.gmra.mxu1 %vm770_vm1, %v351_v11  ;;  %v355_v27 = vld [vmem:[%s3507_s1 + $0x120] sm:$0xff]  ;;  %v356_v31 = vld [vmem:[%s3507_s1 + $0x128] sm:$0xff]  ;;  %v325_v34 = vld [vmem:[%s3507_s1 + $0x30] sm:$0xff] }
  0x16   : > { %475 = vperm.xlu1 %2293, %v389_v8   ;;  %470 = vperm.xlu0 %2292, %v388_v9   ;;  %v401_v32 = vld [vmem:[%s3508_s2 + $0x88] sm:$0xff]  ;;  %v400_v33 = vld [vmem:[%s3508_s2 + $0x80] sm:$0xff]  ;;  %v357_v35 = vld [vmem:[%s3507_s1 + $0x130] sm:$0xff] }
  0x17   : > { %1038 = vmatprep.mubr.f32.mxu0 %v2320_v5  ;;  %1230 = vmatprep.mubr.f32.mxu1 %v2320_v5  ;;  %v403_v36 = vld [vmem:[%s3508_s2 + $0x98] sm:$0xff]  ;;  %v402_v37 = vld [vmem:[%s3508_s2 + $0x90] sm:$0xff]  ;;  %v405_v40 = vld [vmem:[%s3508_s2 + $0xa8] sm:$0xff] }
  0x18   : > { %v326_v38 = vld [vmem:[%s3507_s1 + $0x38] sm:$0xff]  ;;  %v404_v41 = vld [vmem:[%s3508_s2 + $0xa0] sm:$0xff]  ;;  %v406_v45 = vld [vmem:[%s3508_s2 + $0xb0] sm:$0xff] }
  0x19   : > { %2195 = vmatmul.mubr.msk.f32.gmra.mxu0 %vm770_vm1, %v320_v14  ;;  %2227 = vmatmul.mubr.msk.f32.gmra.mxu1 %vm770_vm1, %v352_v15  ;;  %v358_v39 = vld [vmem:[%s3507_s1 + $0x138] sm:$0xff]  ;;  %v327_v42 = vld [vmem:[%s3507_s1 + $0x40] sm:$0xff]  ;;  %v328_v46 = vld [vmem:[%s3507_s1 + $0x48] sm:$0xff] }
  0x1a   : > { %485 = vperm.xlu1 %2293, %v391_v12   ;;  %480 = vperm.xlu0 %2292, %v390_v13   ;;  %v359_v43 = vld [vmem:[%s3507_s1 + $0x140] sm:$0xff]  ;;  %v407_v44 = vld [vmem:[%s3508_s2 + $0xb8] sm:$0xff]  ;;  %v360_v47 = vld [vmem:[%s3507_s1 + $0x148] sm:$0xff] }
  0x1b   : > { %1044 = vmatprep.mubr.f32.mxu0 %v2320_v5  ;;  %1236 = vmatprep.mubr.f32.mxu1 %v2320_v5  ;;  %v409_v48 = vld [vmem:[%s3508_s2 + $0xc8] sm:$0xff]  ;;  %v408_v49 = vld [vmem:[%s3508_s2 + $0xc0] sm:$0xff]  ;;  %v329_v50 = vld [vmem:[%s3507_s1 + $0x50] sm:$0xff] }
  0x1c   : > { %v361_v51 = vld [vmem:[%s3507_s1 + $0x150] sm:$0xff]  ;;  %v411_v52 = vld [vmem:[%s3508_s2 + $0xd8] sm:$0xff]  ;;  %v413_v56 = vld [vmem:[%s3508_s2 + $0xe8] sm:$0xff] }
  0x1d   : > { %2196 = vmatmul.mubr.msk.f32.gmra.mxu0 %vm770_vm1, %v321_v18  ;;  %2228 = vmatmul.mubr.msk.f32.gmra.mxu1 %vm770_vm1, %v353_v19  ;;  %v410_v53 = vld [vmem:[%s3508_s2 + $0xd0] sm:$0xff]  ;;  %v330_v54 = vld [vmem:[%s3507_s1 + $0x58] sm:$0xff]  ;;  %v412_v57 = vld [vmem:[%s3508_s2 + $0xe0] sm:$0xff] }
  0x1e   : > { %495 = vperm.xlu1 %2293, %v393_v16   ;;  %490 = vperm.xlu0 %2292, %v392_v17   ;;  %v362_v55 = vld [vmem:[%s3507_s1 + $0x158] sm:$0xff]  ;;  %v331_v58 = vld [vmem:[%s3507_s1 + $0x60] sm:$0xff]  ;;  %v414_v61 = vld [vmem:[%s3508_s2 + $0xf0] sm:$0xff] }
  0x1f   : > { %1050 = vmatprep.mubr.f32.mxu0 %v2320_v5  ;;  %1242 = vmatprep.mubr.f32.mxu1 %v2320_v5  ;;  %v363_v59 = vld [vmem:[%s3507_s1 + $0x160] sm:$0xff]  ;;  %v415_v60 = vld [vmem:[%s3508_s2 + $0xf8] sm:$0xff]  ;;  %v332_v62 = vld [vmem:[%s3507_s1 + $0x68] sm:$0xff] }
  0x20   : > { %v364_v63 = vld [vmem:[%s3507_s1 + $0x168] sm:$0xff]  ;;  %v416_v1 = vld [vmem:[%s3508_s2 + $0x100] sm:$0xff]  ;;  %v333_v2 = vld [vmem:[%s3507_s1 + $0x70] sm:$0xff] }
  0x21   : > { %2197 = vmatmul.mubr.msk.f32.gmra.mxu0 %vm770_vm1, %v322_v22  ;;  %2229 = vmatmul.mubr.msk.f32.gmra.mxu1 %vm770_vm1, %v354_v23  ;;  %v417_v0 = vld [vmem:[%s3508_s2 + $0x108] sm:$0xff]  ;;  %v365_v3 = vld [vmem:[%s3507_s1 + $0x170] sm:$0xff]  ;;  %v419_v4 = vld [vmem:[%s3508_s2 + $0x118] sm:$0xff] }
  0x22   : > { %505 = vperm.xlu1 %2293, %v395_v20   ;;  %500 = vperm.xlu0 %2292, %v394_v21   ;;  %v418_v6 = vld [vmem:[%s3508_s2 + $0x110] sm:$0xff]  ;;  %v334_v7 = vld [vmem:[%s3507_s1 + $0x78] sm:$0xff]  ;;  %v421_v9 = vld [vmem:[%s3508_s2 + $0x128] sm:$0xff] }
  0x23   : > { %1056 = vmatprep.mubr.f32.mxu0 %v2320_v5  ;;  %1248 = vmatprep.mubr.f32.mxu1 %v2320_v5  ;;  %v366_v8 = vld [vmem:[%s3507_s1 + $0x178] sm:$0xff]  ;;  %v420_v10 = vld [vmem:[%s3508_s2 + $0x120] sm:$0xff]  ;;  %v422_v14 = vld [vmem:[%s3508_s2 + $0x130] sm:$0xff] }
  0x24   : > { %v335_v11 = vld [vmem:[%s3507_s1 + $0x80] sm:$0xff]  ;;  %v423_v13 = vld [vmem:[%s3508_s2 + $0x138] sm:$0xff]  ;;  %v336_v15 = vld [vmem:[%s3507_s1 + $0x88] sm:$0xff] }
  0x25   : > { %2198 = vmatmul.mubr.msk.f32.gmra.mxu0 %vm770_vm1, %v323_v26  ;;  %2230 = vmatmul.mubr.msk.f32.gmra.mxu1 %vm770_vm1, %v355_v27  ;;  %v367_v12 = vld [vmem:[%s3507_s1 + $0x180] sm:$0xff]  ;;  %v368_v16 = vld [vmem:[%s3507_s1 + $0x188] sm:$0xff]  ;;  %v337_v19 = vld [vmem:[%s3507_s1 + $0x90] sm:$0xff] }
  0x26   : > { %515 = vperm.xlu1 %2293, %v397_v24   ;;  %510 = vperm.xlu0 %2292, %v396_v25   ;;  %v425_v17 = vld [vmem:[%s3508_s2 + $0x148] sm:$0xff]  ;;  %v424_v18 = vld [vmem:[%s3508_s2 + $0x140] sm:$0xff]  ;;  %v369_v20 = vld [vmem:[%s3507_s1 + $0x190] sm:$0xff] }
  0x27   : > { %1062 = vmatprep.mubr.f32.mxu0 %v2320_v5  ;;  %1254 = vmatprep.mubr.f32.mxu1 %v2320_v5  ;;  %v427_v21 = vld [vmem:[%s3508_s2 + $0x158] sm:$0xff]  ;;  %v426_v22 = vld [vmem:[%s3508_s2 + $0x150] sm:$0xff]  ;;  %v429_v25 = vld [vmem:[%s3508_s2 + $0x168] sm:$0xff] }
  0x28   : > { %v338_v23 = vld [vmem:[%s3507_s1 + $0x98] sm:$0xff]  ;;  %v428_v26 = vld [vmem:[%s3508_s2 + $0x160] sm:$0xff] }
  0x29   : > { %2199 = vmatmul.mubr.msk.f32.gmra.mxu0 %vm770_vm1, %v324_v30  ;;  %2231 = vmatmul.mubr.msk.f32.gmra.mxu1 %vm770_vm1, %v356_v31  ;;  %v370_v24 = vld [vmem:[%s3507_s1 + $0x198] sm:$0xff]  ;;  %v339_v27 = vld [vmem:[%s3507_s1 + $0xa0] sm:$0xff]  ;;  %v430_v30 = vld [vmem:[%s3508_s2 + $0x170] sm:$0xff] }
  0x2a   : > { %525 = vperm.xlu1 %2293, %v399_v28   ;;  %520 = vperm.xlu0 %2292, %v398_v29   ;;  %v371_v28 = vld [vmem:[%s3507_s1 + $0x1a0] sm:$0xff]  ;;  %v431_v29 = vld [vmem:[%s3508_s2 + $0x178] sm:$0xff]  ;;  %v340_v31 = vld [vmem:[%s3507_s1 + $0xa8] sm:$0xff] }
  0x2b   : > { %1068 = vmatprep.mubr.f32.mxu0 %v2320_v5  ;;  %1260 = vmatprep.mubr.f32.mxu1 %v2320_v5 }
  0x2d   : > { %2200 = vmatmul.mubr.msk.f32.gmra.mxu0 %vm770_vm1, %v325_v34  ;;  %2232 = vmatmul.mubr.msk.f32.gmra.mxu1 %vm770_vm1, %v357_v35  ;;  %v432_v34 = vld [vmem:[%s3508_s2 + $0x180] sm:$0xff]  ;;  %v341_v35 = vld [vmem:[%s3507_s1 + $0xb0] sm:$0xff] }
  0x2e   : > { %535 = vperm.xlu1 %2293, %v401_v32   ;;  %530 = vperm.xlu0 %2292, %v400_v33   ;;  %v372_v32 = vld [vmem:[%s3507_s1 + $0x1a8] sm:$0xff] }
  0x2f   : > { %1074 = vmatprep.mubr.f32.mxu0 %v2320_v5  ;;  %1266 = vmatprep.mubr.f32.mxu1 %v2320_v5  ;;  %v433_v33 = vld [vmem:[%s3508_s2 + $0x188] sm:$0xff] }
  0x31   : > { %2201 = vmatmul.mubr.msk.f32.gmra.mxu0 %vm770_vm1, %v326_v38  ;;  %2233 = vmatmul.mubr.msk.f32.gmra.mxu1 %vm770_vm1, %v358_v39  ;;  %v434_v38 = vld [vmem:[%s3508_s2 + $0x190] sm:$0xff]  ;;  %v342_v39 = vld [vmem:[%s3507_s1 + $0xb8] sm:$0xff] }
  0x32   : > { %545 = vperm.xlu1 %2293, %v403_v36   ;;  %540 = vperm.xlu0 %2292, %v402_v37   ;;  %v373_v36 = vld [vmem:[%s3507_s1 + $0x1b0] sm:$0xff]  ;;  %v435_v37 = vld [vmem:[%s3508_s2 + $0x198] sm:$0xff] }
  0x33   : > { %1080 = vmatprep.mubr.f32.mxu0 %v2320_v5  ;;  %1272 = vmatprep.mubr.f32.mxu1 %v2320_v5 }
  0x35   : > { %2202 = vmatmul.mubr.msk.f32.gmra.mxu0 %vm770_vm1, %v327_v42  ;;  %2234 = vmatmul.mubr.msk.f32.gmra.mxu1 %vm770_vm1, %v359_v43  ;;  %v436_v42 = vld [vmem:[%s3508_s2 + $0x1a0] sm:$0xff] }
  0x36   : > { %555 = vperm.xlu1 %2293, %v405_v40   ;;  %550 = vperm.xlu0 %2292, %v404_v41   ;;  %v374_v40 = vld [vmem:[%s3507_s1 + $0x1b8] sm:$0xff]  ;;  %v437_v41 = vld [vmem:[%s3508_s2 + $0x1a8] sm:$0xff]  ;;  %v343_v43 = vld [vmem:[%s3507_s1 + $0xc0] sm:$0xff] }
  0x37   : > { %1086 = vmatprep.mubr.f32.mxu0 %v2320_v5  ;;  %1278 = vmatprep.mubr.f32.mxu1 %v2320_v5 }
  0x39   : > { %2203 = vmatmul.mubr.msk.f32.gmra.mxu0 %vm770_vm1, %v328_v46  ;;  %2235 = vmatmul.mubr.msk.f32.gmra.mxu1 %vm770_vm1, %v360_v47  ;;  %v438_v46 = vld [vmem:[%s3508_s2 + $0x1b0] sm:$0xff]  ;;  %v344_v47 = vld [vmem:[%s3507_s1 + $0xc8] sm:$0xff] }
  0x3a   : > { %565 = vperm.xlu1 %2293, %v407_v44   ;;  %560 = vperm.xlu0 %2292, %v406_v45   ;;  %v375_v44 = vld [vmem:[%s3507_s1 + $0x1c0] sm:$0xff]  ;;  %v439_v45 = vld [vmem:[%s3508_s2 + $0x1b8] sm:$0xff] }
  0x3b   : > { %1092 = vmatprep.mubr.f32.mxu0 %v2320_v5  ;;  %1284 = vmatprep.mubr.f32.mxu1 %v2320_v5 }
  0x3d   : > { %2204 = vmatmul.mubr.msk.f32.gmra.mxu0 %vm770_vm1, %v329_v50  ;;  %2236 = vmatmul.mubr.msk.f32.gmra.mxu1 %vm770_vm1, %v361_v51  ;;  %v440_v50 = vld [vmem:[%s3508_s2 + $0x1c0] sm:$0xff]  ;;  %v345_v51 = vld [vmem:[%s3507_s1 + $0xd0] sm:$0xff] }
  0x3e   : > { %575 = vperm.xlu1 %2293, %v409_v48   ;;  %570 = vperm.xlu0 %2292, %v408_v49   ;;  %v376_v48 = vld [vmem:[%s3507_s1 + $0x1c8] sm:$0xff] }
  0x3f   : > { %1098 = vmatprep.mubr.f32.mxu0 %v2320_v5  ;;  %1290 = vmatprep.mubr.f32.mxu1 %v2320_v5  ;;  %v441_v49 = vld [vmem:[%s3508_s2 + $0x1c8] sm:$0xff] }
  0x41   : > { %2205 = vmatmul.mubr.msk.f32.gmra.mxu0 %vm770_vm1, %v330_v54  ;;  %2237 = vmatmul.mubr.msk.f32.gmra.mxu1 %vm770_vm1, %v362_v55  ;;  %v442_v54 = vld [vmem:[%s3508_s2 + $0x1d0] sm:$0xff]  ;;  %v346_v55 = vld [vmem:[%s3507_s1 + $0xd8] sm:$0xff] }
  0x42   : > { %585 = vperm.xlu1 %2293, %v411_v52   ;;  %580 = vperm.xlu0 %2292, %v410_v53   ;;  %v377_v52 = vld [vmem:[%s3507_s1 + $0x1d0] sm:$0xff]  ;;  %v443_v53 = vld [vmem:[%s3508_s2 + $0x1d8] sm:$0xff] }
  0x43   : > { %1104 = vmatprep.mubr.f32.mxu0 %v2320_v5  ;;  %1296 = vmatprep.mubr.f32.mxu1 %v2320_v5 }
  0x45   : > { %2206 = vmatmul.mubr.msk.f32.gmra.mxu0 %vm770_vm1, %v331_v58  ;;  %2238 = vmatmul.mubr.msk.f32.gmra.mxu1 %vm770_vm1, %v363_v59  ;;  %v444_v58 = vld [vmem:[%s3508_s2 + $0x1e0] sm:$0xff] }
  0x46   : > { %595 = vperm.xlu1 %2293, %v413_v56   ;;  %590 = vperm.xlu0 %2292, %v412_v57   ;;  %v378_v56 = vld [vmem:[%s3507_s1 + $0x1d8] sm:$0xff]  ;;  %v445_v57 = vld [vmem:[%s3508_s2 + $0x1e8] sm:$0xff]  ;;  %v347_v59 = vld [vmem:[%s3507_s1 + $0xe0] sm:$0xff] }
  0x47   : > { %1110 = vmatprep.mubr.f32.mxu0 %v2320_v5  ;;  %1302 = vmatprep.mubr.f32.mxu1 %v2320_v5 }
  0x49   : > { %2207 = vmatmul.mubr.msk.f32.gmra.mxu0 %vm770_vm1, %v332_v62  ;;  %2239 = vmatmul.mubr.msk.f32.gmra.mxu1 %vm770_vm1, %v364_v63  ;;  %v446_v62 = vld [vmem:[%s3508_s2 + $0x1f0] sm:$0xff] }
  0x4a   : > { %605 = vperm.xlu1 %2293, %v415_v60   ;;  %600 = vperm.xlu0 %2292, %v414_v61   ;;  %v379_v60 = vld [vmem:[%s3507_s1 + $0x1e0] sm:$0xff]  ;;  %v447_v61 = vld [vmem:[%s3508_s2 + $0x1f8] sm:$0xff] }
  0x4b   : > { %1116 = vmatprep.mubr.f32.mxu0 %v2320_v5  ;;  %1308 = vmatprep.mubr.f32.mxu1 %v2320_v5 }
  0x4d   : > { %2208 = vmatmul.mubr.msk.f32.gmra.mxu0 %vm770_vm1, %v333_v2  ;;  %2240 = vmatmul.mubr.msk.f32.gmra.mxu1 %vm770_vm1, %v365_v3  ;;  %v380_v2 = vld [vmem:[%s3507_s1 + $0x1e8] sm:$0xff] }
  0x4e   : > { %615 = vperm.xlu1 %2293, %v417_v0   ;;  %610 = vperm.xlu0 %2292, %v416_v1   ;;  %v348_v1 = vld [vmem:[%s3507_s1 + $0xe8] sm:$0xff] }
  0x4f   : > { %1122 = vmatprep.mubr.f32.mxu0 %v2320_v5  ;;  %1314 = vmatprep.mubr.f32.mxu1 %v2320_v5 }
  0x51   : > { %2209 = vmatmul.mubr.msk.f32.gmra.mxu0 %vm770_vm1, %v334_v7  ;;  %2241 = vmatmul.mubr.msk.f32.gmra.mxu1 %vm770_vm1, %v366_v8  ;;  %v381_v7 = vld [vmem:[%s3507_s1 + $0x1f0] sm:$0xff] }
  0x52   : > { %625 = vperm.xlu1 %2293, %v419_v4   ;;  %620 = vperm.xlu0 %2292, %v418_v6   ;;  %v349_v6 = vld [vmem:[%s3507_s1 + $0xf0] sm:$0xff] }
  0x53   : > { %1128 = vmatprep.mubr.f32.mxu0 %v2320_v5  ;;  %1320 = vmatprep.mubr.f32.mxu1 %v2320_v5 }
  0x55   : > { %2210 = vmatmul.mubr.msk.f32.gmra.mxu0 %vm770_vm1, %v335_v11  ;;  %2242 = vmatmul.mubr.msk.f32.gmra.mxu1 %vm770_vm1, %v367_v12  ;;  %v382_v11 = vld [vmem:[%s3507_s1 + $0x1f8] sm:$0xff] }
  0x56   : > { %635 = vperm.xlu1 %2293, %v421_v9   ;;  %630 = vperm.xlu0 %2292, %v420_v10   ;;  %v350_v10 = vld [vmem:[%s3507_s1 + $0xf8] sm:$0xff] }
  0x57   : > { %1134 = vmatprep.mubr.f32.mxu0 %v2320_v5  ;;  %1326 = vmatprep.mubr.f32.mxu1 %v2320_v5 }
  0x59   : > { %2211 = vmatmul.mubr.msk.f32.gmra.mxu0 %vm770_vm1, %v336_v15  ;;  %2243 = vmatmul.mubr.msk.f32.gmra.mxu1 %vm770_vm1, %v368_v16 }
  0x5a   : > { %645 = vperm.xlu1 %2293, %v423_v13   ;;  %640 = vperm.xlu0 %2292, %v422_v14  }
  0x5b   : > { %1140 = vmatprep.mubr.f32.mxu0 %v2320_v5  ;;  %1332 = vmatprep.mubr.f32.mxu1 %v2320_v5 }
  0x5d   : > { %2212 = vmatmul.mubr.msk.f32.gmra.mxu0 %vm770_vm1, %v337_v19  ;;  %2244 = vmatmul.mubr.msk.f32.gmra.mxu1 %vm770_vm1, %v369_v20 }
  0x5e   : > { %655 = vperm.xlu1 %2293, %v425_v17   ;;  %650 = vperm.xlu0 %2292, %v424_v18  }
  0x5f   : > { %1146 = vmatprep.mubr.f32.mxu0 %v2320_v5  ;;  %1338 = vmatprep.mubr.f32.mxu1 %v2320_v5 }
  0x61   : > { %2213 = vmatmul.mubr.msk.f32.gmra.mxu0 %vm770_vm1, %v338_v23  ;;  %2245 = vmatmul.mubr.msk.f32.gmra.mxu1 %vm770_vm1, %v370_v24 }
  0x62   : > { %665 = vperm.xlu1 %2293, %v427_v21   ;;  %660 = vperm.xlu0 %2292, %v426_v22  }
  0x63   : > { %1152 = vmatprep.mubr.f32.mxu0 %v2320_v5  ;;  %1344 = vmatprep.mubr.f32.mxu1 %v2320_v5 }
  0x65   : > { %2214 = vmatmul.mubr.msk.f32.gmra.mxu0 %vm770_vm1, %v339_v27  ;;  %2246 = vmatmul.mubr.msk.f32.gmra.mxu1 %vm770_vm1, %v371_v28 }
  0x66   : > { %675 = vperm.xlu1 %2293, %v429_v25   ;;  %670 = vperm.xlu0 %2292, %v428_v26  }
  0x67   : > { %1158 = vmatprep.mubr.f32.mxu0 %v2320_v5  ;;  %1350 = vmatprep.mubr.f32.mxu1 %v2320_v5 }
  0x69   : > { %2215 = vmatmul.mubr.msk.f32.gmra.mxu0 %vm770_vm1, %v340_v31  ;;  %2247 = vmatmul.mubr.msk.f32.gmra.mxu1 %vm770_vm1, %v372_v32 }
  0x6a   : > { %685 = vperm.xlu1 %2293, %v431_v29   ;;  %680 = vperm.xlu0 %2292, %v430_v30  }
  0x6b   : > { %1164 = vmatprep.mubr.f32.mxu0 %v2320_v5  ;;  %1356 = vmatprep.mubr.f32.mxu1 %v2320_v5 }
  0x6d   : > { %2216 = vmatmul.mubr.msk.f32.gmra.mxu0 %vm770_vm1, %v341_v35  ;;  %2248 = vmatmul.mubr.msk.f32.gmra.mxu1 %vm770_vm1, %v373_v36 }
  0x6e   : > { %695 = vperm.xlu1 %2293, %v433_v33   ;;  %690 = vperm.xlu0 %2292, %v432_v34  }
  0x6f   : > { %1170 = vmatprep.mubr.f32.mxu0 %v2320_v5  ;;  %1362 = vmatprep.mubr.f32.mxu1 %v2320_v5 }
  0x71   : > { %2217 = vmatmul.mubr.msk.f32.gmra.mxu0 %vm770_vm1, %v342_v39  ;;  %2249 = vmatmul.mubr.msk.f32.gmra.mxu1 %vm770_vm1, %v374_v40 }
  0x72   : > { %705 = vperm.xlu1 %2293, %v435_v37   ;;  %700 = vperm.xlu0 %2292, %v434_v38  }
  0x73   : > { %1176 = vmatprep.mubr.f32.mxu0 %v2320_v5  ;;  %1368 = vmatprep.mubr.f32.mxu1 %v2320_v5 }
  0x75   : > { %2218 = vmatmul.mubr.msk.f32.gmra.mxu0 %vm770_vm1, %v343_v43  ;;  %2250 = vmatmul.mubr.msk.f32.gmra.mxu1 %vm770_vm1, %v375_v44 }
  0x76   : > { %715 = vperm.xlu1 %2293, %v437_v41   ;;  %710 = vperm.xlu0 %2292, %v436_v42  }
  0x77   : > { %1182 = vmatprep.mubr.f32.mxu0 %v2320_v5  ;;  %1374 = vmatprep.mubr.f32.mxu1 %v2320_v5 }
  0x79   : > { %2219 = vmatmul.mubr.msk.f32.gmra.mxu0 %vm770_vm1, %v344_v47  ;;  %2251 = vmatmul.mubr.msk.f32.gmra.mxu1 %vm770_vm1, %v376_v48 }
  0x7a   : > { %725 = vperm.xlu1 %2293, %v439_v45   ;;  %720 = vperm.xlu0 %2292, %v438_v46  }
  0x7b   : > { %1188 = vmatprep.mubr.f32.mxu0 %v2320_v5  ;;  %1380 = vmatprep.mubr.f32.mxu1 %v2320_v5 }
  0x7d   : > { %2220 = vmatmul.mubr.msk.f32.gmra.mxu0 %vm770_vm1, %v345_v51  ;;  %2252 = vmatmul.mubr.msk.f32.gmra.mxu1 %vm770_vm1, %v377_v52 }
  0x7e   : > { %735 = vperm.xlu1 %2293, %v441_v49   ;;  %730 = vperm.xlu0 %2292, %v440_v50  }
  0x7f   : > { %1194 = vmatprep.mubr.f32.mxu0 %v2320_v5  ;;  %1386 = vmatprep.mubr.f32.mxu1 %v2320_v5 }
  0x81   : > { %2221 = vmatmul.mubr.msk.f32.gmra.mxu0 %vm770_vm1, %v346_v55  ;;  %2253 = vmatmul.mubr.msk.f32.gmra.mxu1 %vm770_vm1, %v378_v56 }
  0x82   : > { %745 = vperm.xlu1 %2293, %v443_v53   ;;  %740 = vperm.xlu0 %2292, %v442_v54  }
  0x83   : > { %1200 = vmatprep.mubr.f32.mxu0 %v2320_v5  ;;  %1392 = vmatprep.mubr.f32.mxu1 %v2320_v5 }
  0x85   : > { %2222 = vmatmul.mubr.msk.f32.gmra.mxu0 %vm770_vm1, %v347_v59  ;;  %2254 = vmatmul.mubr.msk.f32.gmra.mxu1 %vm770_vm1, %v379_v60  ;;  %v2321_v60 = vmov -inf  }
  0x86   : > { %755 = vperm.xlu1 %2293, %v445_v57   ;;  %750 = vperm.xlu0 %2292, %v444_v58   ;;  %287 = vst.msk [vmem:[#allocation2 + $0x100] sm:$0xff] %vm254_vm2, %v2321_v60  ;;  %255 = vst.msk [vmem:[#allocation2] sm:$0xff] %vm254_vm2, %v2321_v60 }
  0x87   : > { %1206 = vmatprep.mubr.f32.mxu0 %v2320_v5  ;;  %1398 = vmatprep.mubr.f32.mxu1 %v2320_v5  ;;  %256 = vst.msk [vmem:[#allocation2 + $0x8] sm:$0xff] %vm254_vm2, %v2321_v60  ;;  %257 = vst.msk [vmem:[#allocation2 + $0x10] sm:$0xff] %vm254_vm2, %v2321_v60 }
  0x88   : > { %258 = vst.msk [vmem:[#allocation2 + $0x18] sm:$0xff] %vm254_vm2, %v2321_v60  ;;  %259 = vst.msk [vmem:[#allocation2 + $0x20] sm:$0xff] %vm254_vm2, %v2321_v60 }
  0x89   : > { %v2853_v63 = vpop.permute.xlu1 %460  ;;  %v2855_v0 = vpop.permute.xlu0 %450  ;;  %2223 = vmatmul.mubr.msk.f32.gmra.mxu0 %vm770_vm1, %v348_v1  ;;  %2255 = vmatmul.mubr.msk.f32.gmra.mxu1 %vm770_vm1, %v380_v2  ;;  %260 = vst.msk [vmem:[#allocation2 + $0x28] sm:$0xff] %vm254_vm2, %v2321_v60  ;;  %261 = vst.msk [vmem:[#allocation2 + $0x30] sm:$0xff] %vm254_vm2, %v2321_v60 }
  0x8a   : > { %765 = vperm.xlu1 %2293, %v447_v61   ;;  %760 = vperm.xlu0 %2292, %v446_v62   ;;  %262 = vst.msk [vmem:[#allocation2 + $0x38] sm:$0xff] %vm254_vm2, %v2321_v60  ;;  %263 = vst.msk [vmem:[#allocation2 + $0x40] sm:$0xff] %vm254_vm2, %v2321_v60 }
  0x8b   : > { %1212 = vmatprep.mubr.f32.mxu0 %v2320_v5  ;;  %1404 = vmatprep.mubr.f32.mxu1 %v2320_v5  ;;  %264 = vst.msk [vmem:[#allocation2 + $0x48] sm:$0xff] %vm254_vm2, %v2321_v60  ;;  %265 = vst.msk [vmem:[#allocation2 + $0x50] sm:$0xff] %vm254_vm2, %v2321_v60 }
  0x8c   : > { %266 = vst.msk [vmem:[#allocation2 + $0x58] sm:$0xff] %vm254_vm2, %v2321_v60  ;;  %267 = vst.msk [vmem:[#allocation2 + $0x60] sm:$0xff] %vm254_vm2, %v2321_v60 }
  0x8d   : > { %v2867_v3 = vpop.permute.xlu1 %465  ;;  %v2869_v4 = vpop.permute.xlu0 %455  ;;  %2224 = vmatmul.mubr.msk.f32.gmra.mxu0 %vm770_vm1, %v349_v6  ;;  %2256 = vmatmul.mubr.msk.f32.gmra.mxu1 %vm770_vm1, %v381_v7  ;;  %268 = vst.msk [vmem:[#allocation2 + $0x68] sm:$0xff] %vm254_vm2, %v2321_v60  ;;  %269 = vst.msk [vmem:[#allocation2 + $0x70] sm:$0xff] %vm254_vm2, %v2321_v60 }
  0x8e   : > { %1218 = vmatprep.mubr.f32.mxu0 %v2320_v5  ;;  %1410 = vmatprep.mubr.f32.mxu1 %v2320_v5  ;;  %270 = vst.msk [vmem:[#allocation2 + $0x78] sm:$0xff] %vm254_vm2, %v2321_v60  ;;  %271 = vst.msk [vmem:[#allocation2 + $0x80] sm:$0xff] %vm254_vm2, %v2321_v60 }
  0x8f   : > { %272 = vst.msk [vmem:[#allocation2 + $0x88] sm:$0xff] %vm254_vm2, %v2321_v60  ;;  %273 = vst.msk [vmem:[#allocation2 + $0x90] sm:$0xff] %vm254_vm2, %v2321_v60 }
  0x90   : > { %274 = vst.msk [vmem:[#allocation2 + $0x98] sm:$0xff] %vm254_vm2, %v2321_v60  ;;  %275 = vst.msk [vmem:[#allocation2 + $0xa0] sm:$0xff] %vm254_vm2, %v2321_v60 }
  0x91   : > { %v2881_v8 = vpop.permute.xlu1 %475  ;;  %v2883_v9 = vpop.permute.xlu0 %470  ;;  %2225 = vmatmul.mubr.msk.f32.gmra.mxu0 %vm770_vm1, %v350_v10  ;;  %2257 = vmatmul.mubr.msk.f32.gmra.mxu1 %vm770_vm1, %v382_v11  ;;  %276 = vst.msk [vmem:[#allocation2 + $0xa8] sm:$0xff] %vm254_vm2, %v2321_v60  ;;  %277 = vst.msk [vmem:[#allocation2 + $0xb0] sm:$0xff] %vm254_vm2, %v2321_v60 }
  0x92   : > { %278 = vst.msk [vmem:[#allocation2 + $0xb8] sm:$0xff] %vm254_vm2, %v2321_v60  ;;  %279 = vst.msk [vmem:[#allocation2 + $0xc0] sm:$0xff] %vm254_vm2, %v2321_v60 }
  0x93   : > { %280 = vst.msk [vmem:[#allocation2 + $0xc8] sm:$0xff] %vm254_vm2, %v2321_v60  ;;  %281 = vst.msk [vmem:[#allocation2 + $0xd0] sm:$0xff] %vm254_vm2, %v2321_v60 }
  0x94   : > { %282 = vst.msk [vmem:[#allocation2 + $0xd8] sm:$0xff] %vm254_vm2, %v2321_v60  ;;  %283 = vst.msk [vmem:[#allocation2 + $0xe0] sm:$0xff] %vm254_vm2, %v2321_v60 }
  0x95   : > { %v2895_v12 = vpop.permute.xlu1 %485  ;;  %v2897_v13 = vpop.permute.xlu0 %480  ;;  %284 = vst.msk [vmem:[#allocation2 + $0xe8] sm:$0xff] %vm254_vm2, %v2321_v60  ;;  %285 = vst.msk [vmem:[#allocation2 + $0xf0] sm:$0xff] %vm254_vm2, %v2321_v60 }
  0x96   : > { %286 = vst.msk [vmem:[#allocation2 + $0xf8] sm:$0xff] %vm254_vm2, %v2321_v60  ;;  %288 = vst.msk [vmem:[#allocation2 + $0x108] sm:$0xff] %vm254_vm2, %v2321_v60 }
  0x97   : > { %289 = vst.msk [vmem:[#allocation2 + $0x110] sm:$0xff] %vm254_vm2, %v2321_v60  ;;  %290 = vst.msk [vmem:[#allocation2 + $0x118] sm:$0xff] %vm254_vm2, %v2321_v60 }
  0x98   : > { %291 = vst.msk [vmem:[#allocation2 + $0x120] sm:$0xff] %vm254_vm2, %v2321_v60  ;;  %292 = vst.msk [vmem:[#allocation2 + $0x128] sm:$0xff] %vm254_vm2, %v2321_v60 }
  0x99   : > { %v2899_v14 = vpop.permute.xlu1 %495  ;;  %v2901_v15 = vpop.permute.xlu0 %490  ;;  %293 = vst.msk [vmem:[#allocation2 + $0x130] sm:$0xff] %vm254_vm2, %v2321_v60  ;;  %294 = vst.msk [vmem:[#allocation2 + $0x138] sm:$0xff] %vm254_vm2, %v2321_v60 }
  0x9a   : > { %295 = vst.msk [vmem:[#allocation2 + $0x140] sm:$0xff] %vm254_vm2, %v2321_v60  ;;  %296 = vst.msk [vmem:[#allocation2 + $0x148] sm:$0xff] %vm254_vm2, %v2321_v60 }
  0x9b   : > { %297 = vst.msk [vmem:[#allocation2 + $0x150] sm:$0xff] %vm254_vm2, %v2321_v60  ;;  %298 = vst.msk [vmem:[#allocation2 + $0x158] sm:$0xff] %vm254_vm2, %v2321_v60 }
  0x9c   : > { %299 = vst.msk [vmem:[#allocation2 + $0x160] sm:$0xff] %vm254_vm2, %v2321_v60  ;;  %300 = vst.msk [vmem:[#allocation2 + $0x168] sm:$0xff] %vm254_vm2, %v2321_v60 }
  0x9d   : > { %v2903_v5 = vpop.permute.xlu1 %505  ;;  %v2905_v16 = vpop.permute.xlu0 %500  ;;  %301 = vst.msk [vmem:[#allocation2 + $0x170] sm:$0xff] %vm254_vm2, %v2321_v60  ;;  %302 = vst.msk [vmem:[#allocation2 + $0x178] sm:$0xff] %vm254_vm2, %v2321_v60 }
  0x9e   : > { %303 = vst.msk [vmem:[#allocation2 + $0x180] sm:$0xff] %vm254_vm2, %v2321_v60  ;;  %304 = vst.msk [vmem:[#allocation2 + $0x188] sm:$0xff] %vm254_vm2, %v2321_v60 }
  0x9f   : > { %305 = vst.msk [vmem:[#allocation2 + $0x190] sm:$0xff] %vm254_vm2, %v2321_v60  ;;  %306 = vst.msk [vmem:[#allocation2 + $0x198] sm:$0xff] %vm254_vm2, %v2321_v60 }
  0xa0   : > { %307 = vst.msk [vmem:[#allocation2 + $0x1a0] sm:$0xff] %vm254_vm2, %v2321_v60  ;;  %308 = vst.msk [vmem:[#allocation2 + $0x1a8] sm:$0xff] %vm254_vm2, %v2321_v60 }
  0xa1   : > { %v2907_v17 = vpop.permute.xlu1 %515  ;;  %v2909_v18 = vpop.permute.xlu0 %510  ;;  %309 = vst.msk [vmem:[#allocation2 + $0x1b0] sm:$0xff] %vm254_vm2, %v2321_v60  ;;  %310 = vst.msk [vmem:[#allocation2 + $0x1b8] sm:$0xff] %vm254_vm2, %v2321_v60 }
  0xa2   : > { %311 = vst.msk [vmem:[#allocation2 + $0x1c0] sm:$0xff] %vm254_vm2, %v2321_v60  ;;  %312 = vst.msk [vmem:[#allocation2 + $0x1c8] sm:$0xff] %vm254_vm2, %v2321_v60 }
  0xa3   : > { %313 = vst.msk [vmem:[#allocation2 + $0x1d0] sm:$0xff] %vm254_vm2, %v2321_v60  ;;  %314 = vst.msk [vmem:[#allocation2 + $0x1d8] sm:$0xff] %vm254_vm2, %v2321_v60 }
  0xa4   : > { %315 = vst.msk [vmem:[#allocation2 + $0x1e0] sm:$0xff] %vm254_vm2, %v2321_v60  ;;  %316 = vst.msk [vmem:[#allocation2 + $0x1e8] sm:$0xff] %vm254_vm2, %v2321_v60 }
  0xa5   : > { %v2911_v19 = vpop.permute.xlu1 %525  ;;  %v2913_v20 = vpop.permute.xlu0 %520  ;;  %317 = vst.msk [vmem:[#allocation2 + $0x1f0] sm:$0xff] %vm254_vm2, %v2321_v60  ;;  %318 = vst.msk [vmem:[#allocation2 + $0x1f8] sm:$0xff] %vm254_vm2, %v2321_v60 }
  0xa9   : > { %v2915_v21 = vpop.permute.xlu0 %530  ;;  %v2917_v22 = vpop.permute.xlu1 %535 }
  0xad   : > { %v2919_v23 = vpop.permute.xlu0 %540  ;;  %v2921_v24 = vpop.permute.xlu1 %545 }
  0xb1   : > { %v2923_v25 = vpop.permute.xlu0 %550  ;;  %v2925_v26 = vpop.permute.xlu1 %555 }
  0xb5   : > { %v2927_v27 = vpop.permute.xlu0 %560  ;;  %v2929_v28 = vpop.permute.xlu1 %565 }
  0xb9   : > { %v2931_v29 = vpop.permute.xlu0 %570  ;;  %v2933_v30 = vpop.permute.xlu1 %575 }
  0xbd   : > { %v2935_v31 = vpop.permute.xlu0 %580  ;;  %v2937_v32 = vpop.permute.xlu1 %585 }
  0xc1   : > { %v2939_v33 = vpop.permute.xlu0 %590  ;;  %v2941_v34 = vpop.permute.xlu1 %595 }
  0xc5   : > { %v2943_v35 = vpop.permute.xlu0 %600  ;;  %v2945_v36 = vpop.permute.xlu1 %605 }
  0xc9   : > { %v611_v37 = vpop.permute.xlu0 %610  ;;  %v616_v44 = vpop.permute.xlu1 %615 }
  0xcd   : > { %v2964_v55 = vpop.permute.xlu0 %620  ;;  %v626_v6 = vpop.permute.xlu1 %625 }
  0xd5   : > { %v1034_v38 = vpop.f32.mrf.mxu0  ;;  %v1226_v39 = vpop.f32.mrf.mxu1 }
  0xd6   : > { %v1035_v40 = vadd.f32 %v1034_v38, %v2855_v0  ;;  %v1227_v41 = vadd.f32 %v1226_v39, %v611_v37 }
  0xd7   : > { %v1036_v42 = vpop.f32.mrf.mxu0  ;;  %v1228_v43 = vpop.f32.mrf.mxu1 }
  0xd8   : > { %1417 = vst [vmem:[%s2951_s14] sm:$0xff] %v1035_v40  ;;  %1481 = vst [vmem:[%s2951_s14 + $0x200] sm:$0xff] %v1227_v41  ;;  %v1037_v45 = vadd.f32 %v1036_v42, %v2855_v0  ;;  %v1229_v46 = vadd.f32 %v1228_v43, %v611_v37 }
  0xd9   : > { %v1040_v47 = vpop.f32.mrf.mxu0  ;;  %v1232_v48 = vpop.f32.mrf.mxu1 }
  0xda   : > { %1418 = vst [vmem:[%s2951_s14 + $0x8] sm:$0xff] %v1037_v45  ;;  %1482 = vst [vmem:[%s2951_s14 + $0x208] sm:$0xff] %v1229_v46  ;;  %v2960_v49 = vadd.f32 %v1040_v47, %v2869_v4  ;;  %v2962_v50 = vadd.f32 %v1232_v48, %v616_v44  ;;  %v1705_v51 = vmax.f32 %v1227_v41, %v1229_v46 }
  0xdb   : > { %v1609_v52 = vmax.f32 %v1035_v40, %v1037_v45  ;;  %v1042_v53 = vpop.f32.mrf.mxu0  ;;  %v1234_v54 = vpop.f32.mrf.mxu1 }
  0xdc   : > { %1419 = vst [vmem:[%s2951_s14 + $0x10] sm:$0xff] %v2960_v49  ;;  %1483 = vst [vmem:[%s2951_s14 + $0x210] sm:$0xff] %v2962_v50  ;;  %v2971_v56 = vadd.f32 %v1042_v53, %v2869_v4  ;;  %v2973_v57 = vadd.f32 %v1234_v54, %v616_v44  ;;  %1706 = vmax.xlane.f32.xlu1 %v1705_v51  ;;  %v631_v44 = vpop.permute.xlu0 %630  ;;  %v636_v53 = vpop.permute.xlu1 %635 }
  0xdd   : > { %1610 = vmax.xlane.f32.xlu0 %v1609_v52  ;;  %v2975_v58 = vpop.f32.mrf.mxu0  ;;  %v2977_v59 = vpop.f32.mrf.mxu1 }
  0xde   : > { %1420 = vst [vmem:[%s2951_s14 + $0x18] sm:$0xff] %v2971_v56  ;;  %1484 = vst [vmem:[%s2951_s14 + $0x218] sm:$0xff] %v2973_v57  ;;  %v1047_v61 = vadd.f32 %v2975_v58, %v2853_v63  ;;  %v1239_v62 = vadd.f32 %v2977_v59, %v2964_v55  ;;  %v1612_v0 = vmax.f32 %v2960_v49, %v2971_v56 }
  0xdf   : > { %v1708_v1 = vmax.f32 %v2962_v50, %v2973_v57  ;;  %v1048_v2 = vpop.f32.mrf.mxu0  ;;  %v1240_v4 = vpop.f32.mrf.mxu1 }
  0xe0   : > { %1421 = vst [vmem:[%s2951_s14 + $0x20] sm:$0xff] %v1047_v61  ;;  %1485 = vst [vmem:[%s2951_s14 + $0x220] sm:$0xff] %v1239_v62  ;;  %v1049_v7 = vadd.f32 %v1048_v2, %v2853_v63  ;;  %v1241_v10 = vadd.f32 %v1240_v4, %v2964_v55  ;;  %1613 = vmax.xlane.f32.xlu1 %v1612_v0  ;;  %v641_v0 = vpop.permute.xlu0 %640 }
  0xe1   : > { %1709 = vmax.xlane.f32.xlu0 %v1708_v1  ;;  %v1052_v11 = vpop.f32.mrf.mxu0  ;;  %v1244_v37 = vpop.f32.mrf.mxu1 }
  0xe2   : > { %1422 = vst [vmem:[%s2951_s14 + $0x28] sm:$0xff] %v1049_v7  ;;  %1486 = vst [vmem:[%s2951_s14 + $0x228] sm:$0xff] %v1241_v10  ;;  %v1053_v38 = vadd.f32 %v1052_v11, %v2867_v3  ;;  %v1245_v39 = vadd.f32 %v1244_v37, %v626_v6  ;;  %v1711_v40 = vmax.f32 %v1239_v62, %v1241_v10 }
  0xe3   : > { %v1615_v41 = vmax.f32 %v1047_v61, %v1049_v7  ;;  %v1054_v42 = vpop.f32.mrf.mxu0  ;;  %v1246_v43 = vpop.f32.mrf.mxu1 }
  0xe4   : > { %1423 = vst [vmem:[%s2951_s14 + $0x30] sm:$0xff] %v1053_v38  ;;  %1487 = vst [vmem:[%s2951_s14 + $0x230] sm:$0xff] %v1245_v39  ;;  %v1055_v63 = vadd.f32 %v1054_v42, %v2867_v3  ;;  %v1247_v45 = vadd.f32 %v1246_v43, %v626_v6  ;;  %1712 = vmax.xlane.f32.xlu1 %v1711_v40 }
  0xe5   : > { %1616 = vmax.xlane.f32.xlu0 %v1615_v41  ;;  %v1058_v46 = vpop.f32.mrf.mxu0  ;;  %v1250_v47 = vpop.f32.mrf.mxu1 }
  0xe6   : > { %1424 = vst [vmem:[%s2951_s14 + $0x38] sm:$0xff] %v1055_v63  ;;  %1488 = vst [vmem:[%s2951_s14 + $0x238] sm:$0xff] %v1247_v45  ;;  %v1059_v48 = vadd.f32 %v1058_v46, %v2883_v9  ;;  %v1251_v49 = vadd.f32 %v1250_v47, %v631_v44  ;;  %v1618_v50 = vmax.f32 %v1053_v38, %v1055_v63 }
  0xe7   : > { %v1060_v51 = vpop.f32.mrf.mxu0  ;;  %v1252_v52 = vpop.f32.mrf.mxu1  ;;  %v1714_v60 = vmax.f32 %v1245_v39, %v1247_v45 }
  0xe8   : > { %1425 = vst [vmem:[%s2951_s14 + $0x40] sm:$0xff] %v1059_v48  ;;  %1489 = vst [vmem:[%s2951_s14 + $0x240] sm:$0xff] %v1251_v49  ;;  %v1061_v3 = vadd.f32 %v1060_v51, %v2883_v9  ;;  %v1253_v54 = vadd.f32 %v1252_v52, %v631_v44  ;;  %v646_v39 = vpop.permute.xlu1 %645 }
  0xe9   : > { %1619 = vmax.xlane.f32.xlu0 %v1618_v50  ;;  %v1064_v55 = vpop.f32.mrf.mxu0  ;;  %v1256_v56 = vpop.f32.mrf.mxu1 }
  0xea   : > { %1426 = vst [vmem:[%s2951_s14 + $0x48] sm:$0xff] %v1061_v3  ;;  %1490 = vst [vmem:[%s2951_s14 + $0x248] sm:$0xff] %v1253_v54  ;;  %v1065_v57 = vadd.f32 %v1064_v55, %v2881_v8  ;;  %v1257_v58 = vadd.f32 %v1256_v56, %v636_v53  ;;  %v1621_v59 = vmax.f32 %v1059_v48, %v1061_v3  ;;  %v651_v48 = vpop.permute.xlu0 %650 }
  0xeb   : > { %v1066_v61 = vpop.f32.mrf.mxu0  ;;  %v1258_v62 = vpop.f32.mrf.mxu1  ;;  %v1717_v10 = vmax.f32 %v1251_v49, %v1253_v54 }
  0xec   : > { %1427 = vst [vmem:[%s2951_s14 + $0x50] sm:$0xff] %v1065_v57  ;;  %1491 = vst [vmem:[%s2951_s14 + $0x250] sm:$0xff] %v1257_v58  ;;  %v1067_v9 = vadd.f32 %v1066_v61, %v2881_v8  ;;  %v1259_v1 = vadd.f32 %v1258_v62, %v636_v53  ;;  %1622 = vmax.xlane.f32.xlu1 %v1621_v59 }
  0xed   : > { %1715 = vmax.xlane.f32.xlu0 %v1714_v60  ;;  %v1070_v2 = vpop.f32.mrf.mxu0  ;;  %v1262_v4 = vpop.f32.mrf.mxu1 }
  0xee   : > { %1428 = vst [vmem:[%s2951_s14 + $0x58] sm:$0xff] %v1067_v9  ;;  %1492 = vst [vmem:[%s2951_s14 + $0x258] sm:$0xff] %v1259_v1  ;;  %v1071_v6 = vadd.f32 %v1070_v2, %v2897_v13  ;;  %v1263_v7 = vadd.f32 %v1262_v4, %v641_v0  ;;  %v1624_v11 = vmax.f32 %v1065_v57, %v1067_v9  ;;  %v656_v57 = vpop.permute.xlu1 %655  ;;  %v661_v4 = vpop.permute.xlu0 %660 }
  0xef   : > { %v1072_v37 = vpop.f32.mrf.mxu0  ;;  %v1264_v38 = vpop.f32.mrf.mxu1  ;;  %v1720_v45 = vmax.f32 %v1257_v58, %v1259_v1 }
  0xf0   : > { %1429 = vst [vmem:[%s2951_s14 + $0x60] sm:$0xff] %v1071_v6  ;;  %1493 = vst [vmem:[%s2951_s14 + $0x260] sm:$0xff] %v1263_v7  ;;  %v1073_v8 = vadd.f32 %v1072_v37, %v2897_v13  ;;  %v1265_v40 = vadd.f32 %v1264_v38, %v641_v0  ;;  %1718 = vmax.xlane.f32.xlu1 %v1717_v10 }
  0xf1   : > { %1625 = vmax.xlane.f32.xlu0 %v1624_v11  ;;  %v1076_v41 = vpop.f32.mrf.mxu0  ;;  %v1268_v42 = vpop.f32.mrf.mxu1 }
  0xf2   : > { %1430 = vst [vmem:[%s2951_s14 + $0x68] sm:$0xff] %v1073_v8  ;;  %1494 = vst [vmem:[%s2951_s14 + $0x268] sm:$0xff] %v1265_v40  ;;  %v1077_v43 = vadd.f32 %v1076_v41, %v2895_v12  ;;  %v1269_v44 = vadd.f32 %v1268_v42, %v646_v39  ;;  %v1627_v63 = vmax.f32 %v1071_v6, %v1073_v8  ;;  %v666_v41 = vpop.permute.xlu1 %665 }
  0xf3   : > { %v1078_v46 = vpop.f32.mrf.mxu0  ;;  %v1270_v47 = vpop.f32.mrf.mxu1  ;;  %v1723_v3 = vmax.f32 %v1263_v7, %v1265_v40 }
  0xf4   : > { %1431 = vst [vmem:[%s2951_s14 + $0x70] sm:$0xff] %v1077_v43  ;;  %1495 = vst [vmem:[%s2951_s14 + $0x270] sm:$0xff] %v1269_v44  ;;  %v1079_v13 = vadd.f32 %v1078_v46, %v2895_v12  ;;  %v1271_v49 = vadd.f32 %v1270_v47, %v646_v39  ;;  %1628 = vmax.xlane.f32.xlu1 %v1627_v63 }
  0xf5   : > { %1721 = vmax.xlane.f32.xlu0 %v1720_v45  ;;  %v1082_v50 = vpop.f32.mrf.mxu0  ;;  %v1274_v51 = vpop.f32.mrf.mxu1 }
  0xf6   : > { %1432 = vst [vmem:[%s2951_s14 + $0x78] sm:$0xff] %v1079_v13  ;;  %1496 = vst [vmem:[%s2951_s14 + $0x278] sm:$0xff] %v1271_v49  ;;  %v1083_v52 = vadd.f32 %v1082_v50, %v2901_v15  ;;  %v1275_v53 = vadd.f32 %v1274_v51, %v651_v48  ;;  %v1630_v54 = vmax.f32 %v1077_v43, %v1079_v13 }
  0xf7   : > { %v1084_v55 = vpop.f32.mrf.mxu0  ;;  %v1276_v56 = vpop.f32.mrf.mxu1  ;;  %v1726_v9 = vmax.f32 %v1269_v44, %v1271_v49 }
  0xf8   : > { %1433 = vst [vmem:[%s2951_s14 + $0x80] sm:$0xff] %v1083_v52  ;;  %1497 = vst [vmem:[%s2951_s14 + $0x280] sm:$0xff] %v1275_v53  ;;  %v1085_v12 = vadd.f32 %v1084_v55, %v2901_v15  ;;  %v1277_v58 = vadd.f32 %v1276_v56, %v651_v48  ;;  %1724 = vmax.xlane.f32.xlu1 %v1723_v3  ;;  %v671_v49 = vpop.permute.xlu0 %670 }
  0xf9   : > { %1631 = vmax.xlane.f32.xlu0 %v1630_v54  ;;  %v1088_v59 = vpop.f32.mrf.mxu0  ;;  %v1280_v60 = vpop.f32.mrf.mxu1 }
  0xfa   : > { %1434 = vst [vmem:[%s2951_s14 + $0x88] sm:$0xff] %v1085_v12  ;;  %1498 = vst [vmem:[%s2951_s14 + $0x288] sm:$0xff] %v1277_v58  ;;  %v1089_v61 = vadd.f32 %v1088_v59, %v2899_v14  ;;  %v1281_v62 = vadd.f32 %v1280_v60, %v656_v57  ;;  %v1633_v0 = vmax.f32 %v1083_v52, %v1085_v12  ;;  %v676_v12 = vpop.permute.xlu1 %675 }
  0xfb   : > { %v1090_v1 = vpop.f32.mrf.mxu0  ;;  %v1282_v2 = vpop.f32.mrf.mxu1  ;;  %v1729_v38 = vmax.f32 %v1275_v53, %v1277_v58 }
  0xfc   : > { %1435 = vst [vmem:[%s2951_s14 + $0x90] sm:$0xff] %v1089_v61  ;;  %1499 = vst [vmem:[%s2951_s14 + $0x290] sm:$0xff] %v1281_v62  ;;  %v1091_v15 = vadd.f32 %v1090_v1, %v2899_v14  ;;  %v1283_v6 = vadd.f32 %v1282_v2, %v656_v57  ;;  %1634 = vmax.xlane.f32.xlu1 %v1633_v0 }
  0xfd   : > { %1727 = vmax.xlane.f32.xlu0 %v1726_v9  ;;  %v1094_v7 = vpop.f32.mrf.mxu0  ;;  %v1286_v10 = vpop.f32.mrf.mxu1 }
  0xfe   : > { %1436 = vst [vmem:[%s2951_s14 + $0x98] sm:$0xff] %v1091_v15  ;;  %1500 = vst [vmem:[%s2951_s14 + $0x298] sm:$0xff] %v1283_v6  ;;  %v1095_v11 = vadd.f32 %v1094_v7, %v2905_v16  ;;  %v1287_v37 = vadd.f32 %v1286_v10, %v661_v4  ;;  %v1636_v39 = vmax.f32 %v1089_v61, %v1091_v15 }
  0xff   : > { %v1096_v8 = vpop.f32.mrf.mxu0  ;;  %v1288_v40 = vpop.f32.mrf.mxu1  ;;  %v1732_v47 = vmax.f32 %v1281_v62, %v1283_v6 }
 0x100   : > { %1437 = vst [vmem:[%s2951_s14 + $0xa0] sm:$0xff] %v1095_v11  ;;  %1501 = vst [vmem:[%s2951_s14 + $0x2a0] sm:$0xff] %v1287_v37  ;;  %v1097_v14 = vadd.f32 %v1096_v8, %v2905_v16  ;;  %v1289_v42 = vadd.f32 %v1288_v40, %v661_v4  ;;  %1730 = vmax.xlane.f32.xlu1 %v1729_v38  ;;  %v681_v4 = vpop.permute.xlu0 %680  ;;  %v686_v40 = vpop.permute.xlu1 %685 }
 0x101   : > { %1637 = vmax.xlane.f32.xlu0 %v1636_v39  ;;  %v1100_v43 = vpop.f32.mrf.mxu0  ;;  %v1292_v44 = vpop.f32.mrf.mxu1 }
 0x102   : > { %1438 = vst [vmem:[%s2951_s14 + $0xa8] sm:$0xff] %v1097_v14  ;;  %1502 = vst [vmem:[%s2951_s14 + $0x2a8] sm:$0xff] %v1289_v42  ;;  %v1101_v63 = vadd.f32 %v1100_v43, %v2903_v5  ;;  %v1293_v45 = vadd.f32 %v1292_v44, %v666_v41  ;;  %v1639_v46 = vmax.f32 %v1095_v11, %v1097_v14 }
 0x103   : > { %v1102_v48 = vpop.f32.mrf.mxu0  ;;  %v1294_v13 = vpop.f32.mrf.mxu1  ;;  %v1735_v54 = vmax.f32 %v1287_v37, %v1289_v42 }
 0x104   : > { %1439 = vst [vmem:[%s2951_s14 + $0xb0] sm:$0xff] %v1101_v63  ;;  %1503 = vst [vmem:[%s2951_s14 + $0x2b0] sm:$0xff] %v1293_v45  ;;  %v1103_v16 = vadd.f32 %v1102_v48, %v2903_v5  ;;  %v1295_v50 = vadd.f32 %v1294_v13, %v666_v41  ;;  %1640 = vmax.xlane.f32.xlu1 %v1639_v46  ;;  %v691_v48 = vpop.permute.xlu0 %690 }
 0x105   : > { %1733 = vmax.xlane.f32.xlu0 %v1732_v47  ;;  %v1106_v51 = vpop.f32.mrf.mxu0  ;;  %v1298_v52 = vpop.f32.mrf.mxu1 }
 0x106   : > { %1440 = vst [vmem:[%s2951_s14 + $0xb8] sm:$0xff] %v1103_v16  ;;  %1504 = vst [vmem:[%s2951_s14 + $0x2b8] sm:$0xff] %v1295_v50  ;;  %v1107_v53 = vadd.f32 %v1106_v51, %v2909_v18  ;;  %v1299_v3 = vadd.f32 %v1298_v52, %v671_v49  ;;  %v1642_v55 = vmax.f32 %v1101_v63, %v1103_v16 }
 0x107   : > { %v1108_v56 = vpop.f32.mrf.mxu0  ;;  %v1300_v57 = vpop.f32.mrf.mxu1  ;;  %v1738_v9 = vmax.f32 %v1293_v45, %v1295_v50 }
 0x108   : > { %1441 = vst [vmem:[%s2951_s14 + $0xc0] sm:$0xff] %v1107_v53  ;;  %1505 = vst [vmem:[%s2951_s14 + $0x2c0] sm:$0xff] %v1299_v3  ;;  %v1109_v5 = vadd.f32 %v1108_v56, %v2909_v18  ;;  %v1301_v58 = vadd.f32 %v1300_v57, %v671_v49  ;;  %1736 = vmax.xlane.f32.xlu1 %v1735_v54 }
 0x109   : > { %1643 = vmax.xlane.f32.xlu0 %v1642_v55  ;;  %v1112_v59 = vpop.f32.mrf.mxu0  ;;  %v1304_v60 = vpop.f32.mrf.mxu1 }
 0x10a   : > { %1442 = vst [vmem:[%s2951_s14 + $0xc8] sm:$0xff] %v1109_v5  ;;  %1506 = vst [vmem:[%s2951_s14 + $0x2c8] sm:$0xff] %v1301_v58  ;;  %v1113_v61 = vadd.f32 %v1112_v59, %v2907_v17  ;;  %v1305_v62 = vadd.f32 %v1304_v60, %v676_v12  ;;  %v1645_v0 = vmax.f32 %v1107_v53, %v1109_v5  ;;  %v696_v55 = vpop.permute.xlu1 %695 }
 0x10b   : > { %v1114_v1 = vpop.f32.mrf.mxu0  ;;  %v1306_v2 = vpop.f32.mrf.mxu1  ;;  %v1741_v37 = vmax.f32 %v1299_v3, %v1301_v58 }
 0x10c   : > { %1443 = vst [vmem:[%s2951_s14 + $0xd0] sm:$0xff] %v1113_v61  ;;  %1507 = vst [vmem:[%s2951_s14 + $0x2d0] sm:$0xff] %v1305_v62  ;;  %v1115_v18 = vadd.f32 %v1114_v1, %v2907_v17  ;;  %v1307_v15 = vadd.f32 %v1306_v2, %v676_v12  ;;  %1646 = vmax.xlane.f32.xlu1 %v1645_v0  ;;  %v701_v0 = vpop.permute.xlu0 %700 }
 0x10d   : > { %1739 = vmax.xlane.f32.xlu0 %v1738_v9  ;;  %v1118_v6 = vpop.f32.mrf.mxu0  ;;  %v1310_v7 = vpop.f32.mrf.mxu1 }
 0x10e   : > { %1444 = vst [vmem:[%s2951_s14 + $0xd8] sm:$0xff] %v1115_v18  ;;  %1508 = vst [vmem:[%s2951_s14 + $0x2d8] sm:$0xff] %v1307_v15  ;;  %v1119_v10 = vadd.f32 %v1118_v6, %v2913_v20  ;;  %v1311_v11 = vadd.f32 %v1310_v7, %v681_v4  ;;  %v1648_v38 = vmax.f32 %v1113_v61, %v1115_v18 }
 0x10f   : > { %v1120_v39 = vpop.f32.mrf.mxu0  ;;  %v1312_v8 = vpop.f32.mrf.mxu1  ;;  %v1744_v45 = vmax.f32 %v1305_v62, %v1307_v15 }
 0x110   : > { %1445 = vst [vmem:[%s2951_s14 + $0xe0] sm:$0xff] %v1119_v10  ;;  %1509 = vst [vmem:[%s2951_s14 + $0x2e0] sm:$0xff] %v1311_v11  ;;  %v1121_v17 = vadd.f32 %v1120_v39, %v2913_v20  ;;  %v1313_v41 = vadd.f32 %v1312_v8, %v681_v4  ;;  %1742 = vmax.xlane.f32.xlu1 %v1741_v37 }
 0x111   : > { %1649 = vmax.xlane.f32.xlu0 %v1648_v38  ;;  %v1124_v14 = vpop.f32.mrf.mxu0  ;;  %v1316_v42 = vpop.f32.mrf.mxu1 }
 0x112   : > { %1446 = vst [vmem:[%s2951_s14 + $0xe8] sm:$0xff] %v1121_v17  ;;  %1510 = vst [vmem:[%s2951_s14 + $0x2e8] sm:$0xff] %v1313_v41  ;;  %v1125_v43 = vadd.f32 %v1124_v14, %v2911_v19  ;;  %v1317_v44 = vadd.f32 %v1316_v42, %v686_v40  ;;  %v1651_v63 = vmax.f32 %v1119_v10, %v1121_v17 }
 0x113   : > { %v1126_v46 = vpop.f32.mrf.mxu0  ;;  %v1318_v47 = vpop.f32.mrf.mxu1  ;;  %v1747_v52 = vmax.f32 %v1311_v11, %v1313_v41 }
 0x114   : > { %1447 = vst [vmem:[%s2951_s14 + $0xf0] sm:$0xff] %v1125_v43  ;;  %1511 = vst [vmem:[%s2951_s14 + $0x2f0] sm:$0xff] %v1317_v44  ;;  %v1127_v20 = vadd.f32 %v1126_v46, %v2911_v19  ;;  %v1319_v13 = vadd.f32 %v1318_v47, %v686_v40  ;;  %1652 = vmax.xlane.f32.xlu1 %v1651_v63  ;;  %v706_v11 = vpop.permute.xlu1 %705 }
 0x115   : > { %1745 = vmax.xlane.f32.xlu0 %v1744_v45  ;;  %v1130_v49 = vpop.f32.mrf.mxu0  ;;  %v1322_v16 = vpop.f32.mrf.mxu1 }
 0x116   : > { %1448 = vst [vmem:[%s2951_s14 + $0xf8] sm:$0xff] %v1127_v20  ;;  %1512 = vst [vmem:[%s2951_s14 + $0x2f8] sm:$0xff] %v1319_v13  ;;  %v1131_v50 = vadd.f32 %v1130_v49, %v2915_v21  ;;  %v1323_v51 = vadd.f32 %v1322_v16, %v691_v48  ;;  %v1654_v53 = vmax.f32 %v1125_v43, %v1127_v20  ;;  %v711_v43 = vpop.permute.xlu0 %710 }
 0x117   : > { %v1132_v3 = vpop.f32.mrf.mxu0  ;;  %v1324_v54 = vpop.f32.mrf.mxu1  ;;  %v1750_v60 = vmax.f32 %v1317_v44, %v1319_v13 }
 0x118   : > { %1449 = vst [vmem:[%s2951_s14 + $0x100] sm:$0xff] %v1131_v50  ;;  %1513 = vst [vmem:[%s2951_s14 + $0x300] sm:$0xff] %v1323_v51  ;;  %v1133_v19 = vadd.f32 %v1132_v3, %v2915_v21  ;;  %v1325_v56 = vadd.f32 %v1324_v54, %v691_v48  ;;  %1748 = vmax.xlane.f32.xlu1 %v1747_v52  ;;  %v716_v16 = vpop.permute.xlu1 %715 }
 0x119   : > { %1655 = vmax.xlane.f32.xlu0 %v1654_v53  ;;  %v1136_v57 = vpop.f32.mrf.mxu0  ;;  %v1328_v12 = vpop.f32.mrf.mxu1 }
 0x11a   : > { %1450 = vst [vmem:[%s2951_s14 + $0x108] sm:$0xff] %v1133_v19  ;;  %1514 = vst [vmem:[%s2951_s14 + $0x308] sm:$0xff] %v1325_v56  ;;  %v1137_v5 = vadd.f32 %v1136_v57, %v2917_v22  ;;  %v1329_v58 = vadd.f32 %v1328_v12, %v696_v55  ;;  %v1657_v59 = vmax.f32 %v1131_v50, %v1133_v19  ;;  %v721_v57 = vpop.permute.xlu0 %720 }
 0x11b   : > { %v1138_v61 = vpop.f32.mrf.mxu0  ;;  %v1330_v62 = vpop.f32.mrf.mxu1  ;;  %v1753_v6 = vmax.f32 %v1323_v51, %v1325_v56 }
 0x11c   : > { %1451 = vst [vmem:[%s2951_s14 + $0x110] sm:$0xff] %v1137_v5  ;;  %1515 = vst [vmem:[%s2951_s14 + $0x310] sm:$0xff] %v1329_v58  ;;  %v1139_v21 = vadd.f32 %v1138_v61, %v2917_v22  ;;  %v1331_v9 = vadd.f32 %v1330_v62, %v696_v55  ;;  %1658 = vmax.xlane.f32.xlu1 %v1657_v59 }
 0x11d   : > { %1751 = vmax.xlane.f32.xlu0 %v1750_v60  ;;  %v1142_v1 = vpop.f32.mrf.mxu0  ;;  %v1334_v2 = vpop.f32.mrf.mxu1 }
 0x11e   : > { %1452 = vst [vmem:[%s2951_s14 + $0x118] sm:$0xff] %v1139_v21  ;;  %v1660_v4 = vmax.f32 %v1137_v5, %v1139_v21  ;;  %1516 = vst [vmem:[%s2951_s14 + $0x318] sm:$0xff] %v1331_v9  ;;  %v1143_v18 = vadd.f32 %v1142_v1, %v2919_v23  ;;  %v1335_v15 = vadd.f32 %v1334_v2, %v701_v0 }
 0x11f   : > { %v1144_v7 = vpop.f32.mrf.mxu0  ;;  %v1336_v10 = vpop.f32.mrf.mxu1  ;;  %v1756_v8 = vmax.f32 %v1329_v58, %v1331_v9 }
 0x120   : > { %1453 = vst [vmem:[%s2951_s14 + $0x120] sm:$0xff] %v1143_v18  ;;  %1517 = vst [vmem:[%s2951_s14 + $0x320] sm:$0xff] %v1335_v15  ;;  %v1145_v22 = vadd.f32 %v1144_v7, %v2919_v23  ;;  %v1337_v37 = vadd.f32 %v1336_v10, %v701_v0  ;;  %1754 = vmax.xlane.f32.xlu1 %v1753_v6  ;;  %v726_v9 = vpop.permute.xlu1 %725 }
 0x121   : > { %1661 = vmax.xlane.f32.xlu0 %v1660_v4  ;;  %v1148_v38 = vpop.f32.mrf.mxu0  ;;  %v1340_v39 = vpop.f32.mrf.mxu1 }
 0x122   : > { %1454 = vst [vmem:[%s2951_s14 + $0x128] sm:$0xff] %v1145_v22  ;;  %v1663_v40 = vmax.f32 %v1143_v18, %v1145_v22  ;;  %1518 = vst [vmem:[%s2951_s14 + $0x328] sm:$0xff] %v1337_v37  ;;  %v1149_v17 = vadd.f32 %v1148_v38, %v2921_v24  ;;  %v1341_v41 = vadd.f32 %v1340_v39, %v706_v11  ;;  %v731_v22 = vpop.permute.xlu0 %730 }
 0x123   : > { %v1150_v14 = vpop.f32.mrf.mxu0  ;;  %v1342_v42 = vpop.f32.mrf.mxu1  ;;  %v1759_v46 = vmax.f32 %v1335_v15, %v1337_v37 }
 0x124   : > { %1455 = vst [vmem:[%s2951_s14 + $0x130] sm:$0xff] %v1149_v17  ;;  %1519 = vst [vmem:[%s2951_s14 + $0x330] sm:$0xff] %v1341_v41  ;;  %v1151_v23 = vadd.f32 %v1150_v14, %v2921_v24  ;;  %v1343_v44 = vadd.f32 %v1342_v42, %v706_v11  ;;  %1664 = vmax.xlane.f32.xlu1 %v1663_v40 }
 0x125   : > { %1757 = vmax.xlane.f32.xlu0 %v1756_v8  ;;  %v1154_v63 = vpop.f32.mrf.mxu0  ;;  %v1346_v45 = vpop.f32.mrf.mxu1 }
 0x126   : > { %1456 = vst [vmem:[%s2951_s14 + $0x138] sm:$0xff] %v1151_v23  ;;  %v1666_v47 = vmax.f32 %v1149_v17, %v1151_v23  ;;  %1520 = vst [vmem:[%s2951_s14 + $0x338] sm:$0xff] %v1343_v44  ;;  %v1155_v48 = vadd.f32 %v1154_v63, %v2923_v25  ;;  %v1347_v20 = vadd.f32 %v1346_v45, %v711_v43 }
 0x127   : > { %v1156_v13 = vpop.f32.mrf.mxu0  ;;  %v1348_v49 = vpop.f32.mrf.mxu1  ;;  %v1762_v53 = vmax.f32 %v1341_v41, %v1343_v44 }
 0x128   : > { %1457 = vst [vmem:[%s2951_s14 + $0x140] sm:$0xff] %v1155_v48  ;;  %1521 = vst [vmem:[%s2951_s14 + $0x340] sm:$0xff] %v1347_v20  ;;  %v1157_v24 = vadd.f32 %v1156_v13, %v2923_v25  ;;  %v1349_v50 = vadd.f32 %v1348_v49, %v711_v43  ;;  %1760 = vmax.xlane.f32.xlu1 %v1759_v46  ;;  %v736_v43 = vpop.permute.xlu1 %735  ;;  %v741_v49 = vpop.permute.xlu0 %740 }
 0x129   : > { %1667 = vmax.xlane.f32.xlu0 %v1666_v47  ;;  %v1160_v51 = vpop.f32.mrf.mxu0  ;;  %v1352_v52 = vpop.f32.mrf.mxu1 }
 0x12a   : > { %1458 = vst [vmem:[%s2951_s14 + $0x148] sm:$0xff] %v1157_v24  ;;  %v1669_v3 = vmax.f32 %v1155_v48, %v1157_v24  ;;  %1522 = vst [vmem:[%s2951_s14 + $0x348] sm:$0xff] %v1349_v50  ;;  %v1161_v54 = vadd.f32 %v1160_v51, %v2925_v26  ;;  %v1353_v55 = vadd.f32 %v1352_v52, %v716_v16 }
 0x12b   : > { %v1162_v19 = vpop.f32.mrf.mxu0  ;;  %v1354_v56 = vpop.f32.mrf.mxu1  ;;  %v1765_v59 = vmax.f32 %v1347_v20, %v1349_v50 }
 0x12c   : > { %1459 = vst [vmem:[%s2951_s14 + $0x150] sm:$0xff] %v1161_v54  ;;  %1523 = vst [vmem:[%s2951_s14 + $0x350] sm:$0xff] %v1353_v55  ;;  %v1163_v25 = vadd.f32 %v1162_v19, %v2925_v26  ;;  %v1355_v12 = vadd.f32 %v1354_v56, %v716_v16  ;;  %1670 = vmax.xlane.f32.xlu1 %v1669_v3  ;;  %v746_v19 = vpop.permute.xlu1 %745 }
 0x12d   : > { %1763 = vmax.xlane.f32.xlu0 %v1762_v53  ;;  %v1166_v5 = vpop.f32.mrf.mxu0  ;;  %v1358_v58 = vpop.f32.mrf.mxu1 }
 0x12e   : > { %1460 = vst [vmem:[%s2951_s14 + $0x158] sm:$0xff] %v1163_v25  ;;  %v1672_v60 = vmax.f32 %v1161_v54, %v1163_v25  ;;  %1524 = vst [vmem:[%s2951_s14 + $0x358] sm:$0xff] %v1355_v12  ;;  %v1167_v61 = vadd.f32 %v1166_v5, %v2927_v27  ;;  %v1359_v62 = vadd.f32 %v1358_v58, %v721_v57 }
 0x12f   : > { %v1168_v0 = vpop.f32.mrf.mxu0  ;;  %v1360_v21 = vpop.f32.mrf.mxu1  ;;  %v1768_v18 = vmax.f32 %v1353_v55, %v1355_v12 }
 0x130   : > { %1461 = vst [vmem:[%s2951_s14 + $0x160] sm:$0xff] %v1167_v61  ;;  %1525 = vst [vmem:[%s2951_s14 + $0x360] sm:$0xff] %v1359_v62  ;;  %v1169_v26 = vadd.f32 %v1168_v0, %v2927_v27  ;;  %v1361_v1 = vadd.f32 %v1360_v21, %v721_v57  ;;  %1766 = vmax.xlane.f32.xlu1 %v1765_v59 }
 0x131   : > { %1673 = vmax.xlane.f32.xlu0 %v1672_v60  ;;  %v1172_v2 = vpop.f32.mrf.mxu0  ;;  %v1364_v4 = vpop.f32.mrf.mxu1 }
 0x132   : > { %1462 = vst [vmem:[%s2951_s14 + $0x168] sm:$0xff] %v1169_v26  ;;  %v1675_v15 = vmax.f32 %v1167_v61, %v1169_v26  ;;  %1526 = vst [vmem:[%s2951_s14 + $0x368] sm:$0xff] %v1361_v1  ;;  %v1173_v6 = vadd.f32 %v1172_v2, %v2929_v28  ;;  %v1365_v7 = vadd.f32 %v1364_v4, %v726_v9 }
 0x133   : > { %v1174_v10 = vpop.f32.mrf.mxu0  ;;  %v1366_v11 = vpop.f32.mrf.mxu1  ;;  %v1771_v8 = vmax.f32 %v1359_v62, %v1361_v1 }
 0x134   : > { %1463 = vst [vmem:[%s2951_s14 + $0x170] sm:$0xff] %v1173_v6  ;;  %1527 = vst [vmem:[%s2951_s14 + $0x370] sm:$0xff] %v1365_v7  ;;  %v1175_v27 = vadd.f32 %v1174_v10, %v2929_v28  ;;  %v1367_v37 = vadd.f32 %v1366_v11, %v726_v9  ;;  %1676 = vmax.xlane.f32.xlu1 %v1675_v15  ;;  %v751_v62 = vpop.permute.xlu0 %750 }
 0x135   : > { %1769 = vmax.xlane.f32.xlu0 %v1768_v18  ;;  %v1178_v38 = vpop.f32.mrf.mxu0  ;;  %v1370_v39 = vpop.f32.mrf.mxu1 }
 0x136   : > { %1464 = vst [vmem:[%s2951_s14 + $0x178] sm:$0xff] %v1175_v27  ;;  %v1678_v40 = vmax.f32 %v1173_v6, %v1175_v27  ;;  %1528 = vst [vmem:[%s2951_s14 + $0x378] sm:$0xff] %v1367_v37  ;;  %v1179_v17 = vadd.f32 %v1178_v38, %v2931_v29  ;;  %v1371_v41 = vadd.f32 %v1370_v39, %v731_v22  ;;  %v756_v6 = vpop.permute.xlu1 %755 }
 0x137   : > { %v1180_v14 = vpop.f32.mrf.mxu0  ;;  %v1372_v42 = vpop.f32.mrf.mxu1  ;;  %v1774_v45 = vmax.f32 %v1365_v7, %v1367_v37 }
 0x138   : > { %1465 = vst [vmem:[%s2951_s14 + $0x180] sm:$0xff] %v1179_v17  ;;  %1529 = vst [vmem:[%s2951_s14 + $0x380] sm:$0xff] %v1371_v41  ;;  %v1181_v28 = vadd.f32 %v1180_v14, %v2931_v29  ;;  %v1373_v23 = vadd.f32 %v1372_v42, %v731_v22  ;;  %1772 = vmax.xlane.f32.xlu1 %v1771_v8 }
 0x139   : > { %1679 = vmax.xlane.f32.xlu0 %v1678_v40  ;;  %v1184_v44 = vpop.f32.mrf.mxu0  ;;  %v1376_v63 = vpop.f32.mrf.mxu1 }
 0x13a   : > { %1466 = vst [vmem:[%s2951_s14 + $0x188] sm:$0xff] %v1181_v28  ;;  %v1681_v46 = vmax.f32 %v1179_v17, %v1181_v28  ;;  %1530 = vst [vmem:[%s2951_s14 + $0x388] sm:$0xff] %v1373_v23  ;;  %v1185_v47 = vadd.f32 %v1184_v44, %v2933_v30  ;;  %v1377_v48 = vadd.f32 %v1376_v63, %v736_v43  ;;  %v761_v40 = vpop.permute.xlu0 %760 }
 0x13b   : > { %v1186_v20 = vpop.f32.mrf.mxu0  ;;  %v1378_v13 = vpop.f32.mrf.mxu1  ;;  %v1777_v51 = vmax.f32 %v1371_v41, %v1373_v23 }
 0x13c   : > { %1467 = vst [vmem:[%s2951_s14 + $0x190] sm:$0xff] %v1185_v47  ;;  %1531 = vst [vmem:[%s2951_s14 + $0x390] sm:$0xff] %v1377_v48  ;;  %v1187_v29 = vadd.f32 %v1186_v20, %v2933_v30  ;;  %v1379_v16 = vadd.f32 %v1378_v13, %v736_v43  ;;  %1682 = vmax.xlane.f32.xlu1 %v1681_v46 }
 0x13d   : > { %1775 = vmax.xlane.f32.xlu0 %v1774_v45  ;;  %v1190_v24 = vpop.f32.mrf.mxu0  ;;  %v1382_v50 = vpop.f32.mrf.mxu1 }
 0x13e   : > { %1468 = vst [vmem:[%s2951_s14 + $0x198] sm:$0xff] %v1187_v29  ;;  %v1684_v52 = vmax.f32 %v1185_v47, %v1187_v29  ;;  %1532 = vst [vmem:[%s2951_s14 + $0x398] sm:$0xff] %v1379_v16  ;;  %v1191_v53 = vadd.f32 %v1190_v24, %v2935_v31  ;;  %v1383_v3 = vadd.f32 %v1382_v50, %v741_v49  ;;  %v766_v45 = vpop.permute.xlu1 %765 }
 0x13f   : > { %v1192_v54 = vpop.f32.mrf.mxu0  ;;  %v1384_v55 = vpop.f32.mrf.mxu1  ;;  %v1780_v12 = vmax.f32 %v1377_v48, %v1379_v16 }
 0x140   : > { %1469 = vst [vmem:[%s2951_s14 + $0x1a0] sm:$0xff] %v1191_v53  ;;  %1533 = vst [vmem:[%s2951_s14 + $0x3a0] sm:$0xff] %v1383_v3  ;;  %v1193_v30 = vadd.f32 %v1192_v54, %v2935_v31  ;;  %v1385_v56 = vadd.f32 %v1384_v55, %v741_v49  ;;  %1778 = vmax.xlane.f32.xlu1 %v1777_v51  ;;  %v1545_v54 = vld [vmem:[#allocation2] sm:$0xff] }
 0x141   : > { %1685 = vmax.xlane.f32.xlu0 %v1684_v52  ;;  %v1196_v57 = vpop.f32.mrf.mxu0  ;;  %v1388_v25 = vpop.f32.mrf.mxu1 }
 0x142   : > { %1470 = vst [vmem:[%s2951_s14 + $0x1a8] sm:$0xff] %v1193_v30  ;;  %v1687_v5 = vmax.f32 %v1191_v53, %v1193_v30  ;;  %1534 = vst [vmem:[%s2951_s14 + $0x3a8] sm:$0xff] %v1385_v56  ;;  %v1197_v58 = vadd.f32 %v1196_v57, %v2937_v32  ;;  %v1389_v59 = vadd.f32 %v1388_v25, %v746_v19  ;;  %v1546_v57 = vld [vmem:[#allocation2 + $0x8] sm:$0xff] }
 0x143   : > { %v1198_v60 = vpop.f32.mrf.mxu0  ;;  %v1390_v61 = vpop.f32.mrf.mxu1  ;;  %v1783_v26 = vmax.f32 %v1383_v3, %v1385_v56  ;;  %v1577_v3 = vld [vmem:[#allocation2 + $0x100] sm:$0xff] }
 0x144   : > { %1471 = vst [vmem:[%s2951_s14 + $0x1b0] sm:$0xff] %v1197_v58  ;;  %1535 = vst [vmem:[%s2951_s14 + $0x3b0] sm:$0xff] %v1389_v59  ;;  %v1199_v31 = vadd.f32 %v1198_v60, %v2937_v32  ;;  %v1391_v0 = vadd.f32 %v1390_v61, %v746_v19  ;;  %1688 = vmax.xlane.f32.xlu1 %v1687_v5  ;;  %v1547_v60 = vld [vmem:[#allocation2 + $0x10] sm:$0xff] }
 0x145   : > { %1781 = vmax.xlane.f32.xlu0 %v1780_v12  ;;  %v1202_v21 = vpop.f32.mrf.mxu0  ;;  %v1394_v9 = vpop.f32.mrf.mxu1 }
 0x146   : > { %1472 = vst [vmem:[%s2951_s14 + $0x1b8] sm:$0xff] %v1199_v31  ;;  %v1690_v1 = vmax.f32 %v1197_v58, %v1199_v31  ;;  %1536 = vst [vmem:[%s2951_s14 + $0x3b8] sm:$0xff] %v1391_v0  ;;  %v1203_v2 = vadd.f32 %v1202_v21, %v2939_v33  ;;  %v1395_v4 = vadd.f32 %v1394_v9, %v751_v62 }
 0x147   : > { %v1204_v18 = vpop.f32.mrf.mxu0  ;;  %v1396_v15 = vpop.f32.mrf.mxu1  ;;  %v1786_v22 = vmax.f32 %v1389_v59, %v1391_v0  ;;  %v1579_v59 = vld [vmem:[#allocation2 + $0x110] sm:$0xff] }
 0x148   : > { %1473 = vst [vmem:[%s2951_s14 + $0x1c0] sm:$0xff] %v1203_v2  ;;  %1537 = vst [vmem:[%s2951_s14 + $0x3c0] sm:$0xff] %v1395_v4  ;;  %v1205_v32 = vadd.f32 %v1204_v18, %v2939_v33  ;;  %v1397_v7 = vadd.f32 %v1396_v15, %v751_v62  ;;  %1784 = vmax.xlane.f32.xlu1 %v1783_v26  ;;  %v1548_v26 = vld [vmem:[#allocation2 + $0x18] sm:$0xff] }
 0x149   : > { %1691 = vmax.xlane.f32.xlu0 %v1690_v1  ;;  %v1208_v10 = vpop.f32.mrf.mxu0  ;;  %v1400_v11 = vpop.f32.mrf.mxu1 }
 0x14a   : > { %1474 = vst [vmem:[%s2951_s14 + $0x1c8] sm:$0xff] %v1205_v32  ;;  %v1693_v27 = vmax.f32 %v1203_v2, %v1205_v32  ;;  %1538 = vst [vmem:[%s2951_s14 + $0x3c8] sm:$0xff] %v1397_v7  ;;  %v1209_v37 = vadd.f32 %v1208_v10, %v2941_v34  ;;  %v1401_v38 = vadd.f32 %v1400_v11, %v756_v6 }
 0x14b   : > { %v1210_v39 = vpop.f32.mrf.mxu0  ;;  %v1402_v8 = vpop.f32.mrf.mxu1  ;;  %v1789_v42 = vmax.f32 %v1395_v4, %v1397_v7  ;;  %v1549_v4 = vld [vmem:[#allocation2 + $0x20] sm:$0xff] }
 0x14c   : > { %1475 = vst [vmem:[%s2951_s14 + $0x1d0] sm:$0xff] %v1209_v37  ;;  %1539 = vst [vmem:[%s2951_s14 + $0x3d0] sm:$0xff] %v1401_v38  ;;  %v1211_v33 = vadd.f32 %v1210_v39, %v2941_v34  ;;  %v1403_v17 = vadd.f32 %v1402_v8, %v756_v6  ;;  %1694 = vmax.xlane.f32.xlu1 %v1693_v27  ;;  %v1580_v6 = vld [vmem:[#allocation2 + $0x118] sm:$0xff] }
 0x14d   : > { %1787 = vmax.xlane.f32.xlu0 %v1786_v22  ;;  %v1214_v41 = vpop.f32.mrf.mxu0  ;;  %v1406_v14 = vpop.f32.mrf.mxu1  ;;  %v1581_v22 = vld [vmem:[#allocation2 + $0x120] sm:$0xff] }
 0x14e   : > { %1476 = vst [vmem:[%s2951_s14 + $0x1d8] sm:$0xff] %v1211_v33  ;;  %v1696_v43 = vmax.f32 %v1209_v37, %v1211_v33  ;;  %1540 = vst [vmem:[%s2951_s14 + $0x3d8] sm:$0xff] %v1403_v17  ;;  %v1215_v28 = vadd.f32 %v1214_v41, %v2943_v35  ;;  %v1407_v23 = vadd.f32 %v1406_v14, %v761_v40  ;;  %v1551_v41 = vld [vmem:[#allocation2 + $0x30] sm:$0xff]  ;;  %v1582_v14 = vld [vmem:[#allocation2 + $0x128] sm:$0xff] }
 0x14f   : > { %v1216_v44 = vpop.f32.mrf.mxu0  ;;  %v1408_v63 = vpop.f32.mrf.mxu1  ;;  %v1792_v20 = vmax.f32 %v1401_v38, %v1403_v17  ;;  %v1550_v38 = vld [vmem:[#allocation2 + $0x28] sm:$0xff] }
 0x150   : > { %1477 = vst [vmem:[%s2951_s14 + $0x1e0] sm:$0xff] %v1215_v28  ;;  %1541 = vst [vmem:[%s2951_s14 + $0x3e0] sm:$0xff] %v1407_v23  ;;  %v1217_v34 = vadd.f32 %v1216_v44, %v2943_v35  ;;  %v1409_v46 = vadd.f32 %v1408_v63, %v761_v40  ;;  %1790 = vmax.xlane.f32.xlu1 %v1789_v42  ;;  %v1583_v44 = vld [vmem:[#allocation2 + $0x130] sm:$0xff] }
 0x151   : > { %1697 = vmax.xlane.f32.xlu0 %v1696_v43  ;;  %v1220_v47 = vpop.f32.mrf.mxu0  ;;  %v1412_v48 = vpop.f32.mrf.mxu1 }
 0x152   : > { %1478 = vst [vmem:[%s2951_s14 + $0x1e8] sm:$0xff] %v1217_v34  ;;  %v1699_v13 = vmax.f32 %v1215_v28, %v1217_v34  ;;  %1542 = vst [vmem:[%s2951_s14 + $0x3e8] sm:$0xff] %v1409_v46  ;;  %v1221_v49 = vadd.f32 %v1220_v47, %v2945_v36  ;;  %v1413_v29 = vadd.f32 %v1412_v48, %v766_v45  ;;  %v1552_v34 = vld [vmem:[#allocation2 + $0x38] sm:$0xff] }
 0x153   : > { %v1222_v16 = vpop.f32.mrf.mxu0  ;;  %v1414_v24 = vpop.f32.mrf.mxu1  ;;  %v1795_v51 = vmax.f32 %v1407_v23, %v1409_v46 }
 0x154   : > { %1479 = vst [vmem:[%s2951_s14 + $0x1f0] sm:$0xff] %v1221_v49  ;;  %1543 = vst [vmem:[%s2951_s14 + $0x3f0] sm:$0xff] %v1413_v29  ;;  %v1223_v35 = vadd.f32 %v1222_v16, %v2945_v36  ;;  %v1415_v50 = vadd.f32 %v1414_v24, %v766_v45  ;;  %1700 = vmax.xlane.f32.xlu1 %v1699_v13  ;;  %v1578_v36 = vld [vmem:[#allocation2 + $0x108] sm:$0xff]  ;;  %v1553_v13 = vld [vmem:[#allocation2 + $0x40] sm:$0xff] }
 0x155   : > { %1793 = vmax.xlane.f32.xlu0 %v1792_v20  ;;  %v1584_v16 = vld [vmem:[#allocation2 + $0x138] sm:$0xff] }
 0x156   : > { %1480 = vst [vmem:[%s2951_s14 + $0x1f8] sm:$0xff] %v1223_v35  ;;  %v1702_v52 = vmax.f32 %v1221_v49, %v1223_v35  ;;  %1544 = vst [vmem:[%s2951_s14 + $0x3f8] sm:$0xff] %v1415_v50  ;;  %v1798_v53 = vmax.f32 %v1413_v29, %v1415_v50 }
 0x158   : > { %1796 = vmax.xlane.f32.xlu1 %v1795_v51 }
 0x159   : > { %1703 = vmax.xlane.f32.xlu0 %v1702_v52  ;;  %v1585_v52 = vld [vmem:[#allocation2 + $0x140] sm:$0xff] }
 0x15d   : > { %1799 = vmax.xlane.f32.xlu0 %v1798_v53 }
 0x165   : > { %v1707_v55 = vpop.xlane.xlu1 %1706 }
 0x166   : > { %v1611_v19 = vpop.xlane.xlu0 %1610  ;;  %v1833_v30 = vmax.f32 %v1577_v3, %v1707_v55 }
 0x167   : > { %v1801_v56 = vmax.f32 %v1545_v54, %v1611_v19  ;;  %v1554_v54 = vld [vmem:[#allocation2 + $0x48] sm:$0xff] }
 0x168   : > { %1898 = vst.msk [vmem:[#allocation2 + $0x100] sm:$0xff] %vm254_vm2, %v1833_v30 }
 0x169   : > { %1866 = vst.msk [vmem:[#allocation2] sm:$0xff] %vm254_vm2, %v1801_v56  ;;  %v1614_v25 = vpop.xlane.xlu1 %1613 }
 0x16a   : > { %v1710_v12 = vpop.xlane.xlu0 %1709  ;;  %v1802_v5 = vmax.f32 %v1546_v57, %v1614_v25  ;;  %v1555_v57 = vld [vmem:[#allocation2 + $0x50] sm:$0xff] }
 0x16b   : > { %v1834_v58 = vmax.f32 %v1578_v36, %v1710_v12  ;;  %v1586_v12 = vld [vmem:[#allocation2 + $0x148] sm:$0xff] }
 0x16c   : > { %1867 = vst.msk [vmem:[#allocation2 + $0x8] sm:$0xff] %vm254_vm2, %v1802_v5 }
 0x16d   : > { %1899 = vst.msk [vmem:[#allocation2 + $0x108] sm:$0xff] %vm254_vm2, %v1834_v58  ;;  %v1713_v61 = vpop.xlane.xlu1 %1712 }
 0x16e   : > { %v1617_v62 = vpop.xlane.xlu0 %1616  ;;  %v1835_v31 = vmax.f32 %v1579_v59, %v1713_v61  ;;  %v1587_v61 = vld [vmem:[#allocation2 + $0x150] sm:$0xff] }
 0x16f   : > { %v1803_v0 = vmax.f32 %v1547_v60, %v1617_v62  ;;  %v1965_v21 = vld [vmem:[#allocation2 + $0x100] sm:$0xff] }
 0x170   : > { %v1933_v9 = vld [vmem:[#allocation2] sm:$0xff]  ;;  %2029 = vst.msk [vmem:[%s3307_s22 + $0x100] sm:$0xff] %vm254_vm2, %v1965_v21  ;;  %1900 = vst.msk [vmem:[#allocation2 + $0x110] sm:$0xff] %vm254_vm2, %v1835_v31 }
 0x171   : > { %1997 = vst.msk [vmem:[%s3307_s22] sm:$0xff] %vm254_vm2, %v1933_v9  ;;  %1868 = vst.msk [vmem:[#allocation2 + $0x10] sm:$0xff] %vm254_vm2, %v1803_v0  ;;  %v1556_v0 = vld [vmem:[#allocation2 + $0x58] sm:$0xff] }
 0x172   : > { %v1620_v1 = vpop.xlane.xlu0 %1619 }
 0x173   : > { %v1804_v2 = vmax.f32 %v1548_v26, %v1620_v1  ;;  %v1934_v18 = vld [vmem:[#allocation2 + $0x8] sm:$0xff] }
 0x174   : > { %v1966_v15 = vld [vmem:[#allocation2 + $0x108] sm:$0xff]  ;;  %1998 = vst.msk [vmem:[%s3307_s22 + $0x8] sm:$0xff] %vm254_vm2, %v1934_v18 }
 0x175   : > { %2030 = vst.msk [vmem:[%s3307_s22 + $0x108] sm:$0xff] %vm254_vm2, %v1966_v15  ;;  %1869 = vst.msk [vmem:[#allocation2 + $0x18] sm:$0xff] %vm254_vm2, %v1804_v2  ;;  %v1623_v32 = vpop.xlane.xlu1 %1622  ;;  %v1557_v2 = vld [vmem:[#allocation2 + $0x60] sm:$0xff]  ;;  %v1588_v15 = vld [vmem:[#allocation2 + $0x158] sm:$0xff] }
 0x176   : > { %v1716_v7 = vpop.xlane.xlu0 %1715  ;;  %v1805_v10 = vmax.f32 %v1549_v4, %v1623_v32 }
 0x177   : > { %v1836_v11 = vmax.f32 %v1580_v6, %v1716_v7  ;;  %v1967_v27 = vld [vmem:[#allocation2 + $0x110] sm:$0xff] }
 0x178   : > { %v1935_v37 = vld [vmem:[#allocation2 + $0x10] sm:$0xff]  ;;  %2031 = vst.msk [vmem:[%s3307_s22 + $0x110] sm:$0xff] %vm254_vm2, %v1967_v27  ;;  %1870 = vst.msk [vmem:[#allocation2 + $0x20] sm:$0xff] %vm254_vm2, %v1805_v10 }
 0x179   : > { %1999 = vst.msk [vmem:[%s3307_s22 + $0x10] sm:$0xff] %vm254_vm2, %v1935_v37  ;;  %1901 = vst.msk [vmem:[#allocation2 + $0x118] sm:$0xff] %vm254_vm2, %v1836_v11  ;;  %v1719_v39 = vpop.xlane.xlu1 %1718  ;;  %v1589_v11 = vld [vmem:[#allocation2 + $0x160] sm:$0xff]  ;;  %v1558_v37 = vld [vmem:[#allocation2 + $0x68] sm:$0xff] }
 0x17a   : > { %v1626_v8 = vpop.xlane.xlu0 %1625  ;;  %v1837_v40 = vmax.f32 %v1581_v22, %v1719_v39 }
 0x17b   : > { %v1806_v33 = vmax.f32 %v1550_v38, %v1626_v8 }
 0x17c   : > { %v1936_v17 = vld [vmem:[#allocation2 + $0x18] sm:$0xff]  ;;  %1902 = vst.msk [vmem:[#allocation2 + $0x120] sm:$0xff] %vm254_vm2, %v1837_v40 }
 0x17d   : > { %2000 = vst.msk [vmem:[%s3307_s22 + $0x18] sm:$0xff] %vm254_vm2, %v1936_v17  ;;  %1871 = vst.msk [vmem:[#allocation2 + $0x28] sm:$0xff] %vm254_vm2, %v1806_v33  ;;  %v1629_v42 = vpop.xlane.xlu1 %1628  ;;  %v1559_v33 = vld [vmem:[#allocation2 + $0x70] sm:$0xff] }
 0x17e   : > { %v1722_v43 = vpop.xlane.xlu0 %1721  ;;  %v1807_v28 = vmax.f32 %v1551_v41, %v1629_v42 }
 0x17f   : > { %v1838_v23 = vmax.f32 %v1582_v14, %v1722_v43  ;;  %v1937_v63 = vld [vmem:[#allocation2 + $0x20] sm:$0xff]  ;;  %v1590_v14 = vld [vmem:[#allocation2 + $0x168] sm:$0xff] }
 0x180   : > { %v1968_v45 = vld [vmem:[#allocation2 + $0x118] sm:$0xff]  ;;  %2001 = vst.msk [vmem:[%s3307_s22 + $0x20] sm:$0xff] %vm254_vm2, %v1937_v63  ;;  %1872 = vst.msk [vmem:[#allocation2 + $0x30] sm:$0xff] %vm254_vm2, %v1807_v28 }
 0x181   : > { %2032 = vst.msk [vmem:[%s3307_s22 + $0x118] sm:$0xff] %vm254_vm2, %v1968_v45  ;;  %1903 = vst.msk [vmem:[#allocation2 + $0x128] sm:$0xff] %vm254_vm2, %v1838_v23  ;;  %v1725_v46 = vpop.xlane.xlu1 %1724 }
 0x182   : > { %v1632_v47 = vpop.xlane.xlu0 %1631  ;;  %v1839_v48 = vmax.f32 %v1583_v44, %v1725_v46  ;;  %v1591_v44 = vld [vmem:[#allocation2 + $0x170] sm:$0xff] }
 0x183   : > { %v1808_v20 = vmax.f32 %v1552_v34, %v1632_v47  ;;  %v1969_v49 = vld [vmem:[#allocation2 + $0x120] sm:$0xff]  ;;  %v1560_v34 = vld [vmem:[#allocation2 + $0x78] sm:$0xff] }
 0x184   : > { %v1938_v29 = vld [vmem:[#allocation2 + $0x28] sm:$0xff]  ;;  %2033 = vst.msk [vmem:[%s3307_s22 + $0x120] sm:$0xff] %vm254_vm2, %v1969_v49  ;;  %1904 = vst.msk [vmem:[#allocation2 + $0x130] sm:$0xff] %vm254_vm2, %v1839_v48 }
 0x185   : > { %2002 = vst.msk [vmem:[%s3307_s22 + $0x28] sm:$0xff] %vm254_vm2, %v1938_v29  ;;  %1873 = vst.msk [vmem:[#allocation2 + $0x38] sm:$0xff] %vm254_vm2, %v1808_v20  ;;  %v1635_v24 = vpop.xlane.xlu1 %1634 }
 0x186   : > { %v1728_v35 = vpop.xlane.xlu0 %1727  ;;  %v1809_v50 = vmax.f32 %v1553_v13, %v1635_v24  ;;  %v1561_v13 = vld [vmem:[#allocation2 + $0x80] sm:$0xff] }
 0x187   : > { %v1840_v51 = vmax.f32 %v1584_v16, %v1728_v35  ;;  %v1939_v53 = vld [vmem:[#allocation2 + $0x30] sm:$0xff]  ;;  %v1592_v16 = vld [vmem:[#allocation2 + $0x178] sm:$0xff] }
 0x188   : > { %v1970_v3 = vld [vmem:[#allocation2 + $0x128] sm:$0xff]  ;;  %2003 = vst.msk [vmem:[%s3307_s22 + $0x30] sm:$0xff] %vm254_vm2, %v1939_v53  ;;  %1874 = vst.msk [vmem:[#allocation2 + $0x40] sm:$0xff] %vm254_vm2, %v1809_v50 }
 0x189   : > { %2034 = vst.msk [vmem:[%s3307_s22 + $0x128] sm:$0xff] %vm254_vm2, %v1970_v3  ;;  %1905 = vst.msk [vmem:[#allocation2 + $0x138] sm:$0xff] %vm254_vm2, %v1840_v51  ;;  %v1731_v55 = vpop.xlane.xlu1 %1730 }
 0x18a   : > { %v1638_v19 = vpop.xlane.xlu0 %1637  ;;  %v1841_v30 = vmax.f32 %v1585_v52, %v1731_v55  ;;  %v1593_v52 = vld [vmem:[#allocation2 + $0x180] sm:$0xff] }
 0x18b   : > { %v1810_v56 = vmax.f32 %v1554_v54, %v1638_v19  ;;  %v1971_v36 = vld [vmem:[#allocation2 + $0x130] sm:$0xff]  ;;  %v1562_v54 = vld [vmem:[#allocation2 + $0x88] sm:$0xff] }
 0x18c   : > { %v1940_v25 = vld [vmem:[#allocation2 + $0x38] sm:$0xff]  ;;  %2035 = vst.msk [vmem:[%s3307_s22 + $0x130] sm:$0xff] %vm254_vm2, %v1971_v36  ;;  %1906 = vst.msk [vmem:[#allocation2 + $0x140] sm:$0xff] %vm254_vm2, %v1841_v30 }
 0x18d   : > { %2004 = vst.msk [vmem:[%s3307_s22 + $0x38] sm:$0xff] %vm254_vm2, %v1940_v25  ;;  %1875 = vst.msk [vmem:[#allocation2 + $0x48] sm:$0xff] %vm254_vm2, %v1810_v56  ;;  %v1641_v5 = vpop.xlane.xlu1 %1640 }
 0x18e   : > { %v1734_v58 = vpop.xlane.xlu0 %1733  ;;  %v1811_v59 = vmax.f32 %v1555_v57, %v1641_v5  ;;  %v1563_v57 = vld [vmem:[#allocation2 + $0x90] sm:$0xff] }
 0x18f   : > { %v1842_v60 = vmax.f32 %v1586_v12, %v1734_v58  ;;  %v1941_v62 = vld [vmem:[#allocation2 + $0x40] sm:$0xff]  ;;  %v1594_v12 = vld [vmem:[#allocation2 + $0x188] sm:$0xff] }
 0x190   : > { %v1972_v31 = vld [vmem:[#allocation2 + $0x138] sm:$0xff]  ;;  %2005 = vst.msk [vmem:[%s3307_s22 + $0x40] sm:$0xff] %vm254_vm2, %v1941_v62  ;;  %1876 = vst.msk [vmem:[#allocation2 + $0x50] sm:$0xff] %vm254_vm2, %v1811_v59 }
 0x191   : > { %2036 = vst.msk [vmem:[%s3307_s22 + $0x138] sm:$0xff] %vm254_vm2, %v1972_v31  ;;  %1907 = vst.msk [vmem:[#allocation2 + $0x148] sm:$0xff] %vm254_vm2, %v1842_v60  ;;  %v1737_v21 = vpop.xlane.xlu1 %1736 }
 0x192   : > { %v1644_v9 = vpop.xlane.xlu0 %1643  ;;  %v1843_v26 = vmax.f32 %v1587_v61, %v1737_v21  ;;  %v1595_v61 = vld [vmem:[#allocation2 + $0x190] sm:$0xff] }
 0x193   : > { %v1812_v1 = vmax.f32 %v1556_v0, %v1644_v9  ;;  %v1973_v4 = vld [vmem:[#allocation2 + $0x140] sm:$0xff]  ;;  %v1564_v0 = vld [vmem:[#allocation2 + $0x98] sm:$0xff] }
 0x194   : > { %v1942_v18 = vld [vmem:[#allocation2 + $0x48] sm:$0xff]  ;;  %2037 = vst.msk [vmem:[%s3307_s22 + $0x140] sm:$0xff] %vm254_vm2, %v1973_v4  ;;  %1908 = vst.msk [vmem:[#allocation2 + $0x150] sm:$0xff] %vm254_vm2, %v1843_v26 }
 0x195   : > { %2006 = vst.msk [vmem:[%s3307_s22 + $0x48] sm:$0xff] %vm254_vm2, %v1942_v18  ;;  %1877 = vst.msk [vmem:[#allocation2 + $0x58] sm:$0xff] %vm254_vm2, %v1812_v1  ;;  %v1647_v6 = vpop.xlane.xlu1 %1646 }
 0x196   : > { %v1740_v32 = vpop.xlane.xlu0 %1739  ;;  %v1813_v7 = vmax.f32 %v1557_v2, %v1647_v6  ;;  %v1565_v2 = vld [vmem:[#allocation2 + $0xa0] sm:$0xff] }
 0x197   : > { %v1844_v10 = vmax.f32 %v1588_v15, %v1740_v32  ;;  %v1943_v22 = vld [vmem:[#allocation2 + $0x50] sm:$0xff]  ;;  %v1596_v15 = vld [vmem:[#allocation2 + $0x198] sm:$0xff] }
 0x198   : > { %v1974_v27 = vld [vmem:[#allocation2 + $0x148] sm:$0xff]  ;;  %2007 = vst.msk [vmem:[%s3307_s22 + $0x50] sm:$0xff] %vm254_vm2, %v1943_v22  ;;  %1878 = vst.msk [vmem:[#allocation2 + $0x60] sm:$0xff] %vm254_vm2, %v1813_v7 }
 0x199   : > { %2038 = vst.msk [vmem:[%s3307_s22 + $0x148] sm:$0xff] %vm254_vm2, %v1974_v27  ;;  %1909 = vst.msk [vmem:[#allocation2 + $0x158] sm:$0xff] %vm254_vm2, %v1844_v10  ;;  %v1743_v38 = vpop.xlane.xlu1 %1742 }
 0x19a   : > { %v1650_v39 = vpop.xlane.xlu0 %1649  ;;  %v1845_v8 = vmax.f32 %v1589_v11, %v1743_v38  ;;  %v1597_v11 = vld [vmem:[#allocation2 + $0x1a0] sm:$0xff] }
 0x19b   : > { %v1814_v40 = vmax.f32 %v1558_v37, %v1650_v39  ;;  %v1975_v17 = vld [vmem:[#allocation2 + $0x150] sm:$0xff]  ;;  %v1566_v37 = vld [vmem:[#allocation2 + $0xa8] sm:$0xff] }
 0x19c   : > { %v1944_v41 = vld [vmem:[#allocation2 + $0x58] sm:$0xff]  ;;  %2039 = vst.msk [vmem:[%s3307_s22 + $0x150] sm:$0xff] %vm254_vm2, %v1975_v17  ;;  %1910 = vst.msk [vmem:[#allocation2 + $0x160] sm:$0xff] %vm254_vm2, %v1845_v8 }
 0x19d   : > { %2008 = vst.msk [vmem:[%s3307_s22 + $0x58] sm:$0xff] %vm254_vm2, %v1944_v41  ;;  %1879 = vst.msk [vmem:[#allocation2 + $0x68] sm:$0xff] %vm254_vm2, %v1814_v40  ;;  %v1653_v42 = vpop.xlane.xlu1 %1652 }
 0x19e   : > { %v1746_v43 = vpop.xlane.xlu0 %1745  ;;  %v1815_v28 = vmax.f32 %v1559_v33, %v1653_v42  ;;  %v1567_v33 = vld [vmem:[#allocation2 + $0xb0] sm:$0xff] }
 0x19f   : > { %v1846_v23 = vmax.f32 %v1590_v14, %v1746_v43  ;;  %v1945_v63 = vld [vmem:[#allocation2 + $0x60] sm:$0xff]  ;;  %v1598_v14 = vld [vmem:[#allocation2 + $0x1a8] sm:$0xff] }
 0x1a0   : > { %v1976_v45 = vld [vmem:[#allocation2 + $0x158] sm:$0xff]  ;;  %2009 = vst.msk [vmem:[%s3307_s22 + $0x60] sm:$0xff] %vm254_vm2, %v1945_v63  ;;  %1880 = vst.msk [vmem:[#allocation2 + $0x70] sm:$0xff] %vm254_vm2, %v1815_v28 }
 0x1a1   : > { %2040 = vst.msk [vmem:[%s3307_s22 + $0x158] sm:$0xff] %vm254_vm2, %v1976_v45  ;;  %1911 = vst.msk [vmem:[#allocation2 + $0x168] sm:$0xff] %vm254_vm2, %v1846_v23  ;;  %v1749_v46 = vpop.xlane.xlu1 %1748 }
 0x1a2   : > { %v1656_v47 = vpop.xlane.xlu0 %1655  ;;  %v1847_v48 = vmax.f32 %v1591_v44, %v1749_v46  ;;  %v1599_v44 = vld [vmem:[#allocation2 + $0x1b0] sm:$0xff] }
 0x1a3   : > { %v1816_v20 = vmax.f32 %v1560_v34, %v1656_v47  ;;  %v1977_v49 = vld [vmem:[#allocation2 + $0x160] sm:$0xff]  ;;  %v1568_v34 = vld [vmem:[#allocation2 + $0xb8] sm:$0xff] }
 0x1a4   : > { %v1946_v29 = vld [vmem:[#allocation2 + $0x68] sm:$0xff]  ;;  %2041 = vst.msk [vmem:[%s3307_s22 + $0x160] sm:$0xff] %vm254_vm2, %v1977_v49  ;;  %1912 = vst.msk [vmem:[#allocation2 + $0x170] sm:$0xff] %vm254_vm2, %v1847_v48 }
 0x1a5   : > { %2010 = vst.msk [vmem:[%s3307_s22 + $0x68] sm:$0xff] %vm254_vm2, %v1946_v29  ;;  %1881 = vst.msk [vmem:[#allocation2 + $0x78] sm:$0xff] %vm254_vm2, %v1816_v20  ;;  %v1659_v24 = vpop.xlane.xlu1 %1658 }
 0x1a6   : > { %v1752_v35 = vpop.xlane.xlu0 %1751  ;;  %v1817_v50 = vmax.f32 %v1561_v13, %v1659_v24  ;;  %v1569_v13 = vld [vmem:[#allocation2 + $0xc0] sm:$0xff] }
 0x1a7   : > { %v1848_v51 = vmax.f32 %v1592_v16, %v1752_v35  ;;  %v1947_v53 = vld [vmem:[#allocation2 + $0x70] sm:$0xff]  ;;  %v1600_v16 = vld [vmem:[#allocation2 + $0x1b8] sm:$0xff] }
 0x1a8   : > { %v1978_v3 = vld [vmem:[#allocation2 + $0x168] sm:$0xff]  ;;  %2011 = vst.msk [vmem:[%s3307_s22 + $0x70] sm:$0xff] %vm254_vm2, %v1947_v53  ;;  %1882 = vst.msk [vmem:[#allocation2 + $0x80] sm:$0xff] %vm254_vm2, %v1817_v50 }
 0x1a9   : > { %2042 = vst.msk [vmem:[%s3307_s22 + $0x168] sm:$0xff] %vm254_vm2, %v1978_v3  ;;  %1913 = vst.msk [vmem:[#allocation2 + $0x178] sm:$0xff] %vm254_vm2, %v1848_v51  ;;  %v1755_v55 = vpop.xlane.xlu1 %1754 }
 0x1aa   : > { %v1662_v19 = vpop.xlane.xlu0 %1661  ;;  %v1849_v30 = vmax.f32 %v1593_v52, %v1755_v55  ;;  %v1601_v52 = vld [vmem:[#allocation2 + $0x1c0] sm:$0xff] }
 0x1ab   : > { %v1818_v56 = vmax.f32 %v1562_v54, %v1662_v19  ;;  %v1979_v36 = vld [vmem:[#allocation2 + $0x170] sm:$0xff]  ;;  %v1570_v54 = vld [vmem:[#allocation2 + $0xc8] sm:$0xff] }
 0x1ac   : > { %v1948_v25 = vld [vmem:[#allocation2 + $0x78] sm:$0xff]  ;;  %2043 = vst.msk [vmem:[%s3307_s22 + $0x170] sm:$0xff] %vm254_vm2, %v1979_v36  ;;  %1914 = vst.msk [vmem:[#allocation2 + $0x180] sm:$0xff] %vm254_vm2, %v1849_v30 }
 0x1ad   : > { %2012 = vst.msk [vmem:[%s3307_s22 + $0x78] sm:$0xff] %vm254_vm2, %v1948_v25  ;;  %1883 = vst.msk [vmem:[#allocation2 + $0x88] sm:$0xff] %vm254_vm2, %v1818_v56  ;;  %v1665_v5 = vpop.xlane.xlu1 %1664 }
 0x1ae   : > { %v1758_v58 = vpop.xlane.xlu0 %1757  ;;  %v1819_v59 = vmax.f32 %v1563_v57, %v1665_v5  ;;  %v1571_v57 = vld [vmem:[#allocation2 + $0xd0] sm:$0xff] }
 0x1af   : > { %v1850_v60 = vmax.f32 %v1594_v12, %v1758_v58  ;;  %v1949_v62 = vld [vmem:[#allocation2 + $0x80] sm:$0xff]  ;;  %v1602_v12 = vld [vmem:[#allocation2 + $0x1c8] sm:$0xff] }
 0x1b0   : > { %v1980_v31 = vld [vmem:[#allocation2 + $0x178] sm:$0xff]  ;;  %2013 = vst.msk [vmem:[%s3307_s22 + $0x80] sm:$0xff] %vm254_vm2, %v1949_v62  ;;  %1884 = vst.msk [vmem:[#allocation2 + $0x90] sm:$0xff] %vm254_vm2, %v1819_v59 }
 0x1b1   : > { %2044 = vst.msk [vmem:[%s3307_s22 + $0x178] sm:$0xff] %vm254_vm2, %v1980_v31  ;;  %1915 = vst.msk [vmem:[#allocation2 + $0x188] sm:$0xff] %vm254_vm2, %v1850_v60  ;;  %v1761_v21 = vpop.xlane.xlu1 %1760 }
 0x1b2   : > { %v1668_v9 = vpop.xlane.xlu0 %1667  ;;  %v1851_v26 = vmax.f32 %v1595_v61, %v1761_v21  ;;  %v1603_v61 = vld [vmem:[#allocation2 + $0x1d0] sm:$0xff] }
 0x1b3   : > { %v1820_v1 = vmax.f32 %v1564_v0, %v1668_v9  ;;  %v1981_v4 = vld [vmem:[#allocation2 + $0x180] sm:$0xff]  ;;  %v1572_v0 = vld [vmem:[#allocation2 + $0xd8] sm:$0xff] }
 0x1b4   : > { %v1950_v18 = vld [vmem:[#allocation2 + $0x88] sm:$0xff]  ;;  %2045 = vst.msk [vmem:[%s3307_s22 + $0x180] sm:$0xff] %vm254_vm2, %v1981_v4  ;;  %1916 = vst.msk [vmem:[#allocation2 + $0x190] sm:$0xff] %vm254_vm2, %v1851_v26 }
 0x1b5   : > { %2014 = vst.msk [vmem:[%s3307_s22 + $0x88] sm:$0xff] %vm254_vm2, %v1950_v18  ;;  %1885 = vst.msk [vmem:[#allocation2 + $0x98] sm:$0xff] %vm254_vm2, %v1820_v1  ;;  %v1671_v6 = vpop.xlane.xlu1 %1670 }
 0x1b6   : > { %v1764_v32 = vpop.xlane.xlu0 %1763  ;;  %v1821_v7 = vmax.f32 %v1565_v2, %v1671_v6  ;;  %v1573_v2 = vld [vmem:[#allocation2 + $0xe0] sm:$0xff] }
 0x1b7   : > { %v1852_v10 = vmax.f32 %v1596_v15, %v1764_v32  ;;  %v1951_v22 = vld [vmem:[#allocation2 + $0x90] sm:$0xff]  ;;  %v1604_v15 = vld [vmem:[#allocation2 + $0x1d8] sm:$0xff] }
 0x1b8   : > { %v1982_v27 = vld [vmem:[#allocation2 + $0x188] sm:$0xff]  ;;  %2015 = vst.msk [vmem:[%s3307_s22 + $0x90] sm:$0xff] %vm254_vm2, %v1951_v22  ;;  %1886 = vst.msk [vmem:[#allocation2 + $0xa0] sm:$0xff] %vm254_vm2, %v1821_v7 }
 0x1b9   : > { %2046 = vst.msk [vmem:[%s3307_s22 + $0x188] sm:$0xff] %vm254_vm2, %v1982_v27  ;;  %1917 = vst.msk [vmem:[#allocation2 + $0x198] sm:$0xff] %vm254_vm2, %v1852_v10  ;;  %v1767_v38 = vpop.xlane.xlu1 %1766 }
 0x1ba   : > { %v1674_v39 = vpop.xlane.xlu0 %1673  ;;  %v1853_v8 = vmax.f32 %v1597_v11, %v1767_v38  ;;  %v1605_v11 = vld [vmem:[#allocation2 + $0x1e0] sm:$0xff] }
 0x1bb   : > { %v1822_v40 = vmax.f32 %v1566_v37, %v1674_v39  ;;  %v1983_v17 = vld [vmem:[#allocation2 + $0x190] sm:$0xff]  ;;  %v1574_v37 = vld [vmem:[#allocation2 + $0xe8] sm:$0xff] }
 0x1bc   : > { %v1952_v41 = vld [vmem:[#allocation2 + $0x98] sm:$0xff]  ;;  %2047 = vst.msk [vmem:[%s3307_s22 + $0x190] sm:$0xff] %vm254_vm2, %v1983_v17  ;;  %1918 = vst.msk [vmem:[#allocation2 + $0x1a0] sm:$0xff] %vm254_vm2, %v1853_v8 }
 0x1bd   : > { %2016 = vst.msk [vmem:[%s3307_s22 + $0x98] sm:$0xff] %vm254_vm2, %v1952_v41  ;;  %1887 = vst.msk [vmem:[#allocation2 + $0xa8] sm:$0xff] %vm254_vm2, %v1822_v40  ;;  %v1677_v42 = vpop.xlane.xlu1 %1676 }
 0x1be   : > { %v1770_v43 = vpop.xlane.xlu0 %1769  ;;  %v1823_v28 = vmax.f32 %v1567_v33, %v1677_v42  ;;  %v1575_v33 = vld [vmem:[#allocation2 + $0xf0] sm:$0xff] }
 0x1bf   : > { %v1854_v23 = vmax.f32 %v1598_v14, %v1770_v43  ;;  %v1953_v63 = vld [vmem:[#allocation2 + $0xa0] sm:$0xff]  ;;  %v1606_v14 = vld [vmem:[#allocation2 + $0x1e8] sm:$0xff] }
 0x1c0   : > { %v1984_v45 = vld [vmem:[#allocation2 + $0x198] sm:$0xff]  ;;  %2017 = vst.msk [vmem:[%s3307_s22 + $0xa0] sm:$0xff] %vm254_vm2, %v1953_v63  ;;  %1888 = vst.msk [vmem:[#allocation2 + $0xb0] sm:$0xff] %vm254_vm2, %v1823_v28 }
 0x1c1   : > { %2048 = vst.msk [vmem:[%s3307_s22 + $0x198] sm:$0xff] %vm254_vm2, %v1984_v45  ;;  %1919 = vst.msk [vmem:[#allocation2 + $0x1a8] sm:$0xff] %vm254_vm2, %v1854_v23  ;;  %v1773_v46 = vpop.xlane.xlu1 %1772 }
 0x1c2   : > { %v1680_v47 = vpop.xlane.xlu0 %1679  ;;  %v1855_v48 = vmax.f32 %v1599_v44, %v1773_v46  ;;  %v1607_v44 = vld [vmem:[#allocation2 + $0x1f0] sm:$0xff] }
 0x1c3   : > { %v1824_v20 = vmax.f32 %v1568_v34, %v1680_v47  ;;  %v1985_v49 = vld [vmem:[#allocation2 + $0x1a0] sm:$0xff]  ;;  %v1576_v34 = vld [vmem:[#allocation2 + $0xf8] sm:$0xff] }
 0x1c4   : > { %v1954_v29 = vld [vmem:[#allocation2 + $0xa8] sm:$0xff]  ;;  %2049 = vst.msk [vmem:[%s3307_s22 + $0x1a0] sm:$0xff] %vm254_vm2, %v1985_v49  ;;  %1920 = vst.msk [vmem:[#allocation2 + $0x1b0] sm:$0xff] %vm254_vm2, %v1855_v48 }
 0x1c5   : > { %2018 = vst.msk [vmem:[%s3307_s22 + $0xa8] sm:$0xff] %vm254_vm2, %v1954_v29  ;;  %1889 = vst.msk [vmem:[#allocation2 + $0xb8] sm:$0xff] %vm254_vm2, %v1824_v20  ;;  %v1683_v24 = vpop.xlane.xlu1 %1682  ;;  %v1608_v29 = vld [vmem:[#allocation2 + $0x1f8] sm:$0xff] }
 0x1c6   : > { %v1776_v35 = vpop.xlane.xlu0 %1775  ;;  %v1825_v50 = vmax.f32 %v1569_v13, %v1683_v24 }
 0x1c7   : > { %v1856_v51 = vmax.f32 %v1600_v16, %v1776_v35  ;;  %v1955_v53 = vld [vmem:[#allocation2 + $0xb0] sm:$0xff] }
 0x1c8   : > { %v1986_v3 = vld [vmem:[#allocation2 + $0x1a8] sm:$0xff]  ;;  %2019 = vst.msk [vmem:[%s3307_s22 + $0xb0] sm:$0xff] %vm254_vm2, %v1955_v53  ;;  %1890 = vst.msk [vmem:[#allocation2 + $0xc0] sm:$0xff] %vm254_vm2, %v1825_v50 }
 0x1c9   : > { %2050 = vst.msk [vmem:[%s3307_s22 + $0x1a8] sm:$0xff] %vm254_vm2, %v1986_v3  ;;  %1921 = vst.msk [vmem:[#allocation2 + $0x1b8] sm:$0xff] %vm254_vm2, %v1856_v51  ;;  %v1779_v55 = vpop.xlane.xlu1 %1778 }
 0x1ca   : > { %v1686_v19 = vpop.xlane.xlu0 %1685  ;;  %v1857_v30 = vmax.f32 %v1601_v52, %v1779_v55 }
 0x1cb   : > { %v1826_v56 = vmax.f32 %v1570_v54, %v1686_v19  ;;  %v1987_v36 = vld [vmem:[#allocation2 + $0x1b0] sm:$0xff] }
 0x1cc   : > { %v1956_v25 = vld [vmem:[#allocation2 + $0xb8] sm:$0xff]  ;;  %2051 = vst.msk [vmem:[%s3307_s22 + $0x1b0] sm:$0xff] %vm254_vm2, %v1987_v36  ;;  %1922 = vst.msk [vmem:[#allocation2 + $0x1c0] sm:$0xff] %vm254_vm2, %v1857_v30 }
 0x1cd   : > { %2020 = vst.msk [vmem:[%s3307_s22 + $0xb8] sm:$0xff] %vm254_vm2, %v1956_v25  ;;  %1891 = vst.msk [vmem:[#allocation2 + $0xc8] sm:$0xff] %vm254_vm2, %v1826_v56  ;;  %v1689_v5 = vpop.xlane.xlu1 %1688 }
 0x1ce   : > { %v1782_v58 = vpop.xlane.xlu0 %1781  ;;  %v1827_v59 = vmax.f32 %v1571_v57, %v1689_v5 }
 0x1cf   : > { %v1858_v60 = vmax.f32 %v1602_v12, %v1782_v58  ;;  %v1957_v62 = vld [vmem:[#allocation2 + $0xc0] sm:$0xff] }
 0x1d0   : > { %v1988_v31 = vld [vmem:[#allocation2 + $0x1b8] sm:$0xff]  ;;  %2021 = vst.msk [vmem:[%s3307_s22 + $0xc0] sm:$0xff] %vm254_vm2, %v1957_v62  ;;  %1892 = vst.msk [vmem:[#allocation2 + $0xd0] sm:$0xff] %vm254_vm2, %v1827_v59 }
 0x1d1   : > { %2052 = vst.msk [vmem:[%s3307_s22 + $0x1b8] sm:$0xff] %vm254_vm2, %v1988_v31  ;;  %1923 = vst.msk [vmem:[#allocation2 + $0x1c8] sm:$0xff] %vm254_vm2, %v1858_v60  ;;  %v1785_v21 = vpop.xlane.xlu1 %1784 }
 0x1d2   : > { %v1692_v9 = vpop.xlane.xlu0 %1691  ;;  %v1859_v26 = vmax.f32 %v1603_v61, %v1785_v21 }
 0x1d3   : > { %v1828_v1 = vmax.f32 %v1572_v0, %v1692_v9  ;;  %v1989_v4 = vld [vmem:[#allocation2 + $0x1c0] sm:$0xff] }
 0x1d4   : > { %v1958_v18 = vld [vmem:[#allocation2 + $0xc8] sm:$0xff]  ;;  %2053 = vst.msk [vmem:[%s3307_s22 + $0x1c0] sm:$0xff] %vm254_vm2, %v1989_v4  ;;  %1924 = vst.msk [vmem:[#allocation2 + $0x1d0] sm:$0xff] %vm254_vm2, %v1859_v26 }
 0x1d5   : > { %2022 = vst.msk [vmem:[%s3307_s22 + $0xc8] sm:$0xff] %vm254_vm2, %v1958_v18  ;;  %1893 = vst.msk [vmem:[#allocation2 + $0xd8] sm:$0xff] %vm254_vm2, %v1828_v1  ;;  %v1695_v6 = vpop.xlane.xlu1 %1694 }
 0x1d6   : > { %v1788_v32 = vpop.xlane.xlu0 %1787  ;;  %v1829_v7 = vmax.f32 %v1573_v2, %v1695_v6 }
 0x1d7   : > { %v1860_v10 = vmax.f32 %v1604_v15, %v1788_v32  ;;  %v1959_v22 = vld [vmem:[#allocation2 + $0xd0] sm:$0xff] }
 0x1d8   : > { %v1990_v27 = vld [vmem:[#allocation2 + $0x1c8] sm:$0xff]  ;;  %2023 = vst.msk [vmem:[%s3307_s22 + $0xd0] sm:$0xff] %vm254_vm2, %v1959_v22  ;;  %1894 = vst.msk [vmem:[#allocation2 + $0xe0] sm:$0xff] %vm254_vm2, %v1829_v7 }
 0x1d9   : > { %2054 = vst.msk [vmem:[%s3307_s22 + $0x1c8] sm:$0xff] %vm254_vm2, %v1990_v27  ;;  %1925 = vst.msk [vmem:[#allocation2 + $0x1d8] sm:$0xff] %vm254_vm2, %v1860_v10  ;;  %v1791_v38 = vpop.xlane.xlu1 %1790 }
 0x1da   : > { %v1698_v39 = vpop.xlane.xlu0 %1697  ;;  %v1861_v8 = vmax.f32 %v1605_v11, %v1791_v38 }
 0x1db   : > { %v1830_v40 = vmax.f32 %v1574_v37, %v1698_v39  ;;  %v1991_v17 = vld [vmem:[#allocation2 + $0x1d0] sm:$0xff] }
 0x1dc   : > { %v1960_v41 = vld [vmem:[#allocation2 + $0xd8] sm:$0xff]  ;;  %2055 = vst.msk [vmem:[%s3307_s22 + $0x1d0] sm:$0xff] %vm254_vm2, %v1991_v17  ;;  %1926 = vst.msk [vmem:[#allocation2 + $0x1e0] sm:$0xff] %vm254_vm2, %v1861_v8 }
 0x1dd   : > { %2024 = vst.msk [vmem:[%s3307_s22 + $0xd8] sm:$0xff] %vm254_vm2, %v1960_v41  ;;  %1895 = vst.msk [vmem:[#allocation2 + $0xe8] sm:$0xff] %vm254_vm2, %v1830_v40  ;;  %v1701_v42 = vpop.xlane.xlu1 %1700 }
 0x1de   : > { %v1794_v43 = vpop.xlane.xlu0 %1793  ;;  %v1831_v28 = vmax.f32 %v1575_v33, %v1701_v42 }
 0x1df   : > { %v1862_v23 = vmax.f32 %v1606_v14, %v1794_v43  ;;  %v1961_v63 = vld [vmem:[#allocation2 + $0xe0] sm:$0xff] }
 0x1e0   : > { %v1992_v45 = vld [vmem:[#allocation2 + $0x1d8] sm:$0xff]  ;;  %2025 = vst.msk [vmem:[%s3307_s22 + $0xe0] sm:$0xff] %vm254_vm2, %v1961_v63  ;;  %1896 = vst.msk [vmem:[#allocation2 + $0xf0] sm:$0xff] %vm254_vm2, %v1831_v28 }
 0x1e1   : > { %2056 = vst.msk [vmem:[%s3307_s22 + $0x1d8] sm:$0xff] %vm254_vm2, %v1992_v45  ;;  %1927 = vst.msk [vmem:[#allocation2 + $0x1e8] sm:$0xff] %vm254_vm2, %v1862_v23  ;;  %v1797_v46 = vpop.xlane.xlu1 %1796 }
 0x1e2   : > { %v1704_v47 = vpop.xlane.xlu0 %1703  ;;  %v1863_v48 = vmax.f32 %v1607_v44, %v1797_v46 }
 0x1e3   : > { %v1832_v20 = vmax.f32 %v1576_v34, %v1704_v47  ;;  %v1993_v13 = vld [vmem:[#allocation2 + $0x1e0] sm:$0xff] }
 0x1e4   : > { %v1962_v49 = vld [vmem:[#allocation2 + $0xe8] sm:$0xff]  ;;  %2057 = vst.msk [vmem:[%s3307_s22 + $0x1e0] sm:$0xff] %vm254_vm2, %v1993_v13  ;;  %1928 = vst.msk [vmem:[#allocation2 + $0x1f0] sm:$0xff] %vm254_vm2, %v1863_v48 }
 0x1e5   : > { %2026 = vst.msk [vmem:[%s3307_s22 + $0xe8] sm:$0xff] %vm254_vm2, %v1962_v49  ;;  %1897 = vst.msk [vmem:[#allocation2 + $0xf8] sm:$0xff] %vm254_vm2, %v1832_v20 }
 0x1e6   : > { %v1800_v16 = vpop.xlane.xlu0 %1799 }
 0x1e7   : > { %v1864_v24 = vmax.f32 %v1608_v29, %v1800_v16  ;;  %v1963_v35 = vld [vmem:[#allocation2 + $0xf0] sm:$0xff] }
 0x1e8   : > { %v1994_v50 = vld [vmem:[#allocation2 + $0x1e8] sm:$0xff]  ;;  %2027 = vst.msk [vmem:[%s3307_s22 + $0xf0] sm:$0xff] %vm254_vm2, %v1963_v35 }
 0x1e9   : > { %2058 = vst.msk [vmem:[%s3307_s22 + $0x1e8] sm:$0xff] %vm254_vm2, %v1994_v50  ;;  %1929 = vst.msk [vmem:[#allocation2 + $0x1f8] sm:$0xff] %vm254_vm2, %v1864_v24 }
 0x1eb   : > { %v1995_v51 = vld [vmem:[#allocation2 + $0x1f0] sm:$0xff] }
 0x1ec   : > { %v1964_v52 = vld [vmem:[#allocation2 + $0xf8] sm:$0xff]  ;;  %2059 = vst.msk [vmem:[%s3307_s22 + $0x1f0] sm:$0xff] %vm254_vm2, %v1995_v51 }
 0x1ed   : > { %2028 = vst.msk [vmem:[%s3307_s22 + $0xf8] sm:$0xff] %vm254_vm2, %v1964_v52 }
 0x1f0   : > { %v1996_v53 = vld [vmem:[#allocation2 + $0x1f8] sm:$0xff] }
 0x1f1   : > { %2060 = vst.msk [vmem:[%s3307_s22 + $0x1f8] sm:$0xff] %vm254_vm2, %v1996_v53 }
 0x1f2 PF: > { %s15_s17 = sadd.s32 1, %s2317_s17   ;;  %s3511_s15 = smov %s2313_s16 }
 0x1f3   : > { %p12_p5 = scmp.ge.s32.totalorder %s15_s17, 4   ;;  %s3512_s16 = smov %s3514_s18 }
 0x1f5   :  { %14 = sbr.rel (!%p12_p5) target bundleno = 2 (0x2), region = 82 }

// kernel: classifier_forward.3
= control target key start
LH: loop header
LB: loop body
LE: loop exit
PB: predicated region body
PF: predicated region fallthrough
CT: control target
= control target key end

     0   :  { %12 = vsyncpa [#allocation3], 0  ;;  %s6248_s0 = inlined_call_operand.vmem [shape: f32[2,512], index: 0, kind: input, shape index: {}]   ;;  %s6249_s1 = inlined_call_operand.vmem [shape: f32[512,1024], index: 1, kind: input, shape index: {}]   ;;  %s6250_s2 = inlined_call_operand.hbm [shape: f32[1,1024], index: 2, kind: input, shape index: {}]   ;;  %s6251_s3 = inlined_call_operand.hbm [shape: f32[1024,1024], index: 3, kind: input, shape index: {}]   ;;  %s6252_s4 = inlined_call_operand.hbm [shape: f32[1,1024], index: 4, kind: input, shape index: {}]   ;;  %s6253_s5 = inlined_call_operand.vmem [shape: f32[1024,128], index: 5, kind: input, shape index: {}]   ;;  %s6254_s6 = inlined_call_operand.vmem [shape: f32[1,128], index: 6, kind: input, shape index: {}]   ;;  %s6255_s7 = inlined_call_operand.hbm [shape: f32[2,128], index: 7, kind: output, shape index: {}]  }
   0x1   :  { %13 = vsyncpa [#allocation6], 0 }
   0x2   :  { %14 = vsyncpa [#allocation4], 0  ;;  %s4095_s24 = smov [#allocation5]  }
   0x3   :  { %s34_s25 = sshll.u32 %s4095_s24, 4  ;;  %s35_s25 = int_to_ptr.vmem [resolvable:$true] %s34_s25 }
   0x4   :  { %s4017_s26 = scalar_lea.vmem %s35_s25, 131072  ;;  %p4022_p1 = scmp.lt.s32.totalorder %s35_s25, %s35_s25 }
   0x5   :  { %p4018_p0 = scmp.ne.s32.totalorder %s35_s25, %s4017_s26  ;;  %p4023_p2 = scmp.lt.s32.totalorder %s4017_s26, %s4017_s26 }
   0x7   :  { %p4024_p3 = por %p4023_p2, %p4022_p1 }
   0x9   :  { %p4025_p4 = pnand %p4024_p3, %p4018_p0 }
   0xb   :  { %4028 = shalt.err (!%p4025_p4)
}
   0xc   :  { %s4096_s27 = smov 1024   ;;  %s4097_s28 = smov 64  }
   0xd   :  { %40 = dma.hbm_to_vmem [thread:$0]  %s6251_s3, 131072, %s35_s25, [#allocation6], %s4096_s27, %s4096_s27, %s4097_s28  }
   0xe   :  { %s4098_s8 = smov [#allocation2]   ;;  %s4099_s10 = smov [#allocation7]  }
   0xf   :  { %s25_s9 = sshll.u32 %s4098_s8, 4  ;;  %s47_s11 = sshll.u32 %s4099_s10, 4  ;;  %s26_s9 = int_to_ptr.vmem [resolvable:$true] %s25_s9  ;;  %s48_s11 = int_to_ptr.vmem [resolvable:$true] %s47_s11 }
  0x10   :  { %s4037_s12 = scalar_lea.vmem %s26_s9, 128  ;;  %p4042_p6 = scmp.lt.s32.totalorder %s26_s9, %s26_s9 }
  0x11   :  { %p4038_p5 = scmp.ne.s32.totalorder %s26_s9, %s4037_s12  ;;  %p4043_p7 = scmp.lt.s32.totalorder %s4037_s12, %s4037_s12 }
  0x13   :  { %p4044_p8 = por %p4043_p7, %p4042_p6 }
  0x15   :  { %p4045_p9 = pnand %p4044_p8, %p4038_p5 }
  0x17   :  { %4048 = shalt.err (!%p4045_p9)
}
  0x18   :  { %28 = dma.hbm_to_vmem [thread:$0]  %s6250_s2, 128, %s26_s9, [#allocation3]  }
  0x19   :  { %s4057_s15 = scalar_lea.vmem %s48_s11, 128  ;;  %p4062_p11 = scmp.lt.s32.totalorder %s48_s11, %s48_s11 }
  0x1a   :  { %p4058_p10 = scmp.ne.s32.totalorder %s48_s11, %s4057_s15  ;;  %p4063_p12 = scmp.lt.s32.totalorder %s4057_s15, %s4057_s15 }
  0x1c   :  { %p4064_p13 = por %p4063_p12, %p4062_p11 }
  0x1e   :  { %p4065_p0 = pnand %p4064_p13, %p4058_p10 }
  0x20   :  { %4068 = shalt.err (!%p4065_p0)
}
  0x21   :  { %50 = dma.hbm_to_vmem [thread:$0]  %s6252_s4, 128, %s48_s11, [#allocation6]  }
  0x22   :  { %4089 = dma.done.wait [#allocation3], 128  }
  0x23   :  { %4090 = vsyncadd [#allocation3], 4294967168 }
  0x24   :  { %4091 = dma.done.wait [#allocation6], 131200  }
  0x25   :  { %4092 = vsyncadd [#allocation6], 4294836096  ;;  %v186_v0 = vld [vmem:[%s6249_s1 + $0x3c8] sm:$0xff]  ;;  %v185_v2 = vld [vmem:[%s6249_s1 + $0x3c0] sm:$0xff]  ;;  %s4101_s27 = smov [#allocation8]  }
  0x26   :  { %v442_v1 = vld [vmem:[%s6249_s1 + $0xbc8] sm:$0xff]  ;;  %641 = vmatprep.subr.mxu0 %v186_v0  ;;  %v441_v3 = vld [vmem:[%s6249_s1 + $0xbc0] sm:$0xff]  ;;  %s3849_s28 = sshll.u32 %s4101_s27, 4  ;;  %s3850_s28 = int_to_ptr.vmem [resolvable:$true] %s3849_s28 }
  0x27   :  { %712 = vmatprep.subr.mxu1 %v442_v1  ;;  %v178_v4 = vld [vmem:[%s6249_s1 + $0x388] sm:$0xff]  ;;  %642 = vmatpush1.msra.mxu0 %v185_v2  ;;  %v177_v6 = vld [vmem:[%s6249_s1 + $0x380] sm:$0xff]  ;;  %s4069_s29 = scalar_lea.vmem %s3850_s28, 32  ;;  %p4074_p2 = scmp.lt.s32.totalorder %s3850_s28, %s3850_s28 }
  0x28   :  { %v434_v5 = vld [vmem:[%s6249_s1 + $0xb88] sm:$0xff]  ;;  %713 = vmatpush1.msra.mxu1 %v441_v3  ;;  %v433_v7 = vld [vmem:[%s6249_s1 + $0xb80] sm:$0xff]  ;;  %643 = vmatprep.subr.mxu0 %v178_v4  ;;  %p4070_p1 = scmp.ne.s32.totalorder %s3850_s28, %s4069_s29  ;;  %p4075_p3 = scmp.lt.s32.totalorder %s4069_s29, %s4069_s29 }
  0x29   :  { %v170_v8 = vld [vmem:[%s6249_s1 + $0x348] sm:$0xff]  ;;  %714 = vmatprep.subr.mxu1 %v434_v5  ;;  %v169_v10 = vld [vmem:[%s6249_s1 + $0x340] sm:$0xff]  ;;  %644 = vmatpush1.msra.mxu0 %v177_v6 }
  0x2a   :  { %v426_v9 = vld [vmem:[%s6249_s1 + $0xb48] sm:$0xff]  ;;  %v425_v11 = vld [vmem:[%s6249_s1 + $0xb40] sm:$0xff]  ;;  %715 = vmatpush1.msra.mxu1 %v433_v7  ;;  %645 = vmatprep.subr.mxu0 %v170_v8  ;;  %p4076_p4 = por %p4075_p3, %p4074_p2 }
  0x2b   :  { %v162_v12 = vld [vmem:[%s6249_s1 + $0x308] sm:$0xff]  ;;  %716 = vmatprep.subr.mxu1 %v426_v9  ;;  %v161_v14 = vld [vmem:[%s6249_s1 + $0x300] sm:$0xff]  ;;  %646 = vmatpush1.msra.mxu0 %v169_v10 }
  0x2c   :  { %v418_v13 = vld [vmem:[%s6249_s1 + $0xb08] sm:$0xff]  ;;  %v417_v15 = vld [vmem:[%s6249_s1 + $0xb00] sm:$0xff]  ;;  %717 = vmatpush1.msra.mxu1 %v425_v11  ;;  %647 = vmatprep.subr.mxu0 %v162_v12  ;;  %p4077_p5 = pnand %p4076_p4, %p4070_p1 }
  0x2d   :  { %v154_v16 = vld [vmem:[%s6249_s1 + $0x2c8] sm:$0xff]  ;;  %718 = vmatprep.subr.mxu1 %v418_v13  ;;  %v153_v18 = vld [vmem:[%s6249_s1 + $0x2c0] sm:$0xff]  ;;  %648 = vmatpush1.msra.mxu0 %v161_v14 }
  0x2e   :  { %v410_v17 = vld [vmem:[%s6249_s1 + $0xac8] sm:$0xff]  ;;  %v409_v19 = vld [vmem:[%s6249_s1 + $0xac0] sm:$0xff]  ;;  %719 = vmatpush1.msra.mxu1 %v417_v15  ;;  %649 = vmatprep.subr.mxu0 %v154_v16 }
  0x2f   :  { %v146_v20 = vld [vmem:[%s6249_s1 + $0x288] sm:$0xff]  ;;  %720 = vmatprep.subr.mxu1 %v410_v17  ;;  %v145_v22 = vld [vmem:[%s6249_s1 + $0x280] sm:$0xff]  ;;  %650 = vmatpush1.msra.mxu0 %v153_v18 }
  0x30   :  { %v402_v21 = vld [vmem:[%s6249_s1 + $0xa88] sm:$0xff]  ;;  %v401_v23 = vld [vmem:[%s6249_s1 + $0xa80] sm:$0xff]  ;;  %721 = vmatpush1.msra.mxu1 %v409_v19  ;;  %651 = vmatprep.subr.mxu0 %v146_v20 }
  0x31   :  { %v138_v24 = vld [vmem:[%s6249_s1 + $0x248] sm:$0xff]  ;;  %722 = vmatprep.subr.mxu1 %v402_v21  ;;  %v137_v26 = vld [vmem:[%s6249_s1 + $0x240] sm:$0xff]  ;;  %652 = vmatpush1.msra.mxu0 %v145_v22 }
  0x32   :  { %v394_v25 = vld [vmem:[%s6249_s1 + $0xa48] sm:$0xff]  ;;  %v393_v27 = vld [vmem:[%s6249_s1 + $0xa40] sm:$0xff]  ;;  %723 = vmatpush1.msra.mxu1 %v401_v23  ;;  %653 = vmatprep.subr.mxu0 %v138_v24 }
  0x33   :  { %v130_v28 = vld [vmem:[%s6249_s1 + $0x208] sm:$0xff]  ;;  %724 = vmatprep.subr.mxu1 %v394_v25  ;;  %v129_v30 = vld [vmem:[%s6249_s1 + $0x200] sm:$0xff]  ;;  %654 = vmatpush1.msra.mxu0 %v137_v26 }
  0x34   :  { %v386_v29 = vld [vmem:[%s6249_s1 + $0xa08] sm:$0xff]  ;;  %v385_v31 = vld [vmem:[%s6249_s1 + $0xa00] sm:$0xff]  ;;  %725 = vmatpush1.msra.mxu1 %v393_v27  ;;  %655 = vmatprep.subr.mxu0 %v130_v28 }
  0x35   :  { %v122_v32 = vld [vmem:[%s6249_s1 + $0x1c8] sm:$0xff]  ;;  %726 = vmatprep.subr.mxu1 %v386_v29  ;;  %v121_v34 = vld [vmem:[%s6249_s1 + $0x1c0] sm:$0xff]  ;;  %656 = vmatpush1.msra.mxu0 %v129_v30  ;;  %v579_v30 = vlaneseq }
  0x36   :  { %v378_v33 = vld [vmem:[%s6249_s1 + $0x9c8] sm:$0xff]  ;;  %v377_v35 = vld [vmem:[%s6249_s1 + $0x9c0] sm:$0xff]  ;;  %727 = vmatpush1.msra.mxu1 %v385_v31  ;;  %657 = vmatprep.subr.mxu0 %v122_v32  ;;  %v4100_v31 = vmov 1983009808  }
  0x37   :  { %v114_v36 = vld [vmem:[%s6249_s1 + $0x188] sm:$0xff]  ;;  %728 = vmatprep.subr.mxu1 %v378_v33  ;;  %v113_v38 = vld [vmem:[%s6249_s1 + $0x180] sm:$0xff]  ;;  %658 = vmatpush1.msra.mxu0 %v121_v34  ;;  %v622_v32 = vunpack.c.l.s4 %v4100_v31  ;;  %v411_v31 = vld [vmem:[%s6249_s1 + $0xad0] sm:$0xff] }
  0x38   :  { %v370_v37 = vld [vmem:[%s6249_s1 + $0x988] sm:$0xff]  ;;  %v369_v39 = vld [vmem:[%s6249_s1 + $0x980] sm:$0xff]  ;;  %729 = vmatpush1.msra.mxu1 %v377_v35  ;;  %659 = vmatprep.subr.mxu0 %v114_v36 }
  0x39   :  { %v106_v40 = vld [vmem:[%s6249_s1 + $0x148] sm:$0xff]  ;;  %730 = vmatprep.subr.mxu1 %v370_v37  ;;  %v105_v42 = vld [vmem:[%s6249_s1 + $0x140] sm:$0xff]  ;;  %660 = vmatpush1.msra.mxu0 %v113_v38 }
  0x3a   :  { %v362_v41 = vld [vmem:[%s6249_s1 + $0x948] sm:$0xff]  ;;  %v361_v43 = vld [vmem:[%s6249_s1 + $0x940] sm:$0xff]  ;;  %731 = vmatpush1.msra.mxu1 %v369_v39  ;;  %661 = vmatprep.subr.mxu0 %v106_v40 }
  0x3b   :  { %v98_v44 = vld [vmem:[%s6249_s1 + $0x108] sm:$0xff]  ;;  %732 = vmatprep.subr.mxu1 %v362_v41  ;;  %v97_v46 = vld [vmem:[%s6249_s1 + $0x100] sm:$0xff]  ;;  %662 = vmatpush1.msra.mxu0 %v105_v42  ;;  %v4457_v41 = vshrl.u32 %v579_v30, 7  ;;  %v623_v42 = vunpack.c.0.s8 %v622_v32  ;;  %v155_v30 = vld [vmem:[%s6249_s1 + $0x2d0] sm:$0xff] }
  0x3c   :  { %v354_v45 = vld [vmem:[%s6249_s1 + $0x908] sm:$0xff]  ;;  %v353_v47 = vld [vmem:[%s6249_s1 + $0x900] sm:$0xff]  ;;  %733 = vmatpush1.msra.mxu1 %v361_v43  ;;  %663 = vmatprep.subr.mxu0 %v98_v44  ;;  %v148_v32 = vld [vmem:[%s6249_s1 + $0x298] sm:$0xff] }
  0x3d   :  { %v90_v48 = vld [vmem:[%s6249_s1 + $0xc8] sm:$0xff]  ;;  %734 = vmatprep.subr.mxu1 %v354_v45  ;;  %v89_v50 = vld [vmem:[%s6249_s1 + $0xc0] sm:$0xff]  ;;  %664 = vmatpush1.msra.mxu0 %v97_v46 }
  0x3e   :  { %v346_v49 = vld [vmem:[%s6249_s1 + $0x8c8] sm:$0xff]  ;;  %v345_v51 = vld [vmem:[%s6249_s1 + $0x8c0] sm:$0xff]  ;;  %735 = vmatpush1.msra.mxu1 %v353_v47  ;;  %665 = vmatprep.subr.mxu0 %v90_v48 }
  0x3f   :  { %v82_v52 = vld [vmem:[%s6249_s1 + $0x88] sm:$0xff]  ;;  %736 = vmatprep.subr.mxu1 %v346_v49  ;;  %v81_v54 = vld [vmem:[%s6249_s1 + $0x80] sm:$0xff]  ;;  %666 = vmatpush1.msra.mxu0 %v89_v50 }
  0x40   :  { %v338_v53 = vld [vmem:[%s6249_s1 + $0x888] sm:$0xff]  ;;  %v337_v55 = vld [vmem:[%s6249_s1 + $0x880] sm:$0xff]  ;;  %737 = vmatpush1.msra.mxu1 %v345_v51  ;;  %667 = vmatprep.subr.mxu0 %v82_v52  ;;  %v626_v52 = vsub.s32 %v623_v42, %v4457_v41  ;;  %v388_v42 = vld [vmem:[%s6249_s1 + $0xa18] sm:$0xff] }
  0x41   :  { %v74_v56 = vld [vmem:[%s6249_s1 + $0x48] sm:$0xff]  ;;  %738 = vmatprep.subr.mxu1 %v338_v53  ;;  %v73_v58 = vld [vmem:[%s6249_s1 + $0x40] sm:$0xff]  ;;  %668 = vmatpush1.msra.mxu0 %v81_v54 }
  0x42   :  { %v330_v57 = vld [vmem:[%s6249_s1 + $0x848] sm:$0xff]  ;;  %v329_v59 = vld [vmem:[%s6249_s1 + $0x840] sm:$0xff]  ;;  %739 = vmatpush1.msra.mxu1 %v337_v55  ;;  %669 = vmatprep.subr.mxu0 %v74_v56 }
  0x43   :  { %v66_v60 = vld [vmem:[%s6249_s1 + $0x8] sm:$0xff]  ;;  %740 = vmatprep.subr.mxu1 %v330_v57  ;;  %v65_v62 = vld [vmem:[%s6249_s1] sm:$0xff]  ;;  %670 = vmatpush1.msra.mxu0 %v73_v58 }
  0x44   :  { %v322_v61 = vld [vmem:[%s6249_s1 + $0x808] sm:$0xff]  ;;  %v321_v63 = vld [vmem:[%s6249_s1 + $0x800] sm:$0xff]  ;;  %741 = vmatpush1.msra.mxu1 %v329_v59  ;;  %671 = vmatprep.subr.mxu0 %v66_v60 }
  0x45   :  { %v314_v0 = vld [vmem:[%s6249_s1 + $0x7c8] sm:$0xff]  ;;  %742 = vmatprep.subr.mxu1 %v322_v61  ;;  %v313_v2 = vld [vmem:[%s6249_s1 + $0x7c0] sm:$0xff]  ;;  %672 = vmatpush1.msra.mxu0 %v65_v62 }
  0x46   :  { %v570_v1 = vld [vmem:[%s6249_s1 + $0xfc8] sm:$0xff]  ;;  %v569_v3 = vld [vmem:[%s6249_s1 + $0xfc0] sm:$0xff]  ;;  %743 = vmatpush1.msra.mxu1 %v321_v63  ;;  %673 = vmatprep.subr.mxu0 %v314_v0 }
  0x47   :  { %v306_v4 = vld [vmem:[%s6249_s1 + $0x788] sm:$0xff]  ;;  %744 = vmatprep.subr.mxu1 %v570_v1  ;;  %v305_v6 = vld [vmem:[%s6249_s1 + $0x780] sm:$0xff]  ;;  %674 = vmatpush2.msra.mxu0 %v313_v2 }
  0x48   :  { %v562_v5 = vld [vmem:[%s6249_s1 + $0xf88] sm:$0xff]  ;;  %v561_v7 = vld [vmem:[%s6249_s1 + $0xf80] sm:$0xff]  ;;  %745 = vmatpush2.msra.mxu1 %v569_v3  ;;  %675 = vmatprep.subr.mxu0 %v306_v4 }
  0x49   :  { %v298_v8 = vld [vmem:[%s6249_s1 + $0x748] sm:$0xff]  ;;  %746 = vmatprep.subr.mxu1 %v562_v5  ;;  %v297_v10 = vld [vmem:[%s6249_s1 + $0x740] sm:$0xff]  ;;  %676 = vmatpush2.msra.mxu0 %v305_v6 }
  0x4a   :  { %v554_v9 = vld [vmem:[%s6249_s1 + $0xf48] sm:$0xff]  ;;  %v553_v11 = vld [vmem:[%s6249_s1 + $0xf40] sm:$0xff]  ;;  %747 = vmatpush2.msra.mxu1 %v561_v7  ;;  %677 = vmatprep.subr.mxu0 %v298_v8 }
  0x4b   :  { %v290_v12 = vld [vmem:[%s6249_s1 + $0x708] sm:$0xff]  ;;  %748 = vmatprep.subr.mxu1 %v554_v9  ;;  %v289_v14 = vld [vmem:[%s6249_s1 + $0x700] sm:$0xff]  ;;  %678 = vmatpush2.msra.mxu0 %v297_v10 }
  0x4c   :  { %v546_v13 = vld [vmem:[%s6249_s1 + $0xf08] sm:$0xff]  ;;  %v545_v15 = vld [vmem:[%s6249_s1 + $0xf00] sm:$0xff]  ;;  %749 = vmatpush2.msra.mxu1 %v553_v11  ;;  %679 = vmatprep.subr.mxu0 %v290_v12  ;;  %v188_v12 = vld [vmem:[%s6249_s1 + $0x3d8] sm:$0xff] }
  0x4d   :  { %v282_v16 = vld [vmem:[%s6249_s1 + $0x6c8] sm:$0xff]  ;;  %750 = vmatprep.subr.mxu1 %v546_v13  ;;  %v281_v18 = vld [vmem:[%s6249_s1 + $0x6c0] sm:$0xff]  ;;  %680 = vmatpush2.msra.mxu0 %v289_v14  ;;  %v444_v13 = vld [vmem:[%s6249_s1 + $0xbd8] sm:$0xff] }
  0x4e   :  { %v538_v17 = vld [vmem:[%s6249_s1 + $0xec8] sm:$0xff]  ;;  %v537_v19 = vld [vmem:[%s6249_s1 + $0xec0] sm:$0xff]  ;;  %751 = vmatpush2.msra.mxu1 %v545_v15  ;;  %681 = vmatprep.subr.mxu0 %v282_v16  ;;  %v187_v14 = vld [vmem:[%s6249_s1 + $0x3d0] sm:$0xff] }
  0x4f   :  { %v274_v20 = vld [vmem:[%s6249_s1 + $0x688] sm:$0xff]  ;;  %752 = vmatprep.subr.mxu1 %v538_v17  ;;  %v273_v22 = vld [vmem:[%s6249_s1 + $0x680] sm:$0xff]  ;;  %682 = vmatpush2.msra.mxu0 %v281_v18  ;;  %v443_v15 = vld [vmem:[%s6249_s1 + $0xbd0] sm:$0xff] }
  0x50   :  { %v530_v21 = vld [vmem:[%s6249_s1 + $0xe88] sm:$0xff]  ;;  %v529_v23 = vld [vmem:[%s6249_s1 + $0xe80] sm:$0xff]  ;;  %753 = vmatpush2.msra.mxu1 %v537_v19  ;;  %683 = vmatprep.subr.mxu0 %v274_v20  ;;  %v180_v16 = vld [vmem:[%s6249_s1 + $0x398] sm:$0xff] }
  0x51   :  { %v266_v24 = vld [vmem:[%s6249_s1 + $0x648] sm:$0xff]  ;;  %754 = vmatprep.subr.mxu1 %v530_v21  ;;  %v265_v26 = vld [vmem:[%s6249_s1 + $0x640] sm:$0xff]  ;;  %684 = vmatpush2.msra.mxu0 %v273_v22  ;;  %v436_v17 = vld [vmem:[%s6249_s1 + $0xb98] sm:$0xff] }
  0x52   :  { %v522_v25 = vld [vmem:[%s6249_s1 + $0xe48] sm:$0xff]  ;;  %v521_v27 = vld [vmem:[%s6249_s1 + $0xe40] sm:$0xff]  ;;  %755 = vmatpush2.msra.mxu1 %v529_v23  ;;  %685 = vmatprep.subr.mxu0 %v266_v24  ;;  %v179_v18 = vld [vmem:[%s6249_s1 + $0x390] sm:$0xff] }
  0x53   :  { %v258_v28 = vld [vmem:[%s6249_s1 + $0x608] sm:$0xff]  ;;  %756 = vmatprep.subr.mxu1 %v522_v25  ;;  %v257_v33 = vld [vmem:[%s6249_s1 + $0x600] sm:$0xff]  ;;  %686 = vmatpush2.msra.mxu0 %v265_v26  ;;  %v435_v19 = vld [vmem:[%s6249_s1 + $0xb90] sm:$0xff] }
  0x54   :  { %v514_v29 = vld [vmem:[%s6249_s1 + $0xe08] sm:$0xff]  ;;  %v513_v34 = vld [vmem:[%s6249_s1 + $0xe00] sm:$0xff]  ;;  %757 = vmatpush2.msra.mxu1 %v521_v27  ;;  %687 = vmatprep.subr.mxu0 %v258_v28  ;;  %v172_v20 = vld [vmem:[%s6249_s1 + $0x358] sm:$0xff] }
  0x55   :  { %v250_v35 = vld [vmem:[%s6249_s1 + $0x5c8] sm:$0xff]  ;;  %758 = vmatprep.subr.mxu1 %v514_v29  ;;  %v249_v37 = vld [vmem:[%s6249_s1 + $0x5c0] sm:$0xff]  ;;  %688 = vmatpush2.msra.mxu0 %v257_v33  ;;  %v428_v21 = vld [vmem:[%s6249_s1 + $0xb58] sm:$0xff] }
  0x56   :  { %v506_v36 = vld [vmem:[%s6249_s1 + $0xdc8] sm:$0xff]  ;;  %v505_v38 = vld [vmem:[%s6249_s1 + $0xdc0] sm:$0xff]  ;;  %759 = vmatpush2.msra.mxu1 %v513_v34  ;;  %689 = vmatprep.subr.mxu0 %v250_v35  ;;  %v171_v22 = vld [vmem:[%s6249_s1 + $0x350] sm:$0xff] }
  0x57   :  { %v242_v39 = vld [vmem:[%s6249_s1 + $0x588] sm:$0xff]  ;;  %760 = vmatprep.subr.mxu1 %v506_v36  ;;  %v241_v43 = vld [vmem:[%s6249_s1 + $0x580] sm:$0xff]  ;;  %690 = vmatpush2.msra.mxu0 %v249_v37  ;;  %v427_v23 = vld [vmem:[%s6249_s1 + $0xb50] sm:$0xff] }
  0x58   :  { %v498_v40 = vld [vmem:[%s6249_s1 + $0xd88] sm:$0xff]  ;;  %v497_v44 = vld [vmem:[%s6249_s1 + $0xd80] sm:$0xff]  ;;  %761 = vmatpush2.msra.mxu1 %v505_v38  ;;  %691 = vmatprep.subr.mxu0 %v242_v39  ;;  %v164_v24 = vld [vmem:[%s6249_s1 + $0x318] sm:$0xff] }
  0x59   :  { %v234_v45 = vld [vmem:[%s6249_s1 + $0x548] sm:$0xff]  ;;  %762 = vmatprep.subr.mxu1 %v498_v40  ;;  %v233_v47 = vld [vmem:[%s6249_s1 + $0x540] sm:$0xff]  ;;  %692 = vmatpush2.msra.mxu0 %v241_v43  ;;  %v420_v25 = vld [vmem:[%s6249_s1 + $0xb18] sm:$0xff] }
  0x5a   :  { %v490_v46 = vld [vmem:[%s6249_s1 + $0xd48] sm:$0xff]  ;;  %v489_v48 = vld [vmem:[%s6249_s1 + $0xd40] sm:$0xff]  ;;  %763 = vmatpush2.msra.mxu1 %v497_v44  ;;  %693 = vmatprep.subr.mxu0 %v234_v45  ;;  %v163_v26 = vld [vmem:[%s6249_s1 + $0x310] sm:$0xff] }
  0x5b   :  { %v64_v49 = vld [vmem:[%s6248_s0] sm:$0xff]  ;;  %v226_v50 = vld [vmem:[%s6249_s1 + $0x508] sm:$0xff]  ;;  %764 = vmatprep.subr.mxu1 %v490_v46  ;;  %694 = vmatpush2.msra.mxu0 %v233_v47  ;;  %v419_v27 = vld [vmem:[%s6249_s1 + $0xb10] sm:$0xff] }
  0x5c   :  { %v482_v51 = vld [vmem:[%s6249_s1 + $0xd08] sm:$0xff]  ;;  %v225_v53 = vld [vmem:[%s6249_s1 + $0x500] sm:$0xff]  ;;  %765 = vmatpush2.msra.mxu1 %v489_v48  ;;  %v620_v57 = vcombine.high %v64_v49, %v64_v49  ;;  %695 = vmatprep.subr.mxu0 %v226_v50  ;;  %v4511_v62 = vrot.slane %v64_v49, %v626_v52  ;;  %v156_v28 = vld [vmem:[%s6249_s1 + $0x2d8] sm:$0xff] }
  0x5d   :  { %v481_v54 = vld [vmem:[%s6249_s1 + $0xd00] sm:$0xff]  ;;  %v218_v55 = vld [vmem:[%s6249_s1 + $0x4c8] sm:$0xff]  ;;  %766 = vmatprep.subr.mxu1 %v482_v51  ;;  %696 = vmatpush2.msra.mxu0 %v225_v53  ;;  %v412_v29 = vld [vmem:[%s6249_s1 + $0xad8] sm:$0xff] }
  0x5e   :  { %v474_v56 = vld [vmem:[%s6249_s1 + $0xcc8] sm:$0xff]  ;;  %v217_v58 = vld [vmem:[%s6249_s1 + $0x4c0] sm:$0xff]  ;;  %767 = vmatpush2.msra.mxu1 %v481_v54  ;;  %697 = vmatprep.subr.mxu0 %v218_v55  ;;  %v4525_v3 = vrot.slane %v620_v57, %v626_v52  ;;  %v4541_v8 = vcombine.high %v4511_v62, %v4511_v62  ;;  %v404_v33 = vld [vmem:[%s6249_s1 + $0xa98] sm:$0xff] }
  0x5f   :  { %v473_v59 = vld [vmem:[%s6249_s1 + $0xcc0] sm:$0xff]  ;;  %v210_v60 = vld [vmem:[%s6249_s1 + $0x488] sm:$0xff]  ;;  %768 = vmatprep.subr.mxu1 %v474_v56  ;;  %698 = vmatpush2.msra.mxu0 %v217_v58  ;;  %v147_v34 = vld [vmem:[%s6249_s1 + $0x290] sm:$0xff] }
  0x60   :  { %v466_v61 = vld [vmem:[%s6249_s1 + $0xc88] sm:$0xff]  ;;  %v209_v63 = vld [vmem:[%s6249_s1 + $0x480] sm:$0xff]  ;;  %769 = vmatpush2.msra.mxu1 %v473_v59  ;;  %699 = vmatprep.subr.mxu0 %v210_v60  ;;  %v4551_v11 = vcombine.high %v4525_v3, %v4525_v3  ;;  %v403_v35 = vld [vmem:[%s6249_s1 + $0xa90] sm:$0xff] }
  0x61   :  { %v465_v0 = vld [vmem:[%s6249_s1 + $0xc80] sm:$0xff]  ;;  %v202_v1 = vld [vmem:[%s6249_s1 + $0x448] sm:$0xff]  ;;  %770 = vmatprep.subr.mxu1 %v466_v61  ;;  %700 = vmatpush2.msra.mxu0 %v209_v63  ;;  %v140_v36 = vld [vmem:[%s6249_s1 + $0x258] sm:$0xff] }
  0x62   :  { %v458_v2 = vld [vmem:[%s6249_s1 + $0xc48] sm:$0xff]  ;;  %v201_v4 = vld [vmem:[%s6249_s1 + $0x440] sm:$0xff]  ;;  %771 = vmatpush2.msra.mxu1 %v465_v0  ;;  %701 = vmatprep.subr.mxu0 %v202_v1  ;;  %v396_v37 = vld [vmem:[%s6249_s1 + $0xa58] sm:$0xff] }
  0x63   :  { %v457_v5 = vld [vmem:[%s6249_s1 + $0xc40] sm:$0xff]  ;;  %v194_v6 = vld [vmem:[%s6249_s1 + $0x408] sm:$0xff]  ;;  %772 = vmatprep.subr.mxu1 %v458_v2  ;;  %702 = vmatpush2.msra.mxu0 %v201_v4  ;;  %v139_v38 = vld [vmem:[%s6249_s1 + $0x250] sm:$0xff] }
  0x64   :  { %v450_v7 = vld [vmem:[%s6249_s1 + $0xc08] sm:$0xff]  ;;  %v193_v9 = vld [vmem:[%s6249_s1 + $0x400] sm:$0xff]  ;;  %773 = vmatpush2.msra.mxu1 %v457_v5  ;;  %703 = vmatprep.subr.mxu0 %v194_v6  ;;  %v395_v39 = vld [vmem:[%s6249_s1 + $0xa50] sm:$0xff] }
  0x65   :  { %v449_v10 = vld [vmem:[%s6249_s1 + $0xc00] sm:$0xff]  ;;  %774 = vmatprep.subr.mxu1 %v450_v7  ;;  %704 = vmatpush2.msra.mxu0 %v193_v9  ;;  %v132_v40 = vld [vmem:[%s6249_s1 + $0x218] sm:$0xff]  ;;  %v131_v43 = vld [vmem:[%s6249_s1 + $0x210] sm:$0xff] }
  0x66   :  { %705 = vmatprep.mubr.f32.mxu0 %v4541_v8  ;;  %775 = vmatpush2.msra.mxu1 %v449_v10  ;;  %v387_v44 = vld [vmem:[%s6249_s1 + $0xa10] sm:$0xff]  ;;  %v124_v45 = vld [vmem:[%s6249_s1 + $0x1d8] sm:$0xff] }
  0x67   :  { %706 = vmatmul.mubr.f32.vlgmr.msra.gmra.mxu0 %v4511_v62  ;;  %776 = vmatprep.mubr.f32.mxu1 %v4551_v11  ;;  %v380_v46 = vld [vmem:[%s6249_s1 + $0x9d8] sm:$0xff]  ;;  %v123_v47 = vld [vmem:[%s6249_s1 + $0x1d0] sm:$0xff] }
  0x68   :  { %783 = vmatprep.subr.mxu0 %v188_v12  ;;  %854 = vmatprep.subr.mxu1 %v444_v13  ;;  %v379_v48 = vld [vmem:[%s6249_s1 + $0x9d0] sm:$0xff]  ;;  %v116_v49 = vld [vmem:[%s6249_s1 + $0x198] sm:$0xff] }
  0x69   :  { %777 = vmatmul.mubr.f32.vlgmr.msra.gmra.mxu1 %v4525_v3  ;;  %784 = vmatpush1.msra.mxu0 %v187_v14  ;;  %v372_v50 = vld [vmem:[%s6249_s1 + $0x998] sm:$0xff]  ;;  %v115_v51 = vld [vmem:[%s6249_s1 + $0x190] sm:$0xff] }
  0x6a   :  { %855 = vmatpush1.msra.mxu1 %v443_v15  ;;  %785 = vmatprep.subr.mxu0 %v180_v16  ;;  %v371_v52 = vld [vmem:[%s6249_s1 + $0x990] sm:$0xff]  ;;  %v108_v53 = vld [vmem:[%s6249_s1 + $0x158] sm:$0xff] }
  0x6b   :  { %856 = vmatprep.subr.mxu1 %v436_v17  ;;  %786 = vmatpush1.msra.mxu0 %v179_v18  ;;  %v364_v54 = vld [vmem:[%s6249_s1 + $0x958] sm:$0xff]  ;;  %v107_v55 = vld [vmem:[%s6249_s1 + $0x150] sm:$0xff] }
  0x6c   :  { %857 = vmatpush1.msra.mxu1 %v435_v19  ;;  %787 = vmatprep.subr.mxu0 %v172_v20  ;;  %v363_v56 = vld [vmem:[%s6249_s1 + $0x950] sm:$0xff]  ;;  %v100_v57 = vld [vmem:[%s6249_s1 + $0x118] sm:$0xff] }
  0x6d   :  { %858 = vmatprep.subr.mxu1 %v428_v21  ;;  %788 = vmatpush1.msra.mxu0 %v171_v22  ;;  %v356_v58 = vld [vmem:[%s6249_s1 + $0x918] sm:$0xff]  ;;  %v99_v59 = vld [vmem:[%s6249_s1 + $0x110] sm:$0xff] }
  0x6e   :  { %859 = vmatpush1.msra.mxu1 %v427_v23  ;;  %789 = vmatprep.subr.mxu0 %v164_v24  ;;  %v355_v60 = vld [vmem:[%s6249_s1 + $0x910] sm:$0xff]  ;;  %v92_v61 = vld [vmem:[%s6249_s1 + $0xd8] sm:$0xff] }
  0x6f   :  { %860 = vmatprep.subr.mxu1 %v420_v25  ;;  %790 = vmatpush1.msra.mxu0 %v163_v26  ;;  %v348_v63 = vld [vmem:[%s6249_s1 + $0x8d8] sm:$0xff]  ;;  %v91_v0 = vld [vmem:[%s6249_s1 + $0xd0] sm:$0xff] }
  0x70   :  { %861 = vmatpush1.msra.mxu1 %v419_v27  ;;  %791 = vmatprep.subr.mxu0 %v156_v28  ;;  %v347_v1 = vld [vmem:[%s6249_s1 + $0x8d0] sm:$0xff]  ;;  %v84_v2 = vld [vmem:[%s6249_s1 + $0x98] sm:$0xff] }
  0x71   :  { %862 = vmatprep.subr.mxu1 %v412_v29  ;;  %792 = vmatpush1.msra.mxu0 %v155_v30  ;;  %v340_v4 = vld [vmem:[%s6249_s1 + $0x898] sm:$0xff]  ;;  %v83_v5 = vld [vmem:[%s6249_s1 + $0x90] sm:$0xff] }
  0x72   :  { %863 = vmatpush1.msra.mxu1 %v411_v31  ;;  %793 = vmatprep.subr.mxu0 %v148_v32  ;;  %v339_v6 = vld [vmem:[%s6249_s1 + $0x890] sm:$0xff]  ;;  %v76_v7 = vld [vmem:[%s6249_s1 + $0x58] sm:$0xff] }
  0x73   :  { %864 = vmatprep.subr.mxu1 %v404_v33  ;;  %794 = vmatpush1.msra.mxu0 %v147_v34  ;;  %v332_v9 = vld [vmem:[%s6249_s1 + $0x858] sm:$0xff]  ;;  %v75_v10 = vld [vmem:[%s6249_s1 + $0x50] sm:$0xff] }
  0x74   :  { %865 = vmatpush1.msra.mxu1 %v403_v35  ;;  %795 = vmatprep.subr.mxu0 %v140_v36  ;;  %v331_v12 = vld [vmem:[%s6249_s1 + $0x850] sm:$0xff]  ;;  %v68_v13 = vld [vmem:[%s6249_s1 + $0x18] sm:$0xff] }
  0x75   :  { %866 = vmatprep.subr.mxu1 %v396_v37  ;;  %796 = vmatpush1.msra.mxu0 %v139_v38  ;;  %v324_v14 = vld [vmem:[%s6249_s1 + $0x818] sm:$0xff]  ;;  %v67_v15 = vld [vmem:[%s6249_s1 + $0x10] sm:$0xff] }
  0x76   :  { %867 = vmatpush1.msra.mxu1 %v395_v39  ;;  %797 = vmatprep.subr.mxu0 %v132_v40  ;;  %v323_v16 = vld [vmem:[%s6249_s1 + $0x810] sm:$0xff]  ;;  %v316_v17 = vld [vmem:[%s6249_s1 + $0x7d8] sm:$0xff] }
  0x77   :  { %868 = vmatprep.subr.mxu1 %v388_v42  ;;  %798 = vmatpush1.msra.mxu0 %v131_v43  ;;  %v572_v18 = vld [vmem:[%s6249_s1 + $0xfd8] sm:$0xff]  ;;  %v315_v19 = vld [vmem:[%s6249_s1 + $0x7d0] sm:$0xff] }
  0x78   :  { %869 = vmatpush1.msra.mxu1 %v387_v44  ;;  %799 = vmatprep.subr.mxu0 %v124_v45  ;;  %v571_v20 = vld [vmem:[%s6249_s1 + $0xfd0] sm:$0xff]  ;;  %v308_v21 = vld [vmem:[%s6249_s1 + $0x798] sm:$0xff] }
  0x79   :  { %870 = vmatprep.subr.mxu1 %v380_v46  ;;  %800 = vmatpush1.msra.mxu0 %v123_v47  ;;  %v564_v22 = vld [vmem:[%s6249_s1 + $0xf98] sm:$0xff]  ;;  %v307_v23 = vld [vmem:[%s6249_s1 + $0x790] sm:$0xff] }
  0x7a   :  { %871 = vmatpush1.msra.mxu1 %v379_v48  ;;  %801 = vmatprep.subr.mxu0 %v116_v49  ;;  %v563_v24 = vld [vmem:[%s6249_s1 + $0xf90] sm:$0xff]  ;;  %v300_v25 = vld [vmem:[%s6249_s1 + $0x758] sm:$0xff] }
  0x7b   :  { %872 = vmatprep.subr.mxu1 %v372_v50  ;;  %802 = vmatpush1.msra.mxu0 %v115_v51  ;;  %v556_v26 = vld [vmem:[%s6249_s1 + $0xf58] sm:$0xff]  ;;  %v299_v27 = vld [vmem:[%s6249_s1 + $0x750] sm:$0xff] }
  0x7c   :  { %873 = vmatpush1.msra.mxu1 %v371_v52  ;;  %803 = vmatprep.subr.mxu0 %v108_v53  ;;  %v555_v28 = vld [vmem:[%s6249_s1 + $0xf50] sm:$0xff]  ;;  %v292_v29 = vld [vmem:[%s6249_s1 + $0x718] sm:$0xff] }
  0x7d   :  { %874 = vmatprep.subr.mxu1 %v364_v54  ;;  %804 = vmatpush1.msra.mxu0 %v107_v55  ;;  %v548_v30 = vld [vmem:[%s6249_s1 + $0xf18] sm:$0xff]  ;;  %v291_v31 = vld [vmem:[%s6249_s1 + $0x710] sm:$0xff] }
  0x7e   :  { %875 = vmatpush1.msra.mxu1 %v363_v56  ;;  %805 = vmatprep.subr.mxu0 %v100_v57  ;;  %v547_v32 = vld [vmem:[%s6249_s1 + $0xf10] sm:$0xff]  ;;  %v284_v33 = vld [vmem:[%s6249_s1 + $0x6d8] sm:$0xff] }
  0x7f   :  { %876 = vmatprep.subr.mxu1 %v356_v58  ;;  %806 = vmatpush1.msra.mxu0 %v99_v59  ;;  %v540_v34 = vld [vmem:[%s6249_s1 + $0xed8] sm:$0xff]  ;;  %v283_v35 = vld [vmem:[%s6249_s1 + $0x6d0] sm:$0xff] }
  0x80   :  { %877 = vmatpush1.msra.mxu1 %v355_v60  ;;  %807 = vmatprep.subr.mxu0 %v92_v61  ;;  %v539_v36 = vld [vmem:[%s6249_s1 + $0xed0] sm:$0xff]  ;;  %v276_v37 = vld [vmem:[%s6249_s1 + $0x698] sm:$0xff] }
  0x81   :  { %878 = vmatprep.subr.mxu1 %v348_v63  ;;  %808 = vmatpush1.msra.mxu0 %v91_v0  ;;  %v532_v38 = vld [vmem:[%s6249_s1 + $0xe98] sm:$0xff]  ;;  %v275_v39 = vld [vmem:[%s6249_s1 + $0x690] sm:$0xff] }
  0x82   :  { %879 = vmatpush1.msra.mxu1 %v347_v1  ;;  %809 = vmatprep.subr.mxu0 %v84_v2  ;;  %v531_v40 = vld [vmem:[%s6249_s1 + $0xe90] sm:$0xff]  ;;  %v268_v42 = vld [vmem:[%s6249_s1 + $0x658] sm:$0xff] }
  0x83   :  { %880 = vmatprep.subr.mxu1 %v340_v4  ;;  %810 = vmatpush1.msra.mxu0 %v83_v5  ;;  %v524_v43 = vld [vmem:[%s6249_s1 + $0xe58] sm:$0xff]  ;;  %v267_v44 = vld [vmem:[%s6249_s1 + $0x650] sm:$0xff] }
  0x84   :  { %881 = vmatpush1.msra.mxu1 %v339_v6  ;;  %811 = vmatprep.subr.mxu0 %v76_v7  ;;  %v523_v45 = vld [vmem:[%s6249_s1 + $0xe50] sm:$0xff]  ;;  %v260_v46 = vld [vmem:[%s6249_s1 + $0x618] sm:$0xff] }
  0x85   :  { %882 = vmatprep.subr.mxu1 %v332_v9  ;;  %812 = vmatpush1.msra.mxu0 %v75_v10  ;;  %v516_v47 = vld [vmem:[%s6249_s1 + $0xe18] sm:$0xff]  ;;  %v259_v48 = vld [vmem:[%s6249_s1 + $0x610] sm:$0xff] }
  0x86   :  { %883 = vmatpush1.msra.mxu1 %v331_v12  ;;  %813 = vmatprep.subr.mxu0 %v68_v13  ;;  %v515_v49 = vld [vmem:[%s6249_s1 + $0xe10] sm:$0xff]  ;;  %v252_v50 = vld [vmem:[%s6249_s1 + $0x5d8] sm:$0xff] }
  0x87   :  { %884 = vmatprep.subr.mxu1 %v324_v14  ;;  %814 = vmatpush1.msra.mxu0 %v67_v15  ;;  %v508_v51 = vld [vmem:[%s6249_s1 + $0xdd8] sm:$0xff]  ;;  %v251_v52 = vld [vmem:[%s6249_s1 + $0x5d0] sm:$0xff] }
  0x88   :  { %885 = vmatpush1.msra.mxu1 %v323_v16  ;;  %815 = vmatprep.subr.mxu0 %v316_v17  ;;  %v507_v53 = vld [vmem:[%s6249_s1 + $0xdd0] sm:$0xff]  ;;  %v244_v54 = vld [vmem:[%s6249_s1 + $0x598] sm:$0xff] }
  0x89   :  { %886 = vmatprep.subr.mxu1 %v572_v18  ;;  %816 = vmatpush2.msra.mxu0 %v315_v19  ;;  %v500_v55 = vld [vmem:[%s6249_s1 + $0xd98] sm:$0xff]  ;;  %v243_v56 = vld [vmem:[%s6249_s1 + $0x590] sm:$0xff] }
  0x8a   :  { %887 = vmatpush2.msra.mxu1 %v571_v20  ;;  %817 = vmatprep.subr.mxu0 %v308_v21  ;;  %v499_v57 = vld [vmem:[%s6249_s1 + $0xd90] sm:$0xff]  ;;  %v236_v58 = vld [vmem:[%s6249_s1 + $0x558] sm:$0xff] }
  0x8b   :  { %888 = vmatprep.subr.mxu1 %v564_v22  ;;  %818 = vmatpush2.msra.mxu0 %v307_v23  ;;  %v492_v59 = vld [vmem:[%s6249_s1 + $0xd58] sm:$0xff]  ;;  %v235_v60 = vld [vmem:[%s6249_s1 + $0x550] sm:$0xff]  ;;  %v190_v22 = vld [vmem:[%s6249_s1 + $0x3e8] sm:$0xff] }
  0x8c   :  { %889 = vmatpush2.msra.mxu1 %v563_v24  ;;  %819 = vmatprep.subr.mxu0 %v300_v25  ;;  %v491_v61 = vld [vmem:[%s6249_s1 + $0xd50] sm:$0xff]  ;;  %v228_v63 = vld [vmem:[%s6249_s1 + $0x518] sm:$0xff]  ;;  %v446_v23 = vld [vmem:[%s6249_s1 + $0xbe8] sm:$0xff] }
  0x8d   :  { %890 = vmatprep.subr.mxu1 %v556_v26  ;;  %820 = vmatpush2.msra.mxu0 %v299_v27  ;;  %v484_v0 = vld [vmem:[%s6249_s1 + $0xd18] sm:$0xff]  ;;  %v227_v1 = vld [vmem:[%s6249_s1 + $0x510] sm:$0xff]  ;;  %v189_v24 = vld [vmem:[%s6249_s1 + $0x3e0] sm:$0xff] }
  0x8e   :  { %891 = vmatpush2.msra.mxu1 %v555_v28  ;;  %821 = vmatprep.subr.mxu0 %v292_v29  ;;  %v483_v2 = vld [vmem:[%s6249_s1 + $0xd10] sm:$0xff]  ;;  %v220_v4 = vld [vmem:[%s6249_s1 + $0x4d8] sm:$0xff]  ;;  %v445_v25 = vld [vmem:[%s6249_s1 + $0xbe0] sm:$0xff] }
  0x8f   :  { %892 = vmatprep.subr.mxu1 %v548_v30  ;;  %822 = vmatpush2.msra.mxu0 %v291_v31  ;;  %v476_v5 = vld [vmem:[%s6249_s1 + $0xcd8] sm:$0xff]  ;;  %v219_v6 = vld [vmem:[%s6249_s1 + $0x4d0] sm:$0xff]  ;;  %v182_v26 = vld [vmem:[%s6249_s1 + $0x3a8] sm:$0xff] }
  0x90   :  { %893 = vmatpush2.msra.mxu1 %v547_v32  ;;  %823 = vmatprep.subr.mxu0 %v284_v33  ;;  %v475_v7 = vld [vmem:[%s6249_s1 + $0xcd0] sm:$0xff]  ;;  %v212_v9 = vld [vmem:[%s6249_s1 + $0x498] sm:$0xff]  ;;  %v438_v27 = vld [vmem:[%s6249_s1 + $0xba8] sm:$0xff] }
  0x91   :  { %894 = vmatprep.subr.mxu1 %v540_v34  ;;  %824 = vmatpush2.msra.mxu0 %v283_v35  ;;  %v468_v10 = vld [vmem:[%s6249_s1 + $0xc98] sm:$0xff]  ;;  %v211_v12 = vld [vmem:[%s6249_s1 + $0x490] sm:$0xff]  ;;  %v181_v28 = vld [vmem:[%s6249_s1 + $0x3a0] sm:$0xff] }
  0x92   :  { %895 = vmatpush2.msra.mxu1 %v539_v36  ;;  %825 = vmatprep.subr.mxu0 %v276_v37  ;;  %v467_v13 = vld [vmem:[%s6249_s1 + $0xc90] sm:$0xff]  ;;  %v204_v14 = vld [vmem:[%s6249_s1 + $0x458] sm:$0xff]  ;;  %v437_v29 = vld [vmem:[%s6249_s1 + $0xba0] sm:$0xff] }
  0x93   :  { %896 = vmatprep.subr.mxu1 %v532_v38  ;;  %826 = vmatpush2.msra.mxu0 %v275_v39  ;;  %v460_v15 = vld [vmem:[%s6249_s1 + $0xc58] sm:$0xff]  ;;  %v203_v16 = vld [vmem:[%s6249_s1 + $0x450] sm:$0xff]  ;;  %v174_v30 = vld [vmem:[%s6249_s1 + $0x368] sm:$0xff] }
  0x94   :  { %897 = vmatpush2.msra.mxu1 %v531_v40  ;;  %827 = vmatprep.subr.mxu0 %v268_v42  ;;  %v459_v17 = vld [vmem:[%s6249_s1 + $0xc50] sm:$0xff]  ;;  %v196_v18 = vld [vmem:[%s6249_s1 + $0x418] sm:$0xff]  ;;  %v430_v31 = vld [vmem:[%s6249_s1 + $0xb68] sm:$0xff] }
  0x95   :  { %898 = vmatprep.subr.mxu1 %v524_v43  ;;  %828 = vmatpush2.msra.mxu0 %v267_v44  ;;  %v452_v19 = vld [vmem:[%s6249_s1 + $0xc18] sm:$0xff]  ;;  %v195_v20 = vld [vmem:[%s6249_s1 + $0x410] sm:$0xff]  ;;  %v173_v32 = vld [vmem:[%s6249_s1 + $0x360] sm:$0xff] }
  0x96   :  { %899 = vmatpush2.msra.mxu1 %v523_v45  ;;  %829 = vmatprep.subr.mxu0 %v260_v46  ;;  %v451_v21 = vld [vmem:[%s6249_s1 + $0xc10] sm:$0xff]  ;;  %v429_v33 = vld [vmem:[%s6249_s1 + $0xb60] sm:$0xff]  ;;  %v166_v34 = vld [vmem:[%s6249_s1 + $0x328] sm:$0xff] }
  0x97   :  { %900 = vmatprep.subr.mxu1 %v516_v47  ;;  %830 = vmatpush2.msra.mxu0 %v259_v48  ;;  %v422_v35 = vld [vmem:[%s6249_s1 + $0xb28] sm:$0xff]  ;;  %v165_v36 = vld [vmem:[%s6249_s1 + $0x320] sm:$0xff] }
  0x98   :  { %901 = vmatpush2.msra.mxu1 %v515_v49  ;;  %831 = vmatprep.subr.mxu0 %v252_v50  ;;  %v421_v37 = vld [vmem:[%s6249_s1 + $0xb20] sm:$0xff]  ;;  %v158_v38 = vld [vmem:[%s6249_s1 + $0x2e8] sm:$0xff] }
  0x99   :  { %902 = vmatprep.subr.mxu1 %v508_v51  ;;  %832 = vmatpush2.msra.mxu0 %v251_v52  ;;  %v414_v39 = vld [vmem:[%s6249_s1 + $0xae8] sm:$0xff]  ;;  %v157_v40 = vld [vmem:[%s6249_s1 + $0x2e0] sm:$0xff] }
  0x9a   :  { %903 = vmatpush2.msra.mxu1 %v507_v53  ;;  %833 = vmatprep.subr.mxu0 %v244_v54  ;;  %v413_v42 = vld [vmem:[%s6249_s1 + $0xae0] sm:$0xff]  ;;  %v150_v43 = vld [vmem:[%s6249_s1 + $0x2a8] sm:$0xff] }
  0x9b   :  { %904 = vmatprep.subr.mxu1 %v500_v55  ;;  %834 = vmatpush2.msra.mxu0 %v243_v56  ;;  %v406_v44 = vld [vmem:[%s6249_s1 + $0xaa8] sm:$0xff]  ;;  %v149_v45 = vld [vmem:[%s6249_s1 + $0x2a0] sm:$0xff] }
  0x9c   :  { %905 = vmatpush2.msra.mxu1 %v499_v57  ;;  %835 = vmatprep.subr.mxu0 %v236_v58  ;;  %v405_v46 = vld [vmem:[%s6249_s1 + $0xaa0] sm:$0xff]  ;;  %v142_v47 = vld [vmem:[%s6249_s1 + $0x268] sm:$0xff] }
  0x9d   :  { %906 = vmatprep.subr.mxu1 %v492_v59  ;;  %836 = vmatpush2.msra.mxu0 %v235_v60  ;;  %v398_v48 = vld [vmem:[%s6249_s1 + $0xa68] sm:$0xff]  ;;  %v141_v49 = vld [vmem:[%s6249_s1 + $0x260] sm:$0xff] }
  0x9e   :  { %907 = vmatpush2.msra.mxu1 %v491_v61  ;;  %837 = vmatprep.subr.mxu0 %v228_v63  ;;  %v397_v50 = vld [vmem:[%s6249_s1 + $0xa60] sm:$0xff]  ;;  %v134_v51 = vld [vmem:[%s6249_s1 + $0x228] sm:$0xff] }
  0x9f   :  { %908 = vmatprep.subr.mxu1 %v484_v0  ;;  %838 = vmatpush2.msra.mxu0 %v227_v1  ;;  %v390_v52 = vld [vmem:[%s6249_s1 + $0xa28] sm:$0xff]  ;;  %v133_v53 = vld [vmem:[%s6249_s1 + $0x220] sm:$0xff] }
  0xa0   :  { %909 = vmatpush2.msra.mxu1 %v483_v2  ;;  %839 = vmatprep.subr.mxu0 %v220_v4  ;;  %v389_v54 = vld [vmem:[%s6249_s1 + $0xa20] sm:$0xff]  ;;  %v126_v55 = vld [vmem:[%s6249_s1 + $0x1e8] sm:$0xff] }
  0xa1   :  { %910 = vmatprep.subr.mxu1 %v476_v5  ;;  %840 = vmatpush2.msra.mxu0 %v219_v6  ;;  %v382_v56 = vld [vmem:[%s6249_s1 + $0x9e8] sm:$0xff]  ;;  %v125_v57 = vld [vmem:[%s6249_s1 + $0x1e0] sm:$0xff] }
  0xa2   :  { %911 = vmatpush2.msra.mxu1 %v475_v7  ;;  %841 = vmatprep.subr.mxu0 %v212_v9  ;;  %v381_v58 = vld [vmem:[%s6249_s1 + $0x9e0] sm:$0xff]  ;;  %v118_v59 = vld [vmem:[%s6249_s1 + $0x1a8] sm:$0xff] }
  0xa3   :  { %912 = vmatprep.subr.mxu1 %v468_v10  ;;  %842 = vmatpush2.msra.mxu0 %v211_v12  ;;  %v374_v60 = vld [vmem:[%s6249_s1 + $0x9a8] sm:$0xff]  ;;  %v117_v61 = vld [vmem:[%s6249_s1 + $0x1a0] sm:$0xff] }
  0xa4   :  { %913 = vmatpush2.msra.mxu1 %v467_v13  ;;  %843 = vmatprep.subr.mxu0 %v204_v14  ;;  %v373_v63 = vld [vmem:[%s6249_s1 + $0x9a0] sm:$0xff]  ;;  %v110_v0 = vld [vmem:[%s6249_s1 + $0x168] sm:$0xff] }
  0xa5   :  { %914 = vmatprep.subr.mxu1 %v460_v15  ;;  %844 = vmatpush2.msra.mxu0 %v203_v16  ;;  %v366_v1 = vld [vmem:[%s6249_s1 + $0x968] sm:$0xff]  ;;  %v109_v2 = vld [vmem:[%s6249_s1 + $0x160] sm:$0xff] }
  0xa6   :  { %915 = vmatpush2.msra.mxu1 %v459_v17  ;;  %845 = vmatprep.subr.mxu0 %v196_v18  ;;  %v365_v4 = vld [vmem:[%s6249_s1 + $0x960] sm:$0xff]  ;;  %v102_v5 = vld [vmem:[%s6249_s1 + $0x128] sm:$0xff] }
  0xa7   :  { %916 = vmatprep.subr.mxu1 %v452_v19  ;;  %846 = vmatpush2.msra.mxu0 %v195_v20  ;;  %v358_v6 = vld [vmem:[%s6249_s1 + $0x928] sm:$0xff]  ;;  %v101_v7 = vld [vmem:[%s6249_s1 + $0x120] sm:$0xff] }
  0xa8   :  { %847 = vmatprep.mubr.f32.mxu0 %v4541_v8  ;;  %917 = vmatpush2.msra.mxu1 %v451_v21  ;;  %v357_v9 = vld [vmem:[%s6249_s1 + $0x920] sm:$0xff]  ;;  %v94_v10 = vld [vmem:[%s6249_s1 + $0xe8] sm:$0xff] }
  0xa9   :  { %848 = vmatmul.mubr.f32.vlgmr.msra.gmra.mxu0 %v4511_v62  ;;  %918 = vmatprep.mubr.f32.mxu1 %v4551_v11  ;;  %v350_v12 = vld [vmem:[%s6249_s1 + $0x8e8] sm:$0xff]  ;;  %v93_v13 = vld [vmem:[%s6249_s1 + $0xe0] sm:$0xff] }
  0xaa   :  { %925 = vmatprep.subr.mxu0 %v190_v22  ;;  %996 = vmatprep.subr.mxu1 %v446_v23  ;;  %v349_v14 = vld [vmem:[%s6249_s1 + $0x8e0] sm:$0xff]  ;;  %v86_v15 = vld [vmem:[%s6249_s1 + $0xa8] sm:$0xff] }
  0xab   :  { %919 = vmatmul.mubr.f32.vlgmr.msra.gmra.mxu1 %v4525_v3  ;;  %926 = vmatpush1.msra.mxu0 %v189_v24  ;;  %v342_v16 = vld [vmem:[%s6249_s1 + $0x8a8] sm:$0xff]  ;;  %v85_v17 = vld [vmem:[%s6249_s1 + $0xa0] sm:$0xff] }
  0xac   :  { %997 = vmatpush1.msra.mxu1 %v445_v25  ;;  %927 = vmatprep.subr.mxu0 %v182_v26  ;;  %v341_v18 = vld [vmem:[%s6249_s1 + $0x8a0] sm:$0xff]  ;;  %v78_v19 = vld [vmem:[%s6249_s1 + $0x68] sm:$0xff] }
  0xad   :  { %998 = vmatprep.subr.mxu1 %v438_v27  ;;  %928 = vmatpush1.msra.mxu0 %v181_v28  ;;  %v334_v20 = vld [vmem:[%s6249_s1 + $0x868] sm:$0xff]  ;;  %v77_v21 = vld [vmem:[%s6249_s1 + $0x60] sm:$0xff] }
  0xae   :  { %999 = vmatpush1.msra.mxu1 %v437_v29  ;;  %929 = vmatprep.subr.mxu0 %v174_v30  ;;  %v333_v22 = vld [vmem:[%s6249_s1 + $0x860] sm:$0xff]  ;;  %v70_v23 = vld [vmem:[%s6249_s1 + $0x28] sm:$0xff] }
  0xaf   :  { %1000 = vmatprep.subr.mxu1 %v430_v31  ;;  %930 = vmatpush1.msra.mxu0 %v173_v32  ;;  %v326_v24 = vld [vmem:[%s6249_s1 + $0x828] sm:$0xff]  ;;  %v69_v25 = vld [vmem:[%s6249_s1 + $0x20] sm:$0xff] }
  0xb0   :  { %1001 = vmatpush1.msra.mxu1 %v429_v33  ;;  %931 = vmatprep.subr.mxu0 %v166_v34  ;;  %v325_v26 = vld [vmem:[%s6249_s1 + $0x820] sm:$0xff]  ;;  %v318_v27 = vld [vmem:[%s6249_s1 + $0x7e8] sm:$0xff] }
  0xb1   :  { %1002 = vmatprep.subr.mxu1 %v422_v35  ;;  %932 = vmatpush1.msra.mxu0 %v165_v36  ;;  %v574_v28 = vld [vmem:[%s6249_s1 + $0xfe8] sm:$0xff]  ;;  %v317_v29 = vld [vmem:[%s6249_s1 + $0x7e0] sm:$0xff] }
  0xb2   :  { %1003 = vmatpush1.msra.mxu1 %v421_v37  ;;  %933 = vmatprep.subr.mxu0 %v158_v38  ;;  %v573_v30 = vld [vmem:[%s6249_s1 + $0xfe0] sm:$0xff]  ;;  %v310_v31 = vld [vmem:[%s6249_s1 + $0x7a8] sm:$0xff] }
  0xb3   :  { %1004 = vmatprep.subr.mxu1 %v414_v39  ;;  %934 = vmatpush1.msra.mxu0 %v157_v40  ;;  %v566_v32 = vld [vmem:[%s6249_s1 + $0xfa8] sm:$0xff]  ;;  %v309_v33 = vld [vmem:[%s6249_s1 + $0x7a0] sm:$0xff] }
  0xb4   :  { %1005 = vmatpush1.msra.mxu1 %v413_v42  ;;  %935 = vmatprep.subr.mxu0 %v150_v43  ;;  %v565_v34 = vld [vmem:[%s6249_s1 + $0xfa0] sm:$0xff]  ;;  %v302_v35 = vld [vmem:[%s6249_s1 + $0x768] sm:$0xff] }
  0xb5   :  { %1006 = vmatprep.subr.mxu1 %v406_v44  ;;  %936 = vmatpush1.msra.mxu0 %v149_v45  ;;  %v558_v36 = vld [vmem:[%s6249_s1 + $0xf68] sm:$0xff]  ;;  %v301_v37 = vld [vmem:[%s6249_s1 + $0x760] sm:$0xff] }
  0xb6   :  { %1007 = vmatpush1.msra.mxu1 %v405_v46  ;;  %937 = vmatprep.subr.mxu0 %v142_v47  ;;  %v557_v38 = vld [vmem:[%s6249_s1 + $0xf60] sm:$0xff]  ;;  %v294_v39 = vld [vmem:[%s6249_s1 + $0x728] sm:$0xff] }
  0xb7   :  { %1008 = vmatprep.subr.mxu1 %v398_v48  ;;  %938 = vmatpush1.msra.mxu0 %v141_v49  ;;  %v550_v40 = vld [vmem:[%s6249_s1 + $0xf28] sm:$0xff]  ;;  %v293_v42 = vld [vmem:[%s6249_s1 + $0x720] sm:$0xff] }
  0xb8   :  { %1009 = vmatpush1.msra.mxu1 %v397_v50  ;;  %939 = vmatprep.subr.mxu0 %v134_v51  ;;  %v549_v43 = vld [vmem:[%s6249_s1 + $0xf20] sm:$0xff]  ;;  %v286_v44 = vld [vmem:[%s6249_s1 + $0x6e8] sm:$0xff] }
  0xb9   :  { %1010 = vmatprep.subr.mxu1 %v390_v52  ;;  %940 = vmatpush1.msra.mxu0 %v133_v53  ;;  %v542_v45 = vld [vmem:[%s6249_s1 + $0xee8] sm:$0xff]  ;;  %v285_v46 = vld [vmem:[%s6249_s1 + $0x6e0] sm:$0xff] }
  0xba   :  { %1011 = vmatpush1.msra.mxu1 %v389_v54  ;;  %941 = vmatprep.subr.mxu0 %v126_v55  ;;  %v541_v47 = vld [vmem:[%s6249_s1 + $0xee0] sm:$0xff]  ;;  %v278_v48 = vld [vmem:[%s6249_s1 + $0x6a8] sm:$0xff] }
  0xbb   :  { %1012 = vmatprep.subr.mxu1 %v382_v56  ;;  %942 = vmatpush1.msra.mxu0 %v125_v57  ;;  %v534_v49 = vld [vmem:[%s6249_s1 + $0xea8] sm:$0xff]  ;;  %v277_v50 = vld [vmem:[%s6249_s1 + $0x6a0] sm:$0xff] }
  0xbc   :  { %1013 = vmatpush1.msra.mxu1 %v381_v58  ;;  %943 = vmatprep.subr.mxu0 %v118_v59  ;;  %v533_v51 = vld [vmem:[%s6249_s1 + $0xea0] sm:$0xff]  ;;  %v270_v52 = vld [vmem:[%s6249_s1 + $0x668] sm:$0xff] }
  0xbd   :  { %1014 = vmatprep.subr.mxu1 %v374_v60  ;;  %944 = vmatpush1.msra.mxu0 %v117_v61  ;;  %v526_v53 = vld [vmem:[%s6249_s1 + $0xe68] sm:$0xff]  ;;  %v269_v54 = vld [vmem:[%s6249_s1 + $0x660] sm:$0xff] }
  0xbe   :  { %1015 = vmatpush1.msra.mxu1 %v373_v63  ;;  %945 = vmatprep.subr.mxu0 %v110_v0  ;;  %v525_v55 = vld [vmem:[%s6249_s1 + $0xe60] sm:$0xff]  ;;  %v262_v56 = vld [vmem:[%s6249_s1 + $0x628] sm:$0xff] }
  0xbf   :  { %1016 = vmatprep.subr.mxu1 %v366_v1  ;;  %946 = vmatpush1.msra.mxu0 %v109_v2  ;;  %v518_v57 = vld [vmem:[%s6249_s1 + $0xe28] sm:$0xff]  ;;  %v261_v58 = vld [vmem:[%s6249_s1 + $0x620] sm:$0xff] }
  0xc0   :  { %1017 = vmatpush1.msra.mxu1 %v365_v4  ;;  %947 = vmatprep.subr.mxu0 %v102_v5  ;;  %v517_v59 = vld [vmem:[%s6249_s1 + $0xe20] sm:$0xff]  ;;  %v254_v60 = vld [vmem:[%s6249_s1 + $0x5e8] sm:$0xff] }
  0xc1   :  { %1018 = vmatprep.subr.mxu1 %v358_v6  ;;  %948 = vmatpush1.msra.mxu0 %v101_v7  ;;  %v510_v61 = vld [vmem:[%s6249_s1 + $0xde8] sm:$0xff]  ;;  %v253_v63 = vld [vmem:[%s6249_s1 + $0x5e0] sm:$0xff] }
  0xc2   :  { %1019 = vmatpush1.msra.mxu1 %v357_v9  ;;  %949 = vmatprep.subr.mxu0 %v94_v10  ;;  %v509_v0 = vld [vmem:[%s6249_s1 + $0xde0] sm:$0xff]  ;;  %v246_v1 = vld [vmem:[%s6249_s1 + $0x5a8] sm:$0xff] }
  0xc3   :  { %1020 = vmatprep.subr.mxu1 %v350_v12  ;;  %950 = vmatpush1.msra.mxu0 %v93_v13  ;;  %v502_v2 = vld [vmem:[%s6249_s1 + $0xda8] sm:$0xff]  ;;  %v245_v4 = vld [vmem:[%s6249_s1 + $0x5a0] sm:$0xff] }
  0xc4   :  { %1021 = vmatpush1.msra.mxu1 %v349_v14  ;;  %951 = vmatprep.subr.mxu0 %v86_v15  ;;  %v501_v5 = vld [vmem:[%s6249_s1 + $0xda0] sm:$0xff]  ;;  %v238_v6 = vld [vmem:[%s6249_s1 + $0x568] sm:$0xff] }
  0xc5   :  { %1022 = vmatprep.subr.mxu1 %v342_v16  ;;  %952 = vmatpush1.msra.mxu0 %v85_v17  ;;  %v494_v7 = vld [vmem:[%s6249_s1 + $0xd68] sm:$0xff]  ;;  %v237_v9 = vld [vmem:[%s6249_s1 + $0x560] sm:$0xff] }
  0xc6   :  { %1023 = vmatpush1.msra.mxu1 %v341_v18  ;;  %953 = vmatprep.subr.mxu0 %v78_v19  ;;  %v493_v10 = vld [vmem:[%s6249_s1 + $0xd60] sm:$0xff]  ;;  %v230_v12 = vld [vmem:[%s6249_s1 + $0x528] sm:$0xff] }
  0xc7   :  { %1024 = vmatprep.subr.mxu1 %v334_v20  ;;  %954 = vmatpush1.msra.mxu0 %v77_v21  ;;  %v486_v13 = vld [vmem:[%s6249_s1 + $0xd28] sm:$0xff]  ;;  %v229_v14 = vld [vmem:[%s6249_s1 + $0x520] sm:$0xff] }
  0xc8   :  { %1025 = vmatpush1.msra.mxu1 %v333_v22  ;;  %955 = vmatprep.subr.mxu0 %v70_v23  ;;  %v485_v15 = vld [vmem:[%s6249_s1 + $0xd20] sm:$0xff]  ;;  %v222_v16 = vld [vmem:[%s6249_s1 + $0x4e8] sm:$0xff] }
  0xc9   :  { %1026 = vmatprep.subr.mxu1 %v326_v24  ;;  %956 = vmatpush1.msra.mxu0 %v69_v25  ;;  %v478_v17 = vld [vmem:[%s6249_s1 + $0xce8] sm:$0xff]  ;;  %v221_v18 = vld [vmem:[%s6249_s1 + $0x4e0] sm:$0xff] }
  0xca   :  { %1027 = vmatpush1.msra.mxu1 %v325_v26  ;;  %957 = vmatprep.subr.mxu0 %v318_v27  ;;  %v477_v19 = vld [vmem:[%s6249_s1 + $0xce0] sm:$0xff]  ;;  %v214_v20 = vld [vmem:[%s6249_s1 + $0x4a8] sm:$0xff] }
  0xcb   :  { %1028 = vmatprep.subr.mxu1 %v574_v28  ;;  %958 = vmatpush2.msra.mxu0 %v317_v29  ;;  %v470_v21 = vld [vmem:[%s6249_s1 + $0xca8] sm:$0xff]  ;;  %v213_v22 = vld [vmem:[%s6249_s1 + $0x4a0] sm:$0xff] }
  0xcc   :  { %1029 = vmatpush2.msra.mxu1 %v573_v30  ;;  %959 = vmatprep.subr.mxu0 %v310_v31  ;;  %v469_v23 = vld [vmem:[%s6249_s1 + $0xca0] sm:$0xff]  ;;  %v206_v24 = vld [vmem:[%s6249_s1 + $0x468] sm:$0xff] }
  0xcd   :  { %1030 = vmatprep.subr.mxu1 %v566_v32  ;;  %960 = vmatpush2.msra.mxu0 %v309_v33  ;;  %v462_v25 = vld [vmem:[%s6249_s1 + $0xc68] sm:$0xff]  ;;  %v205_v26 = vld [vmem:[%s6249_s1 + $0x460] sm:$0xff]  ;;  %v192_v32 = vld [vmem:[%s6249_s1 + $0x3f8] sm:$0xff] }
  0xce   :  { %1031 = vmatpush2.msra.mxu1 %v565_v34  ;;  %961 = vmatprep.subr.mxu0 %v302_v35  ;;  %v461_v27 = vld [vmem:[%s6249_s1 + $0xc60] sm:$0xff]  ;;  %v198_v28 = vld [vmem:[%s6249_s1 + $0x428] sm:$0xff]  ;;  %v448_v33 = vld [vmem:[%s6249_s1 + $0xbf8] sm:$0xff] }
  0xcf   :  { %1032 = vmatprep.subr.mxu1 %v558_v36  ;;  %962 = vmatpush2.msra.mxu0 %v301_v37  ;;  %v454_v29 = vld [vmem:[%s6249_s1 + $0xc28] sm:$0xff]  ;;  %v197_v30 = vld [vmem:[%s6249_s1 + $0x420] sm:$0xff]  ;;  %v191_v34 = vld [vmem:[%s6249_s1 + $0x3f0] sm:$0xff] }
  0xd0   :  { %1033 = vmatpush2.msra.mxu1 %v557_v38  ;;  %963 = vmatprep.subr.mxu0 %v294_v39  ;;  %v453_v31 = vld [vmem:[%s6249_s1 + $0xc20] sm:$0xff]  ;;  %v447_v35 = vld [vmem:[%s6249_s1 + $0xbf0] sm:$0xff]  ;;  %v184_v36 = vld [vmem:[%s6249_s1 + $0x3b8] sm:$0xff] }
  0xd1   :  { %1034 = vmatprep.subr.mxu1 %v550_v40  ;;  %964 = vmatpush2.msra.mxu0 %v293_v42  ;;  %v440_v37 = vld [vmem:[%s6249_s1 + $0xbb8] sm:$0xff]  ;;  %v183_v38 = vld [vmem:[%s6249_s1 + $0x3b0] sm:$0xff] }
  0xd2   :  { %1035 = vmatpush2.msra.mxu1 %v549_v43  ;;  %965 = vmatprep.subr.mxu0 %v286_v44  ;;  %v439_v39 = vld [vmem:[%s6249_s1 + $0xbb0] sm:$0xff]  ;;  %v176_v40 = vld [vmem:[%s6249_s1 + $0x378] sm:$0xff] }
  0xd3   :  { %1036 = vmatprep.subr.mxu1 %v542_v45  ;;  %966 = vmatpush2.msra.mxu0 %v285_v46  ;;  %v432_v42 = vld [vmem:[%s6249_s1 + $0xb78] sm:$0xff]  ;;  %v175_v43 = vld [vmem:[%s6249_s1 + $0x370] sm:$0xff] }
  0xd4   :  { %1037 = vmatpush2.msra.mxu1 %v541_v47  ;;  %967 = vmatprep.subr.mxu0 %v278_v48  ;;  %v431_v44 = vld [vmem:[%s6249_s1 + $0xb70] sm:$0xff]  ;;  %v168_v45 = vld [vmem:[%s6249_s1 + $0x338] sm:$0xff] }
  0xd5   :  { %1038 = vmatprep.subr.mxu1 %v534_v49  ;;  %968 = vmatpush2.msra.mxu0 %v277_v50  ;;  %v424_v46 = vld [vmem:[%s6249_s1 + $0xb38] sm:$0xff]  ;;  %v167_v47 = vld [vmem:[%s6249_s1 + $0x330] sm:$0xff] }
  0xd6   :  { %1039 = vmatpush2.msra.mxu1 %v533_v51  ;;  %969 = vmatprep.subr.mxu0 %v270_v52  ;;  %v423_v48 = vld [vmem:[%s6249_s1 + $0xb30] sm:$0xff]  ;;  %v160_v49 = vld [vmem:[%s6249_s1 + $0x2f8] sm:$0xff] }
  0xd7   :  { %1040 = vmatprep.subr.mxu1 %v526_v53  ;;  %970 = vmatpush2.msra.mxu0 %v269_v54  ;;  %v416_v50 = vld [vmem:[%s6249_s1 + $0xaf8] sm:$0xff]  ;;  %v159_v51 = vld [vmem:[%s6249_s1 + $0x2f0] sm:$0xff] }
  0xd8   :  { %1041 = vmatpush2.msra.mxu1 %v525_v55  ;;  %971 = vmatprep.subr.mxu0 %v262_v56  ;;  %v415_v52 = vld [vmem:[%s6249_s1 + $0xaf0] sm:$0xff]  ;;  %v152_v53 = vld [vmem:[%s6249_s1 + $0x2b8] sm:$0xff] }
  0xd9   :  { %1042 = vmatprep.subr.mxu1 %v518_v57  ;;  %972 = vmatpush2.msra.mxu0 %v261_v58  ;;  %v408_v54 = vld [vmem:[%s6249_s1 + $0xab8] sm:$0xff]  ;;  %v151_v55 = vld [vmem:[%s6249_s1 + $0x2b0] sm:$0xff] }
  0xda   :  { %1043 = vmatpush2.msra.mxu1 %v517_v59  ;;  %973 = vmatprep.subr.mxu0 %v254_v60  ;;  %v407_v56 = vld [vmem:[%s6249_s1 + $0xab0] sm:$0xff]  ;;  %v144_v57 = vld [vmem:[%s6249_s1 + $0x278] sm:$0xff] }
  0xdb   :  { %1044 = vmatprep.subr.mxu1 %v510_v61  ;;  %974 = vmatpush2.msra.mxu0 %v253_v63  ;;  %v400_v58 = vld [vmem:[%s6249_s1 + $0xa78] sm:$0xff]  ;;  %v143_v59 = vld [vmem:[%s6249_s1 + $0x270] sm:$0xff] }
  0xdc   :  { %1045 = vmatpush2.msra.mxu1 %v509_v0  ;;  %975 = vmatprep.subr.mxu0 %v246_v1  ;;  %v399_v60 = vld [vmem:[%s6249_s1 + $0xa70] sm:$0xff]  ;;  %v136_v61 = vld [vmem:[%s6249_s1 + $0x238] sm:$0xff] }
  0xdd   :  { %1046 = vmatprep.subr.mxu1 %v502_v2  ;;  %976 = vmatpush2.msra.mxu0 %v245_v4  ;;  %v392_v63 = vld [vmem:[%s6249_s1 + $0xa38] sm:$0xff]  ;;  %v135_v0 = vld [vmem:[%s6249_s1 + $0x230] sm:$0xff] }
  0xde   :  { %1047 = vmatpush2.msra.mxu1 %v501_v5  ;;  %977 = vmatprep.subr.mxu0 %v238_v6  ;;  %v391_v1 = vld [vmem:[%s6249_s1 + $0xa30] sm:$0xff]  ;;  %v128_v2 = vld [vmem:[%s6249_s1 + $0x1f8] sm:$0xff] }
  0xdf   :  { %1048 = vmatprep.subr.mxu1 %v494_v7  ;;  %978 = vmatpush2.msra.mxu0 %v237_v9  ;;  %v384_v4 = vld [vmem:[%s6249_s1 + $0x9f8] sm:$0xff]  ;;  %v127_v5 = vld [vmem:[%s6249_s1 + $0x1f0] sm:$0xff] }
  0xe0   :  { %1049 = vmatpush2.msra.mxu1 %v493_v10  ;;  %979 = vmatprep.subr.mxu0 %v230_v12  ;;  %v383_v6 = vld [vmem:[%s6249_s1 + $0x9f0] sm:$0xff]  ;;  %v120_v7 = vld [vmem:[%s6249_s1 + $0x1b8] sm:$0xff] }
  0xe1   :  { %1050 = vmatprep.subr.mxu1 %v486_v13  ;;  %980 = vmatpush2.msra.mxu0 %v229_v14  ;;  %v376_v9 = vld [vmem:[%s6249_s1 + $0x9b8] sm:$0xff]  ;;  %v119_v10 = vld [vmem:[%s6249_s1 + $0x1b0] sm:$0xff] }
  0xe2   :  { %1051 = vmatpush2.msra.mxu1 %v485_v15  ;;  %981 = vmatprep.subr.mxu0 %v222_v16  ;;  %v375_v12 = vld [vmem:[%s6249_s1 + $0x9b0] sm:$0xff]  ;;  %v112_v13 = vld [vmem:[%s6249_s1 + $0x178] sm:$0xff] }
  0xe3   :  { %1052 = vmatprep.subr.mxu1 %v478_v17  ;;  %982 = vmatpush2.msra.mxu0 %v221_v18  ;;  %v368_v14 = vld [vmem:[%s6249_s1 + $0x978] sm:$0xff]  ;;  %v111_v15 = vld [vmem:[%s6249_s1 + $0x170] sm:$0xff] }
  0xe4   :  { %1053 = vmatpush2.msra.mxu1 %v477_v19  ;;  %983 = vmatprep.subr.mxu0 %v214_v20  ;;  %v367_v16 = vld [vmem:[%s6249_s1 + $0x970] sm:$0xff]  ;;  %v104_v17 = vld [vmem:[%s6249_s1 + $0x138] sm:$0xff] }
  0xe5   :  { %1054 = vmatprep.subr.mxu1 %v470_v21  ;;  %984 = vmatpush2.msra.mxu0 %v213_v22  ;;  %v360_v18 = vld [vmem:[%s6249_s1 + $0x938] sm:$0xff]  ;;  %v103_v19 = vld [vmem:[%s6249_s1 + $0x130] sm:$0xff] }
  0xe6   :  { %1055 = vmatpush2.msra.mxu1 %v469_v23  ;;  %985 = vmatprep.subr.mxu0 %v206_v24  ;;  %v359_v20 = vld [vmem:[%s6249_s1 + $0x930] sm:$0xff]  ;;  %v96_v21 = vld [vmem:[%s6249_s1 + $0xf8] sm:$0xff] }
  0xe7   :  { %1056 = vmatprep.subr.mxu1 %v462_v25  ;;  %986 = vmatpush2.msra.mxu0 %v205_v26  ;;  %v352_v22 = vld [vmem:[%s6249_s1 + $0x8f8] sm:$0xff]  ;;  %v95_v23 = vld [vmem:[%s6249_s1 + $0xf0] sm:$0xff] }
  0xe8   :  { %1057 = vmatpush2.msra.mxu1 %v461_v27  ;;  %987 = vmatprep.subr.mxu0 %v198_v28  ;;  %v351_v24 = vld [vmem:[%s6249_s1 + $0x8f0] sm:$0xff]  ;;  %v88_v25 = vld [vmem:[%s6249_s1 + $0xb8] sm:$0xff] }
  0xe9   :  { %1058 = vmatprep.subr.mxu1 %v454_v29  ;;  %988 = vmatpush2.msra.mxu0 %v197_v30  ;;  %v344_v26 = vld [vmem:[%s6249_s1 + $0x8b8] sm:$0xff]  ;;  %v87_v27 = vld [vmem:[%s6249_s1 + $0xb0] sm:$0xff] }
  0xea   :  { %989 = vmatprep.mubr.f32.mxu0 %v4541_v8  ;;  %1059 = vmatpush2.msra.mxu1 %v453_v31  ;;  %v343_v28 = vld [vmem:[%s6249_s1 + $0x8b0] sm:$0xff]  ;;  %v80_v29 = vld [vmem:[%s6249_s1 + $0x78] sm:$0xff] }
  0xeb   :  { %990 = vmatmul.mubr.f32.vlgmr.msra.gmra.mxu0 %v4511_v62  ;;  %1060 = vmatprep.mubr.f32.mxu1 %v4551_v11  ;;  %v336_v30 = vld [vmem:[%s6249_s1 + $0x878] sm:$0xff]  ;;  %v79_v31 = vld [vmem:[%s6249_s1 + $0x70] sm:$0xff] }
  0xec   :  { %1067 = vmatprep.subr.mxu0 %v192_v32  ;;  %1138 = vmatprep.subr.mxu1 %v448_v33  ;;  %v335_v32 = vld [vmem:[%s6249_s1 + $0x870] sm:$0xff]  ;;  %v72_v33 = vld [vmem:[%s6249_s1 + $0x38] sm:$0xff] }
  0xed   :  { %1061 = vmatmul.mubr.f32.vlgmr.msra.gmra.mxu1 %v4525_v3  ;;  %1068 = vmatpush1.msra.mxu0 %v191_v34  ;;  %v328_v34 = vld [vmem:[%s6249_s1 + $0x838] sm:$0xff] }
  0xee   :  { %1139 = vmatpush1.msra.mxu1 %v447_v35  ;;  %1069 = vmatprep.subr.mxu0 %v184_v36  ;;  %v71_v35 = vld [vmem:[%s6249_s1 + $0x30] sm:$0xff] }
  0xef   :  { %1140 = vmatprep.subr.mxu1 %v440_v37  ;;  %1070 = vmatpush1.msra.mxu0 %v183_v38  ;;  %v327_v36 = vld [vmem:[%s6249_s1 + $0x830] sm:$0xff]  ;;  %v320_v37 = vld [vmem:[%s6249_s1 + $0x7f8] sm:$0xff] }
  0xf0   :  { %1141 = vmatpush1.msra.mxu1 %v439_v39  ;;  %1071 = vmatprep.subr.mxu0 %v176_v40  ;;  %v576_v38 = vld [vmem:[%s6249_s1 + $0xff8] sm:$0xff]  ;;  %v319_v39 = vld [vmem:[%s6249_s1 + $0x7f0] sm:$0xff] }
  0xf1   :  { %1142 = vmatprep.subr.mxu1 %v432_v42  ;;  %1072 = vmatpush1.msra.mxu0 %v175_v43  ;;  %v575_v40 = vld [vmem:[%s6249_s1 + $0xff0] sm:$0xff]  ;;  %v312_v42 = vld [vmem:[%s6249_s1 + $0x7b8] sm:$0xff] }
  0xf2   :  { %1143 = vmatpush1.msra.mxu1 %v431_v44  ;;  %1073 = vmatprep.subr.mxu0 %v168_v45  ;;  %v568_v43 = vld [vmem:[%s6249_s1 + $0xfb8] sm:$0xff]  ;;  %v311_v44 = vld [vmem:[%s6249_s1 + $0x7b0] sm:$0xff] }
  0xf3   :  { %1144 = vmatprep.subr.mxu1 %v424_v46  ;;  %1074 = vmatpush1.msra.mxu0 %v167_v47  ;;  %v567_v45 = vld [vmem:[%s6249_s1 + $0xfb0] sm:$0xff]  ;;  %v304_v46 = vld [vmem:[%s6249_s1 + $0x778] sm:$0xff] }
  0xf4   :  { %1145 = vmatpush1.msra.mxu1 %v423_v48  ;;  %1075 = vmatprep.subr.mxu0 %v160_v49  ;;  %v560_v47 = vld [vmem:[%s6249_s1 + $0xf78] sm:$0xff]  ;;  %v303_v48 = vld [vmem:[%s6249_s1 + $0x770] sm:$0xff] }
  0xf5   :  { %1146 = vmatprep.subr.mxu1 %v416_v50  ;;  %1076 = vmatpush1.msra.mxu0 %v159_v51  ;;  %v559_v49 = vld [vmem:[%s6249_s1 + $0xf70] sm:$0xff]  ;;  %v296_v50 = vld [vmem:[%s6249_s1 + $0x738] sm:$0xff] }
  0xf6   :  { %1147 = vmatpush1.msra.mxu1 %v415_v52  ;;  %1077 = vmatprep.subr.mxu0 %v152_v53  ;;  %v552_v51 = vld [vmem:[%s6249_s1 + $0xf38] sm:$0xff]  ;;  %v295_v52 = vld [vmem:[%s6249_s1 + $0x730] sm:$0xff] }
  0xf7   :  { %1148 = vmatprep.subr.mxu1 %v408_v54  ;;  %1078 = vmatpush1.msra.mxu0 %v151_v55  ;;  %v551_v53 = vld [vmem:[%s6249_s1 + $0xf30] sm:$0xff]  ;;  %v288_v54 = vld [vmem:[%s6249_s1 + $0x6f8] sm:$0xff] }
  0xf8   :  { %1149 = vmatpush1.msra.mxu1 %v407_v56  ;;  %1079 = vmatprep.subr.mxu0 %v144_v57  ;;  %v544_v55 = vld [vmem:[%s6249_s1 + $0xef8] sm:$0xff]  ;;  %v287_v56 = vld [vmem:[%s6249_s1 + $0x6f0] sm:$0xff] }
  0xf9   :  { %1150 = vmatprep.subr.mxu1 %v400_v58  ;;  %1080 = vmatpush1.msra.mxu0 %v143_v59  ;;  %v543_v57 = vld [vmem:[%s6249_s1 + $0xef0] sm:$0xff]  ;;  %v280_v58 = vld [vmem:[%s6249_s1 + $0x6b8] sm:$0xff] }
  0xfa   :  { %1151 = vmatpush1.msra.mxu1 %v399_v60  ;;  %1081 = vmatprep.subr.mxu0 %v136_v61  ;;  %v536_v59 = vld [vmem:[%s6249_s1 + $0xeb8] sm:$0xff]  ;;  %v279_v60 = vld [vmem:[%s6249_s1 + $0x6b0] sm:$0xff] }
  0xfb   :  { %1152 = vmatprep.subr.mxu1 %v392_v63  ;;  %1082 = vmatpush1.msra.mxu0 %v135_v0  ;;  %v535_v61 = vld [vmem:[%s6249_s1 + $0xeb0] sm:$0xff]  ;;  %v272_v63 = vld [vmem:[%s6249_s1 + $0x678] sm:$0xff] }
  0xfc   :  { %1153 = vmatpush1.msra.mxu1 %v391_v1  ;;  %1083 = vmatprep.subr.mxu0 %v128_v2  ;;  %v528_v0 = vld [vmem:[%s6249_s1 + $0xe78] sm:$0xff]  ;;  %v271_v1 = vld [vmem:[%s6249_s1 + $0x670] sm:$0xff] }
  0xfd   :  { %1154 = vmatprep.subr.mxu1 %v384_v4  ;;  %1084 = vmatpush1.msra.mxu0 %v127_v5  ;;  %v527_v2 = vld [vmem:[%s6249_s1 + $0xe70] sm:$0xff]  ;;  %v264_v4 = vld [vmem:[%s6249_s1 + $0x638] sm:$0xff] }
  0xfe   :  { %1155 = vmatpush1.msra.mxu1 %v383_v6  ;;  %1085 = vmatprep.subr.mxu0 %v120_v7  ;;  %v520_v5 = vld [vmem:[%s6249_s1 + $0xe38] sm:$0xff]  ;;  %v263_v6 = vld [vmem:[%s6249_s1 + $0x630] sm:$0xff] }
  0xff   :  { %1156 = vmatprep.subr.mxu1 %v376_v9  ;;  %1086 = vmatpush1.msra.mxu0 %v119_v10  ;;  %v519_v7 = vld [vmem:[%s6249_s1 + $0xe30] sm:$0xff]  ;;  %v256_v9 = vld [vmem:[%s6249_s1 + $0x5f8] sm:$0xff] }
 0x100   :  { %1157 = vmatpush1.msra.mxu1 %v375_v12  ;;  %1087 = vmatprep.subr.mxu0 %v112_v13  ;;  %v512_v10 = vld [vmem:[%s6249_s1 + $0xdf8] sm:$0xff]  ;;  %v255_v12 = vld [vmem:[%s6249_s1 + $0x5f0] sm:$0xff] }
 0x101   :  { %1158 = vmatprep.subr.mxu1 %v368_v14  ;;  %1088 = vmatpush1.msra.mxu0 %v111_v15  ;;  %v511_v13 = vld [vmem:[%s6249_s1 + $0xdf0] sm:$0xff]  ;;  %v248_v14 = vld [vmem:[%s6249_s1 + $0x5b8] sm:$0xff] }
 0x102   :  { %1159 = vmatpush1.msra.mxu1 %v367_v16  ;;  %1089 = vmatprep.subr.mxu0 %v104_v17  ;;  %v504_v15 = vld [vmem:[%s6249_s1 + $0xdb8] sm:$0xff]  ;;  %v247_v16 = vld [vmem:[%s6249_s1 + $0x5b0] sm:$0xff] }
 0x103   :  { %1160 = vmatprep.subr.mxu1 %v360_v18  ;;  %1090 = vmatpush1.msra.mxu0 %v103_v19  ;;  %v503_v17 = vld [vmem:[%s6249_s1 + $0xdb0] sm:$0xff]  ;;  %v240_v18 = vld [vmem:[%s6249_s1 + $0x578] sm:$0xff] }
 0x104   :  { %1161 = vmatpush1.msra.mxu1 %v359_v20  ;;  %1091 = vmatprep.subr.mxu0 %v96_v21  ;;  %v496_v19 = vld [vmem:[%s6249_s1 + $0xd78] sm:$0xff]  ;;  %v239_v20 = vld [vmem:[%s6249_s1 + $0x570] sm:$0xff] }
 0x105   :  { %1162 = vmatprep.subr.mxu1 %v352_v22  ;;  %1092 = vmatpush1.msra.mxu0 %v95_v23  ;;  %v495_v21 = vld [vmem:[%s6249_s1 + $0xd70] sm:$0xff]  ;;  %v232_v22 = vld [vmem:[%s6249_s1 + $0x538] sm:$0xff] }
 0x106   :  { %1163 = vmatpush1.msra.mxu1 %v351_v24  ;;  %1093 = vmatprep.subr.mxu0 %v88_v25  ;;  %v488_v23 = vld [vmem:[%s6249_s1 + $0xd38] sm:$0xff]  ;;  %v581_v24 = vsub.s32 0, %v4457_v41  ;;  %v231_v25 = vld [vmem:[%s6249_s1 + $0x530] sm:$0xff] }
 0x107   :  { %1164 = vmatprep.subr.mxu1 %v344_v26  ;;  %1094 = vmatpush1.msra.mxu0 %v87_v27  ;;  %v487_v26 = vld [vmem:[%s6249_s1 + $0xd30] sm:$0xff]  ;;  %v5670_v27 = vld [vmem:[#allocation2] sm:$0xff] }
 0x108   :  { %1165 = vmatpush1.msra.mxu1 %v343_v28  ;;  %1095 = vmatprep.subr.mxu0 %v80_v29  ;;  %v224_v28 = vld [vmem:[%s6249_s1 + $0x4f8] sm:$0xff] }
 0x109   :  { %1166 = vmatprep.subr.mxu1 %v336_v30  ;;  %1096 = vmatpush1.msra.mxu0 %v79_v31  ;;  %v480_v29 = vld [vmem:[%s6249_s1 + $0xcf8] sm:$0xff]  ;;  %v585_v30 = vsub.s32 1, %v4457_v41  ;;  %v223_v31 = vld [vmem:[%s6249_s1 + $0x4f0] sm:$0xff] }
 0x10a   :  { %1167 = vmatpush1.msra.mxu1 %v335_v32  ;;  %1097 = vmatprep.subr.mxu0 %v72_v33  ;;  %v479_v32 = vld [vmem:[%s6249_s1 + $0xcf0] sm:$0xff]  ;;  %v216_v33 = vld [vmem:[%s6249_s1 + $0x4b8] sm:$0xff] }
 0x10b   :  { %1168 = vmatprep.subr.mxu1 %v328_v34  ;;  %1098 = vmatpush1.msra.mxu0 %v71_v35  ;;  %v472_v34 = vld [vmem:[%s6249_s1 + $0xcb8] sm:$0xff]  ;;  %v582_v35 = vrot.slane %v5670_v27, %v581_v24 }
 0x10c   :  { %1169 = vmatpush1.msra.mxu1 %v327_v36  ;;  %1099 = vmatprep.subr.mxu0 %v320_v37  ;;  %v215_v36 = vld [vmem:[%s6249_s1 + $0x4b0] sm:$0xff] }
 0x10d   :  { %1170 = vmatprep.subr.mxu1 %v576_v38  ;;  %1100 = vmatpush2.msra.mxu0 %v319_v39  ;;  %v471_v37 = vld [vmem:[%s6249_s1 + $0xcb0] sm:$0xff]  ;;  %v208_v38 = vld [vmem:[%s6249_s1 + $0x478] sm:$0xff] }
 0x10e   :  { %1171 = vmatpush2.msra.mxu1 %v575_v40  ;;  %1101 = vmatprep.subr.mxu0 %v312_v42  ;;  %v464_v39 = vld [vmem:[%s6249_s1 + $0xc78] sm:$0xff]  ;;  %v586_v40 = vrot.slane %v5670_v27, %v585_v30  ;;  %v207_v42 = vld [vmem:[%s6249_s1 + $0x470] sm:$0xff] }
 0x10f   :  { %1172 = vmatprep.subr.mxu1 %v568_v43  ;;  %1102 = vmatpush2.msra.mxu0 %v311_v44  ;;  %v463_v43 = vld [vmem:[%s6249_s1 + $0xc70] sm:$0xff] }
 0x110   :  { %1173 = vmatpush2.msra.mxu1 %v567_v45  ;;  %1103 = vmatprep.subr.mxu0 %v304_v46  ;;  %v200_v45 = vld [vmem:[%s6249_s1 + $0x438] sm:$0xff] }
 0x111   :  { %1174 = vmatprep.subr.mxu1 %v560_v47  ;;  %1104 = vmatpush2.msra.mxu0 %v303_v48  ;;  %v456_v46 = vld [vmem:[%s6249_s1 + $0xc38] sm:$0xff]  ;;  %v199_v48 = vld [vmem:[%s6249_s1 + $0x430] sm:$0xff] }
 0x112   :  { %1175 = vmatpush2.msra.mxu1 %v559_v49  ;;  %1105 = vmatprep.subr.mxu0 %v296_v50 }
 0x113   :  { %1176 = vmatprep.subr.mxu1 %v552_v51  ;;  %1106 = vmatpush2.msra.mxu0 %v295_v52  ;;  %v455_v51 = vld [vmem:[%s6249_s1 + $0xc30] sm:$0xff] }
 0x114   :  { %1177 = vmatpush2.msra.mxu1 %v551_v53  ;;  %1107 = vmatprep.subr.mxu0 %v288_v54 }
 0x115   :  { %1178 = vmatprep.subr.mxu1 %v544_v55  ;;  %1108 = vmatpush2.msra.mxu0 %v287_v56  ;;  %v1338_v55 = vld [vmem:[#allocation5 + $0x3c8] sm:$0xff] }
 0x116   :  { %1179 = vmatpush2.msra.mxu1 %v543_v57  ;;  %1109 = vmatprep.subr.mxu0 %v280_v58  ;;  %v1594_v57 = vld [vmem:[#allocation5 + $0xbc8] sm:$0xff]  ;;  %v1337_v58 = vld [vmem:[#allocation5 + $0x3c0] sm:$0xff] }
 0x117   :  { %1180 = vmatprep.subr.mxu1 %v536_v59  ;;  %1110 = vmatpush2.msra.mxu0 %v279_v60  ;;  %v1330_v59 = vld [vmem:[#allocation5 + $0x388] sm:$0xff] }
 0x118   :  { %1181 = vmatpush2.msra.mxu1 %v535_v61  ;;  %1111 = vmatprep.subr.mxu0 %v272_v63  ;;  %v1593_v61 = vld [vmem:[#allocation5 + $0xbc0] sm:$0xff] }
 0x119   :  { %1182 = vmatprep.subr.mxu1 %v528_v0  ;;  %1112 = vmatpush2.msra.mxu0 %v271_v1  ;;  %v1329_v63 = vld [vmem:[#allocation5 + $0x380] sm:$0xff]  ;;  %v1586_v0 = vld [vmem:[#allocation5 + $0xb88] sm:$0xff] }
 0x11a   :  { %1183 = vmatpush2.msra.mxu1 %v527_v2  ;;  %1113 = vmatprep.subr.mxu0 %v264_v4  ;;  %v1585_v1 = vld [vmem:[#allocation5 + $0xb80] sm:$0xff]  ;;  %v1578_v2 = vld [vmem:[#allocation5 + $0xb48] sm:$0xff] }
 0x11b   :  { %1184 = vmatprep.subr.mxu1 %v520_v5  ;;  %1114 = vmatpush2.msra.mxu0 %v263_v6  ;;  %v1313_v4 = vld [vmem:[#allocation5 + $0x300] sm:$0xff]  ;;  %v1570_v5 = vld [vmem:[#allocation5 + $0xb08] sm:$0xff] }
 0x11c   :  { %1185 = vmatpush2.msra.mxu1 %v519_v7  ;;  %1115 = vmatprep.subr.mxu0 %v256_v9  ;;  %v1306_v6 = vld [vmem:[#allocation5 + $0x2c8] sm:$0xff]  ;;  %v1569_v7 = vld [vmem:[#allocation5 + $0xb00] sm:$0xff] }
 0x11d   :  { %1186 = vmatprep.subr.mxu1 %v512_v10  ;;  %1116 = vmatpush2.msra.mxu0 %v255_v12  ;;  %v1305_v9 = vld [vmem:[#allocation5 + $0x2c0] sm:$0xff]  ;;  %v1562_v10 = vld [vmem:[#allocation5 + $0xac8] sm:$0xff] }
 0x11e   :  { %1187 = vmatpush2.msra.mxu1 %v511_v13  ;;  %1117 = vmatprep.subr.mxu0 %v248_v14  ;;  %v1298_v12 = vld [vmem:[#allocation5 + $0x288] sm:$0xff]  ;;  %v1561_v13 = vld [vmem:[#allocation5 + $0xac0] sm:$0xff] }
 0x11f   :  { %1188 = vmatprep.subr.mxu1 %v504_v15  ;;  %1118 = vmatpush2.msra.mxu0 %v247_v16  ;;  %v1297_v14 = vld [vmem:[#allocation5 + $0x280] sm:$0xff]  ;;  %v1554_v15 = vld [vmem:[#allocation5 + $0xa88] sm:$0xff] }
 0x120   :  { %1189 = vmatpush2.msra.mxu1 %v503_v17  ;;  %1119 = vmatprep.subr.mxu0 %v240_v18  ;;  %v1290_v16 = vld [vmem:[#allocation5 + $0x248] sm:$0xff]  ;;  %v1553_v17 = vld [vmem:[#allocation5 + $0xa80] sm:$0xff] }
 0x121   :  { %1190 = vmatprep.subr.mxu1 %v496_v19  ;;  %1120 = vmatpush2.msra.mxu0 %v239_v20  ;;  %v1289_v18 = vld [vmem:[#allocation5 + $0x240] sm:$0xff]  ;;  %v1546_v19 = vld [vmem:[#allocation5 + $0xa48] sm:$0xff] }
 0x122   :  { %1191 = vmatpush2.msra.mxu1 %v495_v21  ;;  %1121 = vmatprep.subr.mxu0 %v232_v22  ;;  %v1282_v20 = vld [vmem:[#allocation5 + $0x208] sm:$0xff]  ;;  %v1545_v21 = vld [vmem:[#allocation5 + $0xa40] sm:$0xff] }
 0x123   :  { %1192 = vmatprep.subr.mxu1 %v488_v23  ;;  %1122 = vmatpush2.msra.mxu0 %v231_v25  ;;  %v1281_v22 = vld [vmem:[#allocation5 + $0x200] sm:$0xff]  ;;  %v1538_v23 = vld [vmem:[#allocation5 + $0xa08] sm:$0xff] }
 0x124   :  { %1193 = vmatpush2.msra.mxu1 %v487_v26  ;;  %1123 = vmatprep.subr.mxu0 %v224_v28  ;;  %v1274_v25 = vld [vmem:[#allocation5 + $0x1c8] sm:$0xff]  ;;  %v1537_v26 = vld [vmem:[#allocation5 + $0xa00] sm:$0xff] }
 0x125   :  { %1194 = vmatprep.subr.mxu1 %v480_v29  ;;  %1124 = vmatpush2.msra.mxu0 %v223_v31  ;;  %v1273_v28 = vld [vmem:[#allocation5 + $0x1c0] sm:$0xff]  ;;  %v1530_v29 = vld [vmem:[#allocation5 + $0x9c8] sm:$0xff] }
 0x126   :  { %1195 = vmatpush2.msra.mxu1 %v479_v32  ;;  %1125 = vmatprep.subr.mxu0 %v216_v33  ;;  %v1266_v31 = vld [vmem:[#allocation5 + $0x188] sm:$0xff]  ;;  %v1529_v32 = vld [vmem:[#allocation5 + $0x9c0] sm:$0xff] }
 0x127   :  { %1196 = vmatprep.subr.mxu1 %v472_v34  ;;  %v707_v44 = vpop.f32.mrf.mxu0  ;;  %1126 = vmatpush2.msra.mxu0 %v215_v36  ;;  %v1265_v33 = vld [vmem:[#allocation5 + $0x180] sm:$0xff]  ;;  %v1522_v34 = vld [vmem:[#allocation5 + $0x988] sm:$0xff] }
 0x128   :  { %1197 = vmatpush2.msra.mxu1 %v471_v37  ;;  %v708_v47 = vadd.f32 %v707_v44, %v582_v35  ;;  %1127 = vmatprep.subr.mxu0 %v208_v38  ;;  %v1258_v35 = vld [vmem:[#allocation5 + $0x148] sm:$0xff]  ;;  %v1521_v36 = vld [vmem:[#allocation5 + $0x980] sm:$0xff] }
 0x129   :  { %1198 = vmatprep.subr.mxu1 %v464_v39  ;;  %v778_v49 = vpop.f32.mrf.mxu1  ;;  %v709_v50 = vpop.f32.mrf.mxu0  ;;  %1128 = vmatpush2.msra.mxu0 %v207_v42  ;;  %v1257_v37 = vld [vmem:[#allocation5 + $0x140] sm:$0xff]  ;;  %v1514_v38 = vld [vmem:[#allocation5 + $0x948] sm:$0xff] }
 0x12a   :  { %1199 = vmatpush2.msra.mxu1 %v463_v43  ;;  %v5727_v52 = vadd.f32 %v778_v49, %v708_v47  ;;  %v710_v53 = vadd.f32 %v709_v50, %v586_v40  ;;  %1129 = vmatprep.subr.mxu0 %v200_v45  ;;  %v1250_v39 = vld [vmem:[#allocation5 + $0x108] sm:$0xff]  ;;  %v1513_v40 = vld [vmem:[#allocation5 + $0x940] sm:$0xff] }
 0x12b   :  { %1200 = vmatprep.subr.mxu1 %v456_v46  ;;  %v780_v54 = vpop.f32.mrf.mxu1  ;;  %1130 = vmatpush2.msra.mxu0 %v199_v48  ;;  %v1249_v42 = vld [vmem:[#allocation5 + $0x100] sm:$0xff]  ;;  %v1506_v43 = vld [vmem:[#allocation5 + $0x908] sm:$0xff] }
 0x12c   :  { %1131 = vmatprep.mubr.f32.mxu0 %v4541_v8  ;;  %v781_v56 = vadd.f32 %v780_v54, %v710_v53  ;;  %1201 = vmatpush2.msra.mxu1 %v455_v51  ;;  %v1322_v8 = vld [vmem:[#allocation5 + $0x348] sm:$0xff]  ;;  %v1505_v45 = vld [vmem:[#allocation5 + $0x900] sm:$0xff] }
 0x12d   :  { %1202 = vmatprep.mubr.f32.mxu1 %v4551_v11  ;;  %1132 = vmatmul.mubr.f32.vlgmr.msra.gmra.mxu0 %v4511_v62  ;;  %v1321_v11 = vld [vmem:[#allocation5 + $0x340] sm:$0xff]  ;;  %v1314_v62 = vld [vmem:[#allocation5 + $0x308] sm:$0xff] }
 0x12e   :  { %1203 = vmatmul.mubr.f32.vlgmr.msra.gmra.mxu1 %v4525_v3  ;;  %v5733_v60 = vmax.f32 %v781_v56, 0.0  ;;  %2283 = vmatprep.subr.mxu0 %v1338_v55  ;;  %v1577_v3 = vld [vmem:[#allocation5 + $0xb40] sm:$0xff]  ;;  %v1242_v44 = vld [vmem:[#allocation5 + $0xc8] sm:$0xff] }
 0x12f   :  { %2354 = vmatprep.subr.mxu1 %v1594_v57  ;;  %2284 = vmatpush1.msra.mxu0 %v1337_v58  ;;  %v1241_v46 = vld [vmem:[#allocation5 + $0xc0] sm:$0xff]  ;;  %v1498_v47 = vld [vmem:[#allocation5 + $0x8c8] sm:$0xff] }
 0x130   :  { %2347 = vmatprep.mubr.f32.mxu0 %v5733_v60  ;;  %2285 = vmatprep.subr.mxu0 %v1330_v59  ;;  %v1234_v48 = vld [vmem:[#allocation5 + $0x88] sm:$0xff]  ;;  %v1497_v49 = vld [vmem:[#allocation5 + $0x8c0] sm:$0xff] }
 0x131   :  { %2355 = vmatpush1.msra.mxu1 %v1593_v61  ;;  %2286 = vmatpush1.msra.mxu0 %v1329_v63  ;;  %v1233_v50 = vld [vmem:[#allocation5 + $0x80] sm:$0xff]  ;;  %v1490_v51 = vld [vmem:[#allocation5 + $0x888] sm:$0xff] }
 0x132   :  { %2356 = vmatprep.subr.mxu1 %v1586_v0  ;;  %2287 = vmatprep.subr.mxu0 %v1322_v8  ;;  %v1226_v53 = vld [vmem:[#allocation5 + $0x48] sm:$0xff]  ;;  %v1489_v54 = vld [vmem:[#allocation5 + $0x880] sm:$0xff] }
 0x133   :  { %2357 = vmatpush1.msra.mxu1 %v1585_v1  ;;  %2288 = vmatpush1.msra.mxu0 %v1321_v11  ;;  %v1225_v55 = vld [vmem:[#allocation5 + $0x40] sm:$0xff]  ;;  %v1482_v56 = vld [vmem:[#allocation5 + $0x848] sm:$0xff] }
 0x134   :  { %2358 = vmatprep.subr.mxu1 %v1578_v2  ;;  %2289 = vmatprep.subr.mxu0 %v1314_v62  ;;  %v1218_v57 = vld [vmem:[#allocation5 + $0x8] sm:$0xff]  ;;  %v1481_v58 = vld [vmem:[#allocation5 + $0x840] sm:$0xff] }
 0x135   :  { %2359 = vmatpush1.msra.mxu1 %v1577_v3  ;;  %2290 = vmatpush1.msra.mxu0 %v1313_v4  ;;  %v1217_v59 = vld [vmem:[#allocation5] sm:$0xff]  ;;  %v1474_v61 = vld [vmem:[#allocation5 + $0x808] sm:$0xff] }
 0x136   :  { %2360 = vmatprep.subr.mxu1 %v1570_v5  ;;  %2291 = vmatprep.subr.mxu0 %v1306_v6  ;;  %v1466_v63 = vld [vmem:[#allocation5 + $0x7c8] sm:$0xff]  ;;  %v1473_v0 = vld [vmem:[#allocation5 + $0x800] sm:$0xff] }
 0x137   :  { %2361 = vmatpush1.msra.mxu1 %v1569_v7  ;;  %2292 = vmatpush1.msra.mxu0 %v1305_v9  ;;  %v1465_v8 = vld [vmem:[#allocation5 + $0x7c0] sm:$0xff]  ;;  %v1722_v1 = vld [vmem:[#allocation5 + $0xfc8] sm:$0xff] }
 0x138   :  { %2362 = vmatprep.subr.mxu1 %v1562_v10  ;;  %2293 = vmatprep.subr.mxu0 %v1298_v12  ;;  %v1458_v11 = vld [vmem:[#allocation5 + $0x788] sm:$0xff]  ;;  %v1721_v2 = vld [vmem:[#allocation5 + $0xfc0] sm:$0xff] }
 0x139   :  { %2363 = vmatpush1.msra.mxu1 %v1561_v13  ;;  %2294 = vmatpush1.msra.mxu0 %v1297_v14  ;;  %v1457_v62 = vld [vmem:[#allocation5 + $0x780] sm:$0xff]  ;;  %v1714_v3 = vld [vmem:[#allocation5 + $0xf88] sm:$0xff] }
 0x13a   :  { %2364 = vmatprep.subr.mxu1 %v1554_v15  ;;  %2295 = vmatprep.subr.mxu0 %v1290_v16  ;;  %v1450_v4 = vld [vmem:[#allocation5 + $0x748] sm:$0xff]  ;;  %v1713_v5 = vld [vmem:[#allocation5 + $0xf80] sm:$0xff] }
 0x13b   :  { %2365 = vmatpush1.msra.mxu1 %v1553_v17  ;;  %2296 = vmatpush1.msra.mxu0 %v1289_v18  ;;  %v1449_v6 = vld [vmem:[#allocation5 + $0x740] sm:$0xff]  ;;  %v1706_v7 = vld [vmem:[#allocation5 + $0xf48] sm:$0xff] }
 0x13c   :  { %2366 = vmatprep.subr.mxu1 %v1546_v19  ;;  %2297 = vmatprep.subr.mxu0 %v1282_v20  ;;  %v1442_v9 = vld [vmem:[#allocation5 + $0x708] sm:$0xff]  ;;  %v1705_v10 = vld [vmem:[#allocation5 + $0xf40] sm:$0xff] }
 0x13d   :  { %2367 = vmatpush1.msra.mxu1 %v1545_v21  ;;  %2298 = vmatpush1.msra.mxu0 %v1281_v22  ;;  %v1441_v12 = vld [vmem:[#allocation5 + $0x700] sm:$0xff]  ;;  %v1698_v13 = vld [vmem:[#allocation5 + $0xf08] sm:$0xff] }
 0x13e   :  { %2368 = vmatprep.subr.mxu1 %v1538_v23  ;;  %2299 = vmatprep.subr.mxu0 %v1274_v25  ;;  %v1434_v14 = vld [vmem:[#allocation5 + $0x6c8] sm:$0xff]  ;;  %v1697_v15 = vld [vmem:[#allocation5 + $0xf00] sm:$0xff] }
 0x13f   :  { %2369 = vmatpush1.msra.mxu1 %v1537_v26  ;;  %2300 = vmatpush1.msra.mxu0 %v1273_v28  ;;  %v1433_v16 = vld [vmem:[#allocation5 + $0x6c0] sm:$0xff]  ;;  %v1690_v17 = vld [vmem:[#allocation5 + $0xec8] sm:$0xff] }
 0x140   :  { %2370 = vmatprep.subr.mxu1 %v1530_v29  ;;  %2301 = vmatprep.subr.mxu0 %v1266_v31  ;;  %v1426_v18 = vld [vmem:[#allocation5 + $0x688] sm:$0xff]  ;;  %v1689_v19 = vld [vmem:[#allocation5 + $0xec0] sm:$0xff] }
 0x141   :  { %2371 = vmatpush1.msra.mxu1 %v1529_v32  ;;  %2302 = vmatpush1.msra.mxu0 %v1265_v33  ;;  %v1425_v20 = vld [vmem:[#allocation5 + $0x680] sm:$0xff]  ;;  %v1682_v21 = vld [vmem:[#allocation5 + $0xe88] sm:$0xff] }
 0x142   :  { %2372 = vmatprep.subr.mxu1 %v1522_v34  ;;  %2303 = vmatprep.subr.mxu0 %v1258_v35  ;;  %v1418_v22 = vld [vmem:[#allocation5 + $0x648] sm:$0xff]  ;;  %v1681_v23 = vld [vmem:[#allocation5 + $0xe80] sm:$0xff] }
 0x143   :  { %2373 = vmatpush1.msra.mxu1 %v1521_v36  ;;  %2304 = vmatpush1.msra.mxu0 %v1257_v37  ;;  %v1417_v25 = vld [vmem:[#allocation5 + $0x640] sm:$0xff]  ;;  %v1674_v26 = vld [vmem:[#allocation5 + $0xe48] sm:$0xff] }
 0x144   :  { %2374 = vmatprep.subr.mxu1 %v1514_v38  ;;  %2305 = vmatprep.subr.mxu0 %v1250_v39  ;;  %v1410_v28 = vld [vmem:[#allocation5 + $0x608] sm:$0xff]  ;;  %v1673_v29 = vld [vmem:[#allocation5 + $0xe40] sm:$0xff] }
 0x145   :  { %2375 = vmatpush1.msra.mxu1 %v1513_v40  ;;  %2306 = vmatpush1.msra.mxu0 %v1249_v42  ;;  %v1409_v31 = vld [vmem:[#allocation5 + $0x600] sm:$0xff]  ;;  %v1666_v32 = vld [vmem:[#allocation5 + $0xe08] sm:$0xff] }
 0x146   :  { %2376 = vmatprep.subr.mxu1 %v1506_v43  ;;  %2307 = vmatprep.subr.mxu0 %v1242_v44  ;;  %v1402_v33 = vld [vmem:[#allocation5 + $0x5c8] sm:$0xff]  ;;  %v1665_v34 = vld [vmem:[#allocation5 + $0xe00] sm:$0xff] }
 0x147   :  { %2377 = vmatpush1.msra.mxu1 %v1505_v45  ;;  %2308 = vmatpush1.msra.mxu0 %v1241_v46  ;;  %v1401_v35 = vld [vmem:[#allocation5 + $0x5c0] sm:$0xff]  ;;  %v1658_v36 = vld [vmem:[#allocation5 + $0xdc8] sm:$0xff] }
 0x148   :  { %2378 = vmatprep.subr.mxu1 %v1498_v47  ;;  %2309 = vmatprep.subr.mxu0 %v1234_v48  ;;  %v1394_v37 = vld [vmem:[#allocation5 + $0x588] sm:$0xff]  ;;  %v1657_v38 = vld [vmem:[#allocation5 + $0xdc0] sm:$0xff]  ;;  %v589_v48 = vsub.s32 2, %v4457_v41 }
 0x149   :  { %2379 = vmatpush1.msra.mxu1 %v1497_v49  ;;  %2310 = vmatpush1.msra.mxu0 %v1233_v50  ;;  %v1393_v39 = vld [vmem:[#allocation5 + $0x580] sm:$0xff]  ;;  %v1650_v40 = vld [vmem:[#allocation5 + $0xd88] sm:$0xff] }
 0x14a   :  { %2380 = vmatprep.subr.mxu1 %v1490_v51  ;;  %2311 = vmatprep.subr.mxu0 %v1226_v53  ;;  %v1386_v42 = vld [vmem:[#allocation5 + $0x548] sm:$0xff]  ;;  %v1649_v43 = vld [vmem:[#allocation5 + $0xd80] sm:$0xff] }
 0x14b   :  { %2381 = vmatpush1.msra.mxu1 %v1489_v54  ;;  %2312 = vmatpush1.msra.mxu0 %v1225_v55  ;;  %v1385_v44 = vld [vmem:[#allocation5 + $0x540] sm:$0xff]  ;;  %v1642_v45 = vld [vmem:[#allocation5 + $0xd48] sm:$0xff]  ;;  %v593_v54 = vsub.s32 3, %v4457_v41 }
 0x14c   :  { %2382 = vmatprep.subr.mxu1 %v1482_v56  ;;  %2313 = vmatprep.subr.mxu0 %v1218_v57  ;;  %v1378_v46 = vld [vmem:[#allocation5 + $0x508] sm:$0xff]  ;;  %v1641_v47 = vld [vmem:[#allocation5 + $0xd40] sm:$0xff] }
 0x14d   :  { %2383 = vmatpush1.msra.mxu1 %v1481_v58  ;;  %2314 = vmatpush1.msra.mxu0 %v1217_v59  ;;  %v1377_v49 = vld [vmem:[#allocation5 + $0x500] sm:$0xff]  ;;  %v1634_v50 = vld [vmem:[#allocation5 + $0xd08] sm:$0xff]  ;;  %v590_v58 = vrot.slane %v5670_v27, %v589_v48 }
 0x14e   :  { %2384 = vmatprep.subr.mxu1 %v1474_v61  ;;  %2315 = vmatprep.subr.mxu0 %v1466_v63  ;;  %v1370_v51 = vld [vmem:[#allocation5 + $0x4c8] sm:$0xff]  ;;  %v1633_v53 = vld [vmem:[#allocation5 + $0xd00] sm:$0xff] }
 0x14f   :  { %2385 = vmatpush1.msra.mxu1 %v1473_v0  ;;  %2316 = vmatpush2.msra.mxu0 %v1465_v8  ;;  %v1369_v55 = vld [vmem:[#allocation5 + $0x4c0] sm:$0xff]  ;;  %v1626_v56 = vld [vmem:[#allocation5 + $0xcc8] sm:$0xff]  ;;  %v594_v8 = vrot.slane %v5670_v27, %v593_v54 }
 0x150   :  { %2386 = vmatprep.subr.mxu1 %v1722_v1  ;;  %2317 = vmatprep.subr.mxu0 %v1458_v11  ;;  %v1362_v57 = vld [vmem:[#allocation5 + $0x488] sm:$0xff]  ;;  %v1625_v59 = vld [vmem:[#allocation5 + $0xcc0] sm:$0xff] }
 0x151   :  { %2387 = vmatpush2.msra.mxu1 %v1721_v2  ;;  %2318 = vmatpush2.msra.mxu0 %v1457_v62  ;;  %v1361_v61 = vld [vmem:[#allocation5 + $0x480] sm:$0xff]  ;;  %v1618_v63 = vld [vmem:[#allocation5 + $0xc88] sm:$0xff] }
 0x152   :  { %2388 = vmatprep.subr.mxu1 %v1714_v3  ;;  %2319 = vmatprep.subr.mxu0 %v1450_v4  ;;  %v1354_v0 = vld [vmem:[#allocation5 + $0x448] sm:$0xff]  ;;  %v1617_v1 = vld [vmem:[#allocation5 + $0xc80] sm:$0xff] }
 0x153   :  { %2389 = vmatpush2.msra.mxu1 %v1713_v5  ;;  %2320 = vmatpush2.msra.mxu0 %v1449_v6  ;;  %v1353_v11 = vld [vmem:[#allocation5 + $0x440] sm:$0xff]  ;;  %v1610_v62 = vld [vmem:[#allocation5 + $0xc48] sm:$0xff] }
 0x154   :  { %2390 = vmatprep.subr.mxu1 %v1706_v7  ;;  %2321 = vmatprep.subr.mxu0 %v1442_v9  ;;  %v1346_v3 = vld [vmem:[#allocation5 + $0x408] sm:$0xff]  ;;  %v1609_v5 = vld [vmem:[#allocation5 + $0xc40] sm:$0xff] }
 0x155   :  { %2391 = vmatpush2.msra.mxu1 %v1705_v10  ;;  %2322 = vmatpush2.msra.mxu0 %v1441_v12  ;;  %v1345_v6 = vld [vmem:[#allocation5 + $0x400] sm:$0xff]  ;;  %v1602_v10 = vld [vmem:[#allocation5 + $0xc08] sm:$0xff] }
 0x156   :  { %2392 = vmatprep.subr.mxu1 %v1698_v13  ;;  %2323 = vmatprep.subr.mxu0 %v1434_v14  ;;  %v1601_v12 = vld [vmem:[#allocation5 + $0xc00] sm:$0xff]  ;;  %v5745_v13 = vmax.f32 %v5727_v52, 0.0 }
 0x157   :  { %2393 = vmatpush2.msra.mxu1 %v1697_v15  ;;  %2324 = vmatpush2.msra.mxu0 %v1433_v16  ;;  %v1850_v16 = vld [vmem:[#allocation5 + $0x13c8] sm:$0xff] }
 0x158   :  { %2394 = vmatprep.subr.mxu1 %v1690_v17  ;;  %2325 = vmatprep.subr.mxu0 %v1426_v18  ;;  %v2106_v17 = vld [vmem:[#allocation5 + $0x1bc8] sm:$0xff] }
 0x159   :  { %2395 = vmatpush2.msra.mxu1 %v1689_v19  ;;  %2326 = vmatpush2.msra.mxu0 %v1425_v20  ;;  %v1849_v19 = vld [vmem:[#allocation5 + $0x13c0] sm:$0xff]  ;;  %v1842_v20 = vld [vmem:[#allocation5 + $0x1388] sm:$0xff] }
 0x15a   :  { %2396 = vmatprep.subr.mxu1 %v1682_v21  ;;  %2327 = vmatprep.subr.mxu0 %v1418_v22  ;;  %v1841_v22 = vld [vmem:[#allocation5 + $0x1380] sm:$0xff] }
 0x15b   :  { %2397 = vmatpush2.msra.mxu1 %v1681_v23  ;;  %2328 = vmatpush2.msra.mxu0 %v1417_v25  ;;  %v1834_v23 = vld [vmem:[#allocation5 + $0x1348] sm:$0xff]  ;;  %v2105_v25 = vld [vmem:[#allocation5 + $0x1bc0] sm:$0xff] }
 0x15c   :  { %2398 = vmatprep.subr.mxu1 %v1674_v26  ;;  %2329 = vmatprep.subr.mxu0 %v1410_v28  ;;  %v1833_v26 = vld [vmem:[#allocation5 + $0x1340] sm:$0xff]  ;;  %v2098_v28 = vld [vmem:[#allocation5 + $0x1b88] sm:$0xff] }
 0x15d   :  { %2399 = vmatpush2.msra.mxu1 %v1673_v29  ;;  %2330 = vmatpush2.msra.mxu0 %v1409_v31  ;;  %v1826_v29 = vld [vmem:[#allocation5 + $0x1308] sm:$0xff]  ;;  %v2097_v31 = vld [vmem:[#allocation5 + $0x1b80] sm:$0xff] }
 0x15e   :  { %2400 = vmatprep.subr.mxu1 %v1666_v32  ;;  %2331 = vmatprep.subr.mxu0 %v1402_v33  ;;  %v1825_v32 = vld [vmem:[#allocation5 + $0x1300] sm:$0xff]  ;;  %v2090_v33 = vld [vmem:[#allocation5 + $0x1b48] sm:$0xff] }
 0x15f   :  { %2401 = vmatpush2.msra.mxu1 %v1665_v34  ;;  %2332 = vmatpush2.msra.mxu0 %v1401_v35  ;;  %v1818_v34 = vld [vmem:[#allocation5 + $0x12c8] sm:$0xff]  ;;  %v2089_v35 = vld [vmem:[#allocation5 + $0x1b40] sm:$0xff] }
 0x160   :  { %2402 = vmatprep.subr.mxu1 %v1658_v36  ;;  %2333 = vmatprep.subr.mxu0 %v1394_v37  ;;  %v1817_v36 = vld [vmem:[#allocation5 + $0x12c0] sm:$0xff]  ;;  %v2082_v37 = vld [vmem:[#allocation5 + $0x1b08] sm:$0xff] }
 0x161   :  { %2403 = vmatpush2.msra.mxu1 %v1657_v38  ;;  %2334 = vmatpush2.msra.mxu0 %v1393_v39  ;;  %v1810_v38 = vld [vmem:[#allocation5 + $0x1288] sm:$0xff]  ;;  %v2081_v39 = vld [vmem:[#allocation5 + $0x1b00] sm:$0xff] }
 0x162   :  { %2404 = vmatprep.subr.mxu1 %v1650_v40  ;;  %2335 = vmatprep.subr.mxu0 %v1386_v42  ;;  %v1809_v40 = vld [vmem:[#allocation5 + $0x1280] sm:$0xff]  ;;  %v2074_v42 = vld [vmem:[#allocation5 + $0x1ac8] sm:$0xff] }
 0x163   :  { %2405 = vmatpush2.msra.mxu1 %v1649_v43  ;;  %2336 = vmatpush2.msra.mxu0 %v1385_v44  ;;  %v1802_v43 = vld [vmem:[#allocation5 + $0x1248] sm:$0xff]  ;;  %v2073_v44 = vld [vmem:[#allocation5 + $0x1ac0] sm:$0xff] }
 0x164   :  { %2406 = vmatprep.subr.mxu1 %v1642_v45  ;;  %2337 = vmatprep.subr.mxu0 %v1378_v46  ;;  %v1801_v45 = vld [vmem:[#allocation5 + $0x1240] sm:$0xff]  ;;  %v2066_v46 = vld [vmem:[#allocation5 + $0x1a88] sm:$0xff] }
 0x165   :  { %2407 = vmatpush2.msra.mxu1 %v1641_v47  ;;  %2338 = vmatpush2.msra.mxu0 %v1377_v49  ;;  %v1794_v47 = vld [vmem:[#allocation5 + $0x1208] sm:$0xff]  ;;  %v2065_v49 = vld [vmem:[#allocation5 + $0x1a80] sm:$0xff] }
 0x166   :  { %2408 = vmatprep.subr.mxu1 %v1634_v50  ;;  %2339 = vmatprep.subr.mxu0 %v1370_v51  ;;  %v1793_v50 = vld [vmem:[#allocation5 + $0x1200] sm:$0xff]  ;;  %v2058_v51 = vld [vmem:[#allocation5 + $0x1a48] sm:$0xff] }
 0x167   :  { %2409 = vmatpush2.msra.mxu1 %v1633_v53  ;;  %2340 = vmatpush2.msra.mxu0 %v1369_v55  ;;  %v1786_v53 = vld [vmem:[#allocation5 + $0x11c8] sm:$0xff]  ;;  %v2057_v55 = vld [vmem:[#allocation5 + $0x1a40] sm:$0xff] }
 0x168   :  { %2410 = vmatprep.subr.mxu1 %v1626_v56  ;;  %2341 = vmatprep.subr.mxu0 %v1362_v57  ;;  %v1785_v56 = vld [vmem:[#allocation5 + $0x11c0] sm:$0xff]  ;;  %v2050_v57 = vld [vmem:[#allocation5 + $0x1a08] sm:$0xff] }
 0x169   :  { %v849_v2 = vpop.f32.mrf.mxu0  ;;  %2411 = vmatpush2.msra.mxu1 %v1625_v59  ;;  %2342 = vmatpush2.msra.mxu0 %v1361_v61  ;;  %v2049_v59 = vld [vmem:[#allocation5 + $0x1a00] sm:$0xff] }
 0x16a   :  { %v850_v4 = vadd.f32 %v849_v2, %v590_v58  ;;  %2412 = vmatprep.subr.mxu1 %v1618_v63  ;;  %2343 = vmatprep.subr.mxu0 %v1354_v0  ;;  %v1778_v58 = vld [vmem:[#allocation5 + $0x1188] sm:$0xff]  ;;  %v1777_v61 = vld [vmem:[#allocation5 + $0x1180] sm:$0xff] }
 0x16b   :  { %v920_v7 = vpop.f32.mrf.mxu1  ;;  %v851_v9 = vpop.f32.mrf.mxu0  ;;  %2413 = vmatpush2.msra.mxu1 %v1617_v1  ;;  %2344 = vmatpush2.msra.mxu0 %v1353_v11  ;;  %v2042_v63 = vld [vmem:[#allocation5 + $0x19c8] sm:$0xff]  ;;  %v1769_v1 = vld [vmem:[#allocation5 + $0x1140] sm:$0xff] }
 0x16c   :  { %v852_v27 = vadd.f32 %v851_v9, %v594_v8  ;;  %2414 = vmatprep.subr.mxu1 %v1610_v62  ;;  %2345 = vmatprep.subr.mxu0 %v1346_v3  ;;  %v921_v14 = vadd.f32 %v920_v7, %v850_v4  ;;  %v1770_v0 = vld [vmem:[#allocation5 + $0x1148] sm:$0xff]  ;;  %v2041_v8 = vld [vmem:[#allocation5 + $0x19c0] sm:$0xff] }
 0x16d   :  { %v922_v15 = vpop.f32.mrf.mxu1  ;;  %2415 = vmatpush2.msra.mxu1 %v1609_v5  ;;  %2346 = vmatpush2.msra.mxu0 %v1345_v6  ;;  %v2034_v11 = vld [vmem:[#allocation5 + $0x1988] sm:$0xff]  ;;  %v2033_v62 = vld [vmem:[#allocation5 + $0x1980] sm:$0xff] }
 0x16e   :  { %v923_v18 = vadd.f32 %v922_v15, %v852_v27  ;;  %2416 = vmatprep.subr.mxu1 %v1602_v10  ;;  %2348 = vmatmul.mubr.f32.vlgmr.msra.gmra.mxu0 %v5745_v13  ;;  %v5750_v52 = vmax.f32 %v921_v14, 0.0  ;;  %v1762_v2 = vld [vmem:[#allocation5 + $0x1108] sm:$0xff]  ;;  %v1761_v3 = vld [vmem:[#allocation5 + $0x1100] sm:$0xff] }
 0x16f   :  { %2417 = vmatpush2.msra.mxu1 %v1601_v12  ;;  %2425 = vmatprep.subr.mxu0 %v1850_v16  ;;  %v2026_v4 = vld [vmem:[#allocation5 + $0x1948] sm:$0xff]  ;;  %v2025_v6 = vld [vmem:[#allocation5 + $0x1940] sm:$0xff] }
 0x170   :  { %v5748_v21 = vmax.f32 %v923_v18, 0.0  ;;  %2496 = vmatprep.subr.mxu1 %v2106_v17  ;;  %2426 = vmatpush1.msra.mxu0 %v1849_v19  ;;  %v1754_v5 = vld [vmem:[#allocation5 + $0x10c8] sm:$0xff]  ;;  %v1753_v7 = vld [vmem:[#allocation5 + $0x10c0] sm:$0xff] }
 0x171   :  { %2427 = vmatprep.subr.mxu0 %v1842_v20  ;;  %v2018_v9 = vld [vmem:[#allocation5 + $0x1908] sm:$0xff]  ;;  %v2017_v27 = vld [vmem:[#allocation5 + $0x1900] sm:$0xff] }
 0x172   :  { %2418 = vmatprep.mubr.f32.mxu1 %v5748_v21  ;;  %2428 = vmatpush1.msra.mxu0 %v1841_v22  ;;  %v1746_v10 = vld [vmem:[#allocation5 + $0x1088] sm:$0xff]  ;;  %v1745_v12 = vld [vmem:[#allocation5 + $0x1080] sm:$0xff] }
 0x173   :  { %2419 = vmatmul.mubr.f32.vlgmr.msra.gmra.mxu1 %v5750_v52  ;;  %2429 = vmatprep.subr.mxu0 %v1834_v23  ;;  %v2010_v14 = vld [vmem:[#allocation5 + $0x18c8] sm:$0xff]  ;;  %v2009_v16 = vld [vmem:[#allocation5 + $0x18c0] sm:$0xff] }
 0x174   :  { %2497 = vmatpush1.msra.mxu1 %v2105_v25  ;;  %2430 = vmatpush1.msra.mxu0 %v1833_v26  ;;  %v1738_v15 = vld [vmem:[#allocation5 + $0x1048] sm:$0xff]  ;;  %v1737_v17 = vld [vmem:[#allocation5 + $0x1040] sm:$0xff] }
 0x175   :  { %2498 = vmatprep.subr.mxu1 %v2098_v28  ;;  %2431 = vmatprep.subr.mxu0 %v1826_v29  ;;  %v2002_v18 = vld [vmem:[#allocation5 + $0x1888] sm:$0xff]  ;;  %v2001_v20 = vld [vmem:[#allocation5 + $0x1880] sm:$0xff] }
 0x176   :  { %2499 = vmatpush1.msra.mxu1 %v2097_v31  ;;  %2432 = vmatpush1.msra.mxu0 %v1825_v32  ;;  %v1730_v19 = vld [vmem:[#allocation5 + $0x1008] sm:$0xff]  ;;  %v1729_v22 = vld [vmem:[#allocation5 + $0x1000] sm:$0xff] }
 0x177   :  { %2500 = vmatprep.subr.mxu1 %v2090_v33  ;;  %2433 = vmatprep.subr.mxu0 %v1818_v34  ;;  %v1994_v23 = vld [vmem:[#allocation5 + $0x1848] sm:$0xff]  ;;  %v1993_v26 = vld [vmem:[#allocation5 + $0x1840] sm:$0xff] }
 0x178   :  { %2501 = vmatpush1.msra.mxu1 %v2089_v35  ;;  %2434 = vmatpush1.msra.mxu0 %v1817_v36  ;;  %v1978_v25 = vld [vmem:[#allocation5 + $0x17c8] sm:$0xff]  ;;  %v1977_v28 = vld [vmem:[#allocation5 + $0x17c0] sm:$0xff] }
 0x179   :  { %2502 = vmatprep.subr.mxu1 %v2082_v37  ;;  %2435 = vmatprep.subr.mxu0 %v1810_v38  ;;  %v1986_v29 = vld [vmem:[#allocation5 + $0x1808] sm:$0xff]  ;;  %v1985_v32 = vld [vmem:[#allocation5 + $0x1800] sm:$0xff] }
 0x17a   :  { %2503 = vmatpush1.msra.mxu1 %v2081_v39  ;;  %2436 = vmatpush1.msra.mxu0 %v1809_v40  ;;  %v1970_v31 = vld [vmem:[#allocation5 + $0x1788] sm:$0xff]  ;;  %v1969_v33 = vld [vmem:[#allocation5 + $0x1780] sm:$0xff] }
 0x17b   :  { %2504 = vmatprep.subr.mxu1 %v2074_v42  ;;  %2437 = vmatprep.subr.mxu0 %v1802_v43  ;;  %v2234_v34 = vld [vmem:[#allocation5 + $0x1fc8] sm:$0xff]  ;;  %v2233_v36 = vld [vmem:[#allocation5 + $0x1fc0] sm:$0xff] }
 0x17c   :  { %2505 = vmatpush1.msra.mxu1 %v2073_v44  ;;  %2438 = vmatpush1.msra.mxu0 %v1801_v45  ;;  %v1962_v35 = vld [vmem:[#allocation5 + $0x1748] sm:$0xff]  ;;  %v1961_v37 = vld [vmem:[#allocation5 + $0x1740] sm:$0xff] }
 0x17d   :  { %2506 = vmatprep.subr.mxu1 %v2066_v46  ;;  %2439 = vmatprep.subr.mxu0 %v1794_v47  ;;  %v2226_v38 = vld [vmem:[#allocation5 + $0x1f88] sm:$0xff]  ;;  %v2225_v40 = vld [vmem:[#allocation5 + $0x1f80] sm:$0xff] }
 0x17e   :  { %2507 = vmatpush1.msra.mxu1 %v2065_v49  ;;  %2440 = vmatpush1.msra.mxu0 %v1793_v50  ;;  %v1954_v39 = vld [vmem:[#allocation5 + $0x1708] sm:$0xff]  ;;  %v1953_v42 = vld [vmem:[#allocation5 + $0x1700] sm:$0xff] }
 0x17f   :  { %2508 = vmatprep.subr.mxu1 %v2058_v51  ;;  %2441 = vmatprep.subr.mxu0 %v1786_v53  ;;  %v2218_v43 = vld [vmem:[#allocation5 + $0x1f48] sm:$0xff]  ;;  %v2217_v45 = vld [vmem:[#allocation5 + $0x1f40] sm:$0xff] }
 0x180   :  { %2509 = vmatpush1.msra.mxu1 %v2057_v55  ;;  %2442 = vmatpush1.msra.mxu0 %v1785_v56  ;;  %v1946_v44 = vld [vmem:[#allocation5 + $0x16c8] sm:$0xff]  ;;  %v1945_v46 = vld [vmem:[#allocation5 + $0x16c0] sm:$0xff] }
 0x181   :  { %2510 = vmatprep.subr.mxu1 %v2050_v57  ;;  %2443 = vmatprep.subr.mxu0 %v1778_v58  ;;  %v2210_v47 = vld [vmem:[#allocation5 + $0x1f08] sm:$0xff]  ;;  %v2209_v50 = vld [vmem:[#allocation5 + $0x1f00] sm:$0xff] }
 0x182   :  { %2511 = vmatpush1.msra.mxu1 %v2049_v59  ;;  %2444 = vmatpush1.msra.mxu0 %v1777_v61  ;;  %v1938_v49 = vld [vmem:[#allocation5 + $0x1688] sm:$0xff]  ;;  %v1937_v51 = vld [vmem:[#allocation5 + $0x1680] sm:$0xff] }
 0x183   :  { %2512 = vmatprep.subr.mxu1 %v2042_v63  ;;  %2445 = vmatprep.subr.mxu0 %v1770_v0  ;;  %v2202_v53 = vld [vmem:[#allocation5 + $0x1ec8] sm:$0xff]  ;;  %v2201_v56 = vld [vmem:[#allocation5 + $0x1ec0] sm:$0xff] }
 0x184   :  { %2513 = vmatpush1.msra.mxu1 %v2041_v8  ;;  %2446 = vmatpush1.msra.mxu0 %v1769_v1  ;;  %v1930_v55 = vld [vmem:[#allocation5 + $0x1648] sm:$0xff]  ;;  %v1929_v57 = vld [vmem:[#allocation5 + $0x1640] sm:$0xff] }
 0x185   :  { %2514 = vmatprep.subr.mxu1 %v2034_v11  ;;  %2447 = vmatprep.subr.mxu0 %v1762_v2  ;;  %v2194_v58 = vld [vmem:[#allocation5 + $0x1e88] sm:$0xff]  ;;  %v2193_v61 = vld [vmem:[#allocation5 + $0x1e80] sm:$0xff] }
 0x186   :  { %2515 = vmatpush1.msra.mxu1 %v2033_v62  ;;  %2448 = vmatpush1.msra.mxu0 %v1761_v3  ;;  %v1922_v59 = vld [vmem:[#allocation5 + $0x1608] sm:$0xff]  ;;  %v1921_v63 = vld [vmem:[#allocation5 + $0x1600] sm:$0xff] }
 0x187   :  { %2516 = vmatprep.subr.mxu1 %v2026_v4  ;;  %2449 = vmatprep.subr.mxu0 %v1754_v5  ;;  %v2186_v0 = vld [vmem:[#allocation5 + $0x1e48] sm:$0xff]  ;;  %v2185_v1 = vld [vmem:[#allocation5 + $0x1e40] sm:$0xff] }
 0x188   :  { %2517 = vmatpush1.msra.mxu1 %v2025_v6  ;;  %2450 = vmatpush1.msra.mxu0 %v1753_v7  ;;  %v1914_v8 = vld [vmem:[#allocation5 + $0x15c8] sm:$0xff]  ;;  %v1913_v11 = vld [vmem:[#allocation5 + $0x15c0] sm:$0xff] }
 0x189   :  { %2518 = vmatprep.subr.mxu1 %v2018_v9  ;;  %2451 = vmatprep.subr.mxu0 %v1746_v10  ;;  %v2178_v2 = vld [vmem:[#allocation5 + $0x1e08] sm:$0xff]  ;;  %v2177_v3 = vld [vmem:[#allocation5 + $0x1e00] sm:$0xff] }
 0x18a   :  { %2519 = vmatpush1.msra.mxu1 %v2017_v27  ;;  %2452 = vmatpush1.msra.mxu0 %v1745_v12  ;;  %v1906_v62 = vld [vmem:[#allocation5 + $0x1588] sm:$0xff]  ;;  %v1905_v4 = vld [vmem:[#allocation5 + $0x1580] sm:$0xff] }
 0x18b   :  { %2520 = vmatprep.subr.mxu1 %v2010_v14  ;;  %2453 = vmatprep.subr.mxu0 %v1738_v15  ;;  %v2170_v5 = vld [vmem:[#allocation5 + $0x1dc8] sm:$0xff]  ;;  %v2169_v7 = vld [vmem:[#allocation5 + $0x1dc0] sm:$0xff]  ;;  %v597_v14 = vsub.s32 4, %v4457_v41 }
 0x18c   :  { %2521 = vmatpush1.msra.mxu1 %v2009_v16  ;;  %2454 = vmatpush1.msra.mxu0 %v1737_v17  ;;  %v1898_v6 = vld [vmem:[#allocation5 + $0x1548] sm:$0xff]  ;;  %v1897_v9 = vld [vmem:[#allocation5 + $0x1540] sm:$0xff] }
 0x18d   :  { %2522 = vmatprep.subr.mxu1 %v2002_v18  ;;  %2455 = vmatprep.subr.mxu0 %v1730_v19  ;;  %v2162_v10 = vld [vmem:[#allocation5 + $0x1d88] sm:$0xff]  ;;  %v2161_v12 = vld [vmem:[#allocation5 + $0x1d80] sm:$0xff]  ;;  %v601_v19 = vsub.s32 5, %v4457_v41 }
 0x18e   :  { %2523 = vmatpush1.msra.mxu1 %v2001_v20  ;;  %2456 = vmatpush1.msra.mxu0 %v1729_v22  ;;  %v1890_v27 = vld [vmem:[#allocation5 + $0x1508] sm:$0xff]  ;;  %v1889_v15 = vld [vmem:[#allocation5 + $0x1500] sm:$0xff] }
 0x18f   :  { %2524 = vmatprep.subr.mxu1 %v1994_v23  ;;  %2457 = vmatprep.subr.mxu0 %v1978_v25  ;;  %v2154_v16 = vld [vmem:[#allocation5 + $0x1d48] sm:$0xff]  ;;  %v2153_v18 = vld [vmem:[#allocation5 + $0x1d40] sm:$0xff] }
 0x190   :  { %2525 = vmatpush1.msra.mxu1 %v1993_v26  ;;  %2458 = vmatpush2.msra.mxu0 %v1977_v28  ;;  %v1882_v17 = vld [vmem:[#allocation5 + $0x14c8] sm:$0xff]  ;;  %v1881_v20 = vld [vmem:[#allocation5 + $0x14c0] sm:$0xff]  ;;  %v5756_v26 = vld [vmem:[#allocation2] sm:$0xff] }
 0x191   :  { %2526 = vmatprep.subr.mxu1 %v1986_v29  ;;  %2459 = vmatprep.subr.mxu0 %v1970_v31  ;;  %v2146_v22 = vld [vmem:[#allocation5 + $0x1d08] sm:$0xff]  ;;  %v2145_v25 = vld [vmem:[#allocation5 + $0x1d00] sm:$0xff]  ;;  %v598_v28 = vrot.slane %v5756_v26, %v597_v14 }
 0x192   :  { %2527 = vmatpush1.msra.mxu1 %v1985_v32  ;;  %2460 = vmatpush2.msra.mxu0 %v1969_v33  ;;  %v1874_v23 = vld [vmem:[#allocation5 + $0x1488] sm:$0xff]  ;;  %v1873_v29 = vld [vmem:[#allocation5 + $0x1480] sm:$0xff] }
 0x193   :  { %2528 = vmatprep.subr.mxu1 %v2234_v34  ;;  %2461 = vmatprep.subr.mxu0 %v1962_v35  ;;  %v2138_v31 = vld [vmem:[#allocation5 + $0x1cc8] sm:$0xff]  ;;  %v2137_v33 = vld [vmem:[#allocation5 + $0x1cc0] sm:$0xff]  ;;  %v602_v34 = vrot.slane %v5756_v26, %v601_v19 }
 0x194   :  { %2529 = vmatpush2.msra.mxu1 %v2233_v36  ;;  %2462 = vmatpush2.msra.mxu0 %v1961_v37  ;;  %v1866_v32 = vld [vmem:[#allocation5 + $0x1448] sm:$0xff]  ;;  %v1865_v35 = vld [vmem:[#allocation5 + $0x1440] sm:$0xff] }
 0x195   :  { %2530 = vmatprep.subr.mxu1 %v2226_v38  ;;  %2463 = vmatprep.subr.mxu0 %v1954_v39  ;;  %v2130_v36 = vld [vmem:[#allocation5 + $0x1c88] sm:$0xff]  ;;  %v2129_v39 = vld [vmem:[#allocation5 + $0x1c80] sm:$0xff] }
 0x196   :  { %2531 = vmatpush2.msra.mxu1 %v2225_v40  ;;  %2464 = vmatpush2.msra.mxu0 %v1953_v42  ;;  %v1858_v38 = vld [vmem:[#allocation5 + $0x1408] sm:$0xff]  ;;  %v1857_v42 = vld [vmem:[#allocation5 + $0x1400] sm:$0xff] }
 0x197   :  { %2532 = vmatprep.subr.mxu1 %v2218_v43  ;;  %2465 = vmatprep.subr.mxu0 %v1946_v44  ;;  %v2122_v43 = vld [vmem:[#allocation5 + $0x1c48] sm:$0xff] }
 0x198   :  { %2533 = vmatpush2.msra.mxu1 %v2217_v45  ;;  %2466 = vmatpush2.msra.mxu0 %v1945_v46  ;;  %v1340_v46 = vld [vmem:[#allocation5 + $0x3d8] sm:$0xff] }
 0x199   :  { %2534 = vmatprep.subr.mxu1 %v2210_v47  ;;  %2467 = vmatprep.subr.mxu0 %v1938_v49  ;;  %v2121_v47 = vld [vmem:[#allocation5 + $0x1c40] sm:$0xff] }
 0x19a   :  { %2535 = vmatpush2.msra.mxu1 %v2209_v50  ;;  %2468 = vmatpush2.msra.mxu0 %v1937_v51  ;;  %v2114_v50 = vld [vmem:[#allocation5 + $0x1c08] sm:$0xff] }
 0x19b   :  { %2536 = vmatprep.subr.mxu1 %v2202_v53  ;;  %2469 = vmatprep.subr.mxu0 %v1930_v55  ;;  %v2113_v55 = vld [vmem:[#allocation5 + $0x1c00] sm:$0xff] }
 0x19c   :  { %2537 = vmatpush2.msra.mxu1 %v2201_v56  ;;  %2470 = vmatpush2.msra.mxu0 %v1929_v57  ;;  %v1596_v57 = vld [vmem:[#allocation5 + $0xbd8] sm:$0xff] }
 0x19d   :  { %2538 = vmatprep.subr.mxu1 %v2194_v58  ;;  %2471 = vmatprep.subr.mxu0 %v1922_v59 }
 0x19e   :  { %2539 = vmatpush2.msra.mxu1 %v2193_v61  ;;  %2472 = vmatpush2.msra.mxu0 %v1921_v63  ;;  %v1339_v61 = vld [vmem:[#allocation5 + $0x3d0] sm:$0xff]  ;;  %v1332_v63 = vld [vmem:[#allocation5 + $0x398] sm:$0xff] }
 0x19f   :  { %2540 = vmatprep.subr.mxu1 %v2186_v0  ;;  %2473 = vmatprep.subr.mxu0 %v1914_v8  ;;  %v1331_v0 = vld [vmem:[#allocation5 + $0x390] sm:$0xff]  ;;  %v1324_v8 = vld [vmem:[#allocation5 + $0x358] sm:$0xff] }
 0x1a0   :  { %2541 = vmatpush2.msra.mxu1 %v2185_v1  ;;  %2474 = vmatpush2.msra.mxu0 %v1913_v11  ;;  %v1323_v1 = vld [vmem:[#allocation5 + $0x350] sm:$0xff]  ;;  %v1316_v11 = vld [vmem:[#allocation5 + $0x318] sm:$0xff] }
 0x1a1   :  { %2542 = vmatprep.subr.mxu1 %v2178_v2  ;;  %2475 = vmatprep.subr.mxu0 %v1906_v62  ;;  %v1315_v2 = vld [vmem:[#allocation5 + $0x310] sm:$0xff]  ;;  %v1308_v62 = vld [vmem:[#allocation5 + $0x2d8] sm:$0xff] }
 0x1a2   :  { %2543 = vmatpush2.msra.mxu1 %v2177_v3  ;;  %2476 = vmatpush2.msra.mxu0 %v1905_v4  ;;  %v1307_v3 = vld [vmem:[#allocation5 + $0x2d0] sm:$0xff]  ;;  %v1300_v4 = vld [vmem:[#allocation5 + $0x298] sm:$0xff] }
 0x1a3   :  { %2544 = vmatprep.subr.mxu1 %v2170_v5  ;;  %2477 = vmatprep.subr.mxu0 %v1898_v6  ;;  %v1299_v5 = vld [vmem:[#allocation5 + $0x290] sm:$0xff]  ;;  %v1292_v6 = vld [vmem:[#allocation5 + $0x258] sm:$0xff] }
 0x1a4   :  { %2545 = vmatpush2.msra.mxu1 %v2169_v7  ;;  %2478 = vmatpush2.msra.mxu0 %v1897_v9  ;;  %v1291_v7 = vld [vmem:[#allocation5 + $0x250] sm:$0xff]  ;;  %v1284_v9 = vld [vmem:[#allocation5 + $0x218] sm:$0xff] }
 0x1a5   :  { %2546 = vmatprep.subr.mxu1 %v2162_v10  ;;  %2479 = vmatprep.subr.mxu0 %v1890_v27  ;;  %v1283_v10 = vld [vmem:[#allocation5 + $0x210] sm:$0xff]  ;;  %v1276_v27 = vld [vmem:[#allocation5 + $0x1d8] sm:$0xff] }
 0x1a6   :  { %2547 = vmatpush2.msra.mxu1 %v2161_v12  ;;  %2480 = vmatpush2.msra.mxu0 %v1889_v15  ;;  %v1275_v12 = vld [vmem:[#allocation5 + $0x1d0] sm:$0xff]  ;;  %v1268_v15 = vld [vmem:[#allocation5 + $0x198] sm:$0xff] }
 0x1a7   :  { %2548 = vmatprep.subr.mxu1 %v2154_v16  ;;  %2481 = vmatprep.subr.mxu0 %v1882_v17  ;;  %v1267_v16 = vld [vmem:[#allocation5 + $0x190] sm:$0xff]  ;;  %v1260_v17 = vld [vmem:[#allocation5 + $0x158] sm:$0xff] }
 0x1a8   :  { %2549 = vmatpush2.msra.mxu1 %v2153_v18  ;;  %2482 = vmatpush2.msra.mxu0 %v1881_v20  ;;  %v1259_v18 = vld [vmem:[#allocation5 + $0x150] sm:$0xff]  ;;  %v1252_v20 = vld [vmem:[#allocation5 + $0x118] sm:$0xff] }
 0x1a9   :  { %2550 = vmatprep.subr.mxu1 %v2146_v22  ;;  %2483 = vmatprep.subr.mxu0 %v1874_v23  ;;  %v1251_v22 = vld [vmem:[#allocation5 + $0x110] sm:$0xff]  ;;  %v1244_v23 = vld [vmem:[#allocation5 + $0xd8] sm:$0xff] }
 0x1aa   :  { %2551 = vmatpush2.msra.mxu1 %v2145_v25  ;;  %2484 = vmatpush2.msra.mxu0 %v1873_v29  ;;  %v1243_v25 = vld [vmem:[#allocation5 + $0xd0] sm:$0xff] }
 0x1ab   :  { %v991_v37 = vpop.f32.mrf.mxu0  ;;  %2552 = vmatprep.subr.mxu1 %v2138_v31  ;;  %2485 = vmatprep.subr.mxu0 %v1866_v32  ;;  %v1235_v29 = vld [vmem:[#allocation5 + $0x90] sm:$0xff]  ;;  %v1228_v31 = vld [vmem:[#allocation5 + $0x58] sm:$0xff] }
 0x1ac   :  { %v992_v40 = vadd.f32 %v991_v37, %v598_v28  ;;  %2553 = vmatpush2.msra.mxu1 %v2137_v33  ;;  %2486 = vmatpush2.msra.mxu0 %v1865_v35  ;;  %v1236_v28 = vld [vmem:[#allocation5 + $0x98] sm:$0xff]  ;;  %v1227_v32 = vld [vmem:[#allocation5 + $0x50] sm:$0xff] }
 0x1ad   :  { %v1062_v44 = vpop.f32.mrf.mxu1  ;;  %v993_v45 = vpop.f32.mrf.mxu0  ;;  %2554 = vmatprep.subr.mxu1 %v2130_v36  ;;  %2487 = vmatprep.subr.mxu0 %v1858_v38  ;;  %v1220_v33 = vld [vmem:[#allocation5 + $0x18] sm:$0xff]  ;;  %v1467_v36 = vld [vmem:[#allocation5 + $0x7d0] sm:$0xff] }
 0x1ae   :  { %v994_v49 = vadd.f32 %v993_v45, %v602_v34  ;;  %2555 = vmatpush2.msra.mxu1 %v2129_v39  ;;  %v1063_v51 = vadd.f32 %v1062_v44, %v992_v40  ;;  %2488 = vmatpush2.msra.mxu0 %v1857_v42  ;;  %v1219_v34 = vld [vmem:[#allocation5 + $0x10] sm:$0xff]  ;;  %v1468_v35 = vld [vmem:[#allocation5 + $0x7d8] sm:$0xff] }
 0x1af   :  { %v1064_v53 = vpop.f32.mrf.mxu1  ;;  %2556 = vmatprep.subr.mxu1 %v2122_v43  ;;  %2567 = vmatprep.subr.mxu0 %v1340_v46  ;;  %v1460_v37 = vld [vmem:[#allocation5 + $0x798] sm:$0xff]  ;;  %v1459_v38 = vld [vmem:[#allocation5 + $0x790] sm:$0xff] }
 0x1b0   :  { %v1065_v56 = vadd.f32 %v1064_v53, %v994_v49  ;;  %2557 = vmatpush2.msra.mxu1 %v2121_v47  ;;  %v5766_v59 = vmax.f32 %v1063_v51, 0.0  ;;  %v1452_v39 = vld [vmem:[#allocation5 + $0x758] sm:$0xff]  ;;  %v1451_v40 = vld [vmem:[#allocation5 + $0x750] sm:$0xff] }
 0x1b1   :  { %2558 = vmatprep.subr.mxu1 %v2114_v50  ;;  %v1444_v42 = vld [vmem:[#allocation5 + $0x718] sm:$0xff]  ;;  %v1443_v43 = vld [vmem:[#allocation5 + $0x710] sm:$0xff] }
 0x1b2   :  { %v5764_v58 = vmax.f32 %v1065_v56, 0.0  ;;  %2559 = vmatpush2.msra.mxu1 %v2113_v55  ;;  %v1436_v44 = vld [vmem:[#allocation5 + $0x6d8] sm:$0xff]  ;;  %v1435_v45 = vld [vmem:[#allocation5 + $0x6d0] sm:$0xff] }
 0x1b3   :  { %2638 = vmatprep.subr.mxu1 %v1596_v57  ;;  %v1428_v46 = vld [vmem:[#allocation5 + $0x698] sm:$0xff]  ;;  %v1427_v47 = vld [vmem:[#allocation5 + $0x690] sm:$0xff] }
 0x1b4   :  { %2489 = vmatprep.mubr.f32.mxu0 %v5764_v58  ;;  %v1420_v49 = vld [vmem:[#allocation5 + $0x658] sm:$0xff]  ;;  %v1419_v50 = vld [vmem:[#allocation5 + $0x650] sm:$0xff] }
 0x1b5   :  { %2490 = vmatmul.mubr.f32.vlgmr.msra.gmra.mxu0 %v5766_v59  ;;  %v1412_v51 = vld [vmem:[#allocation5 + $0x618] sm:$0xff]  ;;  %v1411_v53 = vld [vmem:[#allocation5 + $0x610] sm:$0xff] }
 0x1b6   :  { %2568 = vmatpush1.msra.mxu0 %v1339_v61  ;;  %2631 = vmatprep.mubr.f32.mxu0 %v5733_v60  ;;  %v1404_v55 = vld [vmem:[#allocation5 + $0x5d8] sm:$0xff]  ;;  %v1403_v56 = vld [vmem:[#allocation5 + $0x5d0] sm:$0xff] }
 0x1b7   :  { %2569 = vmatprep.subr.mxu0 %v1332_v63  ;;  %v1396_v57 = vld [vmem:[#allocation5 + $0x598] sm:$0xff]  ;;  %v1395_v61 = vld [vmem:[#allocation5 + $0x590] sm:$0xff] }
 0x1b8   :  { %2570 = vmatpush1.msra.mxu0 %v1331_v0  ;;  %v1388_v63 = vld [vmem:[#allocation5 + $0x558] sm:$0xff]  ;;  %v1387_v0 = vld [vmem:[#allocation5 + $0x550] sm:$0xff] }
 0x1b9   :  { %2571 = vmatprep.subr.mxu0 %v1324_v8  ;;  %v605_v8 = vsub.s32 6, %v4457_v41 }
 0x1ba   :  { %2572 = vmatpush1.msra.mxu0 %v1323_v1  ;;  %v1380_v1 = vld [vmem:[#allocation5 + $0x518] sm:$0xff] }
 0x1bb   :  { %2573 = vmatprep.subr.mxu0 %v1316_v11  ;;  %v1379_v11 = vld [vmem:[#allocation5 + $0x510] sm:$0xff] }
 0x1bc   :  { %2574 = vmatpush1.msra.mxu0 %v1315_v2  ;;  %v609_v2 = vsub.s32 7, %v4457_v41 }
 0x1bd   :  { %2575 = vmatprep.subr.mxu0 %v1308_v62  ;;  %v1372_v62 = vld [vmem:[#allocation5 + $0x4d8] sm:$0xff] }
 0x1be   :  { %2576 = vmatpush1.msra.mxu0 %v1307_v3  ;;  %v606_v3 = vrot.slane %v5756_v26, %v605_v8 }
 0x1bf   :  { %2577 = vmatprep.subr.mxu0 %v1300_v4  ;;  %v1371_v4 = vld [vmem:[#allocation5 + $0x4d0] sm:$0xff] }
 0x1c0   :  { %2578 = vmatpush1.msra.mxu0 %v1299_v5  ;;  %v1364_v5 = vld [vmem:[#allocation5 + $0x498] sm:$0xff] }
 0x1c1   :  { %2579 = vmatprep.subr.mxu0 %v1292_v6  ;;  %v610_v6 = vrot.slane %v5756_v26, %v609_v2  ;;  %v1851_v26 = vld [vmem:[#allocation5 + $0x13d0] sm:$0xff] }
 0x1c2   :  { %2580 = vmatpush1.msra.mxu0 %v1291_v7  ;;  %v1363_v7 = vld [vmem:[#allocation5 + $0x490] sm:$0xff] }
 0x1c3   :  { %2581 = vmatprep.subr.mxu0 %v1284_v9 }
 0x1c4   :  { %2582 = vmatpush1.msra.mxu0 %v1283_v10 }
 0x1c5   :  { %2583 = vmatprep.subr.mxu0 %v1276_v27  ;;  %v1356_v27 = vld [vmem:[#allocation5 + $0x458] sm:$0xff] }
 0x1c6   :  { %2584 = vmatpush1.msra.mxu0 %v1275_v12 }
 0x1c7   :  { %2585 = vmatprep.subr.mxu0 %v1268_v15  ;;  %v1355_v15 = vld [vmem:[#allocation5 + $0x450] sm:$0xff] }
 0x1c8   :  { %2586 = vmatpush1.msra.mxu0 %v1267_v16 }
 0x1c9   :  { %2587 = vmatprep.subr.mxu0 %v1260_v17  ;;  %v1348_v17 = vld [vmem:[#allocation5 + $0x418] sm:$0xff] }
 0x1ca   :  { %2588 = vmatpush1.msra.mxu0 %v1259_v18 }
 0x1cb   :  { %2589 = vmatprep.subr.mxu0 %v1252_v20  ;;  %v1347_v20 = vld [vmem:[#allocation5 + $0x410] sm:$0xff] }
 0x1cc   :  { %2590 = vmatpush1.msra.mxu0 %v1251_v22 }
 0x1cd   :  { %2591 = vmatprep.subr.mxu0 %v1244_v23 }
 0x1ce   :  { %2592 = vmatpush1.msra.mxu0 %v1243_v25  ;;  %v1852_v25 = vld [vmem:[#allocation5 + $0x13d8] sm:$0xff] }
 0x1cf   :  { %2593 = vmatprep.subr.mxu0 %v1236_v28 }
 0x1d0   :  { %2594 = vmatpush1.msra.mxu0 %v1235_v29  ;;  %v1844_v29 = vld [vmem:[#allocation5 + $0x1398] sm:$0xff] }
 0x1d1   :  { %2595 = vmatprep.subr.mxu0 %v1228_v31 }
 0x1d2   :  { %2596 = vmatpush1.msra.mxu0 %v1227_v32  ;;  %v1843_v32 = vld [vmem:[#allocation5 + $0x1390] sm:$0xff] }
 0x1d3   :  { %2597 = vmatprep.subr.mxu0 %v1220_v33 }
 0x1d4   :  { %2598 = vmatpush1.msra.mxu0 %v1219_v34  ;;  %v1595_v34 = vld [vmem:[#allocation5 + $0xbd0] sm:$0xff] }
 0x1d5   :  { %2599 = vmatprep.subr.mxu0 %v1468_v35  ;;  %v1588_v35 = vld [vmem:[#allocation5 + $0xb98] sm:$0xff] }
 0x1d6   :  { %2600 = vmatpush2.msra.mxu0 %v1467_v36  ;;  %v1836_v36 = vld [vmem:[#allocation5 + $0x1358] sm:$0xff] }
 0x1d7   :  { %2601 = vmatprep.subr.mxu0 %v1460_v37  ;;  %v1587_v37 = vld [vmem:[#allocation5 + $0xb90] sm:$0xff] }
 0x1d8   :  { %2602 = vmatpush2.msra.mxu0 %v1459_v38  ;;  %v1835_v38 = vld [vmem:[#allocation5 + $0x1350] sm:$0xff] }
 0x1d9   :  { %2603 = vmatprep.subr.mxu0 %v1452_v39  ;;  %v1580_v39 = vld [vmem:[#allocation5 + $0xb58] sm:$0xff] }
 0x1da   :  { %2604 = vmatpush2.msra.mxu0 %v1451_v40  ;;  %v1828_v40 = vld [vmem:[#allocation5 + $0x1318] sm:$0xff] }
 0x1db   :  { %2605 = vmatprep.subr.mxu0 %v1444_v42  ;;  %v1579_v42 = vld [vmem:[#allocation5 + $0xb50] sm:$0xff] }
 0x1dc   :  { %2606 = vmatpush2.msra.mxu0 %v1443_v43  ;;  %v1827_v43 = vld [vmem:[#allocation5 + $0x1310] sm:$0xff] }
 0x1dd   :  { %2607 = vmatprep.subr.mxu0 %v1436_v44  ;;  %v1572_v44 = vld [vmem:[#allocation5 + $0xb18] sm:$0xff] }
 0x1de   :  { %2608 = vmatpush2.msra.mxu0 %v1435_v45  ;;  %v1820_v45 = vld [vmem:[#allocation5 + $0x12d8] sm:$0xff] }
 0x1df   :  { %2609 = vmatprep.subr.mxu0 %v1428_v46  ;;  %v1571_v46 = vld [vmem:[#allocation5 + $0xb10] sm:$0xff] }
 0x1e0   :  { %2610 = vmatpush2.msra.mxu0 %v1427_v47  ;;  %v1819_v47 = vld [vmem:[#allocation5 + $0x12d0] sm:$0xff] }
 0x1e1   :  { %2611 = vmatprep.subr.mxu0 %v1420_v49  ;;  %v1564_v49 = vld [vmem:[#allocation5 + $0xad8] sm:$0xff] }
 0x1e2   :  { %2612 = vmatpush2.msra.mxu0 %v1419_v50  ;;  %v1812_v50 = vld [vmem:[#allocation5 + $0x1298] sm:$0xff] }
 0x1e3   :  { %2613 = vmatprep.subr.mxu0 %v1412_v51  ;;  %v1563_v51 = vld [vmem:[#allocation5 + $0xad0] sm:$0xff] }
 0x1e4   :  { %2614 = vmatpush2.msra.mxu0 %v1411_v53  ;;  %v1811_v53 = vld [vmem:[#allocation5 + $0x1290] sm:$0xff] }
 0x1e5   :  { %2615 = vmatprep.subr.mxu0 %v1404_v55  ;;  %v1556_v55 = vld [vmem:[#allocation5 + $0xa98] sm:$0xff] }
 0x1e6   :  { %2616 = vmatpush2.msra.mxu0 %v1403_v56  ;;  %v1804_v56 = vld [vmem:[#allocation5 + $0x1258] sm:$0xff] }
 0x1e7   :  { %2617 = vmatprep.subr.mxu0 %v1396_v57  ;;  %v1555_v57 = vld [vmem:[#allocation5 + $0xa90] sm:$0xff] }
 0x1e8   :  { %2618 = vmatpush2.msra.mxu0 %v1395_v61  ;;  %v1803_v61 = vld [vmem:[#allocation5 + $0x1250] sm:$0xff] }
 0x1e9   :  { %2619 = vmatprep.subr.mxu0 %v1388_v63  ;;  %v1548_v63 = vld [vmem:[#allocation5 + $0xa58] sm:$0xff] }
 0x1ea   :  { %2620 = vmatpush2.msra.mxu0 %v1387_v0  ;;  %v1796_v0 = vld [vmem:[#allocation5 + $0x1218] sm:$0xff] }
 0x1eb   :  { %2621 = vmatprep.subr.mxu0 %v1380_v1  ;;  %v1547_v1 = vld [vmem:[#allocation5 + $0xa50] sm:$0xff] }
 0x1ec   :  { %2622 = vmatpush2.msra.mxu0 %v1379_v11  ;;  %v1795_v11 = vld [vmem:[#allocation5 + $0x1210] sm:$0xff] }
 0x1ed   :  { %2623 = vmatprep.subr.mxu0 %v1372_v62  ;;  %v1133_v9 = vpop.f32.mrf.mxu0  ;;  %v1540_v62 = vld [vmem:[#allocation5 + $0xa18] sm:$0xff] }
 0x1ee   :  { %v1204_v10 = vpop.f32.mrf.mxu1  ;;  %2624 = vmatpush2.msra.mxu0 %v1371_v4  ;;  %v1134_v12 = vadd.f32 %v1133_v9, %v606_v3  ;;  %v1788_v3 = vld [vmem:[#allocation5 + $0x11d8] sm:$0xff]  ;;  %v1539_v4 = vld [vmem:[#allocation5 + $0xa10] sm:$0xff] }
 0x1ef   :  { %2625 = vmatprep.subr.mxu0 %v1364_v5  ;;  %v1135_v16 = vpop.f32.mrf.mxu0  ;;  %v1787_v5 = vld [vmem:[#allocation5 + $0x11d0] sm:$0xff] }
 0x1f0   :  { %2626 = vmatpush2.msra.mxu0 %v1363_v7  ;;  %v1136_v18 = vadd.f32 %v1135_v16, %v610_v6  ;;  %v1205_v22 = vadd.f32 %v1204_v10, %v1134_v12  ;;  %v1206_v23 = vpop.f32.mrf.mxu1  ;;  %v1532_v6 = vld [vmem:[#allocation5 + $0x9d8] sm:$0xff]  ;;  %v1531_v9 = vld [vmem:[#allocation5 + $0x9d0] sm:$0xff] }
 0x1f1   :  { %2627 = vmatprep.subr.mxu0 %v1356_v27  ;;  %v1780_v7 = vld [vmem:[#allocation5 + $0x1198] sm:$0xff]  ;;  %v1779_v10 = vld [vmem:[#allocation5 + $0x1190] sm:$0xff] }
 0x1f2   :  { %2628 = vmatpush2.msra.mxu0 %v1355_v15  ;;  %v1207_v28 = vadd.f32 %v1206_v23, %v1136_v18  ;;  %v5782_v33 = vmax.f32 %v1205_v22, 0.0  ;;  %v1524_v27 = vld [vmem:[#allocation5 + $0x998] sm:$0xff]  ;;  %v1523_v15 = vld [vmem:[#allocation5 + $0x990] sm:$0xff] }
 0x1f3   :  { %2629 = vmatprep.subr.mxu0 %v1348_v17  ;;  %v1772_v12 = vld [vmem:[#allocation5 + $0x1158] sm:$0xff]  ;;  %v1771_v16 = vld [vmem:[#allocation5 + $0x1150] sm:$0xff] }
 0x1f4   :  { %2630 = vmatpush2.msra.mxu0 %v1347_v20  ;;  %v5779_v31 = vmax.f32 %v1207_v28, 0.0  ;;  %v1516_v17 = vld [vmem:[#allocation5 + $0x958] sm:$0xff]  ;;  %v1515_v20 = vld [vmem:[#allocation5 + $0x950] sm:$0xff] }
 0x1f5   :  { %2632 = vmatmul.mubr.f32.vlgmr.msra.gmra.mxu0 %v5745_v13  ;;  %2709 = vmatprep.subr.mxu0 %v1852_v25  ;;  %v1764_v18 = vld [vmem:[#allocation5 + $0x1118] sm:$0xff]  ;;  %v1763_v22 = vld [vmem:[#allocation5 + $0x1110] sm:$0xff] }
 0x1f6   :  { %2710 = vmatpush1.msra.mxu0 %v1851_v26  ;;  %2773 = vmatprep.mubr.f32.mxu0 %v5764_v58  ;;  %v1508_v23 = vld [vmem:[#allocation5 + $0x918] sm:$0xff]  ;;  %v1507_v28 = vld [vmem:[#allocation5 + $0x910] sm:$0xff] }
 0x1f7   :  { %2560 = vmatprep.mubr.f32.mxu1 %v5779_v31  ;;  %2711 = vmatprep.subr.mxu0 %v1844_v29  ;;  %v1756_v25 = vld [vmem:[#allocation5 + $0x10d8] sm:$0xff]  ;;  %v1755_v26 = vld [vmem:[#allocation5 + $0x10d0] sm:$0xff] }
 0x1f8   :  { %2561 = vmatmul.mubr.f32.vlgmr.msra.gmra.mxu1 %v5782_v33  ;;  %2712 = vmatpush1.msra.mxu0 %v1843_v32  ;;  %v1500_v29 = vld [vmem:[#allocation5 + $0x8d8] sm:$0xff] }
 0x1f9   :  { %2639 = vmatpush1.msra.mxu1 %v1595_v34  ;;  %2702 = vmatprep.mubr.f32.mxu1 %v5748_v21  ;;  %v1748_v32 = vld [vmem:[#allocation5 + $0x1098] sm:$0xff]  ;;  %v1499_v34 = vld [vmem:[#allocation5 + $0x8d0] sm:$0xff] }
 0x1fa   :  { %2640 = vmatprep.subr.mxu1 %v1588_v35  ;;  %2713 = vmatprep.subr.mxu0 %v1836_v36  ;;  %v1747_v35 = vld [vmem:[#allocation5 + $0x1090] sm:$0xff]  ;;  %v1492_v36 = vld [vmem:[#allocation5 + $0x898] sm:$0xff] }
 0x1fb   :  { %2641 = vmatpush1.msra.mxu1 %v1587_v37  ;;  %2714 = vmatpush1.msra.mxu0 %v1835_v38  ;;  %v1740_v37 = vld [vmem:[#allocation5 + $0x1058] sm:$0xff]  ;;  %v1491_v38 = vld [vmem:[#allocation5 + $0x890] sm:$0xff] }
 0x1fc   :  { %2642 = vmatprep.subr.mxu1 %v1580_v39  ;;  %2715 = vmatprep.subr.mxu0 %v1828_v40  ;;  %v1739_v39 = vld [vmem:[#allocation5 + $0x1050] sm:$0xff]  ;;  %v1484_v40 = vld [vmem:[#allocation5 + $0x858] sm:$0xff] }
 0x1fd   :  { %2643 = vmatpush1.msra.mxu1 %v1579_v42  ;;  %2716 = vmatpush1.msra.mxu0 %v1827_v43  ;;  %v1732_v42 = vld [vmem:[#allocation5 + $0x1018] sm:$0xff]  ;;  %v1483_v43 = vld [vmem:[#allocation5 + $0x850] sm:$0xff] }
 0x1fe   :  { %2644 = vmatprep.subr.mxu1 %v1572_v44  ;;  %2717 = vmatprep.subr.mxu0 %v1820_v45  ;;  %v1731_v44 = vld [vmem:[#allocation5 + $0x1010] sm:$0xff]  ;;  %v1476_v45 = vld [vmem:[#allocation5 + $0x818] sm:$0xff] }
 0x1ff   :  { %2645 = vmatpush1.msra.mxu1 %v1571_v46  ;;  %2718 = vmatpush1.msra.mxu0 %v1819_v47  ;;  %v1980_v46 = vld [vmem:[#allocation5 + $0x17d8] sm:$0xff]  ;;  %v1475_v47 = vld [vmem:[#allocation5 + $0x810] sm:$0xff] }
 0x200   :  { %2646 = vmatprep.subr.mxu1 %v1564_v49  ;;  %2719 = vmatprep.subr.mxu0 %v1812_v50  ;;  %v1979_v49 = vld [vmem:[#allocation5 + $0x17d0] sm:$0xff]  ;;  %v1724_v50 = vld [vmem:[#allocation5 + $0xfd8] sm:$0xff] }
 0x201   :  { %2647 = vmatpush1.msra.mxu1 %v1563_v51  ;;  %2720 = vmatpush1.msra.mxu0 %v1811_v53  ;;  %v1972_v51 = vld [vmem:[#allocation5 + $0x1798] sm:$0xff]  ;;  %v1723_v53 = vld [vmem:[#allocation5 + $0xfd0] sm:$0xff] }
 0x202   :  { %2648 = vmatprep.subr.mxu1 %v1556_v55  ;;  %2721 = vmatprep.subr.mxu0 %v1804_v56  ;;  %v1971_v55 = vld [vmem:[#allocation5 + $0x1790] sm:$0xff]  ;;  %v1716_v56 = vld [vmem:[#allocation5 + $0xf98] sm:$0xff] }
 0x203   :  { %2649 = vmatpush1.msra.mxu1 %v1555_v57  ;;  %2722 = vmatpush1.msra.mxu0 %v1803_v61  ;;  %v1964_v57 = vld [vmem:[#allocation5 + $0x1758] sm:$0xff]  ;;  %v1715_v61 = vld [vmem:[#allocation5 + $0xf90] sm:$0xff] }
 0x204   :  { %2650 = vmatprep.subr.mxu1 %v1548_v63  ;;  %2723 = vmatprep.subr.mxu0 %v1796_v0  ;;  %v1963_v63 = vld [vmem:[#allocation5 + $0x1750] sm:$0xff]  ;;  %v1708_v0 = vld [vmem:[#allocation5 + $0xf58] sm:$0xff] }
 0x205   :  { %2651 = vmatpush1.msra.mxu1 %v1547_v1  ;;  %2724 = vmatpush1.msra.mxu0 %v1795_v11  ;;  %v1956_v1 = vld [vmem:[#allocation5 + $0x1718] sm:$0xff]  ;;  %v1707_v11 = vld [vmem:[#allocation5 + $0xf50] sm:$0xff] }
 0x206   :  { %2652 = vmatprep.subr.mxu1 %v1540_v62  ;;  %2725 = vmatprep.subr.mxu0 %v1788_v3  ;;  %v1955_v62 = vld [vmem:[#allocation5 + $0x1710] sm:$0xff]  ;;  %v1700_v3 = vld [vmem:[#allocation5 + $0xf18] sm:$0xff] }
 0x207   :  { %2653 = vmatpush1.msra.mxu1 %v1539_v4  ;;  %2726 = vmatpush1.msra.mxu0 %v1787_v5  ;;  %v1948_v4 = vld [vmem:[#allocation5 + $0x16d8] sm:$0xff]  ;;  %v1699_v5 = vld [vmem:[#allocation5 + $0xf10] sm:$0xff] }
 0x208   :  { %2654 = vmatprep.subr.mxu1 %v1532_v6  ;;  %2727 = vmatprep.subr.mxu0 %v1780_v7  ;;  %v1947_v6 = vld [vmem:[#allocation5 + $0x16d0] sm:$0xff]  ;;  %v1692_v7 = vld [vmem:[#allocation5 + $0xed8] sm:$0xff] }
 0x209   :  { %2655 = vmatpush1.msra.mxu1 %v1531_v9  ;;  %2728 = vmatpush1.msra.mxu0 %v1779_v10  ;;  %v1940_v9 = vld [vmem:[#allocation5 + $0x1698] sm:$0xff]  ;;  %v1691_v10 = vld [vmem:[#allocation5 + $0xed0] sm:$0xff] }
 0x20a   :  { %2656 = vmatprep.subr.mxu1 %v1524_v27  ;;  %2729 = vmatprep.subr.mxu0 %v1772_v12  ;;  %v1939_v27 = vld [vmem:[#allocation5 + $0x1690] sm:$0xff]  ;;  %v1684_v12 = vld [vmem:[#allocation5 + $0xe98] sm:$0xff] }
 0x20b   :  { %2657 = vmatpush1.msra.mxu1 %v1523_v15  ;;  %2730 = vmatpush1.msra.mxu0 %v1771_v16  ;;  %v1932_v15 = vld [vmem:[#allocation5 + $0x1658] sm:$0xff]  ;;  %v1683_v16 = vld [vmem:[#allocation5 + $0xe90] sm:$0xff] }
 0x20c   :  { %2658 = vmatprep.subr.mxu1 %v1516_v17  ;;  %2731 = vmatprep.subr.mxu0 %v1764_v18  ;;  %v1931_v17 = vld [vmem:[#allocation5 + $0x1650] sm:$0xff]  ;;  %v1676_v18 = vld [vmem:[#allocation5 + $0xe58] sm:$0xff] }
 0x20d   :  { %2659 = vmatpush1.msra.mxu1 %v1515_v20  ;;  %2732 = vmatpush1.msra.mxu0 %v1763_v22  ;;  %v1924_v20 = vld [vmem:[#allocation5 + $0x1618] sm:$0xff]  ;;  %v1675_v22 = vld [vmem:[#allocation5 + $0xe50] sm:$0xff] }
 0x20e   :  { %2660 = vmatprep.subr.mxu1 %v1508_v23  ;;  %2733 = vmatprep.subr.mxu0 %v1756_v25  ;;  %v1923_v23 = vld [vmem:[#allocation5 + $0x1610] sm:$0xff]  ;;  %v1668_v25 = vld [vmem:[#allocation5 + $0xe18] sm:$0xff] }
 0x20f   :  { %2661 = vmatpush1.msra.mxu1 %v1507_v28  ;;  %2734 = vmatpush1.msra.mxu0 %v1755_v26  ;;  %v1916_v28 = vld [vmem:[#allocation5 + $0x15d8] sm:$0xff]  ;;  %v1667_v26 = vld [vmem:[#allocation5 + $0xe10] sm:$0xff] }
 0x210   :  { %2662 = vmatprep.subr.mxu1 %v1500_v29  ;;  %2735 = vmatprep.subr.mxu0 %v1748_v32  ;;  %v1915_v29 = vld [vmem:[#allocation5 + $0x15d0] sm:$0xff]  ;;  %v1660_v32 = vld [vmem:[#allocation5 + $0xdd8] sm:$0xff] }
 0x211   :  { %2663 = vmatpush1.msra.mxu1 %v1499_v34  ;;  %2736 = vmatpush1.msra.mxu0 %v1747_v35  ;;  %v1908_v34 = vld [vmem:[#allocation5 + $0x1598] sm:$0xff]  ;;  %v1659_v35 = vld [vmem:[#allocation5 + $0xdd0] sm:$0xff] }
 0x212   :  { %2664 = vmatprep.subr.mxu1 %v1492_v36  ;;  %2737 = vmatprep.subr.mxu0 %v1740_v37  ;;  %v1907_v36 = vld [vmem:[#allocation5 + $0x1590] sm:$0xff]  ;;  %v1652_v37 = vld [vmem:[#allocation5 + $0xd98] sm:$0xff] }
 0x213   :  { %2665 = vmatpush1.msra.mxu1 %v1491_v38  ;;  %2738 = vmatpush1.msra.mxu0 %v1739_v39  ;;  %v1900_v38 = vld [vmem:[#allocation5 + $0x1558] sm:$0xff]  ;;  %v1651_v39 = vld [vmem:[#allocation5 + $0xd90] sm:$0xff] }
 0x214   :  { %2666 = vmatprep.subr.mxu1 %v1484_v40  ;;  %2739 = vmatprep.subr.mxu0 %v1732_v42  ;;  %v1899_v40 = vld [vmem:[#allocation5 + $0x1550] sm:$0xff]  ;;  %v1644_v42 = vld [vmem:[#allocation5 + $0xd58] sm:$0xff] }
 0x215   :  { %2667 = vmatpush1.msra.mxu1 %v1483_v43  ;;  %2740 = vmatpush1.msra.mxu0 %v1731_v44  ;;  %v1892_v43 = vld [vmem:[#allocation5 + $0x1518] sm:$0xff]  ;;  %v1643_v44 = vld [vmem:[#allocation5 + $0xd50] sm:$0xff] }
 0x216   :  { %2668 = vmatprep.subr.mxu1 %v1476_v45  ;;  %2741 = vmatprep.subr.mxu0 %v1980_v46  ;;  %v1891_v45 = vld [vmem:[#allocation5 + $0x1510] sm:$0xff]  ;;  %v1636_v46 = vld [vmem:[#allocation5 + $0xd18] sm:$0xff] }
 0x217   :  { %2669 = vmatpush1.msra.mxu1 %v1475_v47  ;;  %2742 = vmatpush2.msra.mxu0 %v1979_v49  ;;  %v1884_v47 = vld [vmem:[#allocation5 + $0x14d8] sm:$0xff]  ;;  %v1635_v49 = vld [vmem:[#allocation5 + $0xd10] sm:$0xff] }
 0x218   :  { %2670 = vmatprep.subr.mxu1 %v1724_v50  ;;  %2743 = vmatprep.subr.mxu0 %v1972_v51  ;;  %v1883_v50 = vld [vmem:[#allocation5 + $0x14d0] sm:$0xff]  ;;  %v1628_v51 = vld [vmem:[#allocation5 + $0xcd8] sm:$0xff] }
 0x219   :  { %2671 = vmatpush2.msra.mxu1 %v1723_v53  ;;  %2744 = vmatpush2.msra.mxu0 %v1971_v55  ;;  %v1876_v53 = vld [vmem:[#allocation5 + $0x1498] sm:$0xff]  ;;  %v1627_v55 = vld [vmem:[#allocation5 + $0xcd0] sm:$0xff] }
 0x21a   :  { %2672 = vmatprep.subr.mxu1 %v1716_v56  ;;  %2745 = vmatprep.subr.mxu0 %v1964_v57  ;;  %v1875_v56 = vld [vmem:[#allocation5 + $0x1490] sm:$0xff]  ;;  %v1620_v57 = vld [vmem:[#allocation5 + $0xc98] sm:$0xff] }
 0x21b   :  { %2673 = vmatpush2.msra.mxu1 %v1715_v61  ;;  %2746 = vmatpush2.msra.mxu0 %v1963_v63  ;;  %v1868_v61 = vld [vmem:[#allocation5 + $0x1458] sm:$0xff]  ;;  %v1619_v63 = vld [vmem:[#allocation5 + $0xc90] sm:$0xff] }
 0x21c   :  { %2674 = vmatprep.subr.mxu1 %v1708_v0  ;;  %2747 = vmatprep.subr.mxu0 %v1956_v1  ;;  %v1867_v0 = vld [vmem:[#allocation5 + $0x1450] sm:$0xff]  ;;  %v1612_v1 = vld [vmem:[#allocation5 + $0xc58] sm:$0xff] }
 0x21d   :  { %2675 = vmatpush2.msra.mxu1 %v1707_v11  ;;  %2748 = vmatpush2.msra.mxu0 %v1955_v62  ;;  %v1860_v11 = vld [vmem:[#allocation5 + $0x1418] sm:$0xff]  ;;  %v1611_v62 = vld [vmem:[#allocation5 + $0xc50] sm:$0xff] }
 0x21e   :  { %2676 = vmatprep.subr.mxu1 %v1700_v3  ;;  %2749 = vmatprep.subr.mxu0 %v1948_v4  ;;  %v1859_v3 = vld [vmem:[#allocation5 + $0x1410] sm:$0xff]  ;;  %v1604_v4 = vld [vmem:[#allocation5 + $0xc18] sm:$0xff] }
 0x21f   :  { %2677 = vmatpush2.msra.mxu1 %v1699_v5  ;;  %2750 = vmatpush2.msra.mxu0 %v1947_v6  ;;  %v1603_v5 = vld [vmem:[#allocation5 + $0xc10] sm:$0xff]  ;;  %v1342_v6 = vld [vmem:[#allocation5 + $0x3e8] sm:$0xff] }
 0x220   :  { %2678 = vmatprep.subr.mxu1 %v1692_v7  ;;  %2751 = vmatprep.subr.mxu0 %v1940_v9  ;;  %v2108_v7 = vld [vmem:[#allocation5 + $0x1bd8] sm:$0xff]  ;;  %v2107_v9 = vld [vmem:[#allocation5 + $0x1bd0] sm:$0xff] }
 0x221   :  { %2679 = vmatpush2.msra.mxu1 %v1691_v10  ;;  %2752 = vmatpush2.msra.mxu0 %v1939_v27  ;;  %v1341_v10 = vld [vmem:[#allocation5 + $0x3e0] sm:$0xff]  ;;  %v2100_v27 = vld [vmem:[#allocation5 + $0x1b98] sm:$0xff] }
 0x222   :  { %2680 = vmatprep.subr.mxu1 %v1684_v12  ;;  %2753 = vmatprep.subr.mxu0 %v1932_v15  ;;  %v1334_v12 = vld [vmem:[#allocation5 + $0x3a8] sm:$0xff]  ;;  %v2099_v15 = vld [vmem:[#allocation5 + $0x1b90] sm:$0xff] }
 0x223   :  { %2681 = vmatpush2.msra.mxu1 %v1683_v16  ;;  %2754 = vmatpush2.msra.mxu0 %v1931_v17  ;;  %v1333_v16 = vld [vmem:[#allocation5 + $0x3a0] sm:$0xff]  ;;  %v2092_v17 = vld [vmem:[#allocation5 + $0x1b58] sm:$0xff] }
 0x224   :  { %2682 = vmatprep.subr.mxu1 %v1676_v18  ;;  %2755 = vmatprep.subr.mxu0 %v1924_v20  ;;  %v1326_v18 = vld [vmem:[#allocation5 + $0x368] sm:$0xff]  ;;  %v2091_v20 = vld [vmem:[#allocation5 + $0x1b50] sm:$0xff] }
 0x225   :  { %2683 = vmatpush2.msra.mxu1 %v1675_v22  ;;  %2756 = vmatpush2.msra.mxu0 %v1923_v23  ;;  %v1325_v22 = vld [vmem:[#allocation5 + $0x360] sm:$0xff]  ;;  %v2084_v23 = vld [vmem:[#allocation5 + $0x1b18] sm:$0xff] }
 0x226   :  { %2684 = vmatprep.subr.mxu1 %v1668_v25  ;;  %2757 = vmatprep.subr.mxu0 %v1916_v28  ;;  %v1318_v25 = vld [vmem:[#allocation5 + $0x328] sm:$0xff]  ;;  %v2083_v28 = vld [vmem:[#allocation5 + $0x1b10] sm:$0xff] }
 0x227   :  { %2685 = vmatpush2.msra.mxu1 %v1667_v26  ;;  %2758 = vmatpush2.msra.mxu0 %v1915_v29  ;;  %v1317_v26 = vld [vmem:[#allocation5 + $0x320] sm:$0xff]  ;;  %v2076_v29 = vld [vmem:[#allocation5 + $0x1ad8] sm:$0xff] }
 0x228   :  { %2686 = vmatprep.subr.mxu1 %v1660_v32  ;;  %2759 = vmatprep.subr.mxu0 %v1908_v34  ;;  %v1310_v32 = vld [vmem:[#allocation5 + $0x2e8] sm:$0xff]  ;;  %v2075_v34 = vld [vmem:[#allocation5 + $0x1ad0] sm:$0xff] }
 0x229   :  { %2687 = vmatpush2.msra.mxu1 %v1659_v35  ;;  %2760 = vmatpush2.msra.mxu0 %v1907_v36  ;;  %v1309_v35 = vld [vmem:[#allocation5 + $0x2e0] sm:$0xff]  ;;  %v2068_v36 = vld [vmem:[#allocation5 + $0x1a98] sm:$0xff] }
 0x22a   :  { %2688 = vmatprep.subr.mxu1 %v1652_v37  ;;  %2761 = vmatprep.subr.mxu0 %v1900_v38  ;;  %v1302_v37 = vld [vmem:[#allocation5 + $0x2a8] sm:$0xff]  ;;  %v2067_v38 = vld [vmem:[#allocation5 + $0x1a90] sm:$0xff] }
 0x22b   :  { %2689 = vmatpush2.msra.mxu1 %v1651_v39  ;;  %2762 = vmatpush2.msra.mxu0 %v1899_v40  ;;  %v1301_v39 = vld [vmem:[#allocation5 + $0x2a0] sm:$0xff]  ;;  %v2060_v40 = vld [vmem:[#allocation5 + $0x1a58] sm:$0xff] }
 0x22c   :  { %2690 = vmatprep.subr.mxu1 %v1644_v42  ;;  %2763 = vmatprep.subr.mxu0 %v1892_v43  ;;  %v1294_v42 = vld [vmem:[#allocation5 + $0x268] sm:$0xff]  ;;  %v2059_v43 = vld [vmem:[#allocation5 + $0x1a50] sm:$0xff] }
 0x22d   :  { %2691 = vmatpush2.msra.mxu1 %v1643_v44  ;;  %2764 = vmatpush2.msra.mxu0 %v1891_v45  ;;  %v1293_v44 = vld [vmem:[#allocation5 + $0x260] sm:$0xff]  ;;  %v2052_v45 = vld [vmem:[#allocation5 + $0x1a18] sm:$0xff] }
 0x22e   :  { %2692 = vmatprep.subr.mxu1 %v1636_v46  ;;  %2765 = vmatprep.subr.mxu0 %v1884_v47  ;;  %v1286_v46 = vld [vmem:[#allocation5 + $0x228] sm:$0xff]  ;;  %v2051_v47 = vld [vmem:[#allocation5 + $0x1a10] sm:$0xff] }
 0x22f   :  { %2693 = vmatpush2.msra.mxu1 %v1635_v49  ;;  %2766 = vmatpush2.msra.mxu0 %v1883_v50  ;;  %v1285_v49 = vld [vmem:[#allocation5 + $0x220] sm:$0xff]  ;;  %v2044_v50 = vld [vmem:[#allocation5 + $0x19d8] sm:$0xff] }
 0x230   :  { %2694 = vmatprep.subr.mxu1 %v1628_v51  ;;  %2767 = vmatprep.subr.mxu0 %v1876_v53  ;;  %v1278_v51 = vld [vmem:[#allocation5 + $0x1e8] sm:$0xff]  ;;  %v2043_v53 = vld [vmem:[#allocation5 + $0x19d0] sm:$0xff] }
 0x231   :  { %2695 = vmatpush2.msra.mxu1 %v1627_v55  ;;  %2768 = vmatpush2.msra.mxu0 %v1875_v56  ;;  %v1277_v55 = vld [vmem:[#allocation5 + $0x1e0] sm:$0xff]  ;;  %v2036_v56 = vld [vmem:[#allocation5 + $0x1998] sm:$0xff] }
 0x232   :  { %2696 = vmatprep.subr.mxu1 %v1620_v57  ;;  %2769 = vmatprep.subr.mxu0 %v1868_v61  ;;  %v1270_v57 = vld [vmem:[#allocation5 + $0x1a8] sm:$0xff]  ;;  %v2035_v61 = vld [vmem:[#allocation5 + $0x1990] sm:$0xff] }
 0x233   :  { %2697 = vmatpush2.msra.mxu1 %v1619_v63  ;;  %2770 = vmatpush2.msra.mxu0 %v1867_v0  ;;  %v1269_v63 = vld [vmem:[#allocation5 + $0x1a0] sm:$0xff]  ;;  %v2028_v0 = vld [vmem:[#allocation5 + $0x1958] sm:$0xff] }
 0x234   :  { %2698 = vmatprep.subr.mxu1 %v1612_v1  ;;  %2771 = vmatprep.subr.mxu0 %v1860_v11  ;;  %v1262_v1 = vld [vmem:[#allocation5 + $0x168] sm:$0xff]  ;;  %v2027_v11 = vld [vmem:[#allocation5 + $0x1950] sm:$0xff] }
 0x235   :  { %2699 = vmatpush2.msra.mxu1 %v1611_v62  ;;  %2772 = vmatpush2.msra.mxu0 %v1859_v3  ;;  %v1261_v62 = vld [vmem:[#allocation5 + $0x160] sm:$0xff]  ;;  %v2020_v3 = vld [vmem:[#allocation5 + $0x1918] sm:$0xff] }
 0x236   :  { %2700 = vmatprep.subr.mxu1 %v1604_v4  ;;  %2774 = vmatmul.mubr.f32.vlgmr.msra.gmra.mxu0 %v5766_v59  ;;  %v1254_v4 = vld [vmem:[#allocation5 + $0x128] sm:$0xff] }
 0x237   :  { %2701 = vmatpush2.msra.mxu1 %v1603_v5  ;;  %2851 = vmatprep.subr.mxu0 %v1342_v6  ;;  %v2019_v5 = vld [vmem:[#allocation5 + $0x1910] sm:$0xff]  ;;  %v1253_v6 = vld [vmem:[#allocation5 + $0x120] sm:$0xff] }
 0x238   :  { %2703 = vmatmul.mubr.f32.vlgmr.msra.gmra.mxu1 %v5750_v52  ;;  %2780 = vmatprep.subr.mxu1 %v2108_v7  ;;  %v2012_v7 = vld [vmem:[#allocation5 + $0x18d8] sm:$0xff] }
 0x239   :  { %2781 = vmatpush1.msra.mxu1 %v2107_v9  ;;  %2844 = vmatprep.mubr.f32.mxu1 %v5779_v31  ;;  %v1246_v9 = vld [vmem:[#allocation5 + $0xe8] sm:$0xff] }
 0x23a   :  { %2852 = vmatpush1.msra.mxu0 %v1341_v10  ;;  %2915 = vmatprep.mubr.f32.mxu0 %v5733_v60  ;;  %v2011_v10 = vld [vmem:[#allocation5 + $0x18d0] sm:$0xff] }
 0x23b   :  { %2782 = vmatprep.subr.mxu1 %v2100_v27  ;;  %2853 = vmatprep.subr.mxu0 %v1334_v12  ;;  %v1245_v27 = vld [vmem:[#allocation5 + $0xe0] sm:$0xff]  ;;  %v2004_v12 = vld [vmem:[#allocation5 + $0x1898] sm:$0xff] }
 0x23c   :  { %2783 = vmatpush1.msra.mxu1 %v2099_v15  ;;  %2854 = vmatpush1.msra.mxu0 %v1333_v16  ;;  %v1238_v15 = vld [vmem:[#allocation5 + $0xa8] sm:$0xff]  ;;  %v2003_v16 = vld [vmem:[#allocation5 + $0x1890] sm:$0xff] }
 0x23d   :  { %2784 = vmatprep.subr.mxu1 %v2092_v17  ;;  %2855 = vmatprep.subr.mxu0 %v1326_v18  ;;  %v1237_v17 = vld [vmem:[#allocation5 + $0xa0] sm:$0xff]  ;;  %v1996_v18 = vld [vmem:[#allocation5 + $0x1858] sm:$0xff] }
 0x23e   :  { %2785 = vmatpush1.msra.mxu1 %v2091_v20  ;;  %2856 = vmatpush1.msra.mxu0 %v1325_v22  ;;  %v1230_v20 = vld [vmem:[#allocation5 + $0x68] sm:$0xff]  ;;  %v1995_v22 = vld [vmem:[#allocation5 + $0x1850] sm:$0xff] }
 0x23f   :  { %2786 = vmatprep.subr.mxu1 %v2084_v23  ;;  %2857 = vmatprep.subr.mxu0 %v1318_v25  ;;  %v1229_v23 = vld [vmem:[#allocation5 + $0x60] sm:$0xff]  ;;  %v1988_v25 = vld [vmem:[#allocation5 + $0x1818] sm:$0xff] }
 0x240   :  { %2787 = vmatpush1.msra.mxu1 %v2083_v28  ;;  %2858 = vmatpush1.msra.mxu0 %v1317_v26  ;;  %v1222_v28 = vld [vmem:[#allocation5 + $0x28] sm:$0xff]  ;;  %v1987_v26 = vld [vmem:[#allocation5 + $0x1810] sm:$0xff] }
 0x241   :  { %2788 = vmatprep.subr.mxu1 %v2076_v29  ;;  %2859 = vmatprep.subr.mxu0 %v1310_v32  ;;  %v1221_v29 = vld [vmem:[#allocation5 + $0x20] sm:$0xff]  ;;  %v2236_v32 = vld [vmem:[#allocation5 + $0x1fd8] sm:$0xff] }
 0x242   :  { %2789 = vmatpush1.msra.mxu1 %v2075_v34  ;;  %2860 = vmatpush1.msra.mxu0 %v1309_v35  ;;  %v1470_v34 = vld [vmem:[#allocation5 + $0x7e8] sm:$0xff]  ;;  %v2235_v35 = vld [vmem:[#allocation5 + $0x1fd0] sm:$0xff] }
 0x243   :  { %2790 = vmatprep.subr.mxu1 %v2068_v36  ;;  %2861 = vmatprep.subr.mxu0 %v1302_v37  ;;  %v1469_v36 = vld [vmem:[#allocation5 + $0x7e0] sm:$0xff]  ;;  %v2228_v37 = vld [vmem:[#allocation5 + $0x1f98] sm:$0xff] }
 0x244   :  { %2791 = vmatpush1.msra.mxu1 %v2067_v38  ;;  %2862 = vmatpush1.msra.mxu0 %v1301_v39  ;;  %v1462_v38 = vld [vmem:[#allocation5 + $0x7a8] sm:$0xff]  ;;  %v2227_v39 = vld [vmem:[#allocation5 + $0x1f90] sm:$0xff] }
 0x245   :  { %2792 = vmatprep.subr.mxu1 %v2060_v40  ;;  %2863 = vmatprep.subr.mxu0 %v1294_v42  ;;  %v1461_v40 = vld [vmem:[#allocation5 + $0x7a0] sm:$0xff]  ;;  %v2220_v42 = vld [vmem:[#allocation5 + $0x1f58] sm:$0xff] }
 0x246   :  { %2793 = vmatpush1.msra.mxu1 %v2059_v43  ;;  %2864 = vmatpush1.msra.mxu0 %v1293_v44  ;;  %v1454_v43 = vld [vmem:[#allocation5 + $0x768] sm:$0xff]  ;;  %v2219_v44 = vld [vmem:[#allocation5 + $0x1f50] sm:$0xff] }
 0x247   :  { %2794 = vmatprep.subr.mxu1 %v2052_v45  ;;  %2865 = vmatprep.subr.mxu0 %v1286_v46  ;;  %v1453_v45 = vld [vmem:[#allocation5 + $0x760] sm:$0xff]  ;;  %v2212_v46 = vld [vmem:[#allocation5 + $0x1f18] sm:$0xff] }
 0x248   :  { %2795 = vmatpush1.msra.mxu1 %v2051_v47  ;;  %2866 = vmatpush1.msra.mxu0 %v1285_v49  ;;  %v1446_v47 = vld [vmem:[#allocation5 + $0x728] sm:$0xff]  ;;  %v2211_v49 = vld [vmem:[#allocation5 + $0x1f10] sm:$0xff] }
 0x249   :  { %2796 = vmatprep.subr.mxu1 %v2044_v50  ;;  %2867 = vmatprep.subr.mxu0 %v1278_v51  ;;  %v1445_v50 = vld [vmem:[#allocation5 + $0x720] sm:$0xff]  ;;  %v2204_v51 = vld [vmem:[#allocation5 + $0x1ed8] sm:$0xff] }
 0x24a   :  { %2797 = vmatpush1.msra.mxu1 %v2043_v53  ;;  %2868 = vmatpush1.msra.mxu0 %v1277_v55  ;;  %v1438_v53 = vld [vmem:[#allocation5 + $0x6e8] sm:$0xff]  ;;  %v2203_v55 = vld [vmem:[#allocation5 + $0x1ed0] sm:$0xff] }
 0x24b   :  { %2798 = vmatprep.subr.mxu1 %v2036_v56  ;;  %2869 = vmatprep.subr.mxu0 %v1270_v57  ;;  %v1437_v56 = vld [vmem:[#allocation5 + $0x6e0] sm:$0xff]  ;;  %v2196_v57 = vld [vmem:[#allocation5 + $0x1e98] sm:$0xff] }
 0x24c   :  { %2799 = vmatpush1.msra.mxu1 %v2035_v61  ;;  %2870 = vmatpush1.msra.mxu0 %v1269_v63  ;;  %v1430_v61 = vld [vmem:[#allocation5 + $0x6a8] sm:$0xff]  ;;  %v2195_v63 = vld [vmem:[#allocation5 + $0x1e90] sm:$0xff] }
 0x24d   :  { %2800 = vmatprep.subr.mxu1 %v2028_v0  ;;  %2871 = vmatprep.subr.mxu0 %v1262_v1  ;;  %v1429_v0 = vld [vmem:[#allocation5 + $0x6a0] sm:$0xff]  ;;  %v2188_v1 = vld [vmem:[#allocation5 + $0x1e58] sm:$0xff] }
 0x24e   :  { %2801 = vmatpush1.msra.mxu1 %v2027_v11  ;;  %2872 = vmatpush1.msra.mxu0 %v1261_v62  ;;  %v1422_v11 = vld [vmem:[#allocation5 + $0x668] sm:$0xff]  ;;  %v2187_v62 = vld [vmem:[#allocation5 + $0x1e50] sm:$0xff] }
 0x24f   :  { %2802 = vmatprep.subr.mxu1 %v2020_v3  ;;  %2873 = vmatprep.subr.mxu0 %v1254_v4  ;;  %v1421_v3 = vld [vmem:[#allocation5 + $0x660] sm:$0xff]  ;;  %v2180_v4 = vld [vmem:[#allocation5 + $0x1e18] sm:$0xff] }
 0x250   :  { %2803 = vmatpush1.msra.mxu1 %v2019_v5  ;;  %2874 = vmatpush1.msra.mxu0 %v1253_v6  ;;  %v1414_v5 = vld [vmem:[#allocation5 + $0x628] sm:$0xff]  ;;  %v2179_v6 = vld [vmem:[#allocation5 + $0x1e10] sm:$0xff] }
 0x251   :  { %2804 = vmatprep.subr.mxu1 %v2012_v7  ;;  %2875 = vmatprep.subr.mxu0 %v1246_v9  ;;  %v1413_v7 = vld [vmem:[#allocation5 + $0x620] sm:$0xff]  ;;  %v2172_v9 = vld [vmem:[#allocation5 + $0x1dd8] sm:$0xff] }
 0x252   :  { %2805 = vmatpush1.msra.mxu1 %v2011_v10  ;;  %2876 = vmatpush1.msra.mxu0 %v1245_v27  ;;  %v1406_v10 = vld [vmem:[#allocation5 + $0x5e8] sm:$0xff]  ;;  %v2171_v27 = vld [vmem:[#allocation5 + $0x1dd0] sm:$0xff] }
 0x253   :  { %2806 = vmatprep.subr.mxu1 %v2004_v12  ;;  %2877 = vmatprep.subr.mxu0 %v1238_v15  ;;  %v1405_v12 = vld [vmem:[#allocation5 + $0x5e0] sm:$0xff]  ;;  %v2164_v15 = vld [vmem:[#allocation5 + $0x1d98] sm:$0xff] }
 0x254   :  { %2807 = vmatpush1.msra.mxu1 %v2003_v16  ;;  %2878 = vmatpush1.msra.mxu0 %v1237_v17  ;;  %v1398_v16 = vld [vmem:[#allocation5 + $0x5a8] sm:$0xff]  ;;  %v2163_v17 = vld [vmem:[#allocation5 + $0x1d90] sm:$0xff] }
 0x255   :  { %2808 = vmatprep.subr.mxu1 %v1996_v18  ;;  %2879 = vmatprep.subr.mxu0 %v1230_v20  ;;  %v1397_v18 = vld [vmem:[#allocation5 + $0x5a0] sm:$0xff]  ;;  %v2156_v20 = vld [vmem:[#allocation5 + $0x1d58] sm:$0xff] }
 0x256   :  { %2809 = vmatpush1.msra.mxu1 %v1995_v22  ;;  %2880 = vmatpush1.msra.mxu0 %v1229_v23  ;;  %v1390_v22 = vld [vmem:[#allocation5 + $0x568] sm:$0xff]  ;;  %v2155_v23 = vld [vmem:[#allocation5 + $0x1d50] sm:$0xff] }
 0x257   :  { %2810 = vmatprep.subr.mxu1 %v1988_v25  ;;  %2881 = vmatprep.subr.mxu0 %v1222_v28  ;;  %v1389_v25 = vld [vmem:[#allocation5 + $0x560] sm:$0xff]  ;;  %v2148_v28 = vld [vmem:[#allocation5 + $0x1d18] sm:$0xff] }
 0x258   :  { %2811 = vmatpush1.msra.mxu1 %v1987_v26  ;;  %2882 = vmatpush1.msra.mxu0 %v1221_v29  ;;  %v1382_v26 = vld [vmem:[#allocation5 + $0x528] sm:$0xff]  ;;  %v2147_v29 = vld [vmem:[#allocation5 + $0x1d10] sm:$0xff] }
 0x259   :  { %2812 = vmatprep.subr.mxu1 %v2236_v32  ;;  %2883 = vmatprep.subr.mxu0 %v1470_v34  ;;  %v1381_v32 = vld [vmem:[#allocation5 + $0x520] sm:$0xff]  ;;  %v2140_v34 = vld [vmem:[#allocation5 + $0x1cd8] sm:$0xff] }
 0x25a   :  { %2813 = vmatpush2.msra.mxu1 %v2235_v35  ;;  %2884 = vmatpush2.msra.mxu0 %v1469_v36  ;;  %v1374_v35 = vld [vmem:[#allocation5 + $0x4e8] sm:$0xff]  ;;  %v2139_v36 = vld [vmem:[#allocation5 + $0x1cd0] sm:$0xff] }
 0x25b   :  { %2814 = vmatprep.subr.mxu1 %v2228_v37  ;;  %2885 = vmatprep.subr.mxu0 %v1462_v38  ;;  %v1373_v37 = vld [vmem:[#allocation5 + $0x4e0] sm:$0xff]  ;;  %v2132_v38 = vld [vmem:[#allocation5 + $0x1c98] sm:$0xff] }
 0x25c   :  { %2815 = vmatpush2.msra.mxu1 %v2227_v39  ;;  %2886 = vmatpush2.msra.mxu0 %v1461_v40  ;;  %v1366_v39 = vld [vmem:[#allocation5 + $0x4a8] sm:$0xff]  ;;  %v2131_v40 = vld [vmem:[#allocation5 + $0x1c90] sm:$0xff] }
 0x25d   :  { %2816 = vmatprep.subr.mxu1 %v2220_v42  ;;  %2887 = vmatprep.subr.mxu0 %v1454_v43  ;;  %v1365_v42 = vld [vmem:[#allocation5 + $0x4a0] sm:$0xff]  ;;  %v2124_v43 = vld [vmem:[#allocation5 + $0x1c58] sm:$0xff] }
 0x25e   :  { %2817 = vmatpush2.msra.mxu1 %v2219_v44  ;;  %2888 = vmatpush2.msra.mxu0 %v1453_v45  ;;  %v1358_v44 = vld [vmem:[#allocation5 + $0x468] sm:$0xff]  ;;  %v2123_v45 = vld [vmem:[#allocation5 + $0x1c50] sm:$0xff] }
 0x25f   :  { %2818 = vmatprep.subr.mxu1 %v2212_v46  ;;  %2889 = vmatprep.subr.mxu0 %v1446_v47  ;;  %v1357_v46 = vld [vmem:[#allocation5 + $0x460] sm:$0xff]  ;;  %v2116_v47 = vld [vmem:[#allocation5 + $0x1c18] sm:$0xff] }
 0x260   :  { %2819 = vmatpush2.msra.mxu1 %v2211_v49  ;;  %2890 = vmatpush2.msra.mxu0 %v1445_v50  ;;  %v1350_v49 = vld [vmem:[#allocation5 + $0x428] sm:$0xff]  ;;  %v2115_v50 = vld [vmem:[#allocation5 + $0x1c10] sm:$0xff] }
 0x261   :  { %2820 = vmatprep.subr.mxu1 %v2204_v51  ;;  %2891 = vmatprep.subr.mxu0 %v1438_v53  ;;  %v1349_v51 = vld [vmem:[#allocation5 + $0x420] sm:$0xff]  ;;  %v1598_v53 = vld [vmem:[#allocation5 + $0xbe8] sm:$0xff] }
 0x262   :  { %2821 = vmatpush2.msra.mxu1 %v2203_v55  ;;  %2892 = vmatpush2.msra.mxu0 %v1437_v56  ;;  %v1854_v55 = vld [vmem:[#allocation5 + $0x13e8] sm:$0xff]  ;;  %v1597_v56 = vld [vmem:[#allocation5 + $0xbe0] sm:$0xff] }
 0x263   :  { %2822 = vmatprep.subr.mxu1 %v2196_v57  ;;  %2893 = vmatprep.subr.mxu0 %v1430_v61  ;;  %v1853_v57 = vld [vmem:[#allocation5 + $0x13e0] sm:$0xff]  ;;  %v1590_v61 = vld [vmem:[#allocation5 + $0xba8] sm:$0xff] }
 0x264   :  { %2823 = vmatpush2.msra.mxu1 %v2195_v63  ;;  %2894 = vmatpush2.msra.mxu0 %v1429_v0  ;;  %v1846_v63 = vld [vmem:[#allocation5 + $0x13a8] sm:$0xff]  ;;  %v1589_v0 = vld [vmem:[#allocation5 + $0xba0] sm:$0xff] }
 0x265   :  { %2824 = vmatprep.subr.mxu1 %v2188_v1  ;;  %2895 = vmatprep.subr.mxu0 %v1422_v11  ;;  %v1845_v1 = vld [vmem:[#allocation5 + $0x13a0] sm:$0xff]  ;;  %v1582_v11 = vld [vmem:[#allocation5 + $0xb68] sm:$0xff] }
 0x266   :  { %2825 = vmatpush2.msra.mxu1 %v2187_v62  ;;  %2896 = vmatpush2.msra.mxu0 %v1421_v3  ;;  %v1838_v62 = vld [vmem:[#allocation5 + $0x1368] sm:$0xff]  ;;  %v1581_v3 = vld [vmem:[#allocation5 + $0xb60] sm:$0xff] }
 0x267   :  { %2826 = vmatprep.subr.mxu1 %v2180_v4  ;;  %2897 = vmatprep.subr.mxu0 %v1414_v5  ;;  %v1837_v4 = vld [vmem:[#allocation5 + $0x1360] sm:$0xff]  ;;  %v1574_v5 = vld [vmem:[#allocation5 + $0xb28] sm:$0xff] }
 0x268   :  { %2827 = vmatpush2.msra.mxu1 %v2179_v6  ;;  %2898 = vmatpush2.msra.mxu0 %v1413_v7  ;;  %v1830_v6 = vld [vmem:[#allocation5 + $0x1328] sm:$0xff]  ;;  %v1573_v7 = vld [vmem:[#allocation5 + $0xb20] sm:$0xff] }
 0x269   :  { %2828 = vmatprep.subr.mxu1 %v2172_v9  ;;  %2899 = vmatprep.subr.mxu0 %v1406_v10  ;;  %v1829_v9 = vld [vmem:[#allocation5 + $0x1320] sm:$0xff]  ;;  %v1566_v10 = vld [vmem:[#allocation5 + $0xae8] sm:$0xff] }
 0x26a   :  { %2829 = vmatpush2.msra.mxu1 %v2171_v27  ;;  %2900 = vmatpush2.msra.mxu0 %v1405_v12  ;;  %v1822_v27 = vld [vmem:[#allocation5 + $0x12e8] sm:$0xff]  ;;  %v1565_v12 = vld [vmem:[#allocation5 + $0xae0] sm:$0xff] }
 0x26b   :  { %2830 = vmatprep.subr.mxu1 %v2164_v15  ;;  %2901 = vmatprep.subr.mxu0 %v1398_v16  ;;  %v1821_v15 = vld [vmem:[#allocation5 + $0x12e0] sm:$0xff]  ;;  %v1558_v16 = vld [vmem:[#allocation5 + $0xaa8] sm:$0xff] }
 0x26c   :  { %2831 = vmatpush2.msra.mxu1 %v2163_v17  ;;  %2902 = vmatpush2.msra.mxu0 %v1397_v18  ;;  %v1814_v17 = vld [vmem:[#allocation5 + $0x12a8] sm:$0xff]  ;;  %v1557_v18 = vld [vmem:[#allocation5 + $0xaa0] sm:$0xff] }
 0x26d   :  { %2832 = vmatprep.subr.mxu1 %v2156_v20  ;;  %2903 = vmatprep.subr.mxu0 %v1390_v22  ;;  %v1813_v20 = vld [vmem:[#allocation5 + $0x12a0] sm:$0xff]  ;;  %v1550_v22 = vld [vmem:[#allocation5 + $0xa68] sm:$0xff] }
 0x26e   :  { %2833 = vmatpush2.msra.mxu1 %v2155_v23  ;;  %2904 = vmatpush2.msra.mxu0 %v1389_v25  ;;  %v1806_v23 = vld [vmem:[#allocation5 + $0x1268] sm:$0xff]  ;;  %v1549_v25 = vld [vmem:[#allocation5 + $0xa60] sm:$0xff] }
 0x26f   :  { %2834 = vmatprep.subr.mxu1 %v2148_v28  ;;  %2905 = vmatprep.subr.mxu0 %v1382_v26  ;;  %v1805_v28 = vld [vmem:[#allocation5 + $0x1260] sm:$0xff]  ;;  %v1542_v26 = vld [vmem:[#allocation5 + $0xa28] sm:$0xff] }
 0x270   :  { %2835 = vmatpush2.msra.mxu1 %v2147_v29  ;;  %2906 = vmatpush2.msra.mxu0 %v1381_v32  ;;  %v1798_v29 = vld [vmem:[#allocation5 + $0x1228] sm:$0xff]  ;;  %v1541_v32 = vld [vmem:[#allocation5 + $0xa20] sm:$0xff] }
 0x271   :  { %2836 = vmatprep.subr.mxu1 %v2140_v34  ;;  %2907 = vmatprep.subr.mxu0 %v1374_v35  ;;  %v1797_v34 = vld [vmem:[#allocation5 + $0x1220] sm:$0xff]  ;;  %v1534_v35 = vld [vmem:[#allocation5 + $0x9e8] sm:$0xff] }
 0x272   :  { %2837 = vmatpush2.msra.mxu1 %v2139_v36  ;;  %2908 = vmatpush2.msra.mxu0 %v1373_v37  ;;  %v1790_v36 = vld [vmem:[#allocation5 + $0x11e8] sm:$0xff]  ;;  %v1533_v37 = vld [vmem:[#allocation5 + $0x9e0] sm:$0xff] }
 0x273   :  { %2838 = vmatprep.subr.mxu1 %v2132_v38  ;;  %2909 = vmatprep.subr.mxu0 %v1366_v39  ;;  %v1789_v38 = vld [vmem:[#allocation5 + $0x11e0] sm:$0xff]  ;;  %v1526_v39 = vld [vmem:[#allocation5 + $0x9a8] sm:$0xff] }
 0x274   :  { %2839 = vmatpush2.msra.mxu1 %v2131_v40  ;;  %2910 = vmatpush2.msra.mxu0 %v1365_v42  ;;  %v1782_v40 = vld [vmem:[#allocation5 + $0x11a8] sm:$0xff]  ;;  %v1525_v42 = vld [vmem:[#allocation5 + $0x9a0] sm:$0xff] }
 0x275   :  { %2840 = vmatprep.subr.mxu1 %v2124_v43  ;;  %2911 = vmatprep.subr.mxu0 %v1358_v44  ;;  %v1781_v43 = vld [vmem:[#allocation5 + $0x11a0] sm:$0xff]  ;;  %v1518_v44 = vld [vmem:[#allocation5 + $0x968] sm:$0xff] }
 0x276   :  { %2841 = vmatpush2.msra.mxu1 %v2123_v45  ;;  %2912 = vmatpush2.msra.mxu0 %v1357_v46  ;;  %v1774_v45 = vld [vmem:[#allocation5 + $0x1168] sm:$0xff]  ;;  %v1517_v46 = vld [vmem:[#allocation5 + $0x960] sm:$0xff] }
 0x277   :  { %2842 = vmatprep.subr.mxu1 %v2116_v47  ;;  %2913 = vmatprep.subr.mxu0 %v1350_v49  ;;  %v1773_v47 = vld [vmem:[#allocation5 + $0x1160] sm:$0xff]  ;;  %v1510_v49 = vld [vmem:[#allocation5 + $0x928] sm:$0xff] }
 0x278   :  { %2843 = vmatpush2.msra.mxu1 %v2115_v50  ;;  %2914 = vmatpush2.msra.mxu0 %v1349_v51  ;;  %v1766_v50 = vld [vmem:[#allocation5 + $0x1128] sm:$0xff]  ;;  %v1509_v51 = vld [vmem:[#allocation5 + $0x920] sm:$0xff] }
 0x279   :  { %2845 = vmatmul.mubr.f32.vlgmr.msra.gmra.mxu1 %v5782_v33  ;;  %2916 = vmatmul.mubr.f32.vlgmr.msra.gmra.mxu0 %v5745_v13 }
 0x27a   :  { %2922 = vmatprep.subr.mxu1 %v1598_v53  ;;  %2993 = vmatprep.subr.mxu0 %v1854_v55  ;;  %v1765_v53 = vld [vmem:[#allocation5 + $0x1120] sm:$0xff]  ;;  %v1502_v55 = vld [vmem:[#allocation5 + $0x8e8] sm:$0xff] }
 0x27b   :  { %2923 = vmatpush1.msra.mxu1 %v1597_v56  ;;  %2986 = vmatprep.mubr.f32.mxu1 %v5748_v21  ;;  %v1758_v56 = vld [vmem:[#allocation5 + $0x10e8] sm:$0xff] }
 0x27c   :  { %2994 = vmatpush1.msra.mxu0 %v1853_v57  ;;  %3057 = vmatprep.mubr.f32.mxu0 %v5764_v58  ;;  %v1501_v57 = vld [vmem:[#allocation5 + $0x8e0] sm:$0xff] }
 0x27d   :  { %2924 = vmatprep.subr.mxu1 %v1590_v61  ;;  %2995 = vmatprep.subr.mxu0 %v1846_v63  ;;  %v1757_v61 = vld [vmem:[#allocation5 + $0x10e0] sm:$0xff]  ;;  %v1494_v63 = vld [vmem:[#allocation5 + $0x8a8] sm:$0xff] }
 0x27e   :  { %2925 = vmatpush1.msra.mxu1 %v1589_v0  ;;  %2996 = vmatpush1.msra.mxu0 %v1845_v1  ;;  %v1750_v0 = vld [vmem:[#allocation5 + $0x10a8] sm:$0xff]  ;;  %v1493_v1 = vld [vmem:[#allocation5 + $0x8a0] sm:$0xff] }
 0x27f   :  { %2926 = vmatprep.subr.mxu1 %v1582_v11  ;;  %2997 = vmatprep.subr.mxu0 %v1838_v62  ;;  %v1749_v11 = vld [vmem:[#allocation5 + $0x10a0] sm:$0xff]  ;;  %v1486_v62 = vld [vmem:[#allocation5 + $0x868] sm:$0xff] }
 0x280   :  { %2927 = vmatpush1.msra.mxu1 %v1581_v3  ;;  %2998 = vmatpush1.msra.mxu0 %v1837_v4  ;;  %v1742_v3 = vld [vmem:[#allocation5 + $0x1068] sm:$0xff]  ;;  %v1485_v4 = vld [vmem:[#allocation5 + $0x860] sm:$0xff] }
 0x281   :  { %2928 = vmatprep.subr.mxu1 %v1574_v5  ;;  %2999 = vmatprep.subr.mxu0 %v1830_v6  ;;  %v1741_v5 = vld [vmem:[#allocation5 + $0x1060] sm:$0xff]  ;;  %v1478_v6 = vld [vmem:[#allocation5 + $0x828] sm:$0xff] }
 0x282   :  { %2929 = vmatpush1.msra.mxu1 %v1573_v7  ;;  %3000 = vmatpush1.msra.mxu0 %v1829_v9  ;;  %v1734_v7 = vld [vmem:[#allocation5 + $0x1028] sm:$0xff]  ;;  %v1477_v9 = vld [vmem:[#allocation5 + $0x820] sm:$0xff] }
 0x283   :  { %2930 = vmatprep.subr.mxu1 %v1566_v10  ;;  %3001 = vmatprep.subr.mxu0 %v1822_v27  ;;  %v1733_v10 = vld [vmem:[#allocation5 + $0x1020] sm:$0xff]  ;;  %v1726_v27 = vld [vmem:[#allocation5 + $0xfe8] sm:$0xff] }
 0x284   :  { %2931 = vmatpush1.msra.mxu1 %v1565_v12  ;;  %3002 = vmatpush1.msra.mxu0 %v1821_v15  ;;  %v1982_v12 = vld [vmem:[#allocation5 + $0x17e8] sm:$0xff]  ;;  %v1725_v15 = vld [vmem:[#allocation5 + $0xfe0] sm:$0xff] }
 0x285   :  { %2932 = vmatprep.subr.mxu1 %v1558_v16  ;;  %3003 = vmatprep.subr.mxu0 %v1814_v17  ;;  %v1981_v16 = vld [vmem:[#allocation5 + $0x17e0] sm:$0xff]  ;;  %v1718_v17 = vld [vmem:[#allocation5 + $0xfa8] sm:$0xff] }
 0x286   :  { %2933 = vmatpush1.msra.mxu1 %v1557_v18  ;;  %3004 = vmatpush1.msra.mxu0 %v1813_v20  ;;  %v1974_v18 = vld [vmem:[#allocation5 + $0x17a8] sm:$0xff]  ;;  %v1717_v20 = vld [vmem:[#allocation5 + $0xfa0] sm:$0xff] }
 0x287   :  { %2934 = vmatprep.subr.mxu1 %v1550_v22  ;;  %3005 = vmatprep.subr.mxu0 %v1806_v23  ;;  %v1973_v22 = vld [vmem:[#allocation5 + $0x17a0] sm:$0xff]  ;;  %v1710_v23 = vld [vmem:[#allocation5 + $0xf68] sm:$0xff] }
 0x288   :  { %2935 = vmatpush1.msra.mxu1 %v1549_v25  ;;  %3006 = vmatpush1.msra.mxu0 %v1805_v28  ;;  %v1966_v25 = vld [vmem:[#allocation5 + $0x1768] sm:$0xff]  ;;  %v1709_v28 = vld [vmem:[#allocation5 + $0xf60] sm:$0xff] }
 0x289   :  { %2936 = vmatprep.subr.mxu1 %v1542_v26  ;;  %3007 = vmatprep.subr.mxu0 %v1798_v29  ;;  %v1965_v26 = vld [vmem:[#allocation5 + $0x1760] sm:$0xff]  ;;  %v1702_v29 = vld [vmem:[#allocation5 + $0xf28] sm:$0xff] }
 0x28a   :  { %2937 = vmatpush1.msra.mxu1 %v1541_v32  ;;  %3008 = vmatpush1.msra.mxu0 %v1797_v34  ;;  %v1958_v32 = vld [vmem:[#allocation5 + $0x1728] sm:$0xff]  ;;  %v1701_v34 = vld [vmem:[#allocation5 + $0xf20] sm:$0xff] }
 0x28b   :  { %2938 = vmatprep.subr.mxu1 %v1534_v35  ;;  %3009 = vmatprep.subr.mxu0 %v1790_v36  ;;  %v1957_v35 = vld [vmem:[#allocation5 + $0x1720] sm:$0xff]  ;;  %v1694_v36 = vld [vmem:[#allocation5 + $0xee8] sm:$0xff] }
 0x28c   :  { %2939 = vmatpush1.msra.mxu1 %v1533_v37  ;;  %3010 = vmatpush1.msra.mxu0 %v1789_v38  ;;  %v1950_v37 = vld [vmem:[#allocation5 + $0x16e8] sm:$0xff]  ;;  %v1693_v38 = vld [vmem:[#allocation5 + $0xee0] sm:$0xff] }
 0x28d   :  { %2940 = vmatprep.subr.mxu1 %v1526_v39  ;;  %3011 = vmatprep.subr.mxu0 %v1782_v40  ;;  %v1949_v39 = vld [vmem:[#allocation5 + $0x16e0] sm:$0xff]  ;;  %v1686_v40 = vld [vmem:[#allocation5 + $0xea8] sm:$0xff] }
 0x28e   :  { %2941 = vmatpush1.msra.mxu1 %v1525_v42  ;;  %3012 = vmatpush1.msra.mxu0 %v1781_v43  ;;  %v1942_v42 = vld [vmem:[#allocation5 + $0x16a8] sm:$0xff]  ;;  %v1685_v43 = vld [vmem:[#allocation5 + $0xea0] sm:$0xff] }
 0x28f   :  { %2942 = vmatprep.subr.mxu1 %v1518_v44  ;;  %3013 = vmatprep.subr.mxu0 %v1774_v45  ;;  %v1941_v44 = vld [vmem:[#allocation5 + $0x16a0] sm:$0xff]  ;;  %v1678_v45 = vld [vmem:[#allocation5 + $0xe68] sm:$0xff] }
 0x290   :  { %2943 = vmatpush1.msra.mxu1 %v1517_v46  ;;  %3014 = vmatpush1.msra.mxu0 %v1773_v47  ;;  %v1934_v46 = vld [vmem:[#allocation5 + $0x1668] sm:$0xff]  ;;  %v1677_v47 = vld [vmem:[#allocation5 + $0xe60] sm:$0xff] }
 0x291   :  { %2944 = vmatprep.subr.mxu1 %v1510_v49  ;;  %3015 = vmatprep.subr.mxu0 %v1766_v50  ;;  %v1933_v49 = vld [vmem:[#allocation5 + $0x1660] sm:$0xff]  ;;  %v1670_v50 = vld [vmem:[#allocation5 + $0xe28] sm:$0xff] }
 0x292   :  { %2945 = vmatpush1.msra.mxu1 %v1509_v51  ;;  %3016 = vmatpush1.msra.mxu0 %v1765_v53  ;;  %v1926_v51 = vld [vmem:[#allocation5 + $0x1628] sm:$0xff]  ;;  %v1669_v53 = vld [vmem:[#allocation5 + $0xe20] sm:$0xff] }
 0x293   :  { %2946 = vmatprep.subr.mxu1 %v1502_v55  ;;  %3017 = vmatprep.subr.mxu0 %v1758_v56  ;;  %v1925_v55 = vld [vmem:[#allocation5 + $0x1620] sm:$0xff]  ;;  %v1662_v56 = vld [vmem:[#allocation5 + $0xde8] sm:$0xff] }
 0x294   :  { %2947 = vmatpush1.msra.mxu1 %v1501_v57  ;;  %3018 = vmatpush1.msra.mxu0 %v1757_v61  ;;  %v1918_v57 = vld [vmem:[#allocation5 + $0x15e8] sm:$0xff]  ;;  %v1661_v61 = vld [vmem:[#allocation5 + $0xde0] sm:$0xff] }
 0x295   :  { %2948 = vmatprep.subr.mxu1 %v1494_v63  ;;  %3019 = vmatprep.subr.mxu0 %v1750_v0  ;;  %v1917_v63 = vld [vmem:[#allocation5 + $0x15e0] sm:$0xff]  ;;  %v1654_v0 = vld [vmem:[#allocation5 + $0xda8] sm:$0xff] }
 0x296   :  { %2949 = vmatpush1.msra.mxu1 %v1493_v1  ;;  %3020 = vmatpush1.msra.mxu0 %v1749_v11  ;;  %v1910_v1 = vld [vmem:[#allocation5 + $0x15a8] sm:$0xff]  ;;  %v1653_v11 = vld [vmem:[#allocation5 + $0xda0] sm:$0xff] }
 0x297   :  { %2950 = vmatprep.subr.mxu1 %v1486_v62  ;;  %3021 = vmatprep.subr.mxu0 %v1742_v3  ;;  %v1909_v62 = vld [vmem:[#allocation5 + $0x15a0] sm:$0xff]  ;;  %v1646_v3 = vld [vmem:[#allocation5 + $0xd68] sm:$0xff] }
 0x298   :  { %2951 = vmatpush1.msra.mxu1 %v1485_v4  ;;  %3022 = vmatpush1.msra.mxu0 %v1741_v5  ;;  %v1902_v4 = vld [vmem:[#allocation5 + $0x1568] sm:$0xff]  ;;  %v1645_v5 = vld [vmem:[#allocation5 + $0xd60] sm:$0xff] }
 0x299   :  { %2952 = vmatprep.subr.mxu1 %v1478_v6  ;;  %3023 = vmatprep.subr.mxu0 %v1734_v7  ;;  %v1901_v6 = vld [vmem:[#allocation5 + $0x1560] sm:$0xff]  ;;  %v1638_v7 = vld [vmem:[#allocation5 + $0xd28] sm:$0xff] }
 0x29a   :  { %2953 = vmatpush1.msra.mxu1 %v1477_v9  ;;  %3024 = vmatpush1.msra.mxu0 %v1733_v10  ;;  %v1894_v9 = vld [vmem:[#allocation5 + $0x1528] sm:$0xff]  ;;  %v1637_v10 = vld [vmem:[#allocation5 + $0xd20] sm:$0xff] }
 0x29b   :  { %2954 = vmatprep.subr.mxu1 %v1726_v27  ;;  %3025 = vmatprep.subr.mxu0 %v1982_v12  ;;  %v1893_v27 = vld [vmem:[#allocation5 + $0x1520] sm:$0xff]  ;;  %v1630_v12 = vld [vmem:[#allocation5 + $0xce8] sm:$0xff] }
 0x29c   :  { %2955 = vmatpush2.msra.mxu1 %v1725_v15  ;;  %3026 = vmatpush2.msra.mxu0 %v1981_v16  ;;  %v1886_v15 = vld [vmem:[#allocation5 + $0x14e8] sm:$0xff]  ;;  %v1629_v16 = vld [vmem:[#allocation5 + $0xce0] sm:$0xff] }
 0x29d   :  { %2956 = vmatprep.subr.mxu1 %v1718_v17  ;;  %3027 = vmatprep.subr.mxu0 %v1974_v18  ;;  %v1885_v17 = vld [vmem:[#allocation5 + $0x14e0] sm:$0xff]  ;;  %v1622_v18 = vld [vmem:[#allocation5 + $0xca8] sm:$0xff] }
 0x29e   :  { %2957 = vmatpush2.msra.mxu1 %v1717_v20  ;;  %3028 = vmatpush2.msra.mxu0 %v1973_v22  ;;  %v1878_v20 = vld [vmem:[#allocation5 + $0x14a8] sm:$0xff]  ;;  %v1621_v22 = vld [vmem:[#allocation5 + $0xca0] sm:$0xff] }
 0x29f   :  { %2958 = vmatprep.subr.mxu1 %v1710_v23  ;;  %3029 = vmatprep.subr.mxu0 %v1966_v25  ;;  %v1877_v23 = vld [vmem:[#allocation5 + $0x14a0] sm:$0xff]  ;;  %v1614_v25 = vld [vmem:[#allocation5 + $0xc68] sm:$0xff] }
 0x2a0   :  { %2959 = vmatpush2.msra.mxu1 %v1709_v28  ;;  %3030 = vmatpush2.msra.mxu0 %v1965_v26  ;;  %v1870_v28 = vld [vmem:[#allocation5 + $0x1468] sm:$0xff]  ;;  %v1613_v26 = vld [vmem:[#allocation5 + $0xc60] sm:$0xff] }
 0x2a1   :  { %2960 = vmatprep.subr.mxu1 %v1702_v29  ;;  %3031 = vmatprep.subr.mxu0 %v1958_v32  ;;  %v1869_v29 = vld [vmem:[#allocation5 + $0x1460] sm:$0xff]  ;;  %v1606_v32 = vld [vmem:[#allocation5 + $0xc28] sm:$0xff] }
 0x2a2   :  { %2961 = vmatpush2.msra.mxu1 %v1701_v34  ;;  %3032 = vmatpush2.msra.mxu0 %v1957_v35  ;;  %v1862_v34 = vld [vmem:[#allocation5 + $0x1428] sm:$0xff]  ;;  %v1605_v35 = vld [vmem:[#allocation5 + $0xc20] sm:$0xff] }
 0x2a3   :  { %2962 = vmatprep.subr.mxu1 %v1694_v36  ;;  %3033 = vmatprep.subr.mxu0 %v1950_v37  ;;  %v1861_v36 = vld [vmem:[#allocation5 + $0x1420] sm:$0xff]  ;;  %v2110_v37 = vld [vmem:[#allocation5 + $0x1be8] sm:$0xff] }
 0x2a4   :  { %2963 = vmatpush2.msra.mxu1 %v1693_v38  ;;  %3034 = vmatpush2.msra.mxu0 %v1949_v39  ;;  %v1344_v38 = vld [vmem:[#allocation5 + $0x3f8] sm:$0xff]  ;;  %v2109_v39 = vld [vmem:[#allocation5 + $0x1be0] sm:$0xff] }
 0x2a5   :  { %2964 = vmatprep.subr.mxu1 %v1686_v40  ;;  %3035 = vmatprep.subr.mxu0 %v1942_v42  ;;  %v1343_v40 = vld [vmem:[#allocation5 + $0x3f0] sm:$0xff]  ;;  %v2102_v42 = vld [vmem:[#allocation5 + $0x1ba8] sm:$0xff] }
 0x2a6   :  { %2965 = vmatpush2.msra.mxu1 %v1685_v43  ;;  %3036 = vmatpush2.msra.mxu0 %v1941_v44  ;;  %v1336_v43 = vld [vmem:[#allocation5 + $0x3b8] sm:$0xff]  ;;  %v2101_v44 = vld [vmem:[#allocation5 + $0x1ba0] sm:$0xff] }
 0x2a7   :  { %2966 = vmatprep.subr.mxu1 %v1678_v45  ;;  %3037 = vmatprep.subr.mxu0 %v1934_v46  ;;  %v1335_v45 = vld [vmem:[#allocation5 + $0x3b0] sm:$0xff]  ;;  %v2094_v46 = vld [vmem:[#allocation5 + $0x1b68] sm:$0xff] }
 0x2a8   :  { %2967 = vmatpush2.msra.mxu1 %v1677_v47  ;;  %3038 = vmatpush2.msra.mxu0 %v1933_v49  ;;  %v1328_v47 = vld [vmem:[#allocation5 + $0x378] sm:$0xff]  ;;  %v2093_v49 = vld [vmem:[#allocation5 + $0x1b60] sm:$0xff] }
 0x2a9   :  { %2968 = vmatprep.subr.mxu1 %v1670_v50  ;;  %3039 = vmatprep.subr.mxu0 %v1926_v51  ;;  %v1327_v50 = vld [vmem:[#allocation5 + $0x370] sm:$0xff]  ;;  %v2086_v51 = vld [vmem:[#allocation5 + $0x1b28] sm:$0xff] }
 0x2aa   :  { %2969 = vmatpush2.msra.mxu1 %v1669_v53  ;;  %3040 = vmatpush2.msra.mxu0 %v1925_v55  ;;  %v1320_v53 = vld [vmem:[#allocation5 + $0x338] sm:$0xff]  ;;  %v2085_v55 = vld [vmem:[#allocation5 + $0x1b20] sm:$0xff] }
 0x2ab   :  { %2970 = vmatprep.subr.mxu1 %v1662_v56  ;;  %3041 = vmatprep.subr.mxu0 %v1918_v57  ;;  %v1319_v56 = vld [vmem:[#allocation5 + $0x330] sm:$0xff]  ;;  %v2078_v57 = vld [vmem:[#allocation5 + $0x1ae8] sm:$0xff] }
 0x2ac   :  { %2971 = vmatpush2.msra.mxu1 %v1661_v61  ;;  %3042 = vmatpush2.msra.mxu0 %v1917_v63  ;;  %v1312_v61 = vld [vmem:[#allocation5 + $0x2f8] sm:$0xff]  ;;  %v1311_v63 = vld [vmem:[#allocation5 + $0x2f0] sm:$0xff] }
 0x2ad   :  { %2972 = vmatprep.subr.mxu1 %v1654_v0  ;;  %3043 = vmatprep.subr.mxu0 %v1910_v1  ;;  %v2070_v0 = vld [vmem:[#allocation5 + $0x1aa8] sm:$0xff]  ;;  %v1304_v1 = vld [vmem:[#allocation5 + $0x2b8] sm:$0xff] }
 0x2ae   :  { %2973 = vmatpush2.msra.mxu1 %v1653_v11  ;;  %3044 = vmatpush2.msra.mxu0 %v1909_v62  ;;  %v2069_v11 = vld [vmem:[#allocation5 + $0x1aa0] sm:$0xff]  ;;  %v1303_v62 = vld [vmem:[#allocation5 + $0x2b0] sm:$0xff] }
 0x2af   :  { %2974 = vmatprep.subr.mxu1 %v1646_v3  ;;  %3045 = vmatprep.subr.mxu0 %v1902_v4  ;;  %v2062_v3 = vld [vmem:[#allocation5 + $0x1a68] sm:$0xff]  ;;  %v1296_v4 = vld [vmem:[#allocation5 + $0x278] sm:$0xff] }
 0x2b0   :  { %2975 = vmatpush2.msra.mxu1 %v1645_v5  ;;  %3046 = vmatpush2.msra.mxu0 %v1901_v6  ;;  %v2061_v5 = vld [vmem:[#allocation5 + $0x1a60] sm:$0xff]  ;;  %v1295_v6 = vld [vmem:[#allocation5 + $0x270] sm:$0xff] }
 0x2b1   :  { %2976 = vmatprep.subr.mxu1 %v1638_v7  ;;  %3047 = vmatprep.subr.mxu0 %v1894_v9  ;;  %v2054_v7 = vld [vmem:[#allocation5 + $0x1a28] sm:$0xff]  ;;  %v1288_v9 = vld [vmem:[#allocation5 + $0x238] sm:$0xff] }
 0x2b2   :  { %2977 = vmatpush2.msra.mxu1 %v1637_v10  ;;  %3048 = vmatpush2.msra.mxu0 %v1893_v27  ;;  %v2053_v10 = vld [vmem:[#allocation5 + $0x1a20] sm:$0xff]  ;;  %v1287_v27 = vld [vmem:[#allocation5 + $0x230] sm:$0xff] }
 0x2b3   :  { %2978 = vmatprep.subr.mxu1 %v1630_v12  ;;  %3049 = vmatprep.subr.mxu0 %v1886_v15  ;;  %v2046_v12 = vld [vmem:[#allocation5 + $0x19e8] sm:$0xff]  ;;  %v1280_v15 = vld [vmem:[#allocation5 + $0x1f8] sm:$0xff] }
 0x2b4   :  { %2979 = vmatpush2.msra.mxu1 %v1629_v16  ;;  %3050 = vmatpush2.msra.mxu0 %v1885_v17  ;;  %v2045_v16 = vld [vmem:[#allocation5 + $0x19e0] sm:$0xff]  ;;  %v1279_v17 = vld [vmem:[#allocation5 + $0x1f0] sm:$0xff] }
 0x2b5   :  { %2980 = vmatprep.subr.mxu1 %v1622_v18  ;;  %3051 = vmatprep.subr.mxu0 %v1878_v20  ;;  %v2038_v18 = vld [vmem:[#allocation5 + $0x19a8] sm:$0xff]  ;;  %v1272_v20 = vld [vmem:[#allocation5 + $0x1b8] sm:$0xff] }
 0x2b6   :  { %2981 = vmatpush2.msra.mxu1 %v1621_v22  ;;  %3052 = vmatpush2.msra.mxu0 %v1877_v23  ;;  %v2037_v22 = vld [vmem:[#allocation5 + $0x19a0] sm:$0xff]  ;;  %v1271_v23 = vld [vmem:[#allocation5 + $0x1b0] sm:$0xff] }
 0x2b7   :  { %2982 = vmatprep.subr.mxu1 %v1614_v25  ;;  %3053 = vmatprep.subr.mxu0 %v1870_v28  ;;  %v2030_v25 = vld [vmem:[#allocation5 + $0x1968] sm:$0xff]  ;;  %v1264_v28 = vld [vmem:[#allocation5 + $0x178] sm:$0xff] }
 0x2b8   :  { %2983 = vmatpush2.msra.mxu1 %v1613_v26  ;;  %3054 = vmatpush2.msra.mxu0 %v1869_v29  ;;  %v2029_v26 = vld [vmem:[#allocation5 + $0x1960] sm:$0xff]  ;;  %v1263_v29 = vld [vmem:[#allocation5 + $0x170] sm:$0xff] }
 0x2b9   :  { %2984 = vmatprep.subr.mxu1 %v1606_v32  ;;  %3055 = vmatprep.subr.mxu0 %v1862_v34  ;;  %v2022_v32 = vld [vmem:[#allocation5 + $0x1928] sm:$0xff]  ;;  %v1256_v34 = vld [vmem:[#allocation5 + $0x138] sm:$0xff] }
 0x2ba   :  { %2985 = vmatpush2.msra.mxu1 %v1605_v35  ;;  %3056 = vmatpush2.msra.mxu0 %v1861_v36  ;;  %v2021_v35 = vld [vmem:[#allocation5 + $0x1920] sm:$0xff]  ;;  %v1255_v36 = vld [vmem:[#allocation5 + $0x130] sm:$0xff] }
 0x2bb   :  { %2987 = vmatmul.mubr.f32.vlgmr.msra.gmra.mxu1 %v5750_v52  ;;  %3058 = vmatmul.mubr.f32.vlgmr.msra.gmra.mxu0 %v5766_v59 }
 0x2bc   :  { %3064 = vmatprep.subr.mxu1 %v2110_v37  ;;  %3135 = vmatprep.subr.mxu0 %v1344_v38  ;;  %v2014_v37 = vld [vmem:[#allocation5 + $0x18e8] sm:$0xff]  ;;  %v1248_v38 = vld [vmem:[#allocation5 + $0xf8] sm:$0xff] }
 0x2bd   :  { %3065 = vmatpush1.msra.mxu1 %v2109_v39  ;;  %3128 = vmatprep.mubr.f32.mxu1 %v5779_v31  ;;  %v2013_v39 = vld [vmem:[#allocation5 + $0x18e0] sm:$0xff] }
 0x2be   :  { %3136 = vmatpush1.msra.mxu0 %v1343_v40  ;;  %3199 = vmatprep.mubr.f32.mxu0 %v5733_v60  ;;  %v2077_v60 = vld [vmem:[#allocation5 + $0x1ae0] sm:$0xff]  ;;  %v1247_v40 = vld [vmem:[#allocation5 + $0xf0] sm:$0xff] }
 0x2bf   :  { %3066 = vmatprep.subr.mxu1 %v2102_v42  ;;  %3137 = vmatprep.subr.mxu0 %v1336_v43  ;;  %v2006_v42 = vld [vmem:[#allocation5 + $0x18a8] sm:$0xff]  ;;  %v1240_v43 = vld [vmem:[#allocation5 + $0xb8] sm:$0xff] }
 0x2c0   :  { %3067 = vmatpush1.msra.mxu1 %v2101_v44  ;;  %3138 = vmatpush1.msra.mxu0 %v1335_v45  ;;  %v2005_v44 = vld [vmem:[#allocation5 + $0x18a0] sm:$0xff]  ;;  %v1239_v45 = vld [vmem:[#allocation5 + $0xb0] sm:$0xff] }
 0x2c1   :  { %3068 = vmatprep.subr.mxu1 %v2094_v46  ;;  %3139 = vmatprep.subr.mxu0 %v1328_v47  ;;  %v1998_v46 = vld [vmem:[#allocation5 + $0x1868] sm:$0xff]  ;;  %v1232_v47 = vld [vmem:[#allocation5 + $0x78] sm:$0xff] }
 0x2c2   :  { %3069 = vmatpush1.msra.mxu1 %v2093_v49  ;;  %3140 = vmatpush1.msra.mxu0 %v1327_v50  ;;  %v1997_v49 = vld [vmem:[#allocation5 + $0x1860] sm:$0xff]  ;;  %v1231_v50 = vld [vmem:[#allocation5 + $0x70] sm:$0xff] }
 0x2c3   :  { %3070 = vmatprep.subr.mxu1 %v2086_v51  ;;  %3141 = vmatprep.subr.mxu0 %v1320_v53  ;;  %v1990_v51 = vld [vmem:[#allocation5 + $0x1828] sm:$0xff]  ;;  %v1224_v53 = vld [vmem:[#allocation5 + $0x38] sm:$0xff] }
 0x2c4   :  { %3071 = vmatpush1.msra.mxu1 %v2085_v55  ;;  %3142 = vmatpush1.msra.mxu0 %v1319_v56  ;;  %v1989_v55 = vld [vmem:[#allocation5 + $0x1820] sm:$0xff]  ;;  %v1223_v56 = vld [vmem:[#allocation5 + $0x30] sm:$0xff] }
 0x2c5   :  { %3072 = vmatprep.subr.mxu1 %v2078_v57  ;;  %3143 = vmatprep.subr.mxu0 %v1312_v61  ;;  %v2238_v57 = vld [vmem:[#allocation5 + $0x1fe8] sm:$0xff]  ;;  %v1472_v61 = vld [vmem:[#allocation5 + $0x7f8] sm:$0xff] }
 0x2c6   :  { %3073 = vmatpush1.msra.mxu1 %v2077_v60  ;;  %3144 = vmatpush1.msra.mxu0 %v1311_v63  ;;  %v2237_v60 = vld [vmem:[#allocation5 + $0x1fe0] sm:$0xff]  ;;  %v1471_v63 = vld [vmem:[#allocation5 + $0x7f0] sm:$0xff] }
 0x2c7   :  { %3074 = vmatprep.subr.mxu1 %v2070_v0  ;;  %3145 = vmatprep.subr.mxu0 %v1304_v1  ;;  %v2230_v0 = vld [vmem:[#allocation5 + $0x1fa8] sm:$0xff]  ;;  %v1464_v1 = vld [vmem:[#allocation5 + $0x7b8] sm:$0xff] }
 0x2c8   :  { %3075 = vmatpush1.msra.mxu1 %v2069_v11  ;;  %3146 = vmatpush1.msra.mxu0 %v1303_v62  ;;  %v2229_v11 = vld [vmem:[#allocation5 + $0x1fa0] sm:$0xff]  ;;  %v1463_v62 = vld [vmem:[#allocation5 + $0x7b0] sm:$0xff] }
 0x2c9   :  { %3076 = vmatprep.subr.mxu1 %v2062_v3  ;;  %3147 = vmatprep.subr.mxu0 %v1296_v4  ;;  %v2222_v3 = vld [vmem:[#allocation5 + $0x1f68] sm:$0xff]  ;;  %v1456_v4 = vld [vmem:[#allocation5 + $0x778] sm:$0xff] }
 0x2ca   :  { %3077 = vmatpush1.msra.mxu1 %v2061_v5  ;;  %3148 = vmatpush1.msra.mxu0 %v1295_v6  ;;  %v2221_v5 = vld [vmem:[#allocation5 + $0x1f60] sm:$0xff]  ;;  %v1455_v6 = vld [vmem:[#allocation5 + $0x770] sm:$0xff] }
 0x2cb   :  { %3078 = vmatprep.subr.mxu1 %v2054_v7  ;;  %3149 = vmatprep.subr.mxu0 %v1288_v9  ;;  %v2214_v7 = vld [vmem:[#allocation5 + $0x1f28] sm:$0xff]  ;;  %v1448_v9 = vld [vmem:[#allocation5 + $0x738] sm:$0xff] }
 0x2cc   :  { %3079 = vmatpush1.msra.mxu1 %v2053_v10  ;;  %3150 = vmatpush1.msra.mxu0 %v1287_v27  ;;  %v2213_v10 = vld [vmem:[#allocation5 + $0x1f20] sm:$0xff]  ;;  %v1447_v27 = vld [vmem:[#allocation5 + $0x730] sm:$0xff] }
 0x2cd   :  { %3080 = vmatprep.subr.mxu1 %v2046_v12  ;;  %3151 = vmatprep.subr.mxu0 %v1280_v15  ;;  %v2206_v12 = vld [vmem:[#allocation5 + $0x1ee8] sm:$0xff]  ;;  %v1440_v15 = vld [vmem:[#allocation5 + $0x6f8] sm:$0xff] }
 0x2ce   :  { %3081 = vmatpush1.msra.mxu1 %v2045_v16  ;;  %3152 = vmatpush1.msra.mxu0 %v1279_v17  ;;  %v2205_v16 = vld [vmem:[#allocation5 + $0x1ee0] sm:$0xff]  ;;  %v1439_v17 = vld [vmem:[#allocation5 + $0x6f0] sm:$0xff] }
 0x2cf   :  { %3082 = vmatprep.subr.mxu1 %v2038_v18  ;;  %3153 = vmatprep.subr.mxu0 %v1272_v20  ;;  %v2198_v18 = vld [vmem:[#allocation5 + $0x1ea8] sm:$0xff]  ;;  %v1432_v20 = vld [vmem:[#allocation5 + $0x6b8] sm:$0xff] }
 0x2d0   :  { %3083 = vmatpush1.msra.mxu1 %v2037_v22  ;;  %3154 = vmatpush1.msra.mxu0 %v1271_v23  ;;  %v2197_v22 = vld [vmem:[#allocation5 + $0x1ea0] sm:$0xff]  ;;  %v1431_v23 = vld [vmem:[#allocation5 + $0x6b0] sm:$0xff] }
 0x2d1   :  { %3084 = vmatprep.subr.mxu1 %v2030_v25  ;;  %3155 = vmatprep.subr.mxu0 %v1264_v28  ;;  %v2190_v25 = vld [vmem:[#allocation5 + $0x1e68] sm:$0xff]  ;;  %v1424_v28 = vld [vmem:[#allocation5 + $0x678] sm:$0xff] }
 0x2d2   :  { %3085 = vmatpush1.msra.mxu1 %v2029_v26  ;;  %3156 = vmatpush1.msra.mxu0 %v1263_v29  ;;  %v2189_v26 = vld [vmem:[#allocation5 + $0x1e60] sm:$0xff]  ;;  %v1423_v29 = vld [vmem:[#allocation5 + $0x670] sm:$0xff] }
 0x2d3   :  { %3086 = vmatprep.subr.mxu1 %v2022_v32  ;;  %3157 = vmatprep.subr.mxu0 %v1256_v34  ;;  %v2182_v32 = vld [vmem:[#allocation5 + $0x1e28] sm:$0xff]  ;;  %v1416_v34 = vld [vmem:[#allocation5 + $0x638] sm:$0xff] }
 0x2d4   :  { %3087 = vmatpush1.msra.mxu1 %v2021_v35  ;;  %3158 = vmatpush1.msra.mxu0 %v1255_v36  ;;  %v2181_v35 = vld [vmem:[#allocation5 + $0x1e20] sm:$0xff]  ;;  %v1415_v36 = vld [vmem:[#allocation5 + $0x630] sm:$0xff] }
 0x2d5   :  { %3088 = vmatprep.subr.mxu1 %v2014_v37  ;;  %3159 = vmatprep.subr.mxu0 %v1248_v38  ;;  %v2174_v37 = vld [vmem:[#allocation5 + $0x1de8] sm:$0xff]  ;;  %v1408_v38 = vld [vmem:[#allocation5 + $0x5f8] sm:$0xff] }
 0x2d6   :  { %3089 = vmatpush1.msra.mxu1 %v2013_v39  ;;  %3160 = vmatpush1.msra.mxu0 %v1247_v40  ;;  %v2173_v39 = vld [vmem:[#allocation5 + $0x1de0] sm:$0xff]  ;;  %v1407_v40 = vld [vmem:[#allocation5 + $0x5f0] sm:$0xff] }
 0x2d7   :  { %3090 = vmatprep.subr.mxu1 %v2006_v42  ;;  %3161 = vmatprep.subr.mxu0 %v1240_v43  ;;  %v2166_v42 = vld [vmem:[#allocation5 + $0x1da8] sm:$0xff]  ;;  %v1400_v43 = vld [vmem:[#allocation5 + $0x5b8] sm:$0xff] }
 0x2d8   :  { %3091 = vmatpush1.msra.mxu1 %v2005_v44  ;;  %3162 = vmatpush1.msra.mxu0 %v1239_v45  ;;  %v2165_v44 = vld [vmem:[#allocation5 + $0x1da0] sm:$0xff]  ;;  %v1399_v45 = vld [vmem:[#allocation5 + $0x5b0] sm:$0xff] }
 0x2d9   :  { %3092 = vmatprep.subr.mxu1 %v1998_v46  ;;  %3163 = vmatprep.subr.mxu0 %v1232_v47  ;;  %v2158_v46 = vld [vmem:[#allocation5 + $0x1d68] sm:$0xff]  ;;  %v1392_v47 = vld [vmem:[#allocation5 + $0x578] sm:$0xff] }
 0x2da   :  { %3093 = vmatpush1.msra.mxu1 %v1997_v49  ;;  %3164 = vmatpush1.msra.mxu0 %v1231_v50  ;;  %v2157_v49 = vld [vmem:[#allocation5 + $0x1d60] sm:$0xff]  ;;  %v1391_v50 = vld [vmem:[#allocation5 + $0x570] sm:$0xff] }
 0x2db   :  { %3094 = vmatprep.subr.mxu1 %v1990_v51  ;;  %3165 = vmatprep.subr.mxu0 %v1224_v53  ;;  %v2150_v51 = vld [vmem:[#allocation5 + $0x1d28] sm:$0xff]  ;;  %v1384_v53 = vld [vmem:[#allocation5 + $0x538] sm:$0xff] }
 0x2dc   :  { %3095 = vmatpush1.msra.mxu1 %v1989_v55  ;;  %3166 = vmatpush1.msra.mxu0 %v1223_v56  ;;  %v2149_v55 = vld [vmem:[#allocation5 + $0x1d20] sm:$0xff]  ;;  %v1383_v56 = vld [vmem:[#allocation5 + $0x530] sm:$0xff] }
 0x2dd   :  { %3096 = vmatprep.subr.mxu1 %v2238_v57  ;;  %3167 = vmatprep.subr.mxu0 %v1472_v61  ;;  %v2142_v57 = vld [vmem:[#allocation5 + $0x1ce8] sm:$0xff]  ;;  %v1376_v61 = vld [vmem:[#allocation5 + $0x4f8] sm:$0xff] }
 0x2de   :  { %3097 = vmatpush2.msra.mxu1 %v2237_v60  ;;  %3168 = vmatpush2.msra.mxu0 %v1471_v63  ;;  %v2141_v60 = vld [vmem:[#allocation5 + $0x1ce0] sm:$0xff]  ;;  %v1375_v63 = vld [vmem:[#allocation5 + $0x4f0] sm:$0xff] }
 0x2df   :  { %3098 = vmatprep.subr.mxu1 %v2230_v0  ;;  %3169 = vmatprep.subr.mxu0 %v1464_v1  ;;  %v2134_v0 = vld [vmem:[#allocation5 + $0x1ca8] sm:$0xff]  ;;  %v1368_v1 = vld [vmem:[#allocation5 + $0x4b8] sm:$0xff] }
 0x2e0   :  { %3099 = vmatpush2.msra.mxu1 %v2229_v11  ;;  %3170 = vmatpush2.msra.mxu0 %v1463_v62  ;;  %v2133_v11 = vld [vmem:[#allocation5 + $0x1ca0] sm:$0xff]  ;;  %v1367_v62 = vld [vmem:[#allocation5 + $0x4b0] sm:$0xff] }
 0x2e1   :  { %3100 = vmatprep.subr.mxu1 %v2222_v3  ;;  %3171 = vmatprep.subr.mxu0 %v1456_v4  ;;  %v2126_v3 = vld [vmem:[#allocation5 + $0x1c68] sm:$0xff]  ;;  %v1360_v4 = vld [vmem:[#allocation5 + $0x478] sm:$0xff] }
 0x2e2   :  { %3101 = vmatpush2.msra.mxu1 %v2221_v5  ;;  %3172 = vmatpush2.msra.mxu0 %v1455_v6  ;;  %v2125_v5 = vld [vmem:[#allocation5 + $0x1c60] sm:$0xff]  ;;  %v1359_v6 = vld [vmem:[#allocation5 + $0x470] sm:$0xff] }
 0x2e3   :  { %3102 = vmatprep.subr.mxu1 %v2214_v7  ;;  %3173 = vmatprep.subr.mxu0 %v1448_v9  ;;  %v2118_v7 = vld [vmem:[#allocation5 + $0x1c28] sm:$0xff]  ;;  %v1352_v9 = vld [vmem:[#allocation5 + $0x438] sm:$0xff] }
 0x2e4   :  { %3103 = vmatpush2.msra.mxu1 %v2213_v10  ;;  %3174 = vmatpush2.msra.mxu0 %v1447_v27  ;;  %v2117_v10 = vld [vmem:[#allocation5 + $0x1c20] sm:$0xff]  ;;  %v1351_v27 = vld [vmem:[#allocation5 + $0x430] sm:$0xff] }
 0x2e5   :  { %3104 = vmatprep.subr.mxu1 %v2206_v12  ;;  %3175 = vmatprep.subr.mxu0 %v1440_v15  ;;  %v1600_v12 = vld [vmem:[#allocation5 + $0xbf8] sm:$0xff] }
 0x2e6   :  { %3105 = vmatpush2.msra.mxu1 %v2205_v16  ;;  %3176 = vmatpush2.msra.mxu0 %v1439_v17  ;;  %v1856_v15 = vld [vmem:[#allocation5 + $0x13f8] sm:$0xff]  ;;  %v1599_v16 = vld [vmem:[#allocation5 + $0xbf0] sm:$0xff] }
 0x2e7   :  { %3106 = vmatprep.subr.mxu1 %v2198_v18  ;;  %3177 = vmatprep.subr.mxu0 %v1432_v20  ;;  %v1855_v17 = vld [vmem:[#allocation5 + $0x13f0] sm:$0xff]  ;;  %v1592_v18 = vld [vmem:[#allocation5 + $0xbb8] sm:$0xff] }
 0x2e8   :  { %3107 = vmatpush2.msra.mxu1 %v2197_v22  ;;  %3178 = vmatpush2.msra.mxu0 %v1431_v23  ;;  %v1848_v20 = vld [vmem:[#allocation5 + $0x13b8] sm:$0xff]  ;;  %v1591_v22 = vld [vmem:[#allocation5 + $0xbb0] sm:$0xff] }
 0x2e9   :  { %3108 = vmatprep.subr.mxu1 %v2190_v25  ;;  %3179 = vmatprep.subr.mxu0 %v1424_v28  ;;  %v1847_v23 = vld [vmem:[#allocation5 + $0x13b0] sm:$0xff]  ;;  %v1584_v25 = vld [vmem:[#allocation5 + $0xb78] sm:$0xff] }
 0x2ea   :  { %3109 = vmatpush2.msra.mxu1 %v2189_v26  ;;  %3180 = vmatpush2.msra.mxu0 %v1423_v29  ;;  %v1840_v28 = vld [vmem:[#allocation5 + $0x1378] sm:$0xff]  ;;  %v1583_v26 = vld [vmem:[#allocation5 + $0xb70] sm:$0xff] }
 0x2eb   :  { %3110 = vmatprep.subr.mxu1 %v2182_v32  ;;  %3181 = vmatprep.subr.mxu0 %v1416_v34  ;;  %v1839_v29 = vld [vmem:[#allocation5 + $0x1370] sm:$0xff]  ;;  %v1832_v32 = vld [vmem:[#allocation5 + $0x1338] sm:$0xff] }
 0x2ec   :  { %3111 = vmatpush2.msra.mxu1 %v2181_v35  ;;  %3182 = vmatpush2.msra.mxu0 %v1415_v36  ;;  %v1575_v34 = vld [vmem:[#allocation5 + $0xb30] sm:$0xff]  ;;  %v1824_v36 = vld [vmem:[#allocation5 + $0x12f8] sm:$0xff] }
 0x2ed   :  { %3112 = vmatprep.subr.mxu1 %v2174_v37  ;;  %3183 = vmatprep.subr.mxu0 %v1408_v38  ;;  %v1831_v35 = vld [vmem:[#allocation5 + $0x1330] sm:$0xff]  ;;  %v1560_v38 = vld [vmem:[#allocation5 + $0xab8] sm:$0xff] }
 0x2ee   :  { %3113 = vmatpush2.msra.mxu1 %v2173_v39  ;;  %3184 = vmatpush2.msra.mxu0 %v1407_v40  ;;  %v1823_v37 = vld [vmem:[#allocation5 + $0x12f0] sm:$0xff]  ;;  %v1816_v39 = vld [vmem:[#allocation5 + $0x12b8] sm:$0xff] }
 0x2ef   :  { %3114 = vmatprep.subr.mxu1 %v2166_v42  ;;  %3185 = vmatprep.subr.mxu0 %v1400_v43  ;;  %v1559_v40 = vld [vmem:[#allocation5 + $0xab0] sm:$0xff]  ;;  %v1552_v43 = vld [vmem:[#allocation5 + $0xa78] sm:$0xff] }
 0x2f0   :  { %3115 = vmatpush2.msra.mxu1 %v2165_v44  ;;  %3186 = vmatpush2.msra.mxu0 %v1399_v45  ;;  %v1815_v42 = vld [vmem:[#allocation5 + $0x12b0] sm:$0xff]  ;;  %v1808_v44 = vld [vmem:[#allocation5 + $0x1278] sm:$0xff] }
 0x2f1   :  { %3116 = vmatprep.subr.mxu1 %v2158_v46  ;;  %3187 = vmatprep.subr.mxu0 %v1392_v47  ;;  %v1551_v45 = vld [vmem:[#allocation5 + $0xa70] sm:$0xff]  ;;  %v1544_v47 = vld [vmem:[#allocation5 + $0xa38] sm:$0xff] }
 0x2f2   :  { %3117 = vmatpush2.msra.mxu1 %v2157_v49  ;;  %3188 = vmatpush2.msra.mxu0 %v1391_v50  ;;  %v1807_v46 = vld [vmem:[#allocation5 + $0x1270] sm:$0xff]  ;;  %v1800_v49 = vld [vmem:[#allocation5 + $0x1238] sm:$0xff] }
 0x2f3   :  { %3118 = vmatprep.subr.mxu1 %v2150_v51  ;;  %3189 = vmatprep.subr.mxu0 %v1384_v53  ;;  %v1543_v50 = vld [vmem:[#allocation5 + $0xa30] sm:$0xff]  ;;  %v1536_v53 = vld [vmem:[#allocation5 + $0x9f8] sm:$0xff] }
 0x2f4   :  { %3119 = vmatpush2.msra.mxu1 %v2149_v55  ;;  %3190 = vmatpush2.msra.mxu0 %v1383_v56  ;;  %v1799_v51 = vld [vmem:[#allocation5 + $0x1230] sm:$0xff]  ;;  %v1792_v55 = vld [vmem:[#allocation5 + $0x11f8] sm:$0xff] }
 0x2f5   :  { %3120 = vmatprep.subr.mxu1 %v2142_v57  ;;  %3191 = vmatprep.subr.mxu0 %v1376_v61  ;;  %v1535_v56 = vld [vmem:[#allocation5 + $0x9f0] sm:$0xff]  ;;  %v1528_v61 = vld [vmem:[#allocation5 + $0x9b8] sm:$0xff] }
 0x2f6   :  { %3121 = vmatpush2.msra.mxu1 %v2141_v60  ;;  %3192 = vmatpush2.msra.mxu0 %v1375_v63  ;;  %v1791_v57 = vld [vmem:[#allocation5 + $0x11f0] sm:$0xff]  ;;  %v1784_v60 = vld [vmem:[#allocation5 + $0x11b8] sm:$0xff] }
 0x2f7   :  { %3122 = vmatprep.subr.mxu1 %v2134_v0  ;;  %3193 = vmatprep.subr.mxu0 %v1368_v1  ;;  %v1527_v63 = vld [vmem:[#allocation5 + $0x9b0] sm:$0xff]  ;;  %v1520_v1 = vld [vmem:[#allocation5 + $0x978] sm:$0xff] }
 0x2f8   :  { %3123 = vmatpush2.msra.mxu1 %v2133_v11  ;;  %3194 = vmatpush2.msra.mxu0 %v1367_v62  ;;  %v1783_v0 = vld [vmem:[#allocation5 + $0x11b0] sm:$0xff]  ;;  %v1776_v11 = vld [vmem:[#allocation5 + $0x1178] sm:$0xff] }
 0x2f9   :  { %3124 = vmatprep.subr.mxu1 %v2126_v3  ;;  %3195 = vmatprep.subr.mxu0 %v1360_v4  ;;  %v1519_v62 = vld [vmem:[#allocation5 + $0x970] sm:$0xff]  ;;  %v1512_v4 = vld [vmem:[#allocation5 + $0x938] sm:$0xff] }
 0x2fa   :  { %3125 = vmatpush2.msra.mxu1 %v2125_v5  ;;  %3196 = vmatpush2.msra.mxu0 %v1359_v6  ;;  %v1775_v3 = vld [vmem:[#allocation5 + $0x1170] sm:$0xff]  ;;  %v1768_v5 = vld [vmem:[#allocation5 + $0x1138] sm:$0xff] }
 0x2fb   :  { %3126 = vmatprep.subr.mxu1 %v2118_v7  ;;  %3197 = vmatprep.subr.mxu0 %v1352_v9  ;;  %v1511_v6 = vld [vmem:[#allocation5 + $0x930] sm:$0xff]  ;;  %v1504_v9 = vld [vmem:[#allocation5 + $0x8f8] sm:$0xff] }
 0x2fc   :  { %3127 = vmatpush2.msra.mxu1 %v2117_v10  ;;  %3198 = vmatpush2.msra.mxu0 %v1351_v27  ;;  %v1767_v7 = vld [vmem:[#allocation5 + $0x1130] sm:$0xff]  ;;  %v1760_v10 = vld [vmem:[#allocation5 + $0x10f8] sm:$0xff] }
 0x2fd   :  { %3129 = vmatmul.mubr.f32.vlgmr.msra.gmra.mxu1 %v5782_v33  ;;  %3200 = vmatmul.mubr.f32.vlgmr.msra.gmra.mxu0 %v5745_v13  ;;  %v1576_v13 = vld [vmem:[#allocation5 + $0xb38] sm:$0xff]  ;;  %v1503_v27 = vld [vmem:[#allocation5 + $0x8f0] sm:$0xff] }
 0x2fe   :  { %3206 = vmatprep.subr.mxu1 %v1600_v12  ;;  %3277 = vmatprep.subr.mxu0 %v1856_v15  ;;  %v1759_v12 = vld [vmem:[#allocation5 + $0x10f0] sm:$0xff]  ;;  %v1496_v15 = vld [vmem:[#allocation5 + $0x8b8] sm:$0xff] }
 0x2ff   :  { %3207 = vmatpush1.msra.mxu1 %v1599_v16  ;;  %3270 = vmatprep.mubr.f32.mxu1 %v5748_v21  ;;  %v1568_v21 = vld [vmem:[#allocation5 + $0xaf8] sm:$0xff] }
 0x300   :  { %3278 = vmatpush1.msra.mxu0 %v1855_v17  ;;  %3341 = vmatprep.mubr.f32.mxu0 %v5764_v58  ;;  %v1567_v58 = vld [vmem:[#allocation5 + $0xaf0] sm:$0xff]  ;;  %v1752_v16 = vld [vmem:[#allocation5 + $0x10b8] sm:$0xff] }
 0x301   :  { %3208 = vmatprep.subr.mxu1 %v1592_v18  ;;  %3279 = vmatprep.subr.mxu0 %v1848_v20  ;;  %v1495_v17 = vld [vmem:[#allocation5 + $0x8b0] sm:$0xff]  ;;  %v1488_v20 = vld [vmem:[#allocation5 + $0x878] sm:$0xff] }
 0x302   :  { %3209 = vmatpush1.msra.mxu1 %v1591_v22  ;;  %3280 = vmatpush1.msra.mxu0 %v1847_v23  ;;  %v1751_v18 = vld [vmem:[#allocation5 + $0x10b0] sm:$0xff]  ;;  %v1744_v22 = vld [vmem:[#allocation5 + $0x1078] sm:$0xff] }
 0x303   :  { %3210 = vmatprep.subr.mxu1 %v1584_v25  ;;  %3281 = vmatprep.subr.mxu0 %v1840_v28  ;;  %v1487_v23 = vld [vmem:[#allocation5 + $0x870] sm:$0xff]  ;;  %v1480_v28 = vld [vmem:[#allocation5 + $0x838] sm:$0xff] }
 0x304   :  { %3211 = vmatpush1.msra.mxu1 %v1583_v26  ;;  %3282 = vmatpush1.msra.mxu0 %v1839_v29  ;;  %v1743_v25 = vld [vmem:[#allocation5 + $0x1070] sm:$0xff]  ;;  %v1736_v26 = vld [vmem:[#allocation5 + $0x1038] sm:$0xff] }
 0x305   :  { %3212 = vmatprep.subr.mxu1 %v1576_v13  ;;  %3283 = vmatprep.subr.mxu0 %v1832_v32  ;;  %v1479_v29 = vld [vmem:[#allocation5 + $0x830] sm:$0xff]  ;;  %v1728_v32 = vld [vmem:[#allocation5 + $0xff8] sm:$0xff] }
 0x306   :  { %3213 = vmatpush1.msra.mxu1 %v1575_v34  ;;  %3284 = vmatpush1.msra.mxu0 %v1831_v35  ;;  %v1735_v13 = vld [vmem:[#allocation5 + $0x1030] sm:$0xff]  ;;  %v1984_v34 = vld [vmem:[#allocation5 + $0x17f8] sm:$0xff] }
 0x307   :  { %3214 = vmatprep.subr.mxu1 %v1568_v21  ;;  %3285 = vmatprep.subr.mxu0 %v1824_v36  ;;  %v1727_v35 = vld [vmem:[#allocation5 + $0xff0] sm:$0xff]  ;;  %v1720_v36 = vld [vmem:[#allocation5 + $0xfb8] sm:$0xff] }
 0x308   :  { %3215 = vmatpush1.msra.mxu1 %v1567_v58  ;;  %3286 = vmatpush1.msra.mxu0 %v1823_v37  ;;  %v1983_v21 = vld [vmem:[#allocation5 + $0x17f0] sm:$0xff]  ;;  %v1976_v58 = vld [vmem:[#allocation5 + $0x17b8] sm:$0xff] }
 0x309   :  { %3216 = vmatprep.subr.mxu1 %v1560_v38  ;;  %3287 = vmatprep.subr.mxu0 %v1816_v39  ;;  %v1719_v37 = vld [vmem:[#allocation5 + $0xfb0] sm:$0xff]  ;;  %v1712_v39 = vld [vmem:[#allocation5 + $0xf78] sm:$0xff] }
 0x30a   :  { %3217 = vmatpush1.msra.mxu1 %v1559_v40  ;;  %3288 = vmatpush1.msra.mxu0 %v1815_v42  ;;  %v1975_v38 = vld [vmem:[#allocation5 + $0x17b0] sm:$0xff]  ;;  %v1968_v40 = vld [vmem:[#allocation5 + $0x1778] sm:$0xff] }
 0x30b   :  { %3218 = vmatprep.subr.mxu1 %v1552_v43  ;;  %3289 = vmatprep.subr.mxu0 %v1808_v44  ;;  %v1711_v42 = vld [vmem:[#allocation5 + $0xf70] sm:$0xff]  ;;  %v1704_v44 = vld [vmem:[#allocation5 + $0xf38] sm:$0xff] }
 0x30c   :  { %3219 = vmatpush1.msra.mxu1 %v1551_v45  ;;  %3290 = vmatpush1.msra.mxu0 %v1807_v46  ;;  %v1967_v43 = vld [vmem:[#allocation5 + $0x1770] sm:$0xff]  ;;  %v1960_v45 = vld [vmem:[#allocation5 + $0x1738] sm:$0xff] }
 0x30d   :  { %3220 = vmatprep.subr.mxu1 %v1544_v47  ;;  %3291 = vmatprep.subr.mxu0 %v1800_v49  ;;  %v1703_v46 = vld [vmem:[#allocation5 + $0xf30] sm:$0xff]  ;;  %v1696_v49 = vld [vmem:[#allocation5 + $0xef8] sm:$0xff] }
 0x30e   :  { %3221 = vmatpush1.msra.mxu1 %v1543_v50  ;;  %3292 = vmatpush1.msra.mxu0 %v1799_v51  ;;  %v1959_v47 = vld [vmem:[#allocation5 + $0x1730] sm:$0xff]  ;;  %v1952_v50 = vld [vmem:[#allocation5 + $0x16f8] sm:$0xff] }
 0x30f   :  { %3222 = vmatprep.subr.mxu1 %v1536_v53  ;;  %3293 = vmatprep.subr.mxu0 %v1792_v55  ;;  %v1695_v51 = vld [vmem:[#allocation5 + $0xef0] sm:$0xff]  ;;  %v1688_v55 = vld [vmem:[#allocation5 + $0xeb8] sm:$0xff] }
 0x310   :  { %3223 = vmatpush1.msra.mxu1 %v1535_v56  ;;  %3294 = vmatpush1.msra.mxu0 %v1791_v57  ;;  %v1951_v53 = vld [vmem:[#allocation5 + $0x16f0] sm:$0xff]  ;;  %v1944_v56 = vld [vmem:[#allocation5 + $0x16b8] sm:$0xff] }
 0x311   :  { %3224 = vmatprep.subr.mxu1 %v1528_v61  ;;  %3295 = vmatprep.subr.mxu0 %v1784_v60  ;;  %v1687_v57 = vld [vmem:[#allocation5 + $0xeb0] sm:$0xff]  ;;  %v1680_v60 = vld [vmem:[#allocation5 + $0xe78] sm:$0xff] }
 0x312   :  { %3225 = vmatpush1.msra.mxu1 %v1527_v63  ;;  %3296 = vmatpush1.msra.mxu0 %v1783_v0  ;;  %v1943_v61 = vld [vmem:[#allocation5 + $0x16b0] sm:$0xff]  ;;  %v1936_v63 = vld [vmem:[#allocation5 + $0x1678] sm:$0xff] }
 0x313   :  { %3226 = vmatprep.subr.mxu1 %v1520_v1  ;;  %3297 = vmatprep.subr.mxu0 %v1776_v11  ;;  %v1679_v0 = vld [vmem:[#allocation5 + $0xe70] sm:$0xff]  ;;  %v1672_v11 = vld [vmem:[#allocation5 + $0xe38] sm:$0xff] }
 0x314   :  { %3227 = vmatpush1.msra.mxu1 %v1519_v62  ;;  %3298 = vmatpush1.msra.mxu0 %v1775_v3  ;;  %v1935_v1 = vld [vmem:[#allocation5 + $0x1670] sm:$0xff]  ;;  %v1928_v62 = vld [vmem:[#allocation5 + $0x1638] sm:$0xff] }
 0x315   :  { %3228 = vmatprep.subr.mxu1 %v1512_v4  ;;  %3299 = vmatprep.subr.mxu0 %v1768_v5  ;;  %v1671_v3 = vld [vmem:[#allocation5 + $0xe30] sm:$0xff]  ;;  %v1664_v5 = vld [vmem:[#allocation5 + $0xdf8] sm:$0xff] }
 0x316   :  { %3229 = vmatpush1.msra.mxu1 %v1511_v6  ;;  %3300 = vmatpush1.msra.mxu0 %v1767_v7  ;;  %v1927_v4 = vld [vmem:[#allocation5 + $0x1630] sm:$0xff]  ;;  %v1920_v6 = vld [vmem:[#allocation5 + $0x15f8] sm:$0xff]  ;;  %v5804_v7 = vpop.f32.mrf.mxu0 }
 0x317   :  { %3230 = vmatprep.subr.mxu1 %v1504_v9  ;;  %3301 = vmatprep.subr.mxu0 %v1760_v10  ;;  %v1663_v9 = vld [vmem:[#allocation5 + $0xdf0] sm:$0xff] }
 0x318   :  { %3231 = vmatpush1.msra.mxu1 %v1503_v27  ;;  %3302 = vmatpush1.msra.mxu0 %v1759_v12  ;;  %v1919_v10 = vld [vmem:[#allocation5 + $0x15f0] sm:$0xff]  ;;  %v1656_v27 = vld [vmem:[#allocation5 + $0xdb8] sm:$0xff] }
 0x319   :  { %3232 = vmatprep.subr.mxu1 %v1496_v15  ;;  %3303 = vmatprep.subr.mxu0 %v1752_v16  ;;  %v1912_v12 = vld [vmem:[#allocation5 + $0x15b8] sm:$0xff]  ;;  %v5806_v15 = vpop.f32.mrf.mxu1  ;;  %v1655_v16 = vld [vmem:[#allocation5 + $0xdb0] sm:$0xff] }
 0x31a   :  { %3233 = vmatpush1.msra.mxu1 %v1495_v17  ;;  %3304 = vmatpush1.msra.mxu0 %v1751_v18  ;;  %v1911_v17 = vld [vmem:[#allocation5 + $0x15b0] sm:$0xff]  ;;  %v1648_v18 = vld [vmem:[#allocation5 + $0xd78] sm:$0xff] }
 0x31b   :  { %3234 = vmatprep.subr.mxu1 %v1488_v20  ;;  %3305 = vmatprep.subr.mxu0 %v1744_v22  ;;  %v1904_v20 = vld [vmem:[#allocation5 + $0x1578] sm:$0xff]  ;;  %v5808_v22 = vld [vmem:[#allocation7] sm:$0xff] }
 0x31c   :  { %3235 = vmatpush1.msra.mxu1 %v1487_v23  ;;  %3306 = vmatpush1.msra.mxu0 %v1743_v25  ;;  %v2351_v23 = vpop.f32.mrf.mxu0  ;;  %v1647_v25 = vld [vmem:[#allocation5 + $0xd70] sm:$0xff] }
 0x31d   :  { %3236 = vmatprep.subr.mxu1 %v1480_v28  ;;  %3307 = vmatprep.subr.mxu0 %v1736_v26  ;;  %v1903_v28 = vld [vmem:[#allocation5 + $0x1570] sm:$0xff]  ;;  %v2250_v26 = vrot.slane %v5808_v22, %v585_v30 }
 0x31e   :  { %3237 = vmatpush1.msra.mxu1 %v1479_v29  ;;  %3308 = vmatpush1.msra.mxu0 %v1735_v13  ;;  %v1640_v29 = vld [vmem:[#allocation5 + $0xd38] sm:$0xff]  ;;  %v1631_v30 = vld [vmem:[#allocation5 + $0xcf0] sm:$0xff] }
 0x31f   :  { %3238 = vmatprep.subr.mxu1 %v1728_v32  ;;  %3309 = vmatprep.subr.mxu0 %v1984_v34  ;;  %v1896_v13 = vld [vmem:[#allocation5 + $0x1538] sm:$0xff]  ;;  %v2422_v32 = vpop.f32.mrf.mxu1  ;;  %v5813_v34 = vpop.f32.mrf.mxu0 }
 0x320   :  { %3239 = vmatpush2.msra.mxu1 %v1727_v35  ;;  %3310 = vmatpush2.msra.mxu0 %v1983_v21  ;;  %v1639_v35 = vld [vmem:[#allocation5 + $0xd30] sm:$0xff] }
 0x321   :  { %3240 = vmatprep.subr.mxu1 %v1720_v36  ;;  %3311 = vmatprep.subr.mxu0 %v1976_v58  ;;  %v1895_v21 = vld [vmem:[#allocation5 + $0x1530] sm:$0xff]  ;;  %v1632_v36 = vld [vmem:[#allocation5 + $0xcf8] sm:$0xff] }
 0x322   :  { %3241 = vmatpush2.msra.mxu1 %v1719_v37  ;;  %3312 = vmatpush2.msra.mxu0 %v1975_v38  ;;  %v1888_v58 = vld [vmem:[#allocation5 + $0x14f8] sm:$0xff]  ;;  %v5815_v37 = vpop.f32.mrf.mxu1  ;;  %v1887_v38 = vld [vmem:[#allocation5 + $0x14f0] sm:$0xff] }
 0x323   :  { %3242 = vmatprep.subr.mxu1 %v1712_v39  ;;  %3313 = vmatprep.subr.mxu0 %v1968_v40  ;;  %v2352_v39 = vadd.f32 %v2351_v23, %v2250_v26  ;;  %v1624_v40 = vld [vmem:[#allocation5 + $0xcb8] sm:$0xff]  ;;  %v2079_v23 = vld [vmem:[#allocation5 + $0x1af0] sm:$0xff]  ;;  %v3453_v26 = vld [vmem:[%s6253_s5 + $0xd0] sm:$0xff] }
 0x324   :  { %3243 = vmatpush2.msra.mxu1 %v1711_v42  ;;  %3314 = vmatpush2.msra.mxu0 %v1967_v43  ;;  %v1880_v42 = vld [vmem:[#allocation5 + $0x14b8] sm:$0xff]  ;;  %v2493_v43 = vpop.f32.mrf.mxu0 }
 0x325   :  { %3244 = vmatprep.subr.mxu1 %v1704_v44  ;;  %3315 = vmatprep.subr.mxu0 %v1960_v45  ;;  %v1623_v44 = vld [vmem:[#allocation5 + $0xcb0] sm:$0xff] }
 0x326   :  { %3245 = vmatpush2.msra.mxu1 %v1703_v46  ;;  %3316 = vmatpush2.msra.mxu0 %v1959_v47  ;;  %v1879_v45 = vld [vmem:[#allocation5 + $0x14b0] sm:$0xff]  ;;  %v2423_v46 = vadd.f32 %v2422_v32, %v2352_v39  ;;  %v1616_v47 = vld [vmem:[#allocation5 + $0xc78] sm:$0xff] }
 0x327   :  { %3246 = vmatprep.subr.mxu1 %v1696_v49  ;;  %3317 = vmatprep.subr.mxu0 %v1952_v50  ;;  %v1872_v49 = vld [vmem:[#allocation5 + $0x1478] sm:$0xff]  ;;  %v2564_v50 = vpop.f32.mrf.mxu1 }
 0x328   :  { %3247 = vmatpush2.msra.mxu1 %v1695_v51  ;;  %3318 = vmatpush2.msra.mxu0 %v1951_v53  ;;  %v1615_v51 = vld [vmem:[#allocation5 + $0xc70] sm:$0xff]  ;;  %v2064_v32 = vld [vmem:[#allocation5 + $0x1a78] sm:$0xff] }
 0x329   :  { %3248 = vmatprep.subr.mxu1 %v1688_v55  ;;  %3319 = vmatprep.subr.mxu0 %v1944_v56  ;;  %v1871_v53 = vld [vmem:[#allocation5 + $0x1470] sm:$0xff]  ;;  %v2494_v55 = vadd.f32 %v2493_v43, %v2423_v46  ;;  %v1608_v56 = vld [vmem:[#allocation5 + $0xc38] sm:$0xff]  ;;  %v3449_v46 = vld [vmem:[%s6253_s5 + $0xb0] sm:$0xff] }
 0x32a   :  { %3249 = vmatpush2.msra.mxu1 %v1687_v57  ;;  %3320 = vmatpush2.msra.mxu0 %v1943_v61  ;;  %v1864_v57 = vld [vmem:[#allocation5 + $0x1438] sm:$0xff]  ;;  %v1607_v61 = vld [vmem:[#allocation5 + $0xc30] sm:$0xff] }
 0x32b   :  { %3250 = vmatprep.subr.mxu1 %v1680_v60  ;;  %3321 = vmatprep.subr.mxu0 %v1936_v63  ;;  %v1863_v60 = vld [vmem:[#allocation5 + $0x1430] sm:$0xff]  ;;  %v2565_v63 = vadd.f32 %v2564_v50, %v2494_v55  ;;  %v3435_v39 = vld [vmem:[%s6253_s5 + $0x40] sm:$0xff]  ;;  %v3433_v50 = vld [vmem:[%s6253_s5 + $0x30] sm:$0xff] }
 0x32c   :  { %3251 = vmatpush2.msra.mxu1 %v1679_v0  ;;  %3322 = vmatpush2.msra.mxu0 %v1935_v1  ;;  %v2112_v0 = vld [vmem:[#allocation5 + $0x1bf8] sm:$0xff]  ;;  %v3458_v1 = vld [vmem:[%s6253_s5 + $0xf8] sm:$0xff] }
 0x32d   :  { %3252 = vmatprep.subr.mxu1 %v1672_v11  ;;  %3323 = vmatprep.subr.mxu0 %v1928_v62  ;;  %v2111_v11 = vld [vmem:[#allocation5 + $0x1bf0] sm:$0xff] }
 0x32e   :  { %3253 = vmatpush2.msra.mxu1 %v1671_v3  ;;  %3324 = vmatpush2.msra.mxu0 %v1927_v4  ;;  %v3442_v62 = vld [vmem:[%s6253_s5 + $0x78] sm:$0xff]  ;;  %v3420_v3 = vmax.f32 %v2565_v63, 0.0  ;;  %v2104_v4 = vld [vmem:[#allocation5 + $0x1bb8] sm:$0xff] }
 0x32f   :  { %3254 = vmatprep.subr.mxu1 %v1664_v5  ;;  %3325 = vmatprep.subr.mxu0 %v1920_v6  ;;  %v3457_v5 = vld [vmem:[%s6253_s5 + $0xf0] sm:$0xff]  ;;  %v2103_v6 = vld [vmem:[#allocation5 + $0x1bb0] sm:$0xff]  ;;  %v3431_v63 = vld [vmem:[%s6253_s5 + $0x20] sm:$0xff] }
 0x330   :  { %3255 = vmatpush2.msra.mxu1 %v1663_v9  ;;  %3326 = vmatpush2.msra.mxu0 %v1919_v10  ;;  %v3456_v9 = vld [vmem:[%s6253_s5 + $0xe8] sm:$0xff]  ;;  %v2095_v10 = vld [vmem:[#allocation5 + $0x1b70] sm:$0xff] }
 0x331   :  { %3256 = vmatprep.subr.mxu1 %v1656_v27  ;;  %3327 = vmatprep.subr.mxu0 %v1912_v12  ;;  %v3440_v27 = vld [vmem:[%s6253_s5 + $0x68] sm:$0xff]  ;;  %v3455_v12 = vld [vmem:[%s6253_s5 + $0xe0] sm:$0xff]  ;;  %v2047_v43 = vld [vmem:[#allocation5 + $0x19f0] sm:$0xff] }
 0x332   :  { %3257 = vmatpush2.msra.mxu1 %v1655_v16  ;;  %3328 = vmatpush2.msra.mxu0 %v1911_v17  ;;  %v2087_v16 = vld [vmem:[#allocation5 + $0x1b30] sm:$0xff]  ;;  %v3439_v17 = vld [vmem:[%s6253_s5 + $0x60] sm:$0xff] }
 0x333   :  { %3258 = vmatprep.subr.mxu1 %v1648_v18  ;;  %3329 = vmatprep.subr.mxu0 %v1904_v20  ;;  %v2080_v18 = vld [vmem:[#allocation5 + $0x1af8] sm:$0xff]  ;;  %v3454_v20 = vld [vmem:[%s6253_s5 + $0xd8] sm:$0xff] }
 0x334   :  { %3259 = vmatpush2.msra.mxu1 %v1647_v25  ;;  %3330 = vmatpush2.msra.mxu0 %v1903_v28  ;;  %v3438_v25 = vld [vmem:[%s6253_s5 + $0x58] sm:$0xff]  ;;  %v2072_v28 = vld [vmem:[#allocation5 + $0x1ab8] sm:$0xff] }
 0x335   :  { %3260 = vmatprep.subr.mxu1 %v1640_v29  ;;  %3331 = vmatprep.subr.mxu0 %v1896_v13  ;;  %v2071_v29 = vld [vmem:[#allocation5 + $0x1ab0] sm:$0xff]  ;;  %v3437_v13 = vld [vmem:[%s6253_s5 + $0x50] sm:$0xff] }
 0x336   :  { %3261 = vmatpush2.msra.mxu1 %v1639_v35  ;;  %3332 = vmatpush2.msra.mxu0 %v1895_v21  ;;  %v3452_v35 = vld [vmem:[%s6253_s5 + $0xc8] sm:$0xff]  ;;  %v2063_v21 = vld [vmem:[#allocation5 + $0x1a70] sm:$0xff] }
 0x337   :  { %3262 = vmatprep.subr.mxu1 %v1632_v36  ;;  %3333 = vmatprep.subr.mxu0 %v1888_v58  ;;  %v3436_v36 = vld [vmem:[%s6253_s5 + $0x48] sm:$0xff]  ;;  %v2056_v58 = vld [vmem:[#allocation5 + $0x1a38] sm:$0xff]  ;;  %v2031_v55 = vld [vmem:[#allocation5 + $0x1970] sm:$0xff] }
 0x338   :  { %3263 = vmatpush2.msra.mxu1 %v1631_v30  ;;  %3334 = vmatpush2.msra.mxu0 %v1887_v38  ;;  %v3451_v30 = vld [vmem:[%s6253_s5 + $0xc0] sm:$0xff]  ;;  %v2055_v38 = vld [vmem:[#allocation5 + $0x1a30] sm:$0xff] }
 0x339   :  { %3264 = vmatprep.subr.mxu1 %v1624_v40  ;;  %3335 = vmatprep.subr.mxu0 %v1880_v42  ;;  %v2048_v40 = vld [vmem:[#allocation5 + $0x19f8] sm:$0xff]  ;;  %v3450_v42 = vld [vmem:[%s6253_s5 + $0xb8] sm:$0xff] }
 0x33a   :  { %3265 = vmatpush2.msra.mxu1 %v1623_v44  ;;  %3336 = vmatpush2.msra.mxu0 %v1879_v45  ;;  %v3434_v44 = vld [vmem:[%s6253_s5 + $0x38] sm:$0xff]  ;;  %v2040_v45 = vld [vmem:[#allocation5 + $0x19b8] sm:$0xff] }
 0x33b   :  { %3266 = vmatprep.subr.mxu1 %v1616_v47  ;;  %3337 = vmatprep.subr.mxu0 %v1872_v49  ;;  %v2246_v47 = vrot.slane %v5808_v22, %v581_v24  ;;  %v2039_v49 = vld [vmem:[#allocation5 + $0x19b0] sm:$0xff]  ;;  %v3432_v24 = vld [vmem:[%s6253_s5 + $0x28] sm:$0xff] }
 0x33c   :  { %3267 = vmatpush2.msra.mxu1 %v1615_v51  ;;  %3338 = vmatpush2.msra.mxu0 %v1871_v53  ;;  %v2032_v51 = vld [vmem:[#allocation5 + $0x1978] sm:$0xff]  ;;  %v3448_v53 = vld [vmem:[%s6253_s5 + $0xa8] sm:$0xff] }
 0x33d   :  { %3268 = vmatprep.subr.mxu1 %v1608_v56  ;;  %3339 = vmatprep.subr.mxu0 %v1864_v57  ;;  %v2024_v56 = vld [vmem:[#allocation5 + $0x1938] sm:$0xff] }
 0x33e   :  { %3269 = vmatpush2.msra.mxu1 %v1607_v61  ;;  %3340 = vmatpush2.msra.mxu0 %v1863_v60  ;;  %v3447_v57 = vld [vmem:[%s6253_s5 + $0xa0] sm:$0xff]  ;;  %v2350_v61 = vadd.f32 %v5804_v7, %v2246_v47  ;;  %v2023_v60 = vld [vmem:[#allocation5 + $0x1930] sm:$0xff] }
 0x33f   :  { %3271 = vmatmul.mubr.f32.vlgmr.msra.gmra.mxu1 %v5750_v52  ;;  %3342 = vmatmul.mubr.f32.vlgmr.msra.gmra.mxu0 %v5766_v59  ;;  %v3441_v52 = vld [vmem:[%s6253_s5 + $0x70] sm:$0xff]  ;;  %v2096_v59 = vld [vmem:[#allocation5 + $0x1b78] sm:$0xff]  ;;  %v3430_v7 = vld [vmem:[%s6253_s5 + $0x18] sm:$0xff] }
 0x340   :  { %3348 = vmatprep.subr.mxu1 %v2112_v0  ;;  %3860 = vmatprep.subr.mxu0 %v3458_v1  ;;  %v2016_v0 = vld [vmem:[#allocation5 + $0x18f8] sm:$0xff]  ;;  %v3446_v1 = vld [vmem:[%s6253_s5 + $0x98] sm:$0xff] }
 0x341   :  { %3349 = vmatpush1.msra.mxu1 %v2111_v11  ;;  %3412 = vmatprep.mubr.f32.mxu1 %v5779_v31  ;;  %v2088_v31 = vld [vmem:[#allocation5 + $0x1b38] sm:$0xff]  ;;  %v2421_v11 = vadd.f32 %v5806_v15, %v2350_v61  ;;  %v3429_v15 = vld [vmem:[%s6253_s5 + $0x10] sm:$0xff] }
 0x342   :  { %3861 = vmatpush3.msra.mxu0 %v3442_v62  ;;  %3626 = vmatprep.mubr.f32.mxu0 %v3420_v3  ;;  %v2015_v62 = vld [vmem:[#allocation5 + $0x18f0] sm:$0xff]  ;;  %v2008_v3 = vld [vmem:[#allocation5 + $0x18b8] sm:$0xff] }
 0x343   :  { %3350 = vmatprep.subr.mxu1 %v2104_v4  ;;  %3862 = vmatprep.subr.mxu0 %v3457_v5  ;;  %v3445_v4 = vld [vmem:[%s6253_s5 + $0x90] sm:$0xff]  ;;  %v2492_v5 = vadd.f32 %v5813_v34, %v2421_v11  ;;  %v3428_v34 = vld [vmem:[%s6253_s5 + $0x8] sm:$0xff]  ;;  %v2192_v47 = vld [vmem:[#allocation5 + $0x1e78] sm:$0xff]  ;;  %v2258_v11 = vrot.slane %v5808_v22, %v593_v54 }
 0x344   :  { %3351 = vmatpush1.msra.mxu1 %v2103_v6  ;;  %3863 = vmatpush3.msra.mxu0 %v3441_v52  ;;  %v2007_v6 = vld [vmem:[#allocation5 + $0x18b0] sm:$0xff]  ;;  %v2000_v52 = vld [vmem:[#allocation5 + $0x1878] sm:$0xff]  ;;  %v3497_v54 = vld [vmem:[%s6253_s5 + $0x230] sm:$0xff] }
 0x345   :  { %3352 = vmatprep.subr.mxu1 %v2096_v59  ;;  %3864 = vmatprep.subr.mxu0 %v3456_v9  ;;  %v3444_v59 = vld [vmem:[%s6253_s5 + $0x88] sm:$0xff]  ;;  %v2563_v9 = vadd.f32 %v5815_v37, %v2492_v5  ;;  %v3427_v37 = vld [vmem:[%s6253_s5] sm:$0xff]  ;;  %v3513_v5 = vld [vmem:[%s6253_s5 + $0x2b0] sm:$0xff] }
 0x346   :  { %3353 = vmatpush1.msra.mxu1 %v2095_v10  ;;  %3865 = vmatpush3.msra.mxu0 %v3440_v27  ;;  %v1999_v10 = vld [vmem:[#allocation5 + $0x1870] sm:$0xff]  ;;  %v1992_v27 = vld [vmem:[#allocation5 + $0x1838] sm:$0xff] }
 0x347   :  { %3354 = vmatprep.subr.mxu1 %v2088_v31  ;;  %3866 = vmatprep.subr.mxu0 %v3455_v12  ;;  %v3443_v31 = vld [vmem:[%s6253_s5 + $0x80] sm:$0xff]  ;;  %v1991_v12 = vld [vmem:[#allocation5 + $0x1830] sm:$0xff] }
 0x348   :  { %3355 = vmatpush1.msra.mxu1 %v2087_v16  ;;  %3867 = vmatpush3.msra.mxu0 %v3439_v17  ;;  %v2240_v16 = vld [vmem:[#allocation5 + $0x1ff8] sm:$0xff]  ;;  %v3419_v17 = vmax.f32 %v2563_v9, 0.0 }
 0x349   :  { %3356 = vmatprep.subr.mxu1 %v2080_v18  ;;  %3868 = vmatprep.subr.mxu0 %v3454_v20  ;;  %v2239_v18 = vld [vmem:[#allocation5 + $0x1ff0] sm:$0xff]  ;;  %v2176_v61 = vld [vmem:[#allocation5 + $0x1df8] sm:$0xff] }
 0x34a   :  { %3357 = vmatpush1.msra.mxu1 %v2079_v23  ;;  %3869 = vmatpush3.msra.mxu0 %v3438_v25  ;;  %v3522_v20 = vld [vmem:[%s6253_s5 + $0x2f8] sm:$0xff]  ;;  %v2232_v23 = vld [vmem:[#allocation5 + $0x1fb8] sm:$0xff] }
 0x34b   :  { %3358 = vmatprep.subr.mxu1 %v2072_v28  ;;  %3870 = vmatprep.subr.mxu0 %v3453_v26  ;;  %v3506_v25 = vld [vmem:[%s6253_s5 + $0x278] sm:$0xff]  ;;  %v3521_v26 = vld [vmem:[%s6253_s5 + $0x2f0] sm:$0xff] }
 0x34c   :  { %3359 = vmatpush1.msra.mxu1 %v2071_v29  ;;  %3871 = vmatpush3.msra.mxu0 %v3437_v13  ;;  %v2231_v28 = vld [vmem:[#allocation5 + $0x1fb0] sm:$0xff]  ;;  %v2224_v29 = vld [vmem:[#allocation5 + $0x1f78] sm:$0xff]  ;;  %v3505_v13 = vld [vmem:[%s6253_s5 + $0x270] sm:$0xff] }
 0x34d   :  { %3360 = vmatprep.subr.mxu1 %v2064_v32  ;;  %3872 = vmatprep.subr.mxu0 %v3452_v35  ;;  %v2223_v32 = vld [vmem:[#allocation5 + $0x1f70] sm:$0xff]  ;;  %v3520_v35 = vld [vmem:[%s6253_s5 + $0x2e8] sm:$0xff] }
 0x34e   :  { %3361 = vmatpush1.msra.mxu1 %v2063_v21  ;;  %3873 = vmatpush3.msra.mxu0 %v3436_v36  ;;  %v2216_v21 = vld [vmem:[#allocation5 + $0x1f38] sm:$0xff]  ;;  %v3504_v36 = vld [vmem:[%s6253_s5 + $0x268] sm:$0xff] }
 0x34f   :  { %3362 = vmatprep.subr.mxu1 %v2056_v58  ;;  %3874 = vmatprep.subr.mxu0 %v3451_v30  ;;  %v2215_v58 = vld [vmem:[#allocation5 + $0x1f30] sm:$0xff]  ;;  %v3519_v30 = vld [vmem:[%s6253_s5 + $0x2e0] sm:$0xff] }
 0x350   :  { %3363 = vmatpush1.msra.mxu1 %v2055_v38  ;;  %3875 = vmatpush3.msra.mxu0 %v3435_v39  ;;  %v2208_v38 = vld [vmem:[#allocation5 + $0x1ef8] sm:$0xff] }
 0x351   :  { %3364 = vmatprep.subr.mxu1 %v2048_v40  ;;  %3876 = vmatprep.subr.mxu0 %v3450_v42  ;;  %v3503_v39 = vld [vmem:[%s6253_s5 + $0x260] sm:$0xff]  ;;  %v2207_v40 = vld [vmem:[#allocation5 + $0x1ef0] sm:$0xff] }
 0x352   :  { %3365 = vmatpush1.msra.mxu1 %v2047_v43  ;;  %3877 = vmatpush3.msra.mxu0 %v3434_v44  ;;  %v3518_v42 = vld [vmem:[%s6253_s5 + $0x2d8] sm:$0xff]  ;;  %v2200_v43 = vld [vmem:[#allocation5 + $0x1eb8] sm:$0xff] }
 0x353   :  { %3366 = vmatprep.subr.mxu1 %v2040_v45  ;;  %3878 = vmatprep.subr.mxu0 %v3449_v46  ;;  %v3502_v44 = vld [vmem:[%s6253_s5 + $0x258] sm:$0xff]  ;;  %v3517_v46 = vld [vmem:[%s6253_s5 + $0x2d0] sm:$0xff] }
 0x354   :  { %3367 = vmatpush1.msra.mxu1 %v2039_v49  ;;  %3879 = vmatpush3.msra.mxu0 %v3433_v50  ;;  %v2199_v45 = vld [vmem:[#allocation5 + $0x1eb0] sm:$0xff]  ;;  %v3501_v49 = vld [vmem:[%s6253_s5 + $0x250] sm:$0xff] }
 0x355   :  { %3368 = vmatprep.subr.mxu1 %v2032_v51  ;;  %3880 = vmatprep.subr.mxu0 %v3448_v53  ;;  %v2191_v50 = vld [vmem:[#allocation5 + $0x1e70] sm:$0xff]  ;;  %v3516_v51 = vld [vmem:[%s6253_s5 + $0x2c8] sm:$0xff]  ;;  %v2184_v53 = vld [vmem:[#allocation5 + $0x1e38] sm:$0xff] }
 0x356   :  { %3369 = vmatpush1.msra.mxu1 %v2031_v55  ;;  %3881 = vmatpush3.msra.mxu0 %v3432_v24  ;;  %v3500_v55 = vld [vmem:[%s6253_s5 + $0x248] sm:$0xff]  ;;  %v5965_v24 = vpop.f32.mrf.mxu0 }
 0x357   :  { %3370 = vmatprep.subr.mxu1 %v2024_v56  ;;  %3882 = vmatprep.subr.mxu0 %v3447_v57  ;;  %v2183_v56 = vld [vmem:[#allocation5 + $0x1e30] sm:$0xff]  ;;  %v3515_v57 = vld [vmem:[%s6253_s5 + $0x2c0] sm:$0xff] }
 0x358   :  { %3371 = vmatpush1.msra.mxu1 %v2023_v60  ;;  %3883 = vmatpush3.msra.mxu0 %v3431_v63  ;;  %v3499_v60 = vld [vmem:[%s6253_s5 + $0x240] sm:$0xff]  ;;  %v5973_v63 = vpop.f32.mrf.mxu1 }
 0x359   :  { %3372 = vmatprep.subr.mxu1 %v2016_v0  ;;  %3884 = vmatprep.subr.mxu0 %v3446_v1  ;;  %v2175_v0 = vld [vmem:[#allocation5 + $0x1df0] sm:$0xff] }
 0x35a   :  { %3373 = vmatpush1.msra.mxu1 %v2015_v62  ;;  %3885 = vmatpush3.msra.mxu0 %v3430_v7  ;;  %v3514_v1 = vld [vmem:[%s6253_s5 + $0x2b8] sm:$0xff]  ;;  %v2168_v62 = vld [vmem:[#allocation5 + $0x1db8] sm:$0xff] }
 0x35b   :  { %3374 = vmatprep.subr.mxu1 %v2008_v3  ;;  %3886 = vmatprep.subr.mxu0 %v3445_v4  ;;  %v3498_v7 = vld [vmem:[%s6253_s5 + $0x238] sm:$0xff]  ;;  %v2635_v3 = vpop.f32.mrf.mxu0 }
 0x35c   :  { %3375 = vmatpush1.msra.mxu1 %v2007_v6  ;;  %3887 = vmatpush3.msra.mxu0 %v3429_v15  ;;  %v2167_v4 = vld [vmem:[#allocation5 + $0x1db0] sm:$0xff]  ;;  %v2160_v6 = vld [vmem:[#allocation5 + $0x1d78] sm:$0xff]  ;;  %v2706_v15 = vpop.f32.mrf.mxu1  ;;  %v2636_v9 = vadd.f32 %v2635_v3, %v2258_v11  ;;  %v2254_v3 = vrot.slane %v5808_v22, %v589_v48  ;;  %v3480_v48 = vld [vmem:[%s6253_s5 + $0x1a8] sm:$0xff] }
 0x35d   :  { %3376 = vmatprep.subr.mxu1 %v2000_v52  ;;  %3888 = vmatprep.subr.mxu0 %v3444_v59  ;;  %v2159_v52 = vld [vmem:[#allocation5 + $0x1d70] sm:$0xff]  ;;  %v3512_v59 = vld [vmem:[%s6253_s5 + $0x2a8] sm:$0xff]  ;;  %v3483_v11 = vld [vmem:[%s6253_s5 + $0x1c0] sm:$0xff] }
 0x35e   :  { %3377 = vmatpush1.msra.mxu1 %v1999_v10  ;;  %3889 = vmatpush3.msra.mxu0 %v3428_v34  ;;  %v2152_v10 = vld [vmem:[#allocation5 + $0x1d38] sm:$0xff]  ;;  %v3496_v34 = vld [vmem:[%s6253_s5 + $0x228] sm:$0xff] }
 0x35f   :  { %3378 = vmatprep.subr.mxu1 %v1992_v27  ;;  %3890 = vmatprep.subr.mxu0 %v3443_v31  ;;  %v5996_v27 = vpop.f32.mrf.mxu0  ;;  %v5998_v31 = vpop.f32.mrf.mxu1 }
 0x360   :  { %3379 = vmatpush1.msra.mxu1 %v1991_v12  ;;  %3891 = vmatpush3.msra.mxu0 %v3427_v37  ;;  %v2151_v12 = vld [vmem:[#allocation5 + $0x1d30] sm:$0xff]  ;;  %v3511_v37 = vld [vmem:[%s6253_s5 + $0x2a0] sm:$0xff] }
 0x361   :  { %3380 = vmatprep.subr.mxu1 %v2240_v16  ;;  %3627 = vmatmul.mubr.f32.vlgmr.msra.gmra.mxu0 %v3419_v17  ;;  %v2707_v16 = vadd.f32 %v2706_v15, %v2636_v9  ;;  %v2144_v17 = vld [vmem:[#allocation5 + $0x1cf8] sm:$0xff]  ;;  %v3464_v15 = vld [vmem:[%s6253_s5 + $0x128] sm:$0xff] }
 0x362   :  { %3381 = vmatpush2.msra.mxu1 %v2239_v18  ;;  %3930 = vmatprep.subr.mxu0 %v3522_v20  ;;  %v3495_v18 = vld [vmem:[%s6253_s5 + $0x220] sm:$0xff]  ;;  %v2143_v20 = vld [vmem:[#allocation5 + $0x1cf0] sm:$0xff] }
 0x363   :  { %3382 = vmatprep.subr.mxu1 %v2232_v23  ;;  %3931 = vmatpush3.msra.mxu0 %v3506_v25  ;;  %v3510_v23 = vld [vmem:[%s6253_s5 + $0x298] sm:$0xff]  ;;  %v2136_v25 = vld [vmem:[#allocation5 + $0x1cb8] sm:$0xff] }
 0x364   :  { %3383 = vmatpush2.msra.mxu1 %v2231_v28  ;;  %3932 = vmatprep.subr.mxu0 %v3521_v26  ;;  %v3494_v28 = vld [vmem:[%s6253_s5 + $0x218] sm:$0xff]  ;;  %v2777_v26 = vpop.f32.mrf.mxu0  ;;  %v3463_v9 = vld [vmem:[%s6253_s5 + $0x120] sm:$0xff] }
 0x365   :  { %3384 = vmatprep.subr.mxu1 %v2224_v29  ;;  %3933 = vmatpush3.msra.mxu0 %v3505_v13  ;;  %v2848_v29 = vpop.f32.mrf.mxu1  ;;  %v2135_v13 = vld [vmem:[#allocation5 + $0x1cb0] sm:$0xff] }
 0x366   :  { %3385 = vmatpush2.msra.mxu1 %v2223_v32  ;;  %3934 = vmatprep.subr.mxu0 %v3520_v35  ;;  %v3509_v32 = vld [vmem:[%s6253_s5 + $0x290] sm:$0xff]  ;;  %v2778_v35 = vadd.f32 %v2777_v26, %v2707_v16  ;;  %v3552_v26 = vld [vmem:[%s6253_s5 + $0x3e8] sm:$0xff] }
 0x367   :  { %3386 = vmatprep.subr.mxu1 %v2216_v21  ;;  %3935 = vmatpush3.msra.mxu0 %v3504_v36  ;;  %v2128_v21 = vld [vmem:[#allocation5 + $0x1c78] sm:$0xff]  ;;  %v3493_v36 = vld [vmem:[%s6253_s5 + $0x210] sm:$0xff] }
 0x368   :  { %3387 = vmatpush2.msra.mxu1 %v2215_v58  ;;  %3936 = vmatprep.subr.mxu0 %v3519_v30  ;;  %v2127_v58 = vld [vmem:[#allocation5 + $0x1c70] sm:$0xff]  ;;  %v3508_v30 = vld [vmem:[%s6253_s5 + $0x288] sm:$0xff] }
 0x369   :  { %3388 = vmatprep.subr.mxu1 %v2208_v38  ;;  %3937 = vmatpush3.msra.mxu0 %v3503_v39  ;;  %v2849_v38 = vadd.f32 %v2848_v29, %v2778_v35  ;;  %v2120_v39 = vld [vmem:[#allocation5 + $0x1c38] sm:$0xff]  ;;  %v3536_v29 = vld [vmem:[%s6253_s5 + $0x368] sm:$0xff]  ;;  %v3550_v35 = vld [vmem:[%s6253_s5 + $0x3d8] sm:$0xff] }
 0x36a   :  { %3389 = vmatpush2.msra.mxu1 %v2207_v40  ;;  %3938 = vmatprep.subr.mxu0 %v3518_v42  ;;  %v3492_v40 = vld [vmem:[%s6253_s5 + $0x208] sm:$0xff]  ;;  %v2119_v42 = vld [vmem:[#allocation5 + $0x1c30] sm:$0xff] }
 0x36b   :  { %3390 = vmatprep.subr.mxu1 %v2200_v43  ;;  %3939 = vmatpush3.msra.mxu0 %v3502_v44  ;;  %v3507_v43 = vld [vmem:[%s6253_s5 + $0x280] sm:$0xff]  ;;  %v3490_v44 = vld [vmem:[%s6253_s5 + $0x1f8] sm:$0xff] }
 0x36c   :  { %3391 = vmatpush2.msra.mxu1 %v2199_v45  ;;  %3940 = vmatprep.subr.mxu0 %v3517_v46  ;;  %v3474_v45 = vld [vmem:[%s6253_s5 + $0x178] sm:$0xff]  ;;  %v3422_v46 = vmax.f32 %v2849_v38, 0.0  ;;  %v2917_v38 = vpop.f32.mrf.mxu0 }
 0x36d   :  { %3392 = vmatprep.subr.mxu1 %v2192_v47  ;;  %3941 = vmatpush3.msra.mxu0 %v3501_v49  ;;  %v3489_v47 = vld [vmem:[%s6253_s5 + $0x1f0] sm:$0xff]  ;;  %v3491_v49 = vld [vmem:[%s6253_s5 + $0x200] sm:$0xff] }
 0x36e   :  { %3393 = vmatpush2.msra.mxu1 %v2191_v50  ;;  %3942 = vmatprep.subr.mxu0 %v3516_v51  ;;  %v3473_v50 = vld [vmem:[%s6253_s5 + $0x170] sm:$0xff]  ;;  %v3488_v51 = vld [vmem:[%s6253_s5 + $0x1e8] sm:$0xff] }
 0x36f   :  { %3394 = vmatprep.subr.mxu1 %v2184_v53  ;;  %3943 = vmatpush3.msra.mxu0 %v3500_v55  ;;  %v3472_v53 = vld [vmem:[%s6253_s5 + $0x168] sm:$0xff]  ;;  %v3471_v55 = vld [vmem:[%s6253_s5 + $0x160] sm:$0xff] }
 0x370   :  { %3395 = vmatpush2.msra.mxu1 %v2183_v56  ;;  %3944 = vmatprep.subr.mxu0 %v3515_v57  ;;  %v3486_v56 = vld [vmem:[%s6253_s5 + $0x1d8] sm:$0xff] }
 0x371   :  { %3396 = vmatprep.subr.mxu1 %v2176_v61  ;;  %3945 = vmatpush3.msra.mxu0 %v3499_v60  ;;  %v3470_v57 = vld [vmem:[%s6253_s5 + $0x158] sm:$0xff]  ;;  %v3485_v61 = vld [vmem:[%s6253_s5 + $0x1d0] sm:$0xff] }
 0x372   :  { %3397 = vmatpush2.msra.mxu1 %v2175_v0  ;;  %3946 = vmatprep.subr.mxu0 %v3514_v1  ;;  %v3469_v60 = vld [vmem:[%s6253_s5 + $0x150] sm:$0xff]  ;;  %v3484_v0 = vld [vmem:[%s6253_s5 + $0x1c8] sm:$0xff] }
 0x373   :  { %3398 = vmatprep.subr.mxu1 %v2168_v62  ;;  %3947 = vmatpush3.msra.mxu0 %v3498_v7  ;;  %v3468_v1 = vld [vmem:[%s6253_s5 + $0x148] sm:$0xff]  ;;  %v3467_v62 = vld [vmem:[%s6253_s5 + $0x140] sm:$0xff]  ;;  %v3482_v7 = vld [vmem:[%s6253_s5 + $0x1b8] sm:$0xff] }
 0x374   :  { %3399 = vmatpush2.msra.mxu1 %v2167_v4  ;;  %3948 = vmatprep.subr.mxu0 %v3513_v5  ;;  %v3466_v4 = vld [vmem:[%s6253_s5 + $0x138] sm:$0xff]  ;;  %v3481_v5 = vld [vmem:[%s6253_s5 + $0x1b0] sm:$0xff] }
 0x375   :  { %3400 = vmatprep.subr.mxu1 %v2160_v6  ;;  %3949 = vmatpush3.msra.mxu0 %v3497_v54  ;;  %v3465_v6 = vld [vmem:[%s6253_s5 + $0x130] sm:$0xff]  ;;  %v2634_v54 = vadd.f32 %v5965_v24, %v2254_v3  ;;  %v3478_v24 = vld [vmem:[%s6253_s5 + $0x198] sm:$0xff] }
 0x376   :  { %3401 = vmatpush2.msra.mxu1 %v2159_v52  ;;  %3950 = vmatprep.subr.mxu0 %v3512_v59  ;;  %v3479_v52 = vld [vmem:[%s6253_s5 + $0x1a0] sm:$0xff] }
 0x377   :  { %3402 = vmatprep.subr.mxu1 %v2152_v10  ;;  %3951 = vmatpush3.msra.mxu0 %v3496_v34  ;;  %v2705_v59 = vadd.f32 %v5973_v63, %v2634_v54  ;;  %v3462_v10 = vld [vmem:[%s6253_s5 + $0x118] sm:$0xff]  ;;  %v3477_v63 = vld [vmem:[%s6253_s5 + $0x190] sm:$0xff] }
 0x378   :  { %3403 = vmatpush2.msra.mxu1 %v2151_v12  ;;  %3952 = vmatprep.subr.mxu0 %v3511_v37  ;;  %v3461_v12 = vld [vmem:[%s6253_s5 + $0x110] sm:$0xff]  ;;  %v3476_v37 = vld [vmem:[%s6253_s5 + $0x188] sm:$0xff] }
 0x379   :  { %3404 = vmatprep.subr.mxu1 %v2144_v17  ;;  %3953 = vmatpush3.msra.mxu0 %v3495_v18  ;;  %v2776_v34 = vadd.f32 %v5996_v27, %v2705_v59  ;;  %v3460_v17 = vld [vmem:[%s6253_s5 + $0x108] sm:$0xff]  ;;  %v3475_v27 = vld [vmem:[%s6253_s5 + $0x180] sm:$0xff]  ;;  %v3525_v59 = vld [vmem:[%s6253_s5 + $0x310] sm:$0xff] }
 0x37a   :  { %3405 = vmatpush2.msra.mxu1 %v2143_v20  ;;  %3954 = vmatprep.subr.mxu0 %v3510_v23  ;;  %v3459_v18 = vld [vmem:[%s6253_s5 + $0x100] sm:$0xff]  ;;  %v3538_v23 = vld [vmem:[%s6253_s5 + $0x378] sm:$0xff] }
 0x37b   :  { %3406 = vmatprep.subr.mxu1 %v2136_v25  ;;  %3955 = vmatpush3.msra.mxu0 %v3494_v28  ;;  %v2847_v16 = vadd.f32 %v5998_v31, %v2776_v34  ;;  %v3554_v31 = vld [vmem:[%s6253_s5 + $0x3f8] sm:$0xff]  ;;  %v3553_v25 = vld [vmem:[%s6253_s5 + $0x3f0] sm:$0xff] }
 0x37c   :  { %3407 = vmatpush2.msra.mxu1 %v2135_v13  ;;  %3956 = vmatprep.subr.mxu0 %v3509_v32  ;;  %v3537_v28 = vld [vmem:[%s6253_s5 + $0x370] sm:$0xff]  ;;  %v3551_v13 = vld [vmem:[%s6253_s5 + $0x3e0] sm:$0xff] }
 0x37d   :  { %3408 = vmatprep.subr.mxu1 %v2128_v21  ;;  %3957 = vmatpush3.msra.mxu0 %v3493_v36  ;;  %v3421_v20 = vmax.f32 %v2847_v16, 0.0  ;;  %v3535_v32 = vld [vmem:[%s6253_s5 + $0x360] sm:$0xff]  ;;  %v3534_v21 = vld [vmem:[%s6253_s5 + $0x358] sm:$0xff]  ;;  %v3549_v36 = vld [vmem:[%s6253_s5 + $0x3d0] sm:$0xff]  ;;  %v2274_v16 = vrot.slane %v5808_v22, %v609_v2 }
 0x37e   :  { %3409 = vmatpush2.msra.mxu1 %v2127_v58  ;;  %3958 = vmatprep.subr.mxu0 %v3508_v30  ;;  %v3533_v58 = vld [vmem:[%s6253_s5 + $0x350] sm:$0xff]  ;;  %v3548_v30 = vld [vmem:[%s6253_s5 + $0x3c8] sm:$0xff] }
 0x37f   :  { %3410 = vmatprep.subr.mxu1 %v2120_v39  ;;  %3959 = vmatpush3.msra.mxu0 %v3492_v40  ;;  %v3532_v39 = vld [vmem:[%s6253_s5 + $0x348] sm:$0xff]  ;;  %v3547_v40 = vld [vmem:[%s6253_s5 + $0x3c0] sm:$0xff] }
 0x380   :  { %3411 = vmatpush2.msra.mxu1 %v2119_v42  ;;  %3960 = vmatprep.subr.mxu0 %v3507_v43  ;;  %v2262_v42 = vrot.slane %v5808_v22, %v597_v14  ;;  %v2988_v43 = vpop.f32.mrf.mxu1  ;;  %v3530_v14 = vld [vmem:[%s6253_s5 + $0x338] sm:$0xff] }
 0x381   :  { %3413 = vmatmul.mubr.f32.vlgmr.msra.gmra.mxu1 %v5782_v33  ;;  %3895 = vmatprep.subr.mxu1 %v3490_v44  ;;  %v3487_v33 = vld [vmem:[%s6253_s5 + $0x1e0] sm:$0xff] }
 0x382   :  { %3896 = vmatpush3.msra.mxu1 %v3474_v45  ;;  %3696 = vmatprep.mubr.f32.mxu1 %v3422_v46  ;;  %v3531_v44 = vld [vmem:[%s6253_s5 + $0x340] sm:$0xff]  ;;  %v2266_v45 = vrot.slane %v5808_v22, %v601_v19  ;;  %v3546_v46 = vld [vmem:[%s6253_s5 + $0x3b8] sm:$0xff]  ;;  %v3529_v19 = vld [vmem:[%s6253_s5 + $0x330] sm:$0xff] }
 0x383   :  { %3897 = vmatprep.subr.mxu1 %v3489_v47  ;;  %3961 = vmatpush3.msra.mxu0 %v3491_v49  ;;  %v2919_v47 = vpop.f32.mrf.mxu0  ;;  %v3545_v49 = vld [vmem:[%s6253_s5 + $0x3b0] sm:$0xff] }
 0x384   :  { %3898 = vmatpush3.msra.mxu1 %v3473_v50  ;;  %v2918_v50 = vadd.f32 %v2917_v38, %v2262_v42 }
 0x385   :  { %3899 = vmatprep.subr.mxu1 %v3488_v51  ;;  %v2990_v51 = vpop.f32.mrf.mxu1 }
 0x386   :  { %3900 = vmatpush3.msra.mxu1 %v3472_v53  ;;  %v2920_v53 = vadd.f32 %v2919_v47, %v2266_v45 }
 0x387   :  { %3901 = vmatprep.subr.mxu1 %v3487_v33  ;;  %v3544_v33 = vld [vmem:[%s6253_s5 + $0x3a8] sm:$0xff] }
 0x388   :  { %3902 = vmatpush3.msra.mxu1 %v3471_v55  ;;  %v2989_v55 = vadd.f32 %v2988_v43, %v2918_v50 }
 0x389   :  { %3903 = vmatprep.subr.mxu1 %v3486_v56  ;;  %v3059_v56 = vpop.f32.mrf.mxu0 }
 0x38a   :  { %3904 = vmatpush3.msra.mxu1 %v3470_v57  ;;  %v3528_v57 = vld [vmem:[%s6253_s5 + $0x328] sm:$0xff] }
 0x38b   :  { %3905 = vmatprep.subr.mxu1 %v3485_v61  ;;  %v2991_v61 = vadd.f32 %v2990_v51, %v2920_v53 }
 0x38c   :  { %3906 = vmatpush3.msra.mxu1 %v3469_v60  ;;  %v3543_v60 = vld [vmem:[%s6253_s5 + $0x3a0] sm:$0xff] }
 0x38d   :  { %3907 = vmatprep.subr.mxu1 %v3484_v0  ;;  %v3527_v0 = vld [vmem:[%s6253_s5 + $0x320] sm:$0xff] }
 0x38e   :  { %3908 = vmatpush3.msra.mxu1 %v3468_v1  ;;  %v3060_v1 = vadd.f32 %v3059_v56, %v2989_v55 }
 0x38f   :  { %3909 = vmatprep.subr.mxu1 %v3483_v11  ;;  %v3061_v11 = vpop.f32.mrf.mxu0 }
 0x390   :  { %3910 = vmatpush3.msra.mxu1 %v3467_v62 }
 0x391   :  { %3911 = vmatprep.subr.mxu1 %v3482_v7  ;;  %v3062_v7 = vadd.f32 %v3061_v11, %v2991_v61 }
 0x392   :  { %3912 = vmatpush3.msra.mxu1 %v3466_v4 }
 0x393   :  { %3913 = vmatprep.subr.mxu1 %v3481_v5 }
 0x394   :  { %3914 = vmatpush3.msra.mxu1 %v3465_v6  ;;  %v3542_v6 = vld [vmem:[%s6253_s5 + $0x398] sm:$0xff] }
 0x395   :  { %3915 = vmatprep.subr.mxu1 %v3480_v48  ;;  %v3526_v48 = vld [vmem:[%s6253_s5 + $0x318] sm:$0xff] }
 0x396   :  { %3916 = vmatpush3.msra.mxu1 %v3464_v15  ;;  %v3541_v15 = vld [vmem:[%s6253_s5 + $0x390] sm:$0xff] }
 0x397   :  { %3917 = vmatprep.subr.mxu1 %v3479_v52 }
 0x398   :  { %3918 = vmatpush3.msra.mxu1 %v3463_v9  ;;  %v3540_v9 = vld [vmem:[%s6253_s5 + $0x388] sm:$0xff] }
 0x399   :  { %3919 = vmatprep.subr.mxu1 %v3478_v24  ;;  %v3524_v24 = vld [vmem:[%s6253_s5 + $0x308] sm:$0xff] }
 0x39a   :  { %3920 = vmatpush3.msra.mxu1 %v3462_v10  ;;  %v3539_v10 = vld [vmem:[%s6253_s5 + $0x380] sm:$0xff] }
 0x39b   :  { %3921 = vmatprep.subr.mxu1 %v3477_v63  ;;  %v3523_v63 = vld [vmem:[%s6253_s5 + $0x300] sm:$0xff] }
 0x39c   :  { %3922 = vmatpush3.msra.mxu1 %v3461_v12  ;;  %v2270_v12 = vrot.slane %v5808_v22, %v605_v8 }
 0x39d   :  { %3923 = vmatprep.subr.mxu1 %v3476_v37 }
 0x39e   :  { %3924 = vmatpush3.msra.mxu1 %v3460_v17 }
 0x39f   :  { %3925 = vmatprep.subr.mxu1 %v3475_v27 }
 0x3a0   :  { %3926 = vmatpush3.msra.mxu1 %v3459_v18 }
 0x3a1   :  { %3697 = vmatmul.mubr.f32.vlgmr.msra.gmra.mxu1 %v3421_v20  ;;  %3965 = vmatprep.subr.mxu1 %v3554_v31 }
 0x3a2   :  { %3966 = vmatpush3.msra.mxu1 %v3538_v23 }
 0x3a3   :  { %3967 = vmatprep.subr.mxu1 %v3553_v25 }
 0x3a4   :  { %3968 = vmatpush3.msra.mxu1 %v3537_v28 }
 0x3a5   :  { %3969 = vmatprep.subr.mxu1 %v3552_v26 }
 0x3a6   :  { %3970 = vmatpush3.msra.mxu1 %v3536_v29 }
 0x3a7   :  { %3971 = vmatprep.subr.mxu1 %v3551_v13 }
 0x3a8   :  { %3972 = vmatpush3.msra.mxu1 %v3535_v32 }
 0x3a9   :  { %3973 = vmatprep.subr.mxu1 %v3550_v35 }
 0x3aa   :  { %3974 = vmatpush3.msra.mxu1 %v3534_v21 }
 0x3ab   :  { %3975 = vmatprep.subr.mxu1 %v3549_v36 }
 0x3ac   :  { %3976 = vmatpush3.msra.mxu1 %v3533_v58 }
 0x3ad   :  { %3977 = vmatprep.subr.mxu1 %v3548_v30 }
 0x3ae   :  { %3978 = vmatpush3.msra.mxu1 %v3532_v39  ;;  %v3859_v39 = vld [vmem:[%s6254_s6] ss:$0 sm:$0xff] }
 0x3af   :  { %3979 = vmatprep.subr.mxu1 %v3547_v40 }
 0x3b0   :  { %3980 = vmatpush3.msra.mxu1 %v3531_v44 }
 0x3b1   :  { %3981 = vmatprep.subr.mxu1 %v3546_v46 }
 0x3b2   :  { %3982 = vmatpush3.msra.mxu1 %v3530_v14 }
 0x3b3   :  { %3983 = vmatprep.subr.mxu1 %v3545_v49 }
 0x3b4   :  { %3984 = vmatpush3.msra.mxu1 %v3529_v19 }
 0x3b5   :  { %3985 = vmatprep.subr.mxu1 %v3544_v33 }
 0x3b6   :  { %3986 = vmatpush3.msra.mxu1 %v3528_v57 }
 0x3b7   :  { %3987 = vmatprep.subr.mxu1 %v3543_v60 }
 0x3b8   :  { %3988 = vmatpush3.msra.mxu1 %v3527_v0 }
 0x3b9   :  { %3989 = vmatprep.subr.mxu1 %v3542_v6 }
 0x3ba   :  { %3990 = vmatpush3.msra.mxu1 %v3526_v48 }
 0x3bb   :  { %3991 = vmatprep.subr.mxu1 %v3541_v15 }
 0x3bc   :  { %3992 = vmatpush3.msra.mxu1 %v3525_v59 }
 0x3bd   :  { %v3130_v62 = vpop.f32.mrf.mxu1  ;;  %3993 = vmatprep.subr.mxu1 %v3540_v9  ;;  %v3201_v34 = vpop.f32.mrf.mxu0 }
 0x3be   :  { %v3131_v3 = vadd.f32 %v3130_v62, %v3060_v1  ;;  %3994 = vmatpush3.msra.mxu1 %v3524_v24  ;;  %v3202_v27 = vadd.f32 %v3201_v34, %v2270_v12 }
 0x3bf   :  { %v3132_v4 = vpop.f32.mrf.mxu1  ;;  %3995 = vmatprep.subr.mxu1 %v3539_v10  ;;  %v3203_v17 = vpop.f32.mrf.mxu0 }
 0x3c0   :  { %v3133_v5 = vadd.f32 %v3132_v4, %v3062_v7  ;;  %v3423_v52 = vmax.f32 %v3131_v3, 0.0  ;;  %3996 = vmatpush3.msra.mxu1 %v3523_v63  ;;  %v3204_v20 = vadd.f32 %v3203_v17, %v2274_v16 }
 0x3c2   :  { %v3424_v54 = vmax.f32 %v3133_v5, 0.0 }
 0x3c4   :  { %3766 = vmatprep.mubr.f32.mxu0 %v3424_v54 }
 0x3c5   :  { %3767 = vmatmul.mubr.f32.vlgmr.msra.gmra.mxu0 %v3423_v52 }
 0x3ff   :  { %v3272_v37 = vpop.f32.mrf.mxu1  ;;  %v3343_v23 = vpop.f32.mrf.mxu0 }
 0x400   :  { %v3273_v31 = vadd.f32 %v3272_v37, %v3202_v27 }
 0x401   :  { %v3274_v18 = vpop.f32.mrf.mxu1  ;;  %v3345_v26 = vpop.f32.mrf.mxu0 }
 0x402   :  { %v3275_v25 = vadd.f32 %v3274_v18, %v3204_v20  ;;  %v3344_v28 = vadd.f32 %v3343_v23, %v3273_v31 }
 0x404   :  { %v3346_v13 = vadd.f32 %v3345_v26, %v3275_v25 }
 0x421   :  { %v3892_v41 = vpop.f32.mrf.mxu0 }
 0x423   :  { %v3893_v2 = vpop.f32.mrf.mxu0 }
 0x424   :  { %v3894_v38 = vadd.f32 %v3893_v2, %v3892_v41 }
 0x426   :  { %v3629_v43 = vadd.f32 %v3894_v38, %v3859_v39 }
 0x441   :  { %v3414_v29 = vpop.f32.mrf.mxu1 }
 0x442   :  { %v3415_v32 = vadd.f32 %v3414_v29, %v3344_v28 }
 0x443   :  { %v3416_v35 = vpop.f32.mrf.mxu1 }
 0x444   :  { %v3417_v21 = vadd.f32 %v3416_v35, %v3346_v13  ;;  %v3425_v36 = vmax.f32 %v3415_v32, 0.0 }
 0x446   :  { %v3426_v8 = vmax.f32 %v3417_v21, 0.0 }
 0x448   :  { %3836 = vmatprep.mubr.f32.mxu1 %v3426_v8 }
 0x449   :  { %3837 = vmatmul.mubr.f32.vlgmr.msra.gmra.mxu1 %v3425_v36 }
 0x461   :  { %v3927_v22 = vpop.f32.mrf.mxu1 }
 0x463   :  { %v3928_v30 = vpop.f32.mrf.mxu1 }
 0x464   :  { %v3929_v42 = vadd.f32 %v3928_v30, %v3927_v22 }
 0x466   :  { %v3699_v46 = vadd.f32 %v3929_v42, %v3629_v43 }
 0x485   :  { %v3962_v58 = vpop.f32.mrf.mxu0 }
 0x487   :  { %v3963_v40 = vpop.f32.mrf.mxu0 }
 0x488   :  { %v3964_v44 = vadd.f32 %v3963_v40, %v3962_v58 }
 0x48a   :  { %v3769_v14 = vadd.f32 %v3964_v44, %v3699_v46 }
 0x509   :  { %v3997_v45 = vpop.f32.mrf.mxu1 }
 0x50b   :  { %v3998_v47 = vpop.f32.mrf.mxu1 }
 0x50c   :  { %v3999_v49 = vadd.f32 %v3998_v47, %v3997_v45 }
 0x50e   :  { %v3839_v50 = vadd.f32 %v3999_v49, %v3769_v14 }
 0x510   :  { %3842 = vst [vmem:[#allocation8] sm:$0x3] %v3839_v50 }
 0x511   :  { %4080 = shalt.err (!%p4077_p5)
}
 0x512   :  { %3852 = dma.vmem_to_hbm [thread:$0]  %s3850_s28, 32, %s6255_s7, [#allocation4]  }
 0x513   :  { %4093 = dma.done.wait [#allocation4], 32  }
 0x514   :  { %4094 = vsyncadd [#allocation4], 4294967264 }
 0x515   :  { %3856 = vsyncpa [#allocation3], 1 }
 0x516   :  { %3857 = vsyncpa [#allocation6], 1 }
 0x517   :  { %3858 = vsyncpa [#allocation4], 1 }

</bundles_post_ra>
